<compile_context>
chip_gen: v5e
topology: v5e:2x2
jax: 0.10.0
libtpu: 0.0.40
codegen_flags: <defaults>
</compile_context>

<pallas_src>
import functools
import math

import jax
import jax.numpy as jnp
from jax.experimental import pallas as pl
from jax.experimental.pallas import tpu as pltpu

GN_EPS = 1e-5          # nn.GroupNorm default
LANE = 128             # channel dims padded to a multiple of the lane width

_CPARAMS = pltpu.CompilerParams(
    dimension_semantics=("parallel",),
    vmem_limit_bytes=32 * 1024 * 1024,
)


def _round_up(x, m):
    return (x + m - 1) // m * m


# --------------------------------------------------------------------------
# In-kernel GroupNorm (per-sample slab is fully resident in VMEM).
# --------------------------------------------------------------------------
def _gn_affine(y, gm, gmt, gamma, beta):
    """y: (P, Cp) f32 conv output.  gm: (Cp, G) one-hot channel->group mask
    (zero rows for padded channels), gmt = gm.T, gamma/beta: (1, Cp) f32.
    Returns GroupNorm(y) * gamma + beta; padded channels stay exactly 0."""
    p = float(y.shape[0])
    cnt = jnp.sum(gm, axis=0, keepdims=True) * p                         # (1, G)
    colsum = jnp.sum(y, axis=0, keepdims=True)                           # (1, Cp)
    mean_g = jnp.dot(colsum, gm, preferred_element_type=jnp.float32) / cnt
    mean_c = jnp.dot(mean_g, gmt, preferred_element_type=jnp.float32)    # (1, Cp)
    centered = y - mean_c            # padded channels: 0 - 0 = 0
    colsq = jnp.sum(centered * centered, axis=0, keepdims=True)          # (1, Cp)
    var_g = jnp.dot(colsq, gm, preferred_element_type=jnp.float32) / cnt
    inv_c = jnp.dot(jax.lax.rsqrt(var_g + GN_EPS), gmt,
                    preferred_element_type=jnp.float32)                  # (1, Cp)
    return centered * inv_c * gamma + beta


# --------------------------------------------------------------------------
# Pallas kernels
# --------------------------------------------------------------------------
def _conv1x1_gn_kernel(x_ref, w_ref, gamma_ref, beta_ref, gm_ref, gmt_ref,
                       o_ref, *, relu):
    """(P, Cin_p) @ (Cin_p, Cout_p) on the MXU + GroupNorm + optional ReLU."""
    y = jnp.dot(x_ref[0], w_ref[...], preferred_element_type=jnp.float32)
    out = _gn_affine(y, gm_ref[...], gmt_ref[...], gamma_ref[...], beta_ref[...])
    if relu:
        out = jnp.maximum(out, 0.0)
    o_ref[0] = out.astype(o_ref.dtype)


def _conv1x1_gn_add_relu_kernel(x_ref, res_ref, w_ref, gamma_ref, beta_ref,
                                gm_ref, gmt_ref, o_ref):
    """Final bottleneck conv: 1x1 conv + GroupNorm + residual add + ReLU."""
    y = jnp.dot(x_ref[0], w_ref[...], preferred_element_type=jnp.float32)
    out = _gn_affine(y, gm_ref[...], gmt_ref[...], gamma_ref[...], beta_ref[...])
    out = out + res_ref[0].astype(jnp.float32)
    o_ref[0] = jnp.maximum(out, 0.0).astype(o_ref.dtype)


def _conv3x3_gn_kernel(xph_ref, w_ref, gamma_ref, beta_ref, gm_ref, gmt_ref,
                       o_ref, *, stride, ho, wo, relu):
    """3x3 conv (padding=1, given stride) + GroupNorm + optional ReLU.

    xph_ref: (1, stride*stride, Hph, Wph, Cin_p)  phase-split padded input
    w_ref:   (9, Cin_p, Cout_p)                   per-tap weights (bf16)
    o_ref:   (1, ho*wo, Cout_p)
    """
    cin_p = xph_ref.shape[-1]
    cout_p = o_ref.shape[-1]
    p = ho * wo
    acc = jnp.zeros((p, cout_p), jnp.float32)
    for di in range(3):            # static unroll: 9 contiguous shifted reads
        for dj in range(3):
            phase = (di % stride) * stride + (dj % stride)
            win = xph_ref[0, phase,
                          pl.ds(di // stride, ho),
                          pl.ds(dj // stride, wo), :]           # (ho, wo, Cin_p)
            acc = acc + jnp.dot(win.reshape(p, cin_p), w_ref[di * 3 + dj],
                                preferred_element_type=jnp.float32)
    out = _gn_affine(acc, gm_ref[...], gmt_ref[...], gamma_ref[...],
                     beta_ref[...])
    if relu:
        out = jnp.maximum(out, 0.0)
    o_ref[0] = out.astype(o_ref.dtype)


# --------------------------------------------------------------------------
# Wrappers (plain-JAX glue: layout/padding only; no im2col materialization)
# --------------------------------------------------------------------------
def conv1x1_gn(x, w, gamma, beta, gm, *, relu, residual=None,
               out_dtype=jnp.bfloat16):
    """x: (N, H, W, Cin_p) bf16, w: (Cin_p, Cout_p) bf16 -> (N, H, W, Cout_p).
    If `residual` is given, emits relu(GN(conv(x)) + residual) instead."""
    n, h, wdim, cin_p = x.shape
    cout_p = w.shape[1]
    g = gm.shape[1]
    p = h * wdim
    x2 = x.reshape(n, p, cin_p)
    gmt = gm.T

    # Constant index maps: weights / affine / masks are fetched into VMEM once.
    const_specs = [
        pl.BlockSpec((cin_p, cout_p), lambda i: (0, 0)),
        pl.BlockSpec((1, cout_p), lambda i: (0, 0)),
        pl.BlockSpec((1, cout_p), lambda i: (0, 0)),
        pl.BlockSpec((cout_p, g), lambda i: (0, 0)),
        pl.BlockSpec((g, cout_p), lambda i: (0, 0)),
    ]
    x_spec = pl.BlockSpec((1, p, cin_p), lambda i: (i, 0, 0))
    out_spec = pl.BlockSpec((1, p, cout_p), lambda i: (i, 0, 0))

    if residual is None:
        kern = functools.partial(_conv1x1_gn_kernel, relu=relu)
        in_specs = [x_spec] + const_specs
        args = (x2, w, gamma, beta, gm, gmt)
    else:
        kern = _conv1x1_gn_add_relu_kernel
        res2 = residual.reshape(n, p, cout_p)
        in_specs = ([x_spec, pl.BlockSpec((1, p, cout_p), lambda i: (i, 0, 0))]
                    + const_specs)
        args = (x2, res2, w, gamma, beta, gm, gmt)

    out = pl.pallas_call(
        kern,
        out_shape=jax.ShapeDtypeStruct((n, p, cout_p), out_dtype),
        grid=(n,),
        in_specs=in_specs,
        out_specs=out_spec,
        compiler_params=_CPARAMS,
    )(*args)
    return out.reshape(n, h, wdim, cout_p)


def conv3x3_gn(x, w9, gamma, beta, gm, *, stride, relu, out_dtype=jnp.bfloat16):
    """x: (N, H, W, Cin_p) bf16, w9: (9, Cin_p, Cout_p) bf16 (tap-major).
    3x3 conv (padding=1, stride) fused with GroupNorm + optional ReLU."""
    n, h, wdim, cin_p = x.shape
    cout_p = w9.shape[-1]
    g = gm.shape[1]
    ho = (h + 2 - 3) // stride + 1
    wo = (wdim + 2 - 3) // stride + 1

    # Spatial zero-padding (pad=1) done once; this is the only extra HBM copy.
    xp = jnp.pad(x, ((0, 0), (1, 1), (1, 1), (0, 0)))

    # Space-to-depth phase split so every in-kernel tap read is a contiguous
    # (ho, wo, Cin_p) slice even for stride 2.  For stride 1 it is just xp with
    # an added singleton axis (no data movement).
    hph = 2 // stride + ho
    wph = 2 // stride + wo
    phases = []
    for pr in range(stride):
        for pc in range(stride):
            v = xp[:, pr::stride, pc::stride, :][:, :hph, :wph, :]
            dh, dw = hph - v.shape[1], wph - v.shape[2]
            if dh or dw:
                v = jnp.pad(v, ((0, 0), (0, dh), (0, dw), (0, 0)))
            phases.append(v)
    xph = phases[0][:, None] if stride == 1 else jnp.stack(phases, axis=1)

    gmt = gm.T
    kern = functools.partial(_conv3x3_gn_kernel, stride=stride, ho=ho, wo=wo,
                             relu=relu)
    out = pl.pallas_call(
        kern,
        out_shape=jax.ShapeDtypeStruct((n, ho * wo, cout_p), out_dtype),
        grid=(n,),
        in_specs=[
            pl.BlockSpec((1, stride * stride, hph, wph, cin_p),
                         lambda i: (i, 0, 0, 0, 0)),
            pl.BlockSpec((9, cin_p, cout_p), lambda i: (0, 0, 0)),
            pl.BlockSpec((1, cout_p), lambda i: (0, 0)),
            pl.BlockSpec((1, cout_p), lambda i: (0, 0)),
            pl.BlockSpec((cout_p, g), lambda i: (0, 0)),
            pl.BlockSpec((g, cout_p), lambda i: (0, 0)),
        ],
        out_specs=pl.BlockSpec((1, ho * wo, cout_p), lambda i: (i, 0, 0)),
        compiler_params=_CPARAMS,
    )(xph, w9, gamma, beta, gm, gmt)
    return out.reshape(n, ho, wo, cout_p)


# --------------------------------------------------------------------------
# Parameters (deterministic) + forward pass
# --------------------------------------------------------------------------
def _group_mask(c, g, cp):
    ch = jnp.arange(cp)
    grp = jnp.where(ch < c, ch // (c // g), g)       # padded channels -> no group
    return (grp[:, None] == jnp.arange(g)[None, :]).astype(jnp.float32)


def _affine_pad(c, cp):
    # PyTorch GroupNorm default: weight=1, bias=0; zero on padded channels.
    gamma = (jnp.arange(cp) < c).astype(jnp.float32).reshape(1, cp)
    beta = jnp.zeros((1, cp), jnp.float32)
    return gamma, beta


def _pad_w_1x1(w, cin_p, cout_p):
    cin, cout = w.shape
    return jnp.pad(w, ((0, cin_p - cin), (0, cout_p - cout))).astype(jnp.bfloat16)


def _pad_w_3x3(w, cin_p, cout_p):
    _, _, cin, cout = w.shape
    wp = jnp.pad(w, ((0, 0), (0, 0), (0, cin_p - cin), (0, cout_p - cout)))
    return wp.reshape(9, cin_p, cout_p).astype(jnp.bfloat16)


def init_bottleneck_params(key, inplanes, planes, ngroups, stride, expansion=4):
    cout = planes * expansion
    k1, k2, k3, kd = jax.random.split(key, 4)
    w1 = jax.random.normal(k1, (inplanes, planes), jnp.float32) / math.sqrt(inplanes)
    w2 = jax.random.normal(k2, (3, 3, planes, planes), jnp.float32) / math.sqrt(9 * planes)
    w3 = jax.random.normal(k3, (planes, cout), jnp.float32) / math.sqrt(planes)

    cin_p = _round_up(inplanes, LANE)
    cmid_p = _round_up(planes, LANE)
    cout_p = _round_up(cout, LANE)

    g1, b1 = _affine_pad(planes, cmid_p)
    g2, b2 = _affine_pad(planes, cmid_p)
    g3, b3 = _affine_pad(cout, cout_p)

    params = {
        "w1": _pad_w_1x1(w1, cin_p, cmid_p), "g1": g1, "b1": b1,
        "gm1": _group_mask(planes, ngroups, cmid_p),
        "w2": _pad_w_3x3(w2, cmid_p, cmid_p), "g2": g2, "b2": b2,
        "gm2": _group_mask(planes, ngroups, cmid_p),
        "w3": _pad_w_1x1(w3, cmid_p, cout_p), "g3": g3, "b3": b3,
        "gm3": _group_mask(cout, ngroups, cout_p),
    }
    raw = {"w1": w1.reshape(1, 1, inplanes, planes), "w2": w2,
           "w3": w3.reshape(1, 1, planes, cout)}
    if stride != 1 or inplanes != cout:      # standard projection downsample
        wd = jax.random.normal(kd, (inplanes, cout), jnp.float32) / math.sqrt(inplanes)
        gd, bd = _affine_pad(cout, cout_p)
        params.update({"wd": _pad_w_1x1(wd, cin_p, cout_p), "gd": gd, "bd": bd,
                       "gmd": _group_mask(cout, ngroups, cout_p)})
        raw["wd"] = wd.reshape(1, 1, inplanes, cout)
    cfg = {"stride": stride, "cout": cout}
    return params, raw, cfg


def bottleneck_forward(params, x_nchw, *, stride, cout):
    """Pallas forward of the allenact Bottleneck.  x_nchw: (N, Cin, H, W) f32.
    Returns (N, planes*expansion, Ho, Wo) f32 (NCHW, like the PyTorch module)."""
    n, cin, h, w = x_nchw.shape
    cin_p = params["w1"].shape[0]
    x = jnp.transpose(x_nchw, (0, 2, 3, 1))                       # NHWC
    x = jnp.pad(x, ((0, 0), (0, 0), (0, 0), (0, cin_p - cin))).astype(jnp.bfloat16)

    out = conv1x1_gn(x, params["w1"], params["g1"], params["b1"], params["gm1"],
                     relu=True)
    out = conv3x3_gn(out, params["w2"], params["g2"], params["b2"], params["gm2"],
                     stride=stride, relu=True)

    if "wd" in params:
        xs = x[:, ::stride, ::stride, :] if stride != 1 else x
        res = conv1x1_gn(xs, params["wd"], params["gd"], params["bd"],
                         params["gmd"], relu=False)
    else:
        res = x      # identity shortcut (inplanes == planes*expansion, stride 1)

    out = conv1x1_gn(out, params["w3"], params["g3"], params["b3"], params["gm3"],
                     relu=True, residual=res, out_dtype=jnp.float32)
    out = out[..., :cout]
    return jnp.transpose(out, (0, 3, 1, 2))


# --------------------------------------------------------------------------
# Plain-JAX reference for correctness checking
# --------------------------------------------------------------------------
def bottleneck_reference(raw, x_nchw, ngroups, stride):
    def conv(inp, w, s, pad):
        return jax.lax.conv_general_dilated(
            inp, w, window_strides=(s, s), padding=[(pad, pad), (pad, pad)],
            dimension_numbers=("NCHW", "HWIO", "NCHW"))

    def gn(v, g):
        n, c, h, w = v.shape
        vg = v.reshape(n, g, c // g, h, w)
        m = vg.mean(axis=(2, 3, 4), keepdims=True)
        var = ((vg - m) ** 2).mean(axis=(2, 3, 4), keepdims=True)
        return ((vg - m) * jax.lax.rsqrt(var + GN_EPS)).reshape(n, c, h, w)

    out = jax.nn.relu(gn(conv(x_nchw, raw["w1"], 1, 0), ngroups))
    out = jax.nn.relu(gn(conv(out, raw["w2"], stride, 1), ngroups))
    out = gn(conv(out, raw["w3"], 1, 0), ngroups)
    identity = (gn(conv(x_nchw, raw["wd"], stride, 0), ngroups)
                if "wd" in raw else x_nchw)
    return jax.nn.relu(out + identity)


if __name__ == "__main__":
    root = jax.random.PRNGKey(0)
    kpa, kpb, kxa, kxb = jax.random.split(root, 4)

    # Bottleneck A: identity shortcut (stride=1, inplanes == planes*expansion).
    in_a, planes_a, ng_a, st_a = 32, 8, 2, 1
    params_a, raw_a, cfg_a = init_bottleneck_params(kpa, in_a, planes_a, ng_a, st_a)
    x_a = jax.random.normal(kxa, (2, in_a, 16, 16), jnp.float32)
    fwd_a = jax.jit(functools.partial(bottleneck_forward,
                                      stride=cfg_a["stride"], cout=cfg_a["cout"]))
    out_a = jax.block_until_ready(fwd_a(params_a, x_a))
    assert out_a.shape == (2, 32, 16, 16), out_a.shape

    # Bottleneck B: projection shortcut (stride=2, conv1x1+GN downsample).
    in_b, planes_b, ng_b, st_b = 16, 8, 2, 2
    params_b, raw_b, cfg_b = init_bottleneck_params(kpb, in_b, planes_b, ng_b, st_b)
    x_b = jax.random.normal(kxb, (2, in_b, 16, 16), jnp.float32)
    fwd_b = jax.jit(functools.partial(bottleneck_forward,
                                      stride=cfg_b["stride"], cout=cfg_b["cout"]))
    out_b = jax.block_until_ready(fwd_b(params_b, x_b))
    assert out_b.shape == (2, 32, 8, 8), out_b.shape

    # Numerical check vs. plain-JAX reference (bf16 MXU operands -> loose tol).
    ref_a = bottleneck_reference(raw_a, x_a, ng_a, st_a)
    ref_b = bottleneck_reference(raw_b, x_b, ng_b, st_b)
    err_a = float(jnp.max(jnp.abs(out_a - ref_a)))
    err_b = float(jnp.max(jnp.abs(out_b - ref_b)))
    assert err_a < 0.25 and err_b < 0.25, (err_a, err_b)
    assert bool(jnp.all(jnp.isfinite(out_a))) and bool(jnp.all(jnp.isfinite(out_b)))
    print("KERNEL_OK")
</pallas_src>

<mosaic_0001>
module attributes {stable_mosaic.version = 11 : i64} {
  func.func @_conv1x1_gn_kernel(%arg0: i32, %arg1: memref<1x256x128xbf16, #tpu.memory_space<vmem>>, %arg2: memref<128x128xbf16, #tpu.memory_space<vmem>>, %arg3: memref<1x128xf32, #tpu.memory_space<vmem>>, %arg4: memref<1x128xf32, #tpu.memory_space<vmem>>, %arg5: memref<128x2xf32, #tpu.memory_space<vmem>>, %arg6: memref<2x128xf32, #tpu.memory_space<vmem>>, %arg7: memref<1x256x128xbf16, #tpu.memory_space<vmem>>) attributes {dimension_semantics = [#tpu.dimension_semantics<parallel>], iteration_bounds = array<i64: 2>, scalar_prefetch = 0 : i64, scratch_operands = 0 : i64, tpu.core_type = #tpu.core_type<tc>, window_params = [{transform_indices = @transform_0, window_bounds = array<i64: 1, 256, 128>}, {pipeline_mode = #tpu.pipeline_mode<synchronous>, transform_indices = @transform_1, window_bounds = array<i64: 128, 128>}, {pipeline_mode = #tpu.pipeline_mode<synchronous>, transform_indices = @transform_2, window_bounds = array<i64: 1, 128>}, {pipeline_mode = #tpu.pipeline_mode<synchronous>, transform_indices = @transform_3, window_bounds = array<i64: 1, 128>}, {pipeline_mode = #tpu.pipeline_mode<synchronous>, transform_indices = @transform_4, window_bounds = array<i64: 128, 2>}, {pipeline_mode = #tpu.pipeline_mode<synchronous>, transform_indices = @transform_5, window_bounds = array<i64: 2, 128>}, {transform_indices = @transform_6, window_bounds = array<i64: 1, 256, 128>}]} {
    %c0 = arith.constant 0 : index
    %c0_0 = arith.constant 0 : index
    %c0_1 = arith.constant 0 : index
    %0 = vector.load %arg1[%c0, %c0_0, %c0_1] : memref<1x256x128xbf16, #tpu.memory_space<vmem>>, vector<1x256x128xbf16>
    %1 = vector.shape_cast %0 : vector<1x256x128xbf16> to vector<256x128xbf16>
    %c0_2 = arith.constant 0 : index
    %c0_3 = arith.constant 0 : index
    %2 = vector.load %arg2[%c0_2, %c0_3] : memref<128x128xbf16, #tpu.memory_space<vmem>>, vector<128x128xbf16>
    %cst = arith.constant dense<0.000000e+00> : vector<256x128xf32>
    %3 = tpu.matmul %1, %2, %cst {dimension_numbers = #tpu.dot_dimension_numbers<[1], [0], [0], [1], [0, 0, 1, 1], [], []>} : vector<256x128xbf16>, vector<128x128xbf16>, vector<256x128xf32> -> vector<256x128xf32>
    %c0_4 = arith.constant 0 : index
    %c0_5 = arith.constant 0 : index
    %4 = vector.load %arg5[%c0_4, %c0_5] : memref<128x2xf32, #tpu.memory_space<vmem>>, vector<128x2xf32>
    %c0_6 = arith.constant 0 : index
    %c0_7 = arith.constant 0 : index
    %5 = vector.load %arg6[%c0_6, %c0_7] : memref<2x128xf32, #tpu.memory_space<vmem>>, vector<2x128xf32>
    %c0_8 = arith.constant 0 : index
    %c0_9 = arith.constant 0 : index
    %6 = vector.load %arg3[%c0_8, %c0_9] : memref<1x128xf32, #tpu.memory_space<vmem>>, vector<1x128xf32>
    %c0_10 = arith.constant 0 : index
    %c0_11 = arith.constant 0 : index
    %7 = vector.load %arg4[%c0_10, %c0_11] : memref<1x128xf32, #tpu.memory_space<vmem>>, vector<1x128xf32>
    %cst_12 = arith.constant dense<0.000000e+00> : vector<2xf32>
    %8 = vector.multi_reduction <add>, %4, %cst_12 [0] : vector<128x2xf32> to vector<2xf32>
    %9 = vector.shape_cast %8 : vector<2xf32> to vector<1x2xf32>
    %cst_13 = arith.constant 2.560000e+02 : f32
    %10 = vector.broadcast %cst_13 : f32 to vector<1x2xf32>
    %11 = arith.mulf %9, %10 : vector<1x2xf32>
    %cst_14 = arith.constant dense<0.000000e+00> : vector<128xf32>
    %12 = vector.multi_reduction <add>, %3, %cst_14 [0] : vector<256x128xf32> to vector<128xf32>
    %13 = vector.shape_cast %12 : vector<128xf32> to vector<1x128xf32>
    %cst_15 = arith.constant dense<0.000000e+00> : vector<1x2xf32>
    %14 = tpu.matmul %13, %4, %cst_15 {dimension_numbers = #tpu.dot_dimension_numbers<[1], [0], [0], [1], [0, 0, 1, 1], [], []>} : vector<1x128xf32>, vector<128x2xf32>, vector<1x2xf32> -> vector<1x2xf32>
    %15 = arith.divf %14, %11 : vector<1x2xf32>
    %cst_16 = arith.constant dense<0.000000e+00> : vector<1x128xf32>
    %16 = tpu.matmul %15, %5, %cst_16 {dimension_numbers = #tpu.dot_dimension_numbers<[1], [0], [0], [1], [0, 0, 1, 1], [], []>} : vector<1x2xf32>, vector<2x128xf32>, vector<1x128xf32> -> vector<1x128xf32>
    %17 = vector.broadcast %16 : vector<1x128xf32> to vector<256x128xf32>
    %18 = arith.subf %3, %17 : vector<256x128xf32>
    %19 = arith.mulf %18, %18 : vector<256x128xf32>
    %cst_17 = arith.constant dense<0.000000e+00> : vector<128xf32>
    %20 = vector.multi_reduction <add>, %19, %cst_17 [0] : vector<256x128xf32> to vector<128xf32>
    %21 = vector.shape_cast %20 : vector<128xf32> to vector<1x128xf32>
    %cst_18 = arith.constant dense<0.000000e+00> : vector<1x2xf32>
    %22 = tpu.matmul %21, %4, %cst_18 {dimension_numbers = #tpu.dot_dimension_numbers<[1], [0], [0], [1], [0, 0, 1, 1], [], []>} : vector<1x128xf32>, vector<128x2xf32>, vector<1x2xf32> -> vector<1x2xf32>
    %23 = arith.divf %22, %11 : vector<1x2xf32>
    %cst_19 = arith.constant 9.99999974E-6 : f32
    %24 = vector.broadcast %cst_19 : f32 to vector<1x2xf32>
    %25 = arith.addf %23, %24 : vector<1x2xf32>
    %26 = math.rsqrt %25 : vector<1x2xf32>
    %cst_20 = arith.constant dense<0.000000e+00> : vector<1x128xf32>
    %27 = tpu.matmul %26, %5, %cst_20 {dimension_numbers = #tpu.dot_dimension_numbers<[1], [0], [0], [1], [0, 0, 1, 1], [], []>} : vector<1x2xf32>, vector<2x128xf32>, vector<1x128xf32> -> vector<1x128xf32>
    %28 = vector.broadcast %27 : vector<1x128xf32> to vector<256x128xf32>
    %29 = arith.mulf %18, %28 : vector<256x128xf32>
    %30 = vector.broadcast %6 : vector<1x128xf32> to vector<256x128xf32>
    %31 = arith.mulf %29, %30 : vector<256x128xf32>
    %32 = vector.broadcast %7 : vector<1x128xf32> to vector<256x128xf32>
    %33 = arith.addf %31, %32 : vector<256x128xf32>
    %cst_21 = arith.constant 0.000000e+00 : f32
    %34 = vector.broadcast %cst_21 : f32 to vector<256x128xf32>
    %35 = arith.maximumf %33, %34 : vector<256x128xf32>
    %36 = arith.truncf %35 : vector<256x128xf32> to vector<256x128xbf16>
    %c0_22 = arith.constant 0 : index
    %c0_23 = arith.constant 0 : index
    %c0_24 = arith.constant 0 : index
    %37 = vector.load %arg7[%c0_22, %c0_23, %c0_24] : memref<1x256x128xbf16, #tpu.memory_space<vmem>>, vector<1x256x128xbf16>
    %38 = vector.shape_cast %37 : vector<1x256x128xbf16> to vector<256x128xbf16>
    %39 = vector.shape_cast %36 : vector<256x128xbf16> to vector<1x256x128xbf16>
    tpu.vector_store %arg7[%c0_22, %c0_23, %c0_24], %39 {strides = array<i32>} : memref<1x256x128xbf16, #tpu.memory_space<vmem>>, vector<1x256x128xbf16>,
    return
  }
  func.func @transform_0(%arg0: i32) -> (i32, i32, i32) {
    %c0_i32 = arith.constant 0 : i32
    %c0_i32_0 = arith.constant 0 : i32
    %c0_i32_1 = arith.constant 0 : i32
    return %arg0, %c0_i32, %c0_i32_0 : i32, i32, i32
  }
  func.func @transform_1(%arg0: i32) -> (i32, i32) {
    %c0_i32 = arith.constant 0 : i32
    %c0_i32_0 = arith.constant 0 : i32
    %c0_i32_1 = arith.constant 0 : i32
    return %c0_i32, %c0_i32_0 : i32, i32
  }
  func.func @transform_2(%arg0: i32) -> (i32, i32) {
    %c0_i32 = arith.constant 0 : i32
    %c0_i32_0 = arith.constant 0 : i32
    %c0_i32_1 = arith.constant 0 : i32
    return %c0_i32, %c0_i32_0 : i32, i32
  }
  func.func @transform_3(%arg0: i32) -> (i32, i32) {
    %c0_i32 = arith.constant 0 : i32
    %c0_i32_0 = arith.constant 0 : i32
    %c0_i32_1 = arith.constant 0 : i32
    return %c0_i32, %c0_i32_0 : i32, i32
  }
  func.func @transform_4(%arg0: i32) -> (i32, i32) {
    %c0_i32 = arith.constant 0 : i32
    %c0_i32_0 = arith.constant 0 : i32
    %c0_i32_1 = arith.constant 0 : i32
    return %c0_i32, %c0_i32_0 : i32, i32
  }
  func.func @transform_5(%arg0: i32) -> (i32, i32) {
    %c0_i32 = arith.constant 0 : i32
    %c0_i32_0 = arith.constant 0 : i32
    %c0_i32_1 = arith.constant 0 : i32
    return %c0_i32, %c0_i32_0 : i32, i32
  }
  func.func @transform_6(%arg0: i32) -> (i32, i32, i32) {
    %c0_i32 = arith.constant 0 : i32
    %c0_i32_0 = arith.constant 0 : i32
    %c0_i32_1 = arith.constant 0 : i32
    return %arg0, %c0_i32, %c0_i32_0 : i32, i32, i32
  }
}

module attributes {stable_mosaic.version = 11 : i64} {
  func.func @_conv1x1_gn_add_relu_kernel(%arg0: i32, %arg1: memref<1x256x128xbf16, #tpu.memory_space<vmem>>, %arg2: memref<1x256x128xbf16, #tpu.memory_space<vmem>>, %arg3: memref<128x128xbf16, #tpu.memory_space<vmem>>, %arg4: memref<1x128xf32, #tpu.memory_space<vmem>>, %arg5: memref<1x128xf32, #tpu.memory_space<vmem>>, %arg6: memref<128x2xf32, #tpu.memory_space<vmem>>, %arg7: memref<2x128xf32, #tpu.memory_space<vmem>>, %arg8: memref<1x256x128xf32, #tpu.memory_space<vmem>>) attributes {dimension_semantics = [#tpu.dimension_semantics<parallel>], iteration_bounds = array<i64: 2>, scalar_prefetch = 0 : i64, scratch_operands = 0 : i64, tpu.core_type = #tpu.core_type<tc>, window_params = [{transform_indices = @transform_0, window_bounds = array<i64: 1, 256, 128>}, {transform_indices = @transform_1, window_bounds = array<i64: 1, 256, 128>}, {pipeline_mode = #tpu.pipeline_mode<synchronous>, transform_indices = @transform_2, window_bounds = array<i64: 128, 128>}, {pipeline_mode = #tpu.pipeline_mode<synchronous>, transform_indices = @transform_3, window_bounds = array<i64: 1, 128>}, {pipeline_mode = #tpu.pipeline_mode<synchronous>, transform_indices = @transform_4, window_bounds = array<i64: 1, 128>}, {pipeline_mode = #tpu.pipeline_mode<synchronous>, transform_indices = @transform_5, window_bounds = array<i64: 128, 2>}, {pipeline_mode = #tpu.pipeline_mode<synchronous>, transform_indices = @transform_6, window_bounds = array<i64: 2, 128>}, {transform_indices = @transform_7, window_bounds = array<i64: 1, 256, 128>}]} {
    %c0 = arith.constant 0 : index
    %c0_0 = arith.constant 0 : index
    %c0_1 = arith.constant 0 : index
    %0 = vector.load %arg1[%c0, %c0_0, %c0_1] : memref<1x256x128xbf16, #tpu.memory_space<vmem>>, vector<1x256x128xbf16>
    %1 = vector.shape_cast %0 : vector<1x256x128xbf16> to vector<256x128xbf16>
    %c0_2 = arith.constant 0 : index
    %c0_3 = arith.constant 0 : index
    %2 = vector.load %arg3[%c0_2, %c0_3] : memref<128x128xbf16, #tpu.memory_space<vmem>>, vector<128x128xbf16>
    %cst = arith.constant dense<0.000000e+00> : vector<256x128xf32>
    %3 = tpu.matmul %1, %2, %cst {dimension_numbers = #tpu.dot_dimension_numbers<[1], [0], [0], [1], [0, 0, 1, 1], [], []>} : vector<256x128xbf16>, vector<128x128xbf16>, vector<256x128xf32> -> vector<256x128xf32>
    %c0_4 = arith.constant 0 : index
    %c0_5 = arith.constant 0 : index
    %4 = vector.load %arg6[%c0_4, %c0_5] : memref<128x2xf32, #tpu.memory_space<vmem>>, vector<128x2xf32>
    %c0_6 = arith.constant 0 : index
    %c0_7 = arith.constant 0 : index
    %5 = vector.load %arg7[%c0_6, %c0_7] : memref<2x128xf32, #tpu.memory_space<vmem>>, vector<2x128xf32>
    %c0_8 = arith.constant 0 : index
    %c0_9 = arith.constant 0 : index
    %6 = vector.load %arg4[%c0_8, %c0_9] : memref<1x128xf32, #tpu.memory_space<vmem>>, vector<1x128xf32>
    %c0_10 = arith.constant 0 : index
    %c0_11 = arith.constant 0 : index
    %7 = vector.load %arg5[%c0_10, %c0_11] : memref<1x128xf32, #tpu.memory_space<vmem>>, vector<1x128xf32>
    %cst_12 = arith.constant dense<0.000000e+00> : vector<2xf32>
    %8 = vector.multi_reduction <add>, %4, %cst_12 [0] : vector<128x2xf32> to vector<2xf32>
    %9 = vector.shape_cast %8 : vector<2xf32> to vector<1x2xf32>
    %cst_13 = arith.constant 2.560000e+02 : f32
    %10 = vector.broadcast %cst_13 : f32 to vector<1x2xf32>
    %11 = arith.mulf %9, %10 : vector<1x2xf32>
    %cst_14 = arith.constant dense<0.000000e+00> : vector<128xf32>
    %12 = vector.multi_reduction <add>, %3, %cst_14 [0] : vector<256x128xf32> to vector<128xf32>
    %13 = vector.shape_cast %12 : vector<128xf32> to vector<1x128xf32>
    %cst_15 = arith.constant dense<0.000000e+00> : vector<1x2xf32>
    %14 = tpu.matmul %13, %4, %cst_15 {dimension_numbers = #tpu.dot_dimension_numbers<[1], [0], [0], [1], [0, 0, 1, 1], [], []>} : vector<1x128xf32>, vector<128x2xf32>, vector<1x2xf32> -> vector<1x2xf32>
    %15 = arith.divf %14, %11 : vector<1x2xf32>
    %cst_16 = arith.constant dense<0.000000e+00> : vector<1x128xf32>
    %16 = tpu.matmul %15, %5, %cst_16 {dimension_numbers = #tpu.dot_dimension_numbers<[1], [0], [0], [1], [0, 0, 1, 1], [], []>} : vector<1x2xf32>, vector<2x128xf32>, vector<1x128xf32> -> vector<1x128xf32>
    %17 = vector.broadcast %16 : vector<1x128xf32> to vector<256x128xf32>
    %18 = arith.subf %3, %17 : vector<256x128xf32>
    %19 = arith.mulf %18, %18 : vector<256x128xf32>
    %cst_17 = arith.constant dense<0.000000e+00> : vector<128xf32>
    %20 = vector.multi_reduction <add>, %19, %cst_17 [0] : vector<256x128xf32> to vector<128xf32>
    %21 = vector.shape_cast %20 : vector<128xf32> to vector<1x128xf32>
    %cst_18 = arith.constant dense<0.000000e+00> : vector<1x2xf32>
    %22 = tpu.matmul %21, %4, %cst_18 {dimension_numbers = #tpu.dot_dimension_numbers<[1], [0], [0], [1], [0, 0, 1, 1], [], []>} : vector<1x128xf32>, vector<128x2xf32>, vector<1x2xf32> -> vector<1x2xf32>
    %23 = arith.divf %22, %11 : vector<1x2xf32>
    %cst_19 = arith.constant 9.99999974E-6 : f32
    %24 = vector.broadcast %cst_19 : f32 to vector<1x2xf32>
    %25 = arith.addf %23, %24 : vector<1x2xf32>
    %26 = math.rsqrt %25 : vector<1x2xf32>
    %cst_20 = arith.constant dense<0.000000e+00> : vector<1x128xf32>
    %27 = tpu.matmul %26, %5, %cst_20 {dimension_numbers = #tpu.dot_dimension_numbers<[1], [0], [0], [1], [0, 0, 1, 1], [], []>} : vector<1x2xf32>, vector<2x128xf32>, vector<1x128xf32> -> vector<1x128xf32>
    %28 = vector.broadcast %27 : vector<1x128xf32> to vector<256x128xf32>
    %29 = arith.mulf %18, %28 : vector<256x128xf32>
    %30 = vector.broadcast %6 : vector<1x128xf32> to vector<256x128xf32>
    %31 = arith.mulf %29, %30 : vector<256x128xf32>
    %32 = vector.broadcast %7 : vector<1x128xf32> to vector<256x128xf32>
    %33 = arith.addf %31, %32 : vector<256x128xf32>
    %c0_21 = arith.constant 0 : index
    %c0_22 = arith.constant 0 : index
    %c0_23 = arith.constant 0 : index
    %34 = vector.load %arg2[%c0_21, %c0_22, %c0_23] : memref<1x256x128xbf16, #tpu.memory_space<vmem>>, vector<1x256x128xbf16>
    %35 = vector.shape_cast %34 : vector<1x256x128xbf16> to vector<256x128xbf16>
    %36 = arith.extf %35 : vector<256x128xbf16> to vector<256x128xf32>
    %37 = arith.addf %33, %36 : vector<256x128xf32>
    %cst_24 = arith.constant 0.000000e+00 : f32
    %38 = vector.broadcast %cst_24 : f32 to vector<256x128xf32>
    %39 = arith.maximumf %37, %38 : vector<256x128xf32>
    %c0_25 = arith.constant 0 : index
    %c0_26 = arith.constant 0 : index
    %c0_27 = arith.constant 0 : index
    %40 = vector.load %arg8[%c0_25, %c0_26, %c0_27] : memref<1x256x128xf32, #tpu.memory_space<vmem>>, vector<1x256x128xf32>
    %41 = vector.shape_cast %40 : vector<1x256x128xf32> to vector<256x128xf32>
    %42 = vector.shape_cast %39 : vector<256x128xf32> to vector<1x256x128xf32>
    tpu.vector_store %arg8[%c0_25, %c0_26, %c0_27], %42 {strides = array<i32>} : memref<1x256x128xf32, #tpu.memory_space<vmem>>, vector<1x256x128xf32>,
    return
  }
  func.func @transform_0(%arg0: i32) -> (i32, i32, i32) {
    %c0_i32 = arith.constant 0 : i32
    %c0_i32_0 = arith.constant 0 : i32
    %c0_i32_1 = arith.constant 0 : i32
    return %arg0, %c0_i32, %c0_i32_0 : i32, i32, i32
  }
  func.func @transform_1(%arg0: i32) -> (i32, i32, i32) {
    %c0_i32 = arith.constant 0 : i32
    %c0_i32_0 = arith.constant 0 : i32
    %c0_i32_1 = arith.constant 0 : i32
    return %arg0, %c0_i32, %c0_i32_0 : i32, i32, i32
  }
  func.func @transform_2(%arg0: i32) -> (i32, i32) {
    %c0_i32 = arith.constant 0 : i32
    %c0_i32_0 = arith.constant 0 : i32
    %c0_i32_1 = arith.constant 0 : i32
    return %c0_i32, %c0_i32_0 : i32, i32
  }
  func.func @transform_3(%arg0: i32) -> (i32, i32) {
    %c0_i32 = arith.constant 0 : i32
    %c0_i32_0 = arith.constant 0 : i32
    %c0_i32_1 = arith.constant 0 : i32
    return %c0_i32, %c0_i32_0 : i32, i32
  }
  func.func @transform_4(%arg0: i32) -> (i32, i32) {
    %c0_i32 = arith.constant 0 : i32
    %c0_i32_0 = arith.constant 0 : i32
    %c0_i32_1 = arith.constant 0 : i32
    return %c0_i32, %c0_i32_0 : i32, i32
  }
  func.func @transform_5(%arg0: i32) -> (i32, i32) {
    %c0_i32 = arith.constant 0 : i32
    %c0_i32_0 = arith.constant 0 : i32
    %c0_i32_1 = arith.constant 0 : i32
    return %c0_i32, %c0_i32_0 : i32, i32
  }
  func.func @transform_6(%arg0: i32) -> (i32, i32) {
    %c0_i32 = arith.constant 0 : i32
    %c0_i32_0 = arith.constant 0 : i32
    %c0_i32_1 = arith.constant 0 : i32
    return %c0_i32, %c0_i32_0 : i32, i32
  }
  func.func @transform_7(%arg0: i32) -> (i32, i32, i32) {
    %c0_i32 = arith.constant 0 : i32
    %c0_i32_0 = arith.constant 0 : i32
    %c0_i32_1 = arith.constant 0 : i32
    return %arg0, %c0_i32, %c0_i32_0 : i32, i32, i32
  }
}

module attributes {stable_mosaic.version = 11 : i64} {
  func.func @_conv3x3_gn_kernel(%arg0: i32, %arg1: memref<1x1x18x18x128xbf16, #tpu.memory_space<vmem>>, %arg2: memref<9x128x128xbf16, #tpu.memory_space<vmem>>, %arg3: memref<1x128xf32, #tpu.memory_space<vmem>>, %arg4: memref<1x128xf32, #tpu.memory_space<vmem>>, %arg5: memref<128x2xf32, #tpu.memory_space<vmem>>, %arg6: memref<2x128xf32, #tpu.memory_space<vmem>>, %arg7: memref<1x256x128xbf16, #tpu.memory_space<vmem>>) attributes {dimension_semantics = [#tpu.dimension_semantics<parallel>], iteration_bounds = array<i64: 2>, scalar_prefetch = 0 : i64, scratch_operands = 0 : i64, tpu.core_type = #tpu.core_type<tc>, window_params = [{transform_indices = @transform_0, window_bounds = array<i64: 1, 1, 18, 18, 128>}, {pipeline_mode = #tpu.pipeline_mode<synchronous>, transform_indices = @transform_1, window_bounds = array<i64: 9, 128, 128>}, {pipeline_mode = #tpu.pipeline_mode<synchronous>, transform_indices = @transform_2, window_bounds = array<i64: 1, 128>}, {pipeline_mode = #tpu.pipeline_mode<synchronous>, transform_indices = @transform_3, window_bounds = array<i64: 1, 128>}, {pipeline_mode = #tpu.pipeline_mode<synchronous>, transform_indices = @transform_4, window_bounds = array<i64: 128, 2>}, {pipeline_mode = #tpu.pipeline_mode<synchronous>, transform_indices = @transform_5, window_bounds = array<i64: 2, 128>}, {transform_indices = @transform_6, window_bounds = array<i64: 1, 256, 128>}]} {
    %cst = arith.constant 0.000000e+00 : f32
    %0 = vector.broadcast %cst : f32 to vector<256x128xf32>
    %c0 = arith.constant 0 : index
    %c0_0 = arith.constant 0 : index
    %c0_1 = arith.constant 0 : index
    %c0_2 = arith.constant 0 : index
    %c0_3 = arith.constant 0 : index
    %1 = vector.load %arg1[%c0, %c0_0, %c0_1, %c0_2, %c0_3] : memref<1x1x18x18x128xbf16, #tpu.memory_space<vmem>>, vector<1x1x16x16x128xbf16>
    %2 = vector.shape_cast %1 : vector<1x1x16x16x128xbf16> to vector<16x16x128xbf16>
    %3 = vector.shape_cast %2 : vector<16x16x128xbf16> to vector<256x128xbf16>
    %c0_4 = arith.constant 0 : index
    %c0_5 = arith.constant 0 : index
    %c0_6 = arith.constant 0 : index
    %4 = vector.load %arg2[%c0_4, %c0_5, %c0_6] : memref<9x128x128xbf16, #tpu.memory_space<vmem>>, vector<1x128x128xbf16>
    %5 = vector.shape_cast %4 : vector<1x128x128xbf16> to vector<128x128xbf16>
    %cst_7 = arith.constant dense<0.000000e+00> : vector<256x128xf32>
    %6 = tpu.matmul %3, %5, %cst_7 {dimension_numbers = #tpu.dot_dimension_numbers<[1], [0], [0], [1], [0, 0, 1, 1], [], []>} : vector<256x128xbf16>, vector<128x128xbf16>, vector<256x128xf32> -> vector<256x128xf32>
    %7 = arith.addf %0, %6 : vector<256x128xf32>
    %c0_8 = arith.constant 0 : index
    %c0_9 = arith.constant 0 : index
    %c0_10 = arith.constant 0 : index
    %c1 = arith.constant 1 : index
    %c0_11 = arith.constant 0 : index
    %8 = vector.load %arg1[%c0_8, %c0_9, %c0_10, %c1, %c0_11] : memref<1x1x18x18x128xbf16, #tpu.memory_space<vmem>>, vector<1x1x16x16x128xbf16>
    %9 = vector.shape_cast %8 : vector<1x1x16x16x128xbf16> to vector<16x16x128xbf16>
    %10 = vector.shape_cast %9 : vector<16x16x128xbf16> to vector<256x128xbf16>
    %c1_12 = arith.constant 1 : index
    %c0_13 = arith.constant 0 : index
    %c0_14 = arith.constant 0 : index
    %11 = vector.load %arg2[%c1_12, %c0_13, %c0_14] : memref<9x128x128xbf16, #tpu.memory_space<vmem>>, vector<1x128x128xbf16>
    %12 = vector.shape_cast %11 : vector<1x128x128xbf16> to vector<128x128xbf16>
    %cst_15 = arith.constant dense<0.000000e+00> : vector<256x128xf32>
    %13 = tpu.matmul %10, %12, %cst_15 {dimension_numbers = #tpu.dot_dimension_numbers<[1], [0], [0], [1], [0, 0, 1, 1], [], []>} : vector<256x128xbf16>, vector<128x128xbf16>, vector<256x128xf32> -> vector<256x128xf32>
    %14 = arith.addf %7, %13 : vector<256x128xf32>
    %c0_16 = arith.constant 0 : index
    %c0_17 = arith.constant 0 : index
    %c0_18 = arith.constant 0 : index
    %c2 = arith.constant 2 : index
    %c0_19 = arith.constant 0 : index
    %15 = vector.load %arg1[%c0_16, %c0_17, %c0_18, %c2, %c0_19] : memref<1x1x18x18x128xbf16, #tpu.memory_space<vmem>>, vector<1x1x16x16x128xbf16>
    %16 = vector.shape_cast %15 : vector<1x1x16x16x128xbf16> to vector<16x16x128xbf16>
    %17 = vector.shape_cast %16 : vector<16x16x128xbf16> to vector<256x128xbf16>
    %c2_20 = arith.constant 2 : index
    %c0_21 = arith.constant 0 : index
    %c0_22 = arith.constant 0 : index
    %18 = vector.load %arg2[%c2_20, %c0_21, %c0_22] : memref<9x128x128xbf16, #tpu.memory_space<vmem>>, vector<1x128x128xbf16>
    %19 = vector.shape_cast %18 : vector<1x128x128xbf16> to vector<128x128xbf16>
    %cst_23 = arith.constant dense<0.000000e+00> : vector<256x128xf32>
    %20 = tpu.matmul %17, %19, %cst_23 {dimension_numbers = #tpu.dot_dimension_numbers<[1], [0], [0], [1], [0, 0, 1, 1], [], []>} : vector<256x128xbf16>, vector<128x128xbf16>, vector<256x128xf32> -> vector<256x128xf32>
    %21 = arith.addf %14, %20 : vector<256x128xf32>
    %c0_24 = arith.constant 0 : index
    %c0_25 = arith.constant 0 : index
    %c1_26 = arith.constant 1 : index
    %c0_27 = arith.constant 0 : index
    %c0_28 = arith.constant 0 : index
    %22 = vector.load %arg1[%c0_24, %c0_25, %c1_26, %c0_27, %c0_28] : memref<1x1x18x18x128xbf16, #tpu.memory_space<vmem>>, vector<1x1x16x16x128xbf16>
    %23 = vector.shape_cast %22 : vector<1x1x16x16x128xbf16> to vector<16x16x128xbf16>
    %24 = vector.shape_cast %23 : vector<16x16x128xbf16> to vector<256x128xbf16>
    %c3 = arith.constant 3 : index
    %c0_29 = arith.constant 0 : index
    %c0_30 = arith.constant 0 : index
    %25 = vector.load %arg2[%c3, %c0_29, %c0_30] : memref<9x128x128xbf16, #tpu.memory_space<vmem>>, vector<1x128x128xbf16>
    %26 = vector.shape_cast %25 : vector<1x128x128xbf16> to vector<128x128xbf16>
    %cst_31 = arith.constant dense<0.000000e+00> : vector<256x128xf32>
    %27 = tpu.matmul %24, %26, %cst_31 {dimension_numbers = #tpu.dot_dimension_numbers<[1], [0], [0], [1], [0, 0, 1, 1], [], []>} : vector<256x128xbf16>, vector<128x128xbf16>, vector<256x128xf32> -> vector<256x128xf32>
    %28 = arith.addf %21, %27 : vector<256x128xf32>
    %c0_32 = arith.constant 0 : index
    %c0_33 = arith.constant 0 : index
    %c1_34 = arith.constant 1 : index
    %c1_35 = arith.constant 1 : index
    %c0_36 = arith.constant 0 : index
    %29 = vector.load %arg1[%c0_32, %c0_33, %c1_34, %c1_35, %c0_36] : memref<1x1x18x18x128xbf16, #tpu.memory_space<vmem>>, vector<1x1x16x16x128xbf16>
    %30 = vector.shape_cast %29 : vector<1x1x16x16x128xbf16> to vector<16x16x128xbf16>
    %31 = vector.shape_cast %30 : vector<16x16x128xbf16> to vector<256x128xbf16>
    %c4 = arith.constant 4 : index
    %c0_37 = arith.constant 0 : index
    %c0_38 = arith.constant 0 : index
    %32 = vector.load %arg2[%c4, %c0_37, %c0_38] : memref<9x128x128xbf16, #tpu.memory_space<vmem>>, vector<1x128x128xbf16>
    %33 = vector.shape_cast %32 : vector<1x128x128xbf16> to vector<128x128xbf16>
    %cst_39 = arith.constant dense<0.000000e+00> : vector<256x128xf32>
    %34 = tpu.matmul %31, %33, %cst_39 {dimension_numbers = #tpu.dot_dimension_numbers<[1], [0], [0], [1], [0, 0, 1, 1], [], []>} : vector<256x128xbf16>, vector<128x128xbf16>, vector<256x128xf32> -> vector<256x128xf32>
    %35 = arith.addf %28, %34 : vector<256x128xf32>
    %c0_40 = arith.constant 0 : index
    %c0_41 = arith.constant 0 : index
    %c1_42 = arith.constant 1 : index
    %c2_43 = arith.constant 2 : index
    %c0_44 = arith.constant 0 : index
    %36 = vector.load %arg1[%c0_40, %c0_41, %c1_42, %c2_43, %c0_44] : memref<1x1x18x18x128xbf16, #tpu.memory_space<vmem>>, vector<1x1x16x16x128xbf16>
    %37 = vector.shape_cast %36 : vector<1x1x16x16x128xbf16> to vector<16x16x128xbf16>
    %38 = vector.shape_cast %37 : vector<16x16x128xbf16> to vector<256x128xbf16>
    %c5 = arith.constant 5 : index
    %c0_45 = arith.constant 0 : index
    %c0_46 = arith.constant 0 : index
    %39 = vector.load %arg2[%c5, %c0_45, %c0_46] : memref<9x128x128xbf16, #tpu.memory_space<vmem>>, vector<1x128x128xbf16>
    %40 = vector.shape_cast %39 : vector<1x128x128xbf16> to vector<128x128xbf16>
    %cst_47 = arith.constant dense<0.000000e+00> : vector<256x128xf32>
    %41 = tpu.matmul %38, %40, %cst_47 {dimension_numbers = #tpu.dot_dimension_numbers<[1], [0], [0], [1], [0, 0, 1, 1], [], []>} : vector<256x128xbf16>, vector<128x128xbf16>, vector<256x128xf32> -> vector<256x128xf32>
    %42 = arith.addf %35, %41 : vector<256x128xf32>
    %c0_48 = arith.constant 0 : index
    %c0_49 = arith.constant 0 : index
    %c2_50 = arith.constant 2 : index
    %c0_51 = arith.constant 0 : index
    %c0_52 = arith.constant 0 : index
    %43 = vector.load %arg1[%c0_48, %c0_49, %c2_50, %c0_51, %c0_52] : memref<1x1x18x18x128xbf16, #tpu.memory_space<vmem>>, vector<1x1x16x16x128xbf16>
    %44 = vector.shape_cast %43 : vector<1x1x16x16x128xbf16> to vector<16x16x128xbf16>
    %45 = vector.shape_cast %44 : vector<16x16x128xbf16> to vector<256x128xbf16>
    %c6 = arith.constant 6 : index
    %c0_53 = arith.constant 0 : index
    %c0_54 = arith.constant 0 : index
    %46 = vector.load %arg2[%c6, %c0_53, %c0_54] : memref<9x128x128xbf16, #tpu.memory_space<vmem>>, vector<1x128x128xbf16>
    %47 = vector.shape_cast %46 : vector<1x128x128xbf16> to vector<128x128xbf16>
    %cst_55 = arith.constant dense<0.000000e+00> : vector<256x128xf32>
    %48 = tpu.matmul %45, %47, %cst_55 {dimension_numbers = #tpu.dot_dimension_numbers<[1], [0], [0], [1], [0, 0, 1, 1], [], []>} : vector<256x128xbf16>, vector<128x128xbf16>, vector<256x128xf32> -> vector<256x128xf32>
    %49 = arith.addf %42, %48 : vector<256x128xf32>
    %c0_56 = arith.constant 0 : index
    %c0_57 = arith.constant 0 : index
    %c2_58 = arith.constant 2 : index
    %c1_59 = arith.constant 1 : index
    %c0_60 = arith.constant 0 : index
    %50 = vector.load %arg1[%c0_56, %c0_57, %c2_58, %c1_59, %c0_60] : memref<1x1x18x18x128xbf16, #tpu.memory_space<vmem>>, vector<1x1x16x16x128xbf16>
    %51 = vector.shape_cast %50 : vector<1x1x16x16x128xbf16> to vector<16x16x128xbf16>
    %52 = vector.shape_cast %51 : vector<16x16x128xbf16> to vector<256x128xbf16>
    %c7 = arith.constant 7 : index
    %c0_61 = arith.constant 0 : index
    %c0_62 = arith.constant 0 : index
    %53 = vector.load %arg2[%c7, %c0_61, %c0_62] : memref<9x128x128xbf16, #tpu.memory_space<vmem>>, vector<1x128x128xbf16>
    %54 = vector.shape_cast %53 : vector<1x128x128xbf16> to vector<128x128xbf16>
    %cst_63 = arith.constant dense<0.000000e+00> : vector<256x128xf32>
    %55 = tpu.matmul %52, %54, %cst_63 {dimension_numbers = #tpu.dot_dimension_numbers<[1], [0], [0], [1], [0, 0, 1, 1], [], []>} : vector<256x128xbf16>, vector<128x128xbf16>, vector<256x128xf32> -> vector<256x128xf32>
    %56 = arith.addf %49, %55 : vector<256x128xf32>
    %c0_64 = arith.constant 0 : index
    %c0_65 = arith.constant 0 : index
    %c2_66 = arith.constant 2 : index
    %c2_67 = arith.constant 2 : index
    %c0_68 = arith.constant 0 : index
    %57 = vector.load %arg1[%c0_64, %c0_65, %c2_66, %c2_67, %c0_68] : memref<1x1x18x18x128xbf16, #tpu.memory_space<vmem>>, vector<1x1x16x16x128xbf16>
    %58 = vector.shape_cast %57 : vector<1x1x16x16x128xbf16> to vector<16x16x128xbf16>
    %59 = vector.shape_cast %58 : vector<16x16x128xbf16> to vector<256x128xbf16>
    %c8 = arith.constant 8 : index
    %c0_69 = arith.constant 0 : index
    %c0_70 = arith.constant 0 : index
    %60 = vector.load %arg2[%c8, %c0_69, %c0_70] : memref<9x128x128xbf16, #tpu.memory_space<vmem>>, vector<1x128x128xbf16>
    %61 = vector.shape_cast %60 : vector<1x128x128xbf16> to vector<128x128xbf16>
    %cst_71 = arith.constant dense<0.000000e+00> : vector<256x128xf32>
    %62 = tpu.matmul %59, %61, %cst_71 {dimension_numbers = #tpu.dot_dimension_numbers<[1], [0], [0], [1], [0, 0, 1, 1], [], []>} : vector<256x128xbf16>, vector<128x128xbf16>, vector<256x128xf32> -> vector<256x128xf32>
    %63 = arith.addf %56, %62 : vector<256x128xf32>
    %c0_72 = arith.constant 0 : index
    %c0_73 = arith.constant 0 : index
    %64 = vector.load %arg5[%c0_72, %c0_73] : memref<128x2xf32, #tpu.memory_space<vmem>>, vector<128x2xf32>
    %c0_74 = arith.constant 0 : index
    %c0_75 = arith.constant 0 : index
    %65 = vector.load %arg6[%c0_74, %c0_75] : memref<2x128xf32, #tpu.memory_space<vmem>>, vector<2x128xf32>
    %c0_76 = arith.constant 0 : index
    %c0_77 = arith.constant 0 : index
    %66 = vector.load %arg3[%c0_76, %c0_77] : memref<1x128xf32, #tpu.memory_space<vmem>>, vector<1x128xf32>
    %c0_78 = arith.constant 0 : index
    %c0_79 = arith.constant 0 : index
    %67 = vector.load %arg4[%c0_78, %c0_79] : memref<1x128xf32, #tpu.memory_space<vmem>>, vector<1x128xf32>
    %cst_80 = arith.constant dense<0.000000e+00> : vector<2xf32>
    %68 = vector.multi_reduction <add>, %64, %cst_80 [0] : vector<128x2xf32> to vector<2xf32>
    %69 = vector.shape_cast %68 : vector<2xf32> to vector<1x2xf32>
    %cst_81 = arith.constant 2.560000e+02 : f32
    %70 = vector.broadcast %cst_81 : f32 to vector<1x2xf32>
    %71 = arith.mulf %69, %70 : vector<1x2xf32>
    %cst_82 = arith.constant dense<0.000000e+00> : vector<128xf32>
    %72 = vector.multi_reduction <add>, %63, %cst_82 [0] : vector<256x128xf32> to vector<128xf32>
    %73 = vector.shape_cast %72 : vector<128xf32> to vector<1x128xf32>
    %cst_83 = arith.constant dense<0.000000e+00> : vector<1x2xf32>
    %74 = tpu.matmul %73, %64, %cst_83 {dimension_numbers = #tpu.dot_dimension_numbers<[1], [0], [0], [1], [0, 0, 1, 1], [], []>} : vector<1x128xf32>, vector<128x2xf32>, vector<1x2xf32> -> vector<1x2xf32>
    %75 = arith.divf %74, %71 : vector<1x2xf32>
    %cst_84 = arith.constant dense<0.000000e+00> : vector<1x128xf32>
    %76 = tpu.matmul %75, %65, %cst_84 {dimension_numbers = #tpu.dot_dimension_numbers<[1], [0], [0], [1], [0, 0, 1, 1], [], []>} : vector<1x2xf32>, vector<2x128xf32>, vector<1x128xf32> -> vector<1x128xf32>
    %77 = vector.broadcast %76 : vector<1x128xf32> to vector<256x128xf32>
    %78 = arith.subf %63, %77 : vector<256x128xf32>
    %79 = arith.mulf %78, %78 : vector<256x128xf32>
    %cst_85 = arith.constant dense<0.000000e+00> : vector<128xf32>
    %80 = vector.multi_reduction <add>, %79, %cst_85 [0] : vector<256x128xf32> to vector<128xf32>
    %81 = vector.shape_cast %80 : vector<128xf32> to vector<1x128xf32>
    %cst_86 = arith.constant dense<0.000000e+00> : vector<1x2xf32>
    %82 = tpu.matmul %81, %64, %cst_86 {dimension_numbers = #tpu.dot_dimension_numbers<[1], [0], [0], [1], [0, 0, 1, 1], [], []>} : vector<1x128xf32>, vector<128x2xf32>, vector<1x2xf32> -> vector<1x2xf32>
    %83 = arith.divf %82, %71 : vector<1x2xf32>
    %cst_87 = arith.constant 9.99999974E-6 : f32
    %84 = vector.broadcast %cst_87 : f32 to vector<1x2xf32>
    %85 = arith.addf %83, %84 : vector<1x2xf32>
    %86 = math.rsqrt %85 : vector<1x2xf32>
    %cst_88 = arith.constant dense<0.000000e+00> : vector<1x128xf32>
    %87 = tpu.matmul %86, %65, %cst_88 {dimension_numbers = #tpu.dot_dimension_numbers<[1], [0], [0], [1], [0, 0, 1, 1], [], []>} : vector<1x2xf32>, vector<2x128xf32>, vector<1x128xf32> -> vector<1x128xf32>
    %88 = vector.broadcast %87 : vector<1x128xf32> to vector<256x128xf32>
    %89 = arith.mulf %78, %88 : vector<256x128xf32>
    %90 = vector.broadcast %66 : vector<1x128xf32> to vector<256x128xf32>
    %91 = arith.mulf %89, %90 : vector<256x128xf32>
    %92 = vector.broadcast %67 : vector<1x128xf32> to vector<256x128xf32>
    %93 = arith.addf %91, %92 : vector<256x128xf32>
    %cst_89 = arith.constant 0.000000e+00 : f32
    %94 = vector.broadcast %cst_89 : f32 to vector<256x128xf32>
    %95 = arith.maximumf %93, %94 : vector<256x128xf32>
    %96 = arith.truncf %95 : vector<256x128xf32> to vector<256x128xbf16>
    %c0_90 = arith.constant 0 : index
    %c0_91 = arith.constant 0 : index
    %c0_92 = arith.constant 0 : index
    %97 = vector.load %arg7[%c0_90, %c0_91, %c0_92] : memref<1x256x128xbf16, #tpu.memory_space<vmem>>, vector<1x256x128xbf16>
    %98 = vector.shape_cast %97 : vector<1x256x128xbf16> to vector<256x128xbf16>
    %99 = vector.shape_cast %96 : vector<256x128xbf16> to vector<1x256x128xbf16>
    tpu.vector_store %arg7[%c0_90, %c0_91, %c0_92], %99 {strides = array<i32>} : memref<1x256x128xbf16, #tpu.memory_space<vmem>>, vector<1x256x128xbf16>,
    return
  }
  func.func @transform_0(%arg0: i32) -> (i32, i32, i32, i32, i32) {
    %c0_i32 = arith.constant 0 : i32
    %c0_i32_0 = arith.constant 0 : i32
    %c0_i32_1 = arith.constant 0 : i32
    %c0_i32_2 = arith.constant 0 : i32
    %c0_i32_3 = arith.constant 0 : i32
    return %arg0, %c0_i32, %c0_i32_0, %c0_i32_1, %c0_i32_2 : i32, i32, i32, i32, i32
  }
  func.func @transform_1(%arg0: i32) -> (i32, i32, i32) {
    %c0_i32 = arith.constant 0 : i32
    %c0_i32_0 = arith.constant 0 : i32
    %c0_i32_1 = arith.constant 0 : i32
    %c0_i32_2 = arith.constant 0 : i32
    return %c0_i32, %c0_i32_0, %c0_i32_1 : i32, i32, i32
  }
  func.func @transform_2(%arg0: i32) -> (i32, i32) {
    %c0_i32 = arith.constant 0 : i32
    %c0_i32_0 = arith.constant 0 : i32
    %c0_i32_1 = arith.constant 0 : i32
    return %c0_i32, %c0_i32_0 : i32, i32
  }
  func.func @transform_3(%arg0: i32) -> (i32, i32) {
    %c0_i32 = arith.constant 0 : i32
    %c0_i32_0 = arith.constant 0 : i32
    %c0_i32_1 = arith.constant 0 : i32
    return %c0_i32, %c0_i32_0 : i32, i32
  }
  func.func @transform_4(%arg0: i32) -> (i32, i32) {
    %c0_i32 = arith.constant 0 : i32
    %c0_i32_0 = arith.constant 0 : i32
    %c0_i32_1 = arith.constant 0 : i32
    return %c0_i32, %c0_i32_0 : i32, i32
  }
  func.func @transform_5(%arg0: i32) -> (i32, i32) {
    %c0_i32 = arith.constant 0 : i32
    %c0_i32_0 = arith.constant 0 : i32
    %c0_i32_1 = arith.constant 0 : i32
    return %c0_i32, %c0_i32_0 : i32, i32
  }
  func.func @transform_6(%arg0: i32) -> (i32, i32, i32) {
    %c0_i32 = arith.constant 0 : i32
    %c0_i32_0 = arith.constant 0 : i32
    %c0_i32_1 = arith.constant 0 : i32
    return %arg0, %c0_i32, %c0_i32_0 : i32, i32, i32
  }
}

</mosaic_0001>

<bundles_post_ra>
// kernel: bottleneck_forward.3
= control target key start
LH: loop header
LB: loop body
LE: loop exit
PB: predicated region body
PF: predicated region fallthrough
CT: control target
= control target key end

     0   :  { %s1414_s21 = smov 0   ;;  %s1980_s0 = inlined_call_operand.vmem [shape: bf16[2,256,128], index: 0, kind: input, shape index: {}]   ;;  %s1981_s1 = inlined_call_operand.vmem [shape: bf16[128,128], index: 1, kind: input, shape index: {}]   ;;  %s1982_s2 = inlined_call_operand.vmem [shape: f32[1,128], index: 2, kind: input, shape index: {}]   ;;  %s1983_s3 = inlined_call_operand.vmem [shape: f32[1,128], index: 3, kind: input, shape index: {}]   ;;  %s1984_s4 = inlined_call_operand.vmem [shape: f32[128,2], index: 4, kind: input, shape index: {}]   ;;  %s1985_s5 = inlined_call_operand.vmem [shape: f32[2,128], index: 5, kind: input, shape index: {}]   ;;  %s1986_s6 = inlined_call_operand.vmem [shape: bf16[2,256,128], index: 6, kind: output, shape index: {}]  }
   0x1 LB: > { %s1101_s22 = sadd.s32 4294967295, %s1377_s21   ;;  %p1105_p0 = scmp.ge.s32.totalorder %s1377_s21, 1  ;;  %s1377_s21 = sphi %s1414_s21, %s16_s21  }
   0x2   : > { %p212_p1 = scmp.lt.s32.totalorder %s1377_s21, 3 }
   0x4   : > { %p213_p2 = pnand %p1105_p0, %p212_p1 }
   0x5   : > { %p242_p3 = scmp.lt.s32.totalorder (!%p213_p2), %s1101_s22, 1 }
   0x6   : > { %216 = sbr.rel (%p213_p2) target bundleno = 971 (0x3cb), region = 44 }
   0xb   : > { %v1237_v0 = vld [vmem:[%s1981_s1 + $0x38] sm:$0xff]  ;;  %v1236_v1 = vld [vmem:[%s1981_s1 + $0x30] sm:$0xff]  ;;  %v1235_v2 = vld [vmem:[%s1981_s1 + $0x28] sm:$0xff]  ;;  %s1988_s22 = smov (!%p242_p3, %s1101_s22), 1  ;;  %vm552_vm0 = vcmask 15360   ;;  %vm666_vm1 = vcmask 1041408  }
   0xc   : > { %444 = vmatpush.bf16.msra.mxu0 %v1237_v0  ;;  %1333 = vmatpush.bf16.msra.mxu1 %v1237_v0  ;;  %v1234_v3 = vld [vmem:[%s1981_s1 + $0x20] sm:$0xff]  ;;  %v1233_v4 = vld [vmem:[%s1981_s1 + $0x18] sm:$0xff]  ;;  %v1232_v5 = vld [vmem:[%s1981_s1 + $0x10] sm:$0xff]  ;;  %s1212_s13 = sshll.u32 %s1988_s22, 7 }
   0xd   : > { %1334 = vmatpush.bf16.msra.mxu2 %v1237_v0  ;;  %1335 = vmatpush.bf16.msra.mxu3 %v1237_v0  ;;  %v1231_v6 = vld [vmem:[%s1981_s1 + $0x8] sm:$0xff]  ;;  %v1230_v7 = vld [vmem:[%s1981_s1] sm:$0xff]  ;;  %s1458_s18 = scalar_lea.vmem %s1980_s0, %s1212_s13  ;;  %v1493_v31 = vld [vmem:[%s1984_s4 + $0x78] sm:$0xff]  ;;  %s1952_s17 = scalar_lea.vmem %s1986_s6, %s1212_s13 }
   0xe   : > { %v1214_v8 = vld [vmem:[%s1458_s18] sm:$0xff]  ;;  %v1219_v9 = vld [vmem:[%s1458_s18 + $0x28] sm:$0xff]  ;;  %v1220_v12 = vld [vmem:[%s1458_s18 + $0x30] sm:$0xff] }
   0xf   : > { %v1223_v10 = vld [vmem:[%s1458_s18 + $0x48] sm:$0xff]  ;;  %v1224_v13 = vld [vmem:[%s1458_s18 + $0x50] sm:$0xff]  ;;  %v1221_v16 = vld [vmem:[%s1458_s18 + $0x38] sm:$0xff] }
  0x10   : > { %445 = vmatpush.bf16.msra.mxu0 %v1236_v1  ;;  %1336 = vmatpush.bf16.msra.mxu1 %v1236_v1  ;;  %v1215_v11 = vld [vmem:[%s1458_s18 + $0x8] sm:$0xff]  ;;  %v1216_v15 = vld [vmem:[%s1458_s18 + $0x10] sm:$0xff]  ;;  %v1225_v17 = vld [vmem:[%s1458_s18 + $0x58] sm:$0xff] }
  0x11   : > { %1337 = vmatpush.bf16.msra.mxu2 %v1236_v1  ;;  %1338 = vmatpush.bf16.msra.mxu3 %v1236_v1  ;;  %v1227_v14 = vld [vmem:[%s1458_s18 + $0x68] sm:$0xff]  ;;  %v1228_v18 = vld [vmem:[%s1458_s18 + $0x70] sm:$0xff]  ;;  %v1217_v19 = vld [vmem:[%s1458_s18 + $0x18] sm:$0xff] }
  0x12   : > { %v1222_v20 = vld [vmem:[%s1458_s18 + $0x40] sm:$0xff]  ;;  %v1229_v22 = vld [vmem:[%s1458_s18 + $0x78] sm:$0xff]  ;;  %v1498_v32 = vld [vmem:[%s1984_s4 + $0x70] sm:$0xff] }
  0x13   : > { %v1226_v21 = vld [vmem:[%s1458_s18 + $0x60] sm:$0xff]  ;;  %v1521_v40 = vld [vmem:[%s1984_s4 + $0x68] sm:$0xff]  ;;  %v1555_v55 = vld [vmem:[%s1984_s4 + $0x58] sm:$0xff] }
  0x14   : > { %446 = vmatpush.bf16.msra.mxu0 %v1235_v2  ;;  %1339 = vmatpush.bf16.msra.mxu1 %v1235_v2  ;;  %v1218_v23 = vld [vmem:[%s1458_s18 + $0x20] sm:$0xff]  ;;  %v1560_v56 = vld [vmem:[%s1984_s4 + $0x50] sm:$0xff]  ;;  %v1568_v58 = vld [vmem:[%s1984_s4 + $0x48] sm:$0xff] }
  0x15   : > { %1340 = vmatpush.bf16.msra.mxu2 %v1235_v2  ;;  %1341 = vmatpush.bf16.msra.mxu3 %v1235_v2  ;;  %v1526_v41 = vld [vmem:[%s1984_s4 + $0x60] sm:$0xff]  ;;  %v540_v2 = vld [vmem:[%s1984_s4 + $0x38] sm:$0xff] }
  0x16   : > { %v1578_v61 = vld [vmem:[%s1984_s4 + $0x40] sm:$0xff] }
  0x18   : > { %447 = vmatpush.bf16.msra.mxu0 %v1234_v3  ;;  %1342 = vmatpush.bf16.msra.mxu1 %v1234_v3 }
  0x19   : > { %1343 = vmatpush.bf16.msra.mxu2 %v1234_v3  ;;  %1344 = vmatpush.bf16.msra.mxu3 %v1234_v3 }
  0x1c   : > { %448 = vmatpush.bf16.msra.mxu0 %v1233_v4  ;;  %1345 = vmatpush.bf16.msra.mxu1 %v1233_v4 }
  0x1d   : > { %1346 = vmatpush.bf16.msra.mxu2 %v1233_v4  ;;  %1347 = vmatpush.bf16.msra.mxu3 %v1233_v4 }
  0x20   : > { %449 = vmatpush.bf16.msra.mxu0 %v1232_v5  ;;  %1348 = vmatpush.bf16.msra.mxu1 %v1232_v5 }
  0x21   : > { %1349 = vmatpush.bf16.msra.mxu2 %v1232_v5  ;;  %1350 = vmatpush.bf16.msra.mxu3 %v1232_v5 }
  0x24   : > { %450 = vmatpush.bf16.msra.mxu0 %v1231_v6  ;;  %1351 = vmatpush.bf16.msra.mxu1 %v1231_v6 }
  0x25   : > { %1352 = vmatpush.bf16.msra.mxu2 %v1231_v6  ;;  %1353 = vmatpush.bf16.msra.mxu3 %v1231_v6 }
  0x28   : > { %451 = vmatpush.bf16.msra.mxu0 %v1230_v7  ;;  %1354 = vmatpush.bf16.msra.mxu1 %v1230_v7 }
  0x29   : > { %1355 = vmatpush.bf16.msra.mxu2 %v1230_v7  ;;  %1356 = vmatpush.bf16.msra.mxu3 %v1230_v7  ;;  %v539_v7 = vld [vmem:[%s1984_s4 + $0x30] sm:$0xff] }
  0x2b   : > { %452 = vmatmul.bf16.vlgmr.msra.gmra.mxu0 %v1214_v8  ;;  %477 = vmatmul.bf16.vlgmr.msra.gmra.mxu1 %v1219_v9  ;;  %v538_v8 = vld [vmem:[%s1984_s4 + $0x28] sm:$0xff] }
  0x2c   : > { %497 = vmatmul.bf16.vlgmr.msra.gmra.mxu2 %v1223_v10  ;;  %517 = vmatmul.bf16.vlgmr.msra.gmra.mxu3 %v1227_v14 }
  0x2d   : > { %628 = vmatpush.msrb.mxu1 %v1493_v31  ;;  %792 = vmatpush.msrb.mxu3 %v1493_v31 }
  0x2f   : > { %629 = vmatpush.msrb.mxu1 %v1498_v32  ;;  %793 = vmatpush.msrb.mxu3 %v1498_v32 }
  0x31   : > { %630 = vmatpush.msrb.mxu1 %v1521_v40  ;;  %794 = vmatpush.msrb.mxu3 %v1521_v40 }
  0x33   : > { %631 = vmatpush.msrb.mxu1 %v1526_v41  ;;  %795 = vmatpush.msrb.mxu3 %v1526_v41 }
  0x35   : > { %632 = vmatpush.msrb.mxu1 %v1555_v55  ;;  %796 = vmatpush.msrb.mxu3 %v1555_v55 }
  0x37   : > { %633 = vmatpush.msrb.mxu1 %v1560_v56  ;;  %797 = vmatpush.msrb.mxu3 %v1560_v56 }
  0x39   : > { %634 = vmatpush.msrb.mxu1 %v1568_v58  ;;  %798 = vmatpush.msrb.mxu3 %v1568_v58 }
  0x3b   : > { %457 = vmatmul.bf16.gmra.mxu0 %v1215_v11  ;;  %482 = vmatmul.bf16.gmra.mxu1 %v1220_v12 }
  0x3c   : > { %502 = vmatmul.bf16.gmra.mxu2 %v1224_v13  ;;  %522 = vmatmul.bf16.gmra.mxu3 %v1228_v18 }
  0x3d   : > { %635 = vmatpush.msrb.mxu1 %v1578_v61  ;;  %799 = vmatpush.msrb.mxu3 %v1578_v61 }
  0x3f   : > { %636 = vmatpush.msrb.mxu1 %v540_v2  ;;  %800 = vmatpush.msrb.mxu3 %v540_v2 }
  0x41   : > { %637 = vmatpush.msrb.mxu1 %v539_v7  ;;  %801 = vmatpush.msrb.mxu3 %v539_v7 }
  0x43   : > { %638 = vmatpush.msrb.mxu1 %v538_v8  ;;  %802 = vmatpush.msrb.mxu3 %v538_v8 }
  0x4b   : > { %462 = vmatmul.bf16.gmra.mxu0 %v1216_v15  ;;  %487 = vmatmul.bf16.gmra.mxu1 %v1221_v16  ;;  %v537_v15 = vld [vmem:[%s1984_s4 + $0x20] sm:$0xff] }
  0x4c   : > { %507 = vmatmul.bf16.gmra.mxu2 %v1225_v17  ;;  %527 = vmatmul.bf16.gmra.mxu3 %v1229_v22  ;;  %v536_v17 = vld [vmem:[%s1984_s4 + $0x18] sm:$0xff] }
  0x4d   : > { %639 = vmatpush.msrb.mxu1 %v537_v15  ;;  %803 = vmatpush.msrb.mxu3 %v537_v15 }
  0x4f   : > { %640 = vmatpush.msrb.mxu1 %v536_v17  ;;  %804 = vmatpush.msrb.mxu3 %v536_v17 }
  0x5b   : > { %467 = vmatmul.bf16.gmra.mxu0 %v1217_v19  ;;  %492 = vmatmul.bf16.gmra.mxu1 %v1222_v20  ;;  %v535_v19 = vld [vmem:[%s1984_s4 + $0x10] sm:$0xff]  ;;  %v534_v20 = vld [vmem:[%s1984_s4 + $0x8] sm:$0xff] }
  0x5c   : > { %512 = vmatmul.bf16.gmra.mxu2 %v1226_v21  ;;  %v533_v21 = vld [vmem:[%s1984_s4] sm:$0xff]  ;;  %641 = vmatpush.msrb.mxu1 %v535_v19 }
  0x5d   : > { %805 = vmatpush.msrb.mxu3 %v535_v19 }
  0x5e   : > { %642 = vmatpush.msrb.mxu1 %v534_v20 }
  0x5f   : > { %806 = vmatpush.msrb.mxu3 %v534_v20 }
  0x60   : > { %643 = vmatpush.msrb.mxu1 %v533_v21 }
  0x61   : > { %807 = vmatpush.msrb.mxu3 %v533_v21 }
  0x6b   : > { %472 = vmatmul.bf16.gmra.mxu0 %v1218_v23  ;;  %v556_v23 = vsel %vm552_vm0, %v535_v19, 0.0 }
  0xa8   : > { %v1476_v24 = vpop.f32.mrf.mxu0  ;;  %v1482_v27 = vpop.f32.mrf.mxu1 }
  0xaf   : > { %v1500_v33 = vpop.f32.mrf.mxu2  ;;  %v1546_v51 = vpop.f32.mrf.mxu3 }
  0xb0   : > { %v1478_v25 = vpop.f32.mrf.mxu0  ;;  %v1486_v29 = vpop.f32.mrf.mxu1 }
  0xb1   : > { %v591_v43 = vadd.f32 %v1478_v25, %v1476_v24 }
  0xb7   : > { %v1510_v36 = vpop.f32.mrf.mxu2  ;;  %v1585_v0 = vpop.f32.mrf.mxu3 }
  0xb8   : > { %v1480_v26 = vpop.f32.mrf.mxu0  ;;  %v1506_v34 = vpop.f32.mrf.mxu1 }
  0xb9   : > { %v592_v45 = vadd.f32 %v591_v43, %v1480_v26  ;;  %v554_v43 = vsel %vm552_vm0, %v534_v20, 0.0 }
  0xbf   : > { %v1516_v39 = vpop.f32.mrf.mxu2  ;;  %v1607_v11 = vpop.f32.mrf.mxu3 }
  0xc0   : > { %v1484_v28 = vpop.f32.mrf.mxu0  ;;  %v1514_v38 = vpop.f32.mrf.mxu1 }
  0xc1   : > { %v593_v46 = vadd.f32 %v592_v45, %v1484_v28  ;;  %v553_v45 = vsel %vm552_vm0, %v533_v21, 0.0 }
  0xc7   : > { %v1543_v49 = vpop.f32.mrf.mxu2 }
  0xc8   : > { %v1488_v30 = vpop.f32.mrf.mxu0  ;;  %v1534_v44 = vpop.f32.mrf.mxu1 }
  0xc9   : > { %v594_v47 = vadd.f32 %v593_v46, %v1488_v30 }
  0xcf   : > { %v1580_v62 = vpop.f32.mrf.mxu2 }
  0xd0   : > { %v1508_v35 = vpop.f32.mrf.mxu0  ;;  %v1549_v53 = vpop.f32.mrf.mxu1 }
  0xd1   : > { %v595_v50 = vadd.f32 %v594_v47, %v1508_v35  ;;  %v555_v47 = vadd.f32 %v554_v43, %v553_v45 }
  0xd7   : > { %v1604_v9 = vpop.f32.mrf.mxu2 }
  0xd8   : > { %v1512_v37 = vpop.f32.mrf.mxu0  ;;  %v1593_v3 = vpop.f32.mrf.mxu1 }
  0xd9   : > { %v596_v52 = vadd.f32 %v595_v50, %v1512_v37  ;;  %v1636_v50 = vpop.f32.mrf.mxu3 }
  0xdf   : > { %v1630_v22 = vpop.f32.mrf.mxu2 }
  0xe0   : > { %v1528_v42 = vpop.f32.mrf.mxu0  ;;  %v1610_v13 = vpop.f32.mrf.mxu1 }
  0xe1   : > { %v597_v54 = vadd.f32 %v596_v52, %v1528_v42  ;;  %v558_v52 = vsel %vm552_vm0, %v536_v17, 0.0  ;;  %v566_v17 = vsel %vm552_vm0, %v540_v2, 0.0  ;;  %v1655_v20 = vpop.f32.mrf.mxu3  ;;  %v572_v2 = vsel %vm552_vm0, %v1560_v56, 0.0 }
  0xe8   : > { %v1541_v48 = vpop.f32.mrf.mxu0 }
  0xe9   : > { %v598_v57 = vadd.f32 %v597_v54, %v1541_v48 }
  0xf0   : > { %v1570_v59 = vpop.f32.mrf.mxu0 }
  0xf1   : > { %v599_v60 = vadd.f32 %v598_v57, %v1570_v59  ;;  %v557_v57 = vadd.f32 %v556_v23, %v555_v47 }
  0xf3   : > { %v600_v63 = vadd.f32 %v599_v60, %v1482_v27  ;;  %v560_v60 = vsel %vm552_vm0, %v537_v15, 0.0 }
  0xf5   : > { %v601_v1 = vadd.f32 %v600_v63, %v1486_v29 }
  0xf7   : > { %v602_v4 = vadd.f32 %v601_v1, %v1506_v34  ;;  %v559_v1 = vadd.f32 %v558_v52, %v557_v57  ;;  %v576_v57 = vsel %vm552_vm0, %v1526_v41, 0.0 }
  0xf9   : > { %v603_v5 = vadd.f32 %v602_v4, %v1514_v38  ;;  %v549_v4 = vld [vmem:[%s1985_s5] sm:$0x3] }
  0xfa   : > { %1206 = vmatpush.msk.msrb.mxu2 %vm666_vm1, %v549_v4 }
  0xfb   : > { %v604_v6 = vadd.f32 %v603_v5, %v1534_v44  ;;  %v562_v5 = vsel %vm552_vm0, %v538_v8, 0.0  ;;  %v568_v8 = vsel %vm552_vm0, %v1578_v61, 0.0  ;;  %v574_v61 = vsel %vm552_vm0, %v1555_v55, 0.0 }
  0xfc   : > { %1208 = vmatpush.msk.msra.mxu2 %vm666_vm1, %v549_v4  ;;  %v580_v55 = vsel %vm552_vm0, %v1498_v32, 0.0 }
  0xfd   : > { %v605_v10 = vadd.f32 %v604_v6, %v1549_v53 }
  0xff   : > { %v606_v12 = vadd.f32 %v605_v10, %v1593_v3  ;;  %v561_v10 = vadd.f32 %v560_v60, %v559_v1  ;;  %v1672_v1 = vpop.f32.mrf.mxu3 }
 0x101   : > { %v607_v14 = vadd.f32 %v606_v12, %v1610_v13  ;;  %v564_v12 = vsel %vm552_vm0, %v539_v7, 0.0  ;;  %v563_v15 = vadd.f32 %v562_v5, %v561_v10  ;;  %v570_v7 = vsel %vm552_vm0, %v1568_v58, 0.0 }
 0x102   : > { %v582_v10 = vsel %vm552_vm0, %v1493_v31, 0.0 }
 0x103   : > { %v608_v16 = vadd.f32 %v607_v14, %v1500_v33  ;;  %v565_v19 = vadd.f32 %v564_v12, %v563_v15 }
 0x105   : > { %v609_v18 = vadd.f32 %v608_v16, %v1510_v36  ;;  %v1649_v16 = vpop.f32.mrf.mxu2  ;;  %v567_v23 = vadd.f32 %v566_v17, %v565_v19 }
 0x107   : > { %v610_v46 = vadd.f32 %v609_v18, %v1516_v39  ;;  %v569_v45 = vadd.f32 %v568_v8, %v567_v23 }
 0x109   : > { %v611_v54 = vadd.f32 %v610_v46, %v1543_v49  ;;  %v571_v47 = vadd.f32 %v570_v7, %v569_v45 }
 0x10b   : > { %v612_v63 = vadd.f32 %v611_v54, %v1580_v62  ;;  %v573_v54 = vadd.f32 %v572_v2, %v571_v47 }
 0x10d   : > { %v613_v6 = vadd.f32 %v612_v63, %v1604_v9  ;;  %v575_v60 = vadd.f32 %v574_v61, %v573_v54  ;;  %v578_v63 = vsel %vm552_vm0, %v1521_v40, 0.0 }
 0x10f   : > { %v614_v14 = vadd.f32 %v613_v6, %v1630_v22  ;;  %v577_v4 = vadd.f32 %v576_v57, %v575_v60 }
 0x111   : > { %v615_v18 = vadd.f32 %v614_v14, %v1649_v16  ;;  %v579_v6 = vadd.f32 %v578_v63, %v577_v4 }
 0x113   : > { %v616_v21 = vadd.f32 %v615_v18, %v1546_v51  ;;  %v581_v12 = vadd.f32 %v580_v55, %v579_v6 }
 0x115   : > { %v617_v43 = vadd.f32 %v616_v21, %v1585_v0  ;;  %v583_v15 = vadd.f32 %v582_v10, %v581_v12 }
 0x117   : > { %v618_v46 = vadd.f32 %v617_v43, %v1607_v11  ;;  %v584_v19 = vrot.slane %v583_v15, 4 }
 0x119   : > { %v619_v52 = vadd.f32 %v618_v46, %v1636_v50  ;;  %v585_v8 = vadd.f32 %v584_v19, %v583_v15 }
 0x11b   : > { %v620_v58 = vadd.f32 %v619_v52, %v1655_v20  ;;  %v586_v21 = vrot.slane %v585_v8, 2 }
 0x11d   : > { %v621_v56 = vadd.f32 %v620_v58, %v1672_v1  ;;  %v587_v23 = vadd.f32 %v586_v21, %v585_v8 }
 0x11f   : > { %v622_v5 = vrot.slane %v621_v56, 4  ;;  %v588_v7 = vrot.slane %v587_v23, 1 }
 0x121   : > { %v623_v41 = vadd.f32 %v622_v5, %v621_v56  ;;  %v589_v43 = vadd.f32 %v588_v7, %v587_v23 }
 0x123   : > { %v624_v14 = vrot.slane %v623_v41, 2  ;;  %v590_v32 = vmul.f32 256.0, %v589_v43 }
 0x125   : > { %v625_v17 = vadd.f32 %v624_v14, %v623_v41  ;;  %1367 = vrcp.f32 %v590_v32  ;;  %vm653_vm2 = vweird.f32 %v590_v32  ;;  %v659_v47 = vand.u32 2147483648, %v590_v32 }
 0x126   : > { %v657_v52 = vand.u32 2147483647, %v590_v32 }
 0x127   : > { %v626_v18 = vrot.slane %v625_v17, 1  ;;  %v660_v54 = vor.u32 1.1754944e-38, %v659_v47 }
 0x128   : > { %vm658_vm5 = vcmp.eq.f32.partialorder %v657_v52, 8.507059e+37 }
 0x129   : > { %v627_v40 = vadd.f32 %v626_v18, %v625_v17 }
 0x12b   : > { %644 = vmatmul.f32.vlgmr.msrb.gmra.mxu1 %v627_v40  ;;  %v1368_v45 = vpop.eup %1367 }
 0x12c   : > { %v649_v2 = vmul.f32 %v1368_v45, %v590_v32  ;;  %vm654_vm3 = vweird.f32 %v1368_v45 }
 0x12d   : > { %vm655_vm4 = vmor %vm653_vm2, %vm654_vm3 }
 0x12e   : > { %v650_v46 = vsub.f32 1.0, %v649_v2 }
 0x130   : > { %v651_v31 = vmul.f32 %v1368_v45, %v650_v46 }
 0x132   : > { %v652_v61 = vadd.f32 %v1368_v45, %v651_v31 }
 0x134   : > { %v656_v57 = vsel %vm655_vm4, %v1368_v45, %v652_v61 }
 0x135   : > { %v1679_v58 = vsel %vm658_vm5, %v660_v54, %v656_v57 }
 0x1a8   : > { %v645_v60 = vpop.f32.mrf.mxu1 }
 0x1a9   : > { %v662_v63 = vmul.f32 %v1679_v58, %v645_v60 }
 0x1ab   : > { %1207 = vmatmul.msk.f32.vlgmr.msrb.gmra.mxu2 %vm552_vm0, %v662_v63 }
 0x22e   : > { %v687_v56 = vpop.f32.mrf.mxu2 }
 0x22f   : > { %v1683_v4 = vperm.slane %v687_v56, 0 }
 0x231   : > { %v1687_v55 = vsub.f32 %v1476_v24, %v1683_v4  ;;  %v1691_v5 = vsub.f32 %v1478_v25, %v1683_v4  ;;  %v1695_v6 = vsub.f32 %v1480_v26, %v1683_v4  ;;  %v1703_v12 = vsub.f32 %v1484_v28, %v1683_v4 }
 0x232   : > { %v1707_v24 = vsub.f32 %v1488_v30, %v1683_v4  ;;  %v1713_v26 = vsub.f32 %v1508_v35, %v1683_v4  ;;  %v1719_v28 = vsub.f32 %v1512_v37, %v1683_v4  ;;  %v1725_v40 = vsub.f32 %v1528_v42, %v1683_v4 }
 0x233   : > { %v723_v10 = vmul.f32 %v1687_v55, %v1687_v55  ;;  %v724_v41 = vmul.f32 %v1691_v5, %v1691_v5  ;;  %v725_v25 = vmul.f32 %v1695_v6, %v1695_v6  ;;  %v726_v15 = vmul.f32 %v1703_v12, %v1703_v12 }
 0x234   : > { %v727_v30 = vmul.f32 %v1707_v24, %v1707_v24  ;;  %v728_v35 = vmul.f32 %v1713_v26, %v1713_v26  ;;  %v1731_v8 = vsub.f32 %v1541_v48, %v1683_v4  ;;  %v729_v37 = vmul.f32 %v1719_v28, %v1719_v28 }
 0x235   : > { %v755_v14 = vadd.f32 %v724_v41, %v723_v10  ;;  %v1737_v23 = vsub.f32 %v1570_v59, %v1683_v4  ;;  %v730_v42 = vmul.f32 %v1725_v40, %v1725_v40  ;;  %v1743_v43 = vsub.f32 %v1482_v27, %v1683_v4 }
 0x236   : > { %v731_v48 = vmul.f32 %v1731_v8, %v1731_v8  ;;  %v1749_v45 = vsub.f32 %v1486_v29, %v1683_v4  ;;  %v1755_v46 = vsub.f32 %v1506_v34, %v1683_v4  ;;  %v1761_v47 = vsub.f32 %v1514_v38, %v1683_v4 }
 0x237   : > { %v756_v17 = vadd.f32 %v755_v14, %v725_v25  ;;  %v732_v59 = vmul.f32 %v1737_v23, %v1737_v23  ;;  %v733_v27 = vmul.f32 %v1743_v43, %v1743_v43  ;;  %v1767_v52 = vsub.f32 %v1534_v44, %v1683_v4 }
 0x238   : > { %v734_v29 = vmul.f32 %v1749_v45, %v1749_v45  ;;  %v735_v34 = vmul.f32 %v1755_v46, %v1755_v46  ;;  %v1773_v57 = vsub.f32 %v1549_v53, %v1683_v4  ;;  %v736_v38 = vmul.f32 %v1761_v47, %v1761_v47 }
 0x239   : > { %v757_v18 = vadd.f32 %v756_v17, %v726_v15  ;;  %v1779_v63 = vsub.f32 %v1593_v3, %v1683_v4  ;;  %v737_v44 = vmul.f32 %v1767_v52, %v1767_v52  ;;  %v1785_v10 = vsub.f32 %v1610_v13, %v1683_v4 }
 0x23a   : > { %v738_v53 = vmul.f32 %v1773_v57, %v1773_v57  ;;  %v1791_v25 = vsub.f32 %v1500_v33, %v1683_v4  ;;  %v1797_v15 = vsub.f32 %v1510_v36, %v1683_v4 }
 0x23b   : > { %v758_v19 = vadd.f32 %v757_v18, %v727_v30  ;;  %v739_v3 = vmul.f32 %v1779_v63, %v1779_v63  ;;  %v740_v13 = vmul.f32 %v1785_v10, %v1785_v10  ;;  %v1803_v30 = vsub.f32 %v1516_v39, %v1683_v4 }
 0x23c   : > { %v741_v33 = vmul.f32 %v1791_v25, %v1791_v25  ;;  %v742_v36 = vmul.f32 %v1797_v15, %v1797_v15 }
 0x23d   : > { %v759_v21 = vadd.f32 %v758_v19, %v728_v35  ;;  %v1809_v35 = vsub.f32 %v1543_v49, %v1683_v4  ;;  %v743_v39 = vmul.f32 %v1803_v30, %v1803_v30 }
 0x23f   : > { %v760_v7 = vadd.f32 %v759_v21, %v729_v37  ;;  %v1815_v37 = vsub.f32 %v1580_v62, %v1683_v4  ;;  %v744_v49 = vmul.f32 %v1809_v35, %v1809_v35 }
 0x241   : > { %v761_v32 = vadd.f32 %v760_v7, %v730_v42  ;;  %v1821_v42 = vsub.f32 %v1604_v9, %v1683_v4  ;;  %v745_v62 = vmul.f32 %v1815_v37, %v1815_v37 }
 0x243   : > { %v762_v2 = vadd.f32 %v761_v32, %v731_v48  ;;  %v1827_v48 = vsub.f32 %v1630_v22, %v1683_v4  ;;  %v746_v9 = vmul.f32 %v1821_v42, %v1821_v42 }
 0x245   : > { %v763_v31 = vadd.f32 %v762_v2, %v732_v59  ;;  %v1833_v59 = vsub.f32 %v1649_v16, %v1683_v4  ;;  %v747_v22 = vmul.f32 %v1827_v48, %v1827_v48 }
 0x247   : > { %v764_v61 = vadd.f32 %v763_v31, %v733_v27  ;;  %v1839_v27 = vsub.f32 %v1546_v51, %v1683_v4  ;;  %v748_v16 = vmul.f32 %v1833_v59, %v1833_v59 }
 0x249   : > { %v765_v54 = vadd.f32 %v764_v61, %v734_v29  ;;  %v1845_v29 = vsub.f32 %v1585_v0, %v1683_v4  ;;  %v749_v51 = vmul.f32 %v1839_v27, %v1839_v27 }
 0x24b   : > { %v766_v60 = vadd.f32 %v765_v54, %v735_v34  ;;  %v1851_v34 = vsub.f32 %v1607_v11, %v1683_v4  ;;  %v750_v0 = vmul.f32 %v1845_v29, %v1845_v29 }
 0x24d   : > { %v767_v56 = vadd.f32 %v766_v60, %v736_v38  ;;  %v1857_v38 = vsub.f32 %v1636_v50, %v1683_v4  ;;  %v751_v11 = vmul.f32 %v1851_v34, %v1851_v34 }
 0x24f   : > { %v768_v41 = vadd.f32 %v767_v56, %v737_v44  ;;  %v1863_v44 = vsub.f32 %v1655_v20, %v1683_v4  ;;  %v752_v50 = vmul.f32 %v1857_v38, %v1857_v38 }
 0x251   : > { %v769_v14 = vadd.f32 %v768_v41, %v738_v53  ;;  %v1869_v53 = vsub.f32 %v1672_v1, %v1683_v4 }
 0x253   : > { %v770_v17 = vadd.f32 %v769_v14, %v739_v3  ;;  %v753_v3 = vmul.f32 %v1863_v44, %v1863_v44  ;;  %v754_v20 = vmul.f32 %v1869_v53, %v1869_v53 }
 0x255   : > { %v771_v18 = vadd.f32 %v770_v17, %v740_v13 }
 0x257   : > { %v772_v19 = vadd.f32 %v771_v18, %v741_v33 }
 0x259   : > { %v773_v21 = vadd.f32 %v772_v19, %v742_v36 }
 0x25b   : > { %v774_v7 = vadd.f32 %v773_v21, %v743_v39 }
 0x25d   : > { %v775_v32 = vadd.f32 %v774_v7, %v744_v49 }
 0x25f   : > { %v776_v2 = vadd.f32 %v775_v32, %v745_v62 }
 0x261   : > { %v777_v31 = vadd.f32 %v776_v2, %v746_v9 }
 0x263   : > { %v778_v61 = vadd.f32 %v777_v31, %v747_v22 }
 0x265   : > { %v779_v54 = vadd.f32 %v778_v61, %v748_v16 }
 0x267   : > { %v780_v60 = vadd.f32 %v779_v54, %v749_v51 }
 0x269   : > { %v781_v56 = vadd.f32 %v780_v60, %v750_v0 }
 0x26b   : > { %v782_v41 = vadd.f32 %v781_v56, %v751_v11 }
 0x26d   : > { %v783_v14 = vadd.f32 %v782_v41, %v752_v50 }
 0x26f   : > { %v784_v13 = vadd.f32 %v783_v14, %v753_v3 }
 0x271   : > { %v785_v17 = vadd.f32 %v784_v13, %v754_v20 }
 0x273   : > { %v786_v33 = vrot.slane %v785_v17, 4 }
 0x275   : > { %v787_v18 = vadd.f32 %v786_v33, %v785_v17 }
 0x277   : > { %v788_v36 = vrot.slane %v787_v18, 2 }
 0x279   : > { %v789_v19 = vadd.f32 %v788_v36, %v787_v18 }
 0x27b   : > { %v790_v39 = vrot.slane %v789_v19, 1 }
 0x27d   : > { %v791_v1 = vadd.f32 %v790_v39, %v789_v19 }
 0x27f   : > { %808 = vmatmul.f32.vlgmr.msrb.gmra.mxu3 %v791_v1 }
 0x302   : > { %v809_v4 = vpop.f32.mrf.mxu3 }
 0x303   : > { %v812_v21 = vmul.f32 %v809_v4, %v1679_v58 }
 0x305   : > { %v813_v49 = vadd.f32 1e-05, %v812_v21  ;;  %v1917_v21 = vld [vmem:[%s1983_s3] ss:$0 sm:$0xff] }
 0x307   : > { %1369 = vrsqrt.f32 %v813_v49  ;;  %vm820_vm7 = vweird.f32 %v813_v49 }
 0x30d   : > { %v1370_v7 = vpop.eup %1369 }
 0x30e   : > { %v815_v62 = vmul.f32 %v1370_v7, %v813_v49  ;;  %vm821_vm6 = vweird.f32 %v1370_v7 }
 0x30f   : > { %vm822_vm8 = vmor %vm820_vm7, %vm821_vm6 }
 0x310   : > { %v816_v32 = vmul.f32 %v1370_v7, %v815_v62 }
 0x312   : > { %v817_v9 = vmul.f32 0.5, %v816_v32 }
 0x314   : > { %v818_v2 = vsub.f32 1.5, %v817_v9 }
 0x316   : > { %v819_v22 = vmul.f32 %v1370_v7, %v818_v2 }
 0x318   : > { %v823_v31 = vsel %vm822_vm8, %v1370_v7, %v819_v22 }
 0x319   : > { %1209 = vmatmul.msk.f32.vlgmr.msra.gmra.mxu2 %vm552_vm0, %v823_v31 }
 0x39c   : > { %v844_v16 = vpop.f32.mrf.mxu2 }
 0x39d   : > { %v847_v61 = vperm.slane %v844_v16, 0 }
 0x39f   : > { %v848_v51 = vmul.f32 %v847_v61, %v1687_v55  ;;  %v849_v58 = vmul.f32 %v847_v61, %v1691_v5  ;;  %v850_v54 = vmul.f32 %v847_v61, %v1695_v6  ;;  %v851_v0 = vmul.f32 %v847_v61, %v1703_v12 }
 0x3a0   : > { %v852_v60 = vmul.f32 %v847_v61, %v1707_v24  ;;  %v853_v11 = vmul.f32 %v847_v61, %v1713_v26  ;;  %v854_v56 = vmul.f32 %v847_v61, %v1719_v28  ;;  %v855_v50 = vmul.f32 %v847_v61, %v1725_v40 }
 0x3a1   : > { %v856_v41 = vmul.f32 %v847_v61, %v1731_v8  ;;  %v857_v3 = vmul.f32 %v847_v61, %v1737_v23  ;;  %v858_v55 = vmul.f32 %v847_v61, %v1743_v43  ;;  %v859_v5 = vmul.f32 %v847_v61, %v1749_v45  ;;  %v1365_v43 = vld [vmem:[%s1982_s2] ss:$0 sm:$0xff] }
 0x3a2   : > { %v860_v6 = vmul.f32 %v847_v61, %v1755_v46  ;;  %v861_v12 = vmul.f32 %v847_v61, %v1761_v47  ;;  %v862_v24 = vmul.f32 %v847_v61, %v1767_v52  ;;  %v863_v26 = vmul.f32 %v847_v61, %v1773_v57 }
 0x3a3   : > { %v864_v28 = vmul.f32 %v847_v61, %v1779_v63  ;;  %v865_v40 = vmul.f32 %v847_v61, %v1785_v10  ;;  %v866_v8 = vmul.f32 %v847_v61, %v1791_v25  ;;  %v867_v23 = vmul.f32 %v847_v61, %v1797_v15 }
 0x3a4   : > { %v868_v45 = vmul.f32 %v847_v61, %v1803_v30  ;;  %v869_v46 = vmul.f32 %v847_v61, %v1809_v35  ;;  %v870_v47 = vmul.f32 %v847_v61, %v1815_v37  ;;  %v871_v52 = vmul.f32 %v847_v61, %v1821_v42 }
 0x3a5   : > { %v872_v57 = vmul.f32 %v847_v61, %v1827_v48  ;;  %v873_v63 = vmul.f32 %v847_v61, %v1833_v59  ;;  %v874_v10 = vmul.f32 %v847_v61, %v1839_v27  ;;  %v875_v25 = vmul.f32 %v847_v61, %v1845_v29 }
 0x3a6   : > { %v876_v15 = vmul.f32 %v847_v61, %v1851_v34  ;;  %v877_v14 = vmul.f32 %v847_v61, %v1857_v38  ;;  %v878_v30 = vmul.f32 %v847_v61, %v1863_v44  ;;  %v879_v35 = vmul.f32 %v847_v61, %v1869_v53 }
 0x3a7   : > { %v883_v20 = vmul.f32 %v1365_v43, %v848_v51  ;;  %v884_v37 = vmul.f32 %v1365_v43, %v849_v58  ;;  %v885_v13 = vmul.f32 %v1365_v43, %v850_v54  ;;  %v886_v42 = vmul.f32 %v1365_v43, %v851_v0 }
 0x3a8   : > { %v887_v17 = vmul.f32 %v1365_v43, %v852_v60  ;;  %v888_v48 = vmul.f32 %v1365_v43, %v853_v11  ;;  %v889_v33 = vmul.f32 %v1365_v43, %v854_v56  ;;  %v890_v59 = vmul.f32 %v1365_v43, %v855_v50 }
 0x3a9   : > { %v891_v18 = vmul.f32 %v1365_v43, %v856_v41  ;;  %v892_v27 = vmul.f32 %v1365_v43, %v857_v3  ;;  %v893_v36 = vmul.f32 %v1365_v43, %v858_v55  ;;  %v894_v29 = vmul.f32 %v1365_v43, %v859_v5 }
 0x3aa   : > { %v895_v19 = vmul.f32 %v1365_v43, %v860_v6  ;;  %v896_v34 = vmul.f32 %v1365_v43, %v861_v12  ;;  %v897_v39 = vmul.f32 %v1365_v43, %v862_v24  ;;  %v898_v38 = vmul.f32 %v1365_v43, %v863_v26 }
 0x3ab   : > { %v899_v1 = vmul.f32 %v1365_v43, %v864_v28  ;;  %v900_v44 = vmul.f32 %v1365_v43, %v865_v40  ;;  %v901_v4 = vmul.f32 %v1365_v43, %v866_v8  ;;  %v902_v53 = vmul.f32 %v1365_v43, %v867_v23 }
 0x3ac   : > { %v903_v49 = vmul.f32 %v1365_v43, %v868_v45  ;;  %v904_v7 = vmul.f32 %v1365_v43, %v869_v46  ;;  %v905_v62 = vmul.f32 %v1365_v43, %v870_v47  ;;  %v906_v32 = vmul.f32 %v1365_v43, %v871_v52 }
 0x3ad   : > { %v907_v9 = vmul.f32 %v1365_v43, %v872_v57  ;;  %v908_v2 = vmul.f32 %v1365_v43, %v873_v63  ;;  %v909_v22 = vmul.f32 %v1365_v43, %v874_v10  ;;  %v910_v31 = vmul.f32 %v1365_v43, %v875_v25 }
 0x3ae   : > { %v911_v16 = vmul.f32 %v1365_v43, %v876_v15  ;;  %v912_v61 = vmul.f32 %v1365_v43, %v877_v14  ;;  %v913_v51 = vmul.f32 %v1365_v43, %v878_v30  ;;  %v1919_v58 = vmul.f32 %v1365_v43, %v879_v35 }
 0x3af   : > { %v918_v54 = vadd.f32 %v1917_v21, %v883_v20  ;;  %v919_v0 = vadd.f32 %v1917_v21, %v884_v37  ;;  %v920_v60 = vadd.f32 %v1917_v21, %v885_v13  ;;  %v921_v11 = vadd.f32 %v1917_v21, %v886_v42 }
 0x3b0   : > { %v922_v56 = vadd.f32 %v1917_v21, %v887_v17  ;;  %v923_v50 = vadd.f32 %v1917_v21, %v888_v48  ;;  %v924_v41 = vadd.f32 %v1917_v21, %v889_v33  ;;  %v925_v3 = vadd.f32 %v1917_v21, %v890_v59 }
 0x3b1   : > { %v926_v55 = vadd.f32 %v1917_v21, %v891_v18  ;;  %v927_v5 = vadd.f32 %v1917_v21, %v892_v27  ;;  %v928_v6 = vadd.f32 %v1917_v21, %v893_v36  ;;  %v929_v12 = vadd.f32 %v1917_v21, %v894_v29 }
 0x3b2   : > { %v930_v24 = vadd.f32 %v1917_v21, %v895_v19  ;;  %v931_v26 = vadd.f32 %v1917_v21, %v896_v34  ;;  %v932_v28 = vadd.f32 %v1917_v21, %v897_v39  ;;  %v933_v40 = vadd.f32 %v1917_v21, %v898_v38 }
 0x3b3   : > { %v934_v8 = vadd.f32 %v1917_v21, %v899_v1  ;;  %v935_v23 = vadd.f32 %v1917_v21, %v900_v44  ;;  %v936_v43 = vadd.f32 %v1917_v21, %v901_v4  ;;  %v937_v45 = vadd.f32 %v1917_v21, %v902_v53 }
 0x3b4   : > { %v938_v46 = vadd.f32 %v1917_v21, %v903_v49  ;;  %v939_v47 = vadd.f32 %v1917_v21, %v904_v7  ;;  %v950_v52 = vmax.f32 %v918_v54, 0.0  ;;  %v951_v57 = vmax.f32 %v919_v0, 0.0 }
 0x3b5   : > { %v952_v63 = vmax.f32 %v920_v60, 0.0  ;;  %v953_v10 = vmax.f32 %v921_v11, 0.0  ;;  %v954_v25 = vmax.f32 %v922_v56, 0.0  ;;  %v955_v15 = vmax.f32 %v923_v50, 0.0 }
 0x3b6   : > { %v940_v14 = vadd.f32 %v1917_v21, %v905_v62  ;;  %v941_v30 = vadd.f32 %v1917_v21, %v906_v32  ;;  %v956_v35 = vmax.f32 %v924_v41, 0.0  ;;  %v957_v20 = vmax.f32 %v925_v3, 0.0 }
 0x3b7   : > { %v942_v37 = vadd.f32 %v1917_v21, %v907_v9  ;;  %v943_v13 = vadd.f32 %v1917_v21, %v908_v2  ;;  %v958_v42 = vmax.f32 %v926_v55, 0.0  ;;  %v959_v17 = vmax.f32 %v927_v5, 0.0 }
 0x3b8   : > { %v944_v48 = vadd.f32 %v1917_v21, %v909_v22  ;;  %v960_v33 = vmax.f32 %v928_v6, 0.0  ;;  %v961_v59 = vmax.f32 %v929_v12, 0.0  ;;  %v962_v18 = vmax.f32 %v930_v24, 0.0 }
 0x3b9   : > { %v963_v27 = vmax.f32 %v931_v26, 0.0  ;;  %v1241_v36 = vpack.c.bf16 %v951_v57, %v950_v52  ;;  %v1246_v29 = vpack.c.bf16 %v953_v10, %v952_v63  ;;  %v1251_v19 = vpack.c.bf16 %v955_v15, %v954_v25 }
 0x3ba   : > { %v945_v34 = vadd.f32 %v1917_v21, %v910_v31  ;;  %v964_v39 = vmax.f32 %v932_v28, 0.0  ;;  %v965_v38 = vmax.f32 %v933_v40, 0.0  ;;  %v1256_v1 = vpack.c.bf16 %v957_v20, %v956_v35 }
 0x3bb   : > { %v946_v44 = vadd.f32 %v1917_v21, %v911_v16  ;;  %v966_v4 = vmax.f32 %v934_v8, 0.0  ;;  %v967_v53 = vmax.f32 %v935_v23, 0.0  ;;  %1242 = vst [vmem:[%s1952_s17] sm:$0xff] %v1241_v36   ;;  %v1261_v49 = vpack.c.bf16 %v959_v17, %v958_v42 }
 0x3bc   : > { %v947_v7 = vadd.f32 %v1917_v21, %v912_v61  ;;  %v968_v62 = vmax.f32 %v936_v43, 0.0  ;;  %v969_v32 = vmax.f32 %v937_v45, 0.0  ;;  %1318 = vst [vmem:[%s1952_s17 + $0x8] sm:$0xff] %v1246_v29   ;;  %v1266_v9 = vpack.c.bf16 %v961_v59, %v960_v33 }
 0x3bd   : > { %v948_v2 = vadd.f32 %v1917_v21, %v913_v51  ;;  %v970_v22 = vmax.f32 %v938_v46, 0.0  ;;  %v971_v31 = vmax.f32 %v939_v47, 0.0  ;;  %1319 = vst [vmem:[%s1952_s17 + $0x10] sm:$0xff] %v1251_v19   ;;  %v1271_v54 = vpack.c.bf16 %v963_v27, %v962_v18 }
 0x3be   : > { %v949_v16 = vadd.f32 %v1917_v21, %v1919_v58  ;;  %v972_v0 = vmax.f32 %v940_v14, 0.0  ;;  %v973_v60 = vmax.f32 %v941_v30, 0.0  ;;  %1320 = vst [vmem:[%s1952_s17 + $0x18] sm:$0xff] %v1256_v1   ;;  %v1276_v61 = vpack.c.bf16 %v965_v38, %v964_v39 }
 0x3bf   : > { %v974_v11 = vmax.f32 %v942_v37, 0.0  ;;  %v975_v56 = vmax.f32 %v943_v13, 0.0  ;;  %1321 = vst [vmem:[%s1952_s17 + $0x20] sm:$0xff] %v1261_v49   ;;  %v1281_v51 = vpack.c.bf16 %v967_v53, %v966_v4  ;;  %v976_v50 = vmax.f32 %v944_v48, 0.0 }
 0x3c0   : > { %v977_v41 = vmax.f32 %v945_v34, 0.0  ;;  %1322 = vst [vmem:[%s1952_s17 + $0x28] sm:$0xff] %v1266_v9   ;;  %v1286_v3 = vpack.c.bf16 %v969_v32, %v968_v62  ;;  %v978_v55 = vmax.f32 %v946_v44, 0.0  ;;  %v979_v21 = vmax.f32 %v947_v7, 0.0 }
 0x3c1   : > { %1323 = vst [vmem:[%s1952_s17 + $0x30] sm:$0xff] %v1271_v54   ;;  %v1291_v58 = vpack.c.bf16 %v971_v31, %v970_v22  ;;  %v980_v5 = vmax.f32 %v948_v2, 0.0  ;;  %v981_v6 = vmax.f32 %v949_v16, 0.0  ;;  %v1296_v12 = vpack.c.bf16 %v973_v60, %v972_v0 }
 0x3c2   : > { %1324 = vst [vmem:[%s1952_s17 + $0x38] sm:$0xff] %v1276_v61   ;;  %v1301_v24 = vpack.c.bf16 %v975_v56, %v974_v11  ;;  %v1306_v26 = vpack.c.bf16 %v977_v41, %v976_v50  ;;  %v1311_v28 = vpack.c.bf16 %v979_v21, %v978_v55 }
 0x3c3   : > { %1325 = vst [vmem:[%s1952_s17 + $0x40] sm:$0xff] %v1281_v51   ;;  %v1316_v40 = vpack.c.bf16 %v981_v6, %v980_v5 }
 0x3c4   : > { %1326 = vst [vmem:[%s1952_s17 + $0x48] sm:$0xff] %v1286_v3  }
 0x3c5   : > { %1327 = vst [vmem:[%s1952_s17 + $0x50] sm:$0xff] %v1291_v58  }
 0x3c6   : > { %1328 = vst [vmem:[%s1952_s17 + $0x58] sm:$0xff] %v1296_v12  }
 0x3c7   : > { %1329 = vst [vmem:[%s1952_s17 + $0x60] sm:$0xff] %v1301_v24  }
 0x3c8   : > { %1330 = vst [vmem:[%s1952_s17 + $0x68] sm:$0xff] %v1306_v26  }
 0x3c9   : > { %1331 = vst [vmem:[%s1952_s17 + $0x70] sm:$0xff] %v1311_v28  }
 0x3ca   : > { %1332 = vst [vmem:[%s1952_s17 + $0x78] sm:$0xff] %v1316_v40  }
 0x3cb PF: > { %s16_s21 = sadd.s32 1, %s1377_s21  }
 0x3cc   : > { %p13_p4 = scmp.ge.s32.totalorder %s16_s21, 4  }
 0x3ce   :  { %15 = sbr.rel (!%p13_p4) target bundleno = 1 (0x1), region = 74 }

// kernel: bottleneck_forward.5
= control target key start
LH: loop header
LB: loop body
LE: loop exit
PB: predicated region body
PF: predicated region fallthrough
CT: control target
= control target key end

     0   :  { %s1529_s24 = smov 0   ;;  %s2352_s0 = inlined_call_operand.vmem [shape: bf16[2,256,128], index: 0, kind: input, shape index: {}]   ;;  %s2353_s1 = inlined_call_operand.vmem [shape: bf16[2,256,128], index: 1, kind: input, shape index: {}]   ;;  %s2354_s2 = inlined_call_operand.vmem [shape: bf16[128,128], index: 2, kind: input, shape index: {}]   ;;  %s2355_s3 = inlined_call_operand.vmem [shape: f32[1,128], index: 3, kind: input, shape index: {}]   ;;  %s2356_s4 = inlined_call_operand.vmem [shape: f32[1,128], index: 4, kind: input, shape index: {}]   ;;  %s2357_s5 = inlined_call_operand.vmem [shape: f32[128,2], index: 5, kind: input, shape index: {}]   ;;  %s2358_s6 = inlined_call_operand.vmem [shape: f32[2,128], index: 6, kind: input, shape index: {}]   ;;  %s2359_s7 = inlined_call_operand.vmem [shape: f32[2,256,128], index: 7, kind: output, shape index: {}]  }
   0x1 LB: > { %s1224_s25 = sadd.s32 4294967295, %s1487_s24   ;;  %p1228_p0 = scmp.ge.s32.totalorder %s1487_s24, 1  ;;  %s1487_s24 = sphi %s1529_s24, %s17_s24  }
   0x2   : > { %p247_p1 = scmp.lt.s32.totalorder %s1487_s24, 3 }
   0x4   : > { %p248_p2 = pnand %p1228_p0, %p247_p1 }
   0x5   : > { %p284_p3 = scmp.lt.s32.totalorder (!%p248_p2), %s1224_s25, 1 }
   0x6   : > { %251 = sbr.rel (%p248_p2) target bundleno = 980 (0x3d4), region = 48 }
   0xb   : > { %v1363_v0 = vld [vmem:[%s2354_s2 + $0x38] sm:$0xff]  ;;  %v1362_v1 = vld [vmem:[%s2354_s2 + $0x30] sm:$0xff]  ;;  %v1361_v2 = vld [vmem:[%s2354_s2 + $0x28] sm:$0xff]  ;;  %s2382_s25 = smov (!%p284_p3, %s1224_s25), 1  ;;  %vm599_vm0 = vcmask 15360   ;;  %vm713_vm1 = vcmask 1041408  }
   0xc   : > { %491 = vmatpush.bf16.msra.mxu0 %v1363_v0  ;;  %1443 = vmatpush.bf16.msra.mxu1 %v1363_v0  ;;  %v1360_v3 = vld [vmem:[%s2354_s2 + $0x20] sm:$0xff]  ;;  %v1359_v4 = vld [vmem:[%s2354_s2 + $0x18] sm:$0xff]  ;;  %v1358_v5 = vld [vmem:[%s2354_s2 + $0x10] sm:$0xff]  ;;  %s1337_s17 = sshll.u32 %s2382_s25, 7  ;;  %s1339_s23 = sshll.u32 %s2382_s25, 8 }
   0xd   : > { %1444 = vmatpush.bf16.msra.mxu2 %v1363_v0  ;;  %1445 = vmatpush.bf16.msra.mxu3 %v1363_v0  ;;  %v1357_v6 = vld [vmem:[%s2354_s2 + $0x8] sm:$0xff]  ;;  %v1356_v7 = vld [vmem:[%s2354_s2] sm:$0xff]  ;;  %s1573_s22 = scalar_lea.vmem %s2352_s0, %s1337_s17  ;;  %v1608_v31 = vld [vmem:[%s2357_s5 + $0x78] sm:$0xff]  ;;  %s1999_s19 = scalar_lea.vmem %s2353_s1, %s1337_s17 }
   0xe   : > { %v1340_v8 = vld [vmem:[%s1573_s22] sm:$0xff]  ;;  %v1345_v9 = vld [vmem:[%s1573_s22 + $0x28] sm:$0xff]  ;;  %v1346_v12 = vld [vmem:[%s1573_s22 + $0x30] sm:$0xff]  ;;  %s2212_s27 = scalar_lea.vmem %s2359_s7, %s1339_s23 }
   0xf   : > { %v1349_v10 = vld [vmem:[%s1573_s22 + $0x48] sm:$0xff]  ;;  %v1350_v13 = vld [vmem:[%s1573_s22 + $0x50] sm:$0xff]  ;;  %v1347_v16 = vld [vmem:[%s1573_s22 + $0x38] sm:$0xff] }
  0x10   : > { %492 = vmatpush.bf16.msra.mxu0 %v1362_v1  ;;  %1446 = vmatpush.bf16.msra.mxu1 %v1362_v1  ;;  %v1341_v11 = vld [vmem:[%s1573_s22 + $0x8] sm:$0xff]  ;;  %v1342_v15 = vld [vmem:[%s1573_s22 + $0x10] sm:$0xff]  ;;  %v1351_v17 = vld [vmem:[%s1573_s22 + $0x58] sm:$0xff] }
  0x11   : > { %1447 = vmatpush.bf16.msra.mxu2 %v1362_v1  ;;  %1448 = vmatpush.bf16.msra.mxu3 %v1362_v1  ;;  %v1353_v14 = vld [vmem:[%s1573_s22 + $0x68] sm:$0xff]  ;;  %v1354_v18 = vld [vmem:[%s1573_s22 + $0x70] sm:$0xff]  ;;  %v1343_v19 = vld [vmem:[%s1573_s22 + $0x18] sm:$0xff] }
  0x12   : > { %v1348_v20 = vld [vmem:[%s1573_s22 + $0x40] sm:$0xff]  ;;  %v1355_v22 = vld [vmem:[%s1573_s22 + $0x78] sm:$0xff]  ;;  %v1613_v32 = vld [vmem:[%s2357_s5 + $0x70] sm:$0xff] }
  0x13   : > { %v1352_v21 = vld [vmem:[%s1573_s22 + $0x60] sm:$0xff]  ;;  %v1636_v40 = vld [vmem:[%s2357_s5 + $0x68] sm:$0xff]  ;;  %v1670_v55 = vld [vmem:[%s2357_s5 + $0x58] sm:$0xff] }
  0x14   : > { %493 = vmatpush.bf16.msra.mxu0 %v1361_v2  ;;  %1449 = vmatpush.bf16.msra.mxu1 %v1361_v2  ;;  %v1344_v23 = vld [vmem:[%s1573_s22 + $0x20] sm:$0xff]  ;;  %v1675_v56 = vld [vmem:[%s2357_s5 + $0x50] sm:$0xff]  ;;  %v1683_v58 = vld [vmem:[%s2357_s5 + $0x48] sm:$0xff] }
  0x15   : > { %1450 = vmatpush.bf16.msra.mxu2 %v1361_v2  ;;  %1451 = vmatpush.bf16.msra.mxu3 %v1361_v2  ;;  %v1641_v41 = vld [vmem:[%s2357_s5 + $0x60] sm:$0xff]  ;;  %v587_v2 = vld [vmem:[%s2357_s5 + $0x38] sm:$0xff] }
  0x16   : > { %v1693_v61 = vld [vmem:[%s2357_s5 + $0x40] sm:$0xff] }
  0x18   : > { %494 = vmatpush.bf16.msra.mxu0 %v1360_v3  ;;  %1452 = vmatpush.bf16.msra.mxu1 %v1360_v3 }
  0x19   : > { %1453 = vmatpush.bf16.msra.mxu2 %v1360_v3  ;;  %1454 = vmatpush.bf16.msra.mxu3 %v1360_v3 }
  0x1c   : > { %495 = vmatpush.bf16.msra.mxu0 %v1359_v4  ;;  %1455 = vmatpush.bf16.msra.mxu1 %v1359_v4 }
  0x1d   : > { %1456 = vmatpush.bf16.msra.mxu2 %v1359_v4  ;;  %1457 = vmatpush.bf16.msra.mxu3 %v1359_v4 }
  0x20   : > { %496 = vmatpush.bf16.msra.mxu0 %v1358_v5  ;;  %1458 = vmatpush.bf16.msra.mxu1 %v1358_v5 }
  0x21   : > { %1459 = vmatpush.bf16.msra.mxu2 %v1358_v5  ;;  %1460 = vmatpush.bf16.msra.mxu3 %v1358_v5 }
  0x24   : > { %497 = vmatpush.bf16.msra.mxu0 %v1357_v6  ;;  %1461 = vmatpush.bf16.msra.mxu1 %v1357_v6 }
  0x25   : > { %1462 = vmatpush.bf16.msra.mxu2 %v1357_v6  ;;  %1463 = vmatpush.bf16.msra.mxu3 %v1357_v6 }
  0x28   : > { %498 = vmatpush.bf16.msra.mxu0 %v1356_v7  ;;  %1464 = vmatpush.bf16.msra.mxu1 %v1356_v7 }
  0x29   : > { %1465 = vmatpush.bf16.msra.mxu2 %v1356_v7  ;;  %1466 = vmatpush.bf16.msra.mxu3 %v1356_v7  ;;  %v586_v7 = vld [vmem:[%s2357_s5 + $0x30] sm:$0xff] }
  0x2b   : > { %499 = vmatmul.bf16.vlgmr.msra.gmra.mxu0 %v1340_v8  ;;  %524 = vmatmul.bf16.vlgmr.msra.gmra.mxu1 %v1345_v9  ;;  %v585_v8 = vld [vmem:[%s2357_s5 + $0x28] sm:$0xff] }
  0x2c   : > { %544 = vmatmul.bf16.vlgmr.msra.gmra.mxu2 %v1349_v10  ;;  %564 = vmatmul.bf16.vlgmr.msra.gmra.mxu3 %v1353_v14 }
  0x2d   : > { %675 = vmatpush.msrb.mxu1 %v1608_v31  ;;  %839 = vmatpush.msrb.mxu3 %v1608_v31 }
  0x2f   : > { %676 = vmatpush.msrb.mxu1 %v1613_v32  ;;  %840 = vmatpush.msrb.mxu3 %v1613_v32 }
  0x31   : > { %677 = vmatpush.msrb.mxu1 %v1636_v40  ;;  %841 = vmatpush.msrb.mxu3 %v1636_v40 }
  0x33   : > { %678 = vmatpush.msrb.mxu1 %v1641_v41  ;;  %842 = vmatpush.msrb.mxu3 %v1641_v41 }
  0x35   : > { %679 = vmatpush.msrb.mxu1 %v1670_v55  ;;  %843 = vmatpush.msrb.mxu3 %v1670_v55 }
  0x37   : > { %680 = vmatpush.msrb.mxu1 %v1675_v56  ;;  %844 = vmatpush.msrb.mxu3 %v1675_v56 }
  0x39   : > { %681 = vmatpush.msrb.mxu1 %v1683_v58  ;;  %845 = vmatpush.msrb.mxu3 %v1683_v58 }
  0x3b   : > { %504 = vmatmul.bf16.gmra.mxu0 %v1341_v11  ;;  %529 = vmatmul.bf16.gmra.mxu1 %v1346_v12 }
  0x3c   : > { %549 = vmatmul.bf16.gmra.mxu2 %v1350_v13  ;;  %569 = vmatmul.bf16.gmra.mxu3 %v1354_v18 }
  0x3d   : > { %682 = vmatpush.msrb.mxu1 %v1693_v61  ;;  %846 = vmatpush.msrb.mxu3 %v1693_v61 }
  0x3f   : > { %683 = vmatpush.msrb.mxu1 %v587_v2  ;;  %847 = vmatpush.msrb.mxu3 %v587_v2 }
  0x41   : > { %684 = vmatpush.msrb.mxu1 %v586_v7  ;;  %848 = vmatpush.msrb.mxu3 %v586_v7 }
  0x43   : > { %685 = vmatpush.msrb.mxu1 %v585_v8  ;;  %849 = vmatpush.msrb.mxu3 %v585_v8 }
  0x4b   : > { %509 = vmatmul.bf16.gmra.mxu0 %v1342_v15  ;;  %534 = vmatmul.bf16.gmra.mxu1 %v1347_v16  ;;  %v584_v15 = vld [vmem:[%s2357_s5 + $0x20] sm:$0xff] }
  0x4c   : > { %554 = vmatmul.bf16.gmra.mxu2 %v1351_v17  ;;  %574 = vmatmul.bf16.gmra.mxu3 %v1355_v22  ;;  %v583_v17 = vld [vmem:[%s2357_s5 + $0x18] sm:$0xff] }
  0x4d   : > { %686 = vmatpush.msrb.mxu1 %v584_v15  ;;  %850 = vmatpush.msrb.mxu3 %v584_v15 }
  0x4f   : > { %687 = vmatpush.msrb.mxu1 %v583_v17  ;;  %851 = vmatpush.msrb.mxu3 %v583_v17 }
  0x5b   : > { %514 = vmatmul.bf16.gmra.mxu0 %v1343_v19  ;;  %539 = vmatmul.bf16.gmra.mxu1 %v1348_v20  ;;  %v582_v19 = vld [vmem:[%s2357_s5 + $0x10] sm:$0xff]  ;;  %v581_v20 = vld [vmem:[%s2357_s5 + $0x8] sm:$0xff] }
  0x5c   : > { %559 = vmatmul.bf16.gmra.mxu2 %v1352_v21  ;;  %v580_v21 = vld [vmem:[%s2357_s5] sm:$0xff]  ;;  %688 = vmatpush.msrb.mxu1 %v582_v19 }
  0x5d   : > { %852 = vmatpush.msrb.mxu3 %v582_v19 }
  0x5e   : > { %689 = vmatpush.msrb.mxu1 %v581_v20 }
  0x5f   : > { %853 = vmatpush.msrb.mxu3 %v581_v20 }
  0x60   : > { %690 = vmatpush.msrb.mxu1 %v580_v21 }
  0x61   : > { %854 = vmatpush.msrb.mxu3 %v580_v21 }
  0x6b   : > { %519 = vmatmul.bf16.gmra.mxu0 %v1344_v23  ;;  %v603_v23 = vsel %vm599_vm0, %v582_v19, 0.0 }
  0xa8   : > { %v1591_v24 = vpop.f32.mrf.mxu0  ;;  %v1597_v27 = vpop.f32.mrf.mxu1 }
  0xaf   : > { %v1615_v33 = vpop.f32.mrf.mxu2  ;;  %v1661_v51 = vpop.f32.mrf.mxu3 }
  0xb0   : > { %v1593_v25 = vpop.f32.mrf.mxu0  ;;  %v1601_v29 = vpop.f32.mrf.mxu1 }
  0xb1   : > { %v638_v43 = vadd.f32 %v1593_v25, %v1591_v24 }
  0xb7   : > { %v1625_v36 = vpop.f32.mrf.mxu2  ;;  %v1700_v0 = vpop.f32.mrf.mxu3 }
  0xb8   : > { %v1595_v26 = vpop.f32.mrf.mxu0  ;;  %v1621_v34 = vpop.f32.mrf.mxu1 }
  0xb9   : > { %v639_v45 = vadd.f32 %v638_v43, %v1595_v26  ;;  %v601_v43 = vsel %vm599_vm0, %v581_v20, 0.0 }
  0xbf   : > { %v1631_v39 = vpop.f32.mrf.mxu2  ;;  %v1722_v11 = vpop.f32.mrf.mxu3 }
  0xc0   : > { %v1599_v28 = vpop.f32.mrf.mxu0  ;;  %v1629_v38 = vpop.f32.mrf.mxu1 }
  0xc1   : > { %v640_v46 = vadd.f32 %v639_v45, %v1599_v28  ;;  %v600_v45 = vsel %vm599_vm0, %v580_v21, 0.0 }
  0xc7   : > { %v1658_v49 = vpop.f32.mrf.mxu2 }
  0xc8   : > { %v1603_v30 = vpop.f32.mrf.mxu0  ;;  %v1649_v44 = vpop.f32.mrf.mxu1 }
  0xc9   : > { %v641_v47 = vadd.f32 %v640_v46, %v1603_v30 }
  0xcf   : > { %v1695_v62 = vpop.f32.mrf.mxu2 }
  0xd0   : > { %v1623_v35 = vpop.f32.mrf.mxu0  ;;  %v1664_v53 = vpop.f32.mrf.mxu1 }
  0xd1   : > { %v642_v50 = vadd.f32 %v641_v47, %v1623_v35  ;;  %v602_v47 = vadd.f32 %v601_v43, %v600_v45 }
  0xd7   : > { %v1719_v9 = vpop.f32.mrf.mxu2 }
  0xd8   : > { %v1627_v37 = vpop.f32.mrf.mxu0  ;;  %v1708_v3 = vpop.f32.mrf.mxu1 }
  0xd9   : > { %v643_v52 = vadd.f32 %v642_v50, %v1627_v37  ;;  %v1751_v50 = vpop.f32.mrf.mxu3 }
  0xdf   : > { %v1745_v22 = vpop.f32.mrf.mxu2 }
  0xe0   : > { %v1643_v42 = vpop.f32.mrf.mxu0  ;;  %v1725_v13 = vpop.f32.mrf.mxu1 }
  0xe1   : > { %v644_v54 = vadd.f32 %v643_v52, %v1643_v42  ;;  %v605_v52 = vsel %vm599_vm0, %v583_v17, 0.0  ;;  %v613_v17 = vsel %vm599_vm0, %v587_v2, 0.0  ;;  %v1770_v20 = vpop.f32.mrf.mxu3  ;;  %v619_v2 = vsel %vm599_vm0, %v1675_v56, 0.0 }
  0xe8   : > { %v1656_v48 = vpop.f32.mrf.mxu0 }
  0xe9   : > { %v645_v57 = vadd.f32 %v644_v54, %v1656_v48 }
  0xf0   : > { %v1685_v59 = vpop.f32.mrf.mxu0 }
  0xf1   : > { %v646_v60 = vadd.f32 %v645_v57, %v1685_v59  ;;  %v604_v57 = vadd.f32 %v603_v23, %v602_v47 }
  0xf3   : > { %v647_v63 = vadd.f32 %v646_v60, %v1597_v27  ;;  %v607_v60 = vsel %vm599_vm0, %v584_v15, 0.0 }
  0xf5   : > { %v648_v1 = vadd.f32 %v647_v63, %v1601_v29 }
  0xf7   : > { %v649_v4 = vadd.f32 %v648_v1, %v1621_v34  ;;  %v606_v1 = vadd.f32 %v605_v52, %v604_v57  ;;  %v623_v57 = vsel %vm599_vm0, %v1641_v41, 0.0 }
  0xf9   : > { %v650_v5 = vadd.f32 %v649_v4, %v1629_v38  ;;  %v596_v4 = vld [vmem:[%s2358_s6] sm:$0x3] }
  0xfa   : > { %1331 = vmatpush.msk.msrb.mxu2 %vm713_vm1, %v596_v4 }
  0xfb   : > { %v651_v6 = vadd.f32 %v650_v5, %v1649_v44  ;;  %v609_v5 = vsel %vm599_vm0, %v585_v8, 0.0  ;;  %v615_v8 = vsel %vm599_vm0, %v1693_v61, 0.0  ;;  %v621_v61 = vsel %vm599_vm0, %v1670_v55, 0.0 }
  0xfc   : > { %1333 = vmatpush.msk.msra.mxu2 %vm713_vm1, %v596_v4  ;;  %v627_v55 = vsel %vm599_vm0, %v1613_v32, 0.0 }
  0xfd   : > { %v652_v10 = vadd.f32 %v651_v6, %v1664_v53 }
  0xff   : > { %v653_v12 = vadd.f32 %v652_v10, %v1708_v3  ;;  %v608_v10 = vadd.f32 %v607_v60, %v606_v1  ;;  %v1787_v1 = vpop.f32.mrf.mxu3 }
 0x101   : > { %v654_v14 = vadd.f32 %v653_v12, %v1725_v13  ;;  %v611_v12 = vsel %vm599_vm0, %v586_v7, 0.0  ;;  %v610_v15 = vadd.f32 %v609_v5, %v608_v10  ;;  %v617_v7 = vsel %vm599_vm0, %v1683_v58, 0.0 }
 0x102   : > { %v629_v10 = vsel %vm599_vm0, %v1608_v31, 0.0 }
 0x103   : > { %v655_v16 = vadd.f32 %v654_v14, %v1615_v33  ;;  %v612_v19 = vadd.f32 %v611_v12, %v610_v15 }
 0x105   : > { %v656_v18 = vadd.f32 %v655_v16, %v1625_v36  ;;  %v1764_v16 = vpop.f32.mrf.mxu2  ;;  %v614_v23 = vadd.f32 %v613_v17, %v612_v19 }
 0x107   : > { %v657_v46 = vadd.f32 %v656_v18, %v1631_v39  ;;  %v616_v45 = vadd.f32 %v615_v8, %v614_v23 }
 0x109   : > { %v658_v54 = vadd.f32 %v657_v46, %v1658_v49  ;;  %v618_v47 = vadd.f32 %v617_v7, %v616_v45 }
 0x10b   : > { %v659_v63 = vadd.f32 %v658_v54, %v1695_v62  ;;  %v620_v54 = vadd.f32 %v619_v2, %v618_v47 }
 0x10d   : > { %v660_v6 = vadd.f32 %v659_v63, %v1719_v9  ;;  %v622_v60 = vadd.f32 %v621_v61, %v620_v54  ;;  %v625_v63 = vsel %vm599_vm0, %v1636_v40, 0.0 }
 0x10f   : > { %v661_v14 = vadd.f32 %v660_v6, %v1745_v22  ;;  %v624_v4 = vadd.f32 %v623_v57, %v622_v60 }
 0x111   : > { %v662_v18 = vadd.f32 %v661_v14, %v1764_v16  ;;  %v626_v6 = vadd.f32 %v625_v63, %v624_v4 }
 0x113   : > { %v663_v21 = vadd.f32 %v662_v18, %v1661_v51  ;;  %v628_v12 = vadd.f32 %v627_v55, %v626_v6 }
 0x115   : > { %v664_v43 = vadd.f32 %v663_v21, %v1700_v0  ;;  %v630_v15 = vadd.f32 %v629_v10, %v628_v12 }
 0x117   : > { %v665_v46 = vadd.f32 %v664_v43, %v1722_v11  ;;  %v631_v19 = vrot.slane %v630_v15, 4 }
 0x119   : > { %v666_v52 = vadd.f32 %v665_v46, %v1751_v50  ;;  %v632_v8 = vadd.f32 %v631_v19, %v630_v15 }
 0x11b   : > { %v667_v58 = vadd.f32 %v666_v52, %v1770_v20  ;;  %v633_v21 = vrot.slane %v632_v8, 2 }
 0x11d   : > { %v668_v56 = vadd.f32 %v667_v58, %v1787_v1  ;;  %v634_v23 = vadd.f32 %v633_v21, %v632_v8 }
 0x11f   : > { %v669_v5 = vrot.slane %v668_v56, 4  ;;  %v635_v7 = vrot.slane %v634_v23, 1 }
 0x121   : > { %v670_v41 = vadd.f32 %v669_v5, %v668_v56  ;;  %v636_v43 = vadd.f32 %v635_v7, %v634_v23 }
 0x123   : > { %v671_v14 = vrot.slane %v670_v41, 2  ;;  %v637_v32 = vmul.f32 256.0, %v636_v43 }
 0x125   : > { %v672_v17 = vadd.f32 %v671_v14, %v670_v41  ;;  %1477 = vrcp.f32 %v637_v32  ;;  %vm700_vm2 = vweird.f32 %v637_v32  ;;  %v706_v47 = vand.u32 2147483648, %v637_v32 }
 0x126   : > { %v704_v52 = vand.u32 2147483647, %v637_v32 }
 0x127   : > { %v673_v18 = vrot.slane %v672_v17, 1  ;;  %v707_v54 = vor.u32 1.1754944e-38, %v706_v47 }
 0x128   : > { %vm705_vm5 = vcmp.eq.f32.partialorder %v704_v52, 8.507059e+37 }
 0x129   : > { %v674_v40 = vadd.f32 %v673_v18, %v672_v17 }
 0x12b   : > { %691 = vmatmul.f32.vlgmr.msrb.gmra.mxu1 %v674_v40  ;;  %v1478_v45 = vpop.eup %1477 }
 0x12c   : > { %v696_v2 = vmul.f32 %v1478_v45, %v637_v32  ;;  %vm701_vm3 = vweird.f32 %v1478_v45 }
 0x12d   : > { %vm702_vm4 = vmor %vm700_vm2, %vm701_vm3 }
 0x12e   : > { %v697_v46 = vsub.f32 1.0, %v696_v2 }
 0x130   : > { %v698_v31 = vmul.f32 %v1478_v45, %v697_v46 }
 0x132   : > { %v699_v61 = vadd.f32 %v1478_v45, %v698_v31 }
 0x134   : > { %v703_v57 = vsel %vm702_vm4, %v1478_v45, %v699_v61 }
 0x135   : > { %v1794_v58 = vsel %vm705_vm5, %v707_v54, %v703_v57 }
 0x1a8   : > { %v692_v60 = vpop.f32.mrf.mxu1 }
 0x1a9   : > { %v709_v63 = vmul.f32 %v1794_v58, %v692_v60 }
 0x1ab   : > { %1332 = vmatmul.msk.f32.vlgmr.msrb.gmra.mxu2 %vm599_vm0, %v709_v63 }
 0x22e   : > { %v734_v56 = vpop.f32.mrf.mxu2 }
 0x22f   : > { %v1798_v4 = vperm.slane %v734_v56, 0 }
 0x231   : > { %v1802_v55 = vsub.f32 %v1591_v24, %v1798_v4  ;;  %v1806_v5 = vsub.f32 %v1593_v25, %v1798_v4  ;;  %v1810_v6 = vsub.f32 %v1595_v26, %v1798_v4  ;;  %v1818_v12 = vsub.f32 %v1599_v28, %v1798_v4 }
 0x232   : > { %v1822_v24 = vsub.f32 %v1603_v30, %v1798_v4  ;;  %v1828_v26 = vsub.f32 %v1623_v35, %v1798_v4  ;;  %v1834_v28 = vsub.f32 %v1627_v37, %v1798_v4  ;;  %v1840_v40 = vsub.f32 %v1643_v42, %v1798_v4 }
 0x233   : > { %v770_v10 = vmul.f32 %v1802_v55, %v1802_v55  ;;  %v771_v41 = vmul.f32 %v1806_v5, %v1806_v5  ;;  %v772_v25 = vmul.f32 %v1810_v6, %v1810_v6  ;;  %v773_v15 = vmul.f32 %v1818_v12, %v1818_v12 }
 0x234   : > { %v774_v30 = vmul.f32 %v1822_v24, %v1822_v24  ;;  %v775_v35 = vmul.f32 %v1828_v26, %v1828_v26  ;;  %v1846_v8 = vsub.f32 %v1656_v48, %v1798_v4  ;;  %v776_v37 = vmul.f32 %v1834_v28, %v1834_v28 }
 0x235   : > { %v802_v14 = vadd.f32 %v771_v41, %v770_v10  ;;  %v1852_v23 = vsub.f32 %v1685_v59, %v1798_v4  ;;  %v777_v42 = vmul.f32 %v1840_v40, %v1840_v40  ;;  %v1858_v43 = vsub.f32 %v1597_v27, %v1798_v4 }
 0x236   : > { %v778_v48 = vmul.f32 %v1846_v8, %v1846_v8  ;;  %v1864_v45 = vsub.f32 %v1601_v29, %v1798_v4  ;;  %v1870_v46 = vsub.f32 %v1621_v34, %v1798_v4  ;;  %v1876_v47 = vsub.f32 %v1629_v38, %v1798_v4 }
 0x237   : > { %v803_v17 = vadd.f32 %v802_v14, %v772_v25  ;;  %v779_v59 = vmul.f32 %v1852_v23, %v1852_v23  ;;  %v780_v27 = vmul.f32 %v1858_v43, %v1858_v43  ;;  %v1882_v52 = vsub.f32 %v1649_v44, %v1798_v4 }
 0x238   : > { %v781_v29 = vmul.f32 %v1864_v45, %v1864_v45  ;;  %v782_v34 = vmul.f32 %v1870_v46, %v1870_v46  ;;  %v1888_v57 = vsub.f32 %v1664_v53, %v1798_v4  ;;  %v783_v38 = vmul.f32 %v1876_v47, %v1876_v47 }
 0x239   : > { %v804_v18 = vadd.f32 %v803_v17, %v773_v15  ;;  %v1894_v63 = vsub.f32 %v1708_v3, %v1798_v4  ;;  %v784_v44 = vmul.f32 %v1882_v52, %v1882_v52  ;;  %v1900_v10 = vsub.f32 %v1725_v13, %v1798_v4 }
 0x23a   : > { %v785_v53 = vmul.f32 %v1888_v57, %v1888_v57  ;;  %v1906_v25 = vsub.f32 %v1615_v33, %v1798_v4  ;;  %v1912_v15 = vsub.f32 %v1625_v36, %v1798_v4 }
 0x23b   : > { %v805_v19 = vadd.f32 %v804_v18, %v774_v30  ;;  %v786_v3 = vmul.f32 %v1894_v63, %v1894_v63  ;;  %v787_v13 = vmul.f32 %v1900_v10, %v1900_v10  ;;  %v1918_v30 = vsub.f32 %v1631_v39, %v1798_v4 }
 0x23c   : > { %v788_v33 = vmul.f32 %v1906_v25, %v1906_v25  ;;  %v789_v36 = vmul.f32 %v1912_v15, %v1912_v15 }
 0x23d   : > { %v806_v21 = vadd.f32 %v805_v19, %v775_v35  ;;  %v1924_v35 = vsub.f32 %v1658_v49, %v1798_v4  ;;  %v790_v39 = vmul.f32 %v1918_v30, %v1918_v30 }
 0x23f   : > { %v807_v7 = vadd.f32 %v806_v21, %v776_v37  ;;  %v1930_v37 = vsub.f32 %v1695_v62, %v1798_v4  ;;  %v791_v49 = vmul.f32 %v1924_v35, %v1924_v35 }
 0x241   : > { %v808_v32 = vadd.f32 %v807_v7, %v777_v42  ;;  %v1936_v42 = vsub.f32 %v1719_v9, %v1798_v4  ;;  %v792_v62 = vmul.f32 %v1930_v37, %v1930_v37 }
 0x243   : > { %v809_v2 = vadd.f32 %v808_v32, %v778_v48  ;;  %v1942_v48 = vsub.f32 %v1745_v22, %v1798_v4  ;;  %v793_v9 = vmul.f32 %v1936_v42, %v1936_v42 }
 0x245   : > { %v810_v31 = vadd.f32 %v809_v2, %v779_v59  ;;  %v1948_v59 = vsub.f32 %v1764_v16, %v1798_v4  ;;  %v794_v22 = vmul.f32 %v1942_v48, %v1942_v48 }
 0x247   : > { %v811_v61 = vadd.f32 %v810_v31, %v780_v27  ;;  %v1954_v27 = vsub.f32 %v1661_v51, %v1798_v4  ;;  %v795_v16 = vmul.f32 %v1948_v59, %v1948_v59 }
 0x249   : > { %v812_v54 = vadd.f32 %v811_v61, %v781_v29  ;;  %v1960_v29 = vsub.f32 %v1700_v0, %v1798_v4  ;;  %v796_v51 = vmul.f32 %v1954_v27, %v1954_v27 }
 0x24b   : > { %v813_v60 = vadd.f32 %v812_v54, %v782_v34  ;;  %v1966_v34 = vsub.f32 %v1722_v11, %v1798_v4  ;;  %v797_v0 = vmul.f32 %v1960_v29, %v1960_v29 }
 0x24d   : > { %v814_v56 = vadd.f32 %v813_v60, %v783_v38  ;;  %v1972_v38 = vsub.f32 %v1751_v50, %v1798_v4  ;;  %v798_v11 = vmul.f32 %v1966_v34, %v1966_v34 }
 0x24f   : > { %v815_v41 = vadd.f32 %v814_v56, %v784_v44  ;;  %v1978_v44 = vsub.f32 %v1770_v20, %v1798_v4  ;;  %v799_v50 = vmul.f32 %v1972_v38, %v1972_v38 }
 0x251   : > { %v816_v14 = vadd.f32 %v815_v41, %v785_v53  ;;  %v1984_v53 = vsub.f32 %v1787_v1, %v1798_v4 }
 0x253   : > { %v817_v17 = vadd.f32 %v816_v14, %v786_v3  ;;  %v800_v3 = vmul.f32 %v1978_v44, %v1978_v44  ;;  %v801_v20 = vmul.f32 %v1984_v53, %v1984_v53 }
 0x255   : > { %v818_v18 = vadd.f32 %v817_v17, %v787_v13 }
 0x257   : > { %v819_v19 = vadd.f32 %v818_v18, %v788_v33 }
 0x259   : > { %v820_v21 = vadd.f32 %v819_v19, %v789_v36 }
 0x25b   : > { %v821_v7 = vadd.f32 %v820_v21, %v790_v39 }
 0x25d   : > { %v822_v32 = vadd.f32 %v821_v7, %v791_v49 }
 0x25f   : > { %v823_v2 = vadd.f32 %v822_v32, %v792_v62 }
 0x261   : > { %v824_v31 = vadd.f32 %v823_v2, %v793_v9 }
 0x263   : > { %v825_v61 = vadd.f32 %v824_v31, %v794_v22 }
 0x265   : > { %v826_v54 = vadd.f32 %v825_v61, %v795_v16  ;;  %v2005_v16 = vld [vmem:[%s1999_s19 + $0x8] sm:$0xff]   ;;  %v2008_v61 = vld [vmem:[%s1999_s19 + $0x10] sm:$0xff]  }
 0x267   : > { %v827_v60 = vadd.f32 %v826_v54, %v796_v51  ;;  %v2011_v51 = vld [vmem:[%s1999_s19 + $0x18] sm:$0xff]   ;;  %v2014_v54 = vld [vmem:[%s1999_s19 + $0x20] sm:$0xff]  }
 0x269   : > { %v828_v56 = vadd.f32 %v827_v60, %v797_v0  ;;  %v2018_v60 = vld [vmem:[%s1999_s19 + $0x28] sm:$0xff]  }
 0x26b   : > { %v829_v41 = vadd.f32 %v828_v56, %v798_v11  ;;  %v2021_v11 = vld [vmem:[%s1999_s19 + $0x30] sm:$0xff]  }
 0x26d   : > { %v830_v14 = vadd.f32 %v829_v41, %v799_v50  ;;  %v1370_v50 = vunpack.c.l.bf16 %v2005_v16  ;;  %v1371_v41 = vunpack.c.h.bf16 %v2005_v16 }
 0x26f   : > { %v831_v13 = vadd.f32 %v830_v14, %v800_v3  ;;  %v1374_v3 = vunpack.c.l.bf16 %v2008_v61  ;;  %v2028_v14 = vld [vmem:[%s1999_s19 + $0x38] sm:$0xff]  }
 0x271   : > { %v832_v17 = vadd.f32 %v831_v13, %v801_v20  ;;  %v1375_v13 = vunpack.c.h.bf16 %v2008_v61 }
 0x273   : > { %v833_v33 = vrot.slane %v832_v17, 4 }
 0x275   : > { %v834_v18 = vadd.f32 %v833_v33, %v832_v17  ;;  %v1378_v17 = vunpack.c.l.bf16 %v2011_v51 }
 0x277   : > { %v835_v36 = vrot.slane %v834_v18, 2 }
 0x279   : > { %v836_v19 = vadd.f32 %v835_v36, %v834_v18  ;;  %v2035_v36 = vld [vmem:[%s1999_s19 + $0x40] sm:$0xff]  }
 0x27b   : > { %v837_v39 = vrot.slane %v836_v19, 1 }
 0x27d   : > { %v838_v1 = vadd.f32 %v837_v39, %v836_v19  ;;  %v2038_v19 = vld [vmem:[%s1999_s19 + $0x48] sm:$0xff]  }
 0x27f   : > { %855 = vmatmul.f32.vlgmr.msrb.gmra.mxu3 %v838_v1 }
 0x302   : > { %v856_v4 = vpop.f32.mrf.mxu3 }
 0x303   : > { %v859_v21 = vmul.f32 %v856_v4, %v1794_v58  ;;  %v2002_v58 = vld [vmem:[%s1999_s19] sm:$0xff]  }
 0x304   : > { %v1366_v0 = vunpack.c.l.bf16 %v2002_v58  ;;  %v1367_v56 = vunpack.c.h.bf16 %v2002_v58 }
 0x305   : > { %v860_v49 = vadd.f32 1e-05, %v859_v21 }
 0x307   : > { %1479 = vrsqrt.f32 %v860_v49  ;;  %vm867_vm7 = vweird.f32 %v860_v49 }
 0x30d   : > { %v1480_v7 = vpop.eup %1479 }
 0x30e   : > { %v862_v62 = vmul.f32 %v1480_v7, %v860_v49  ;;  %vm868_vm6 = vweird.f32 %v1480_v7  ;;  %v2045_v49 = vld [vmem:[%s1999_s19 + $0x50] sm:$0xff]  }
 0x30f   : > { %vm869_vm8 = vmor %vm867_vm7, %vm868_vm6 }
 0x310   : > { %v863_v32 = vmul.f32 %v1480_v7, %v862_v62 }
 0x312   : > { %v864_v9 = vmul.f32 0.5, %v863_v32 }
 0x314   : > { %v865_v2 = vsub.f32 1.5, %v864_v9 }
 0x316   : > { %v866_v22 = vmul.f32 %v1480_v7, %v865_v2  ;;  %v2054_v2 = vld [vmem:[%s1999_s19 + $0x60] sm:$0xff]  }
 0x318   : > { %v870_v31 = vsel %vm869_vm8, %v1480_v7, %v866_v22  ;;  %v2048_v7 = vld [vmem:[%s1999_s19 + $0x58] sm:$0xff]   ;;  %v2057_v22 = vld [vmem:[%s1999_s19 + $0x68] sm:$0xff]  }
 0x319   : > { %1334 = vmatmul.msk.f32.vlgmr.msra.gmra.mxu2 %vm599_vm0, %v870_v31 }
 0x39c   : > { %v891_v20 = vpop.f32.mrf.mxu2 }
 0x39d   : > { %v2059_v31 = vperm.slane %v891_v20, 0  ;;  %v2084_v20 = vld [vmem:[%s2355_s3] ss:$0 sm:$0xff] }
 0x39f   : > { %v895_v1 = vmul.f32 %v2059_v31, %v1802_v55  ;;  %v896_v62 = vmul.f32 %v2059_v31, %v1806_v5  ;;  %v897_v32 = vmul.f32 %v2059_v31, %v1810_v6  ;;  %v898_v18 = vmul.f32 %v2059_v31, %v1818_v12 }
 0x3a0   : > { %v899_v21 = vmul.f32 %v2059_v31, %v1822_v24  ;;  %v900_v55 = vmul.f32 %v2059_v31, %v1828_v26  ;;  %v901_v5 = vmul.f32 %v2059_v31, %v1834_v28  ;;  %v902_v6 = vmul.f32 %v2059_v31, %v1840_v40 }
 0x3a1   : > { %v903_v12 = vmul.f32 %v2059_v31, %v1846_v8  ;;  %v904_v4 = vmul.f32 %v2059_v31, %v1852_v23  ;;  %v905_v33 = vmul.f32 %v2059_v31, %v1858_v43  ;;  %v906_v24 = vmul.f32 %v2059_v31, %v1864_v45 }
 0x3a2   : > { %v907_v26 = vmul.f32 %v2059_v31, %v1870_v46  ;;  %v908_v28 = vmul.f32 %v2059_v31, %v1876_v47  ;;  %v909_v40 = vmul.f32 %v2059_v31, %v1882_v52  ;;  %v910_v8 = vmul.f32 %v2059_v31, %v1888_v57  ;;  %v2118_v46 = vld [vmem:[%s2356_s4] ss:$0 sm:$0xff] }
 0x3a3   : > { %v911_v23 = vmul.f32 %v2059_v31, %v1894_v63  ;;  %v930_v43 = vmul.f32 %v2084_v20, %v895_v1  ;;  %v931_v9 = vmul.f32 %v2084_v20, %v896_v62  ;;  %v932_v45 = vmul.f32 %v2084_v20, %v897_v32 }
 0x3a4   : > { %v912_v47 = vmul.f32 %v2059_v31, %v1900_v10  ;;  %v2124_v52 = vmul.f32 %v2059_v31, %v1906_v25  ;;  %v2128_v57 = vmul.f32 %v2059_v31, %v1912_v15  ;;  %v933_v63 = vmul.f32 %v2084_v20, %v898_v18 }
 0x3a5   : > { %v2133_v1 = vmul.f32 %v2059_v31, %v1918_v30  ;;  %v2137_v62 = vmul.f32 %v2059_v31, %v1924_v35  ;;  %v2141_v10 = vmul.f32 %v2059_v31, %v1930_v37  ;;  %v934_v25 = vmul.f32 %v2084_v20, %v899_v21 }
 0x3a6   : > { %v2146_v15 = vmul.f32 %v2059_v31, %v1936_v42  ;;  %v2150_v18 = vmul.f32 %v2059_v31, %v1942_v48  ;;  %v2154_v30 = vmul.f32 %v2059_v31, %v1948_v59  ;;  %v935_v35 = vmul.f32 %v2084_v20, %v900_v55 }
 0x3a7   : > { %v936_v32 = vmul.f32 %v2084_v20, %v901_v5  ;;  %v965_v37 = vadd.f32 %v2118_v46, %v930_v43  ;;  %v966_v21 = vadd.f32 %v2118_v46, %v931_v9  ;;  %v967_v42 = vadd.f32 %v2118_v46, %v932_v45 }
 0x3a8   : > { %v2163_v39 = vmul.f32 %v2059_v31, %v1954_v27  ;;  %v2167_v48 = vmul.f32 %v2059_v31, %v1960_v29  ;;  %v937_v59 = vmul.f32 %v2084_v20, %v902_v6  ;;  %v968_v55 = vadd.f32 %v2118_v46, %v933_v63 }
 0x3a9   : > { %v2173_v5 = vmul.f32 %v2059_v31, %v1966_v34  ;;  %v2177_v9 = vmul.f32 %v2059_v31, %v1972_v38  ;;  %v938_v43 = vmul.f32 %v2084_v20, %v903_v12  ;;  %v969_v27 = vadd.f32 %v2118_v46, %v934_v25 }
 0x3aa   : > { %v2183_v29 = vmul.f32 %v2059_v31, %v1978_v44  ;;  %v939_v6 = vmul.f32 %v2084_v20, %v904_v4  ;;  %v940_v45 = vmul.f32 %v2084_v20, %v905_v33  ;;  %v970_v63 = vadd.f32 %v2118_v46, %v935_v35 }
 0x3ab   : > { %v971_v34 = vadd.f32 %v2118_v46, %v936_v32  ;;  %v1061_v38 = vadd.f32 %v1366_v0, %v965_v37  ;;  %v1062_v12 = vadd.f32 %v1367_v56, %v966_v21  ;;  %v1063_v25 = vadd.f32 %v1370_v50, %v967_v42 }
 0x3ac   : > { %v2198_v44 = vmul.f32 %v2059_v31, %v1984_v53  ;;  %v941_v33 = vmul.f32 %v2084_v20, %v906_v24  ;;  %v972_v4 = vadd.f32 %v2118_v46, %v937_v59  ;;  %v1064_v35 = vadd.f32 %v1371_v41, %v968_v55 }
 0x3ad   : > { %v942_v32 = vmul.f32 %v2084_v20, %v907_v26  ;;  %v943_v0 = vmul.f32 %v2084_v20, %v908_v28  ;;  %v973_v58 = vadd.f32 %v2118_v46, %v938_v43  ;;  %v1065_v56 = vadd.f32 %v1374_v3, %v969_v27 }
 0x3ae   : > { %v944_v53 = vmul.f32 %v2084_v20, %v909_v40  ;;  %v974_v16 = vadd.f32 %v2118_v46, %v939_v6  ;;  %v975_v50 = vadd.f32 %v2118_v46, %v940_v45  ;;  %v1066_v41 = vadd.f32 %v1375_v13, %v970_v63 }
 0x3af   : > { %v1067_v31 = vadd.f32 %v1378_v17, %v971_v34  ;;  %v1093_v24 = vmax.f32 %v1061_v38, 0.0  ;;  %v1094_v3 = vmax.f32 %v1062_v12, 0.0  ;;  %v1095_v26 = vmax.f32 %v1063_v25, 0.0 }
 0x3b0   : > { %v945_v28 = vmul.f32 %v2084_v20, %v910_v8  ;;  %v976_v37 = vadd.f32 %v2118_v46, %v941_v33  ;;  %v2360_v40 = vunpack.c.h.bf16 %v2011_v51  ;;  %v1096_v42 = vmax.f32 %v1064_v35, 0.0 }
 0x3b1   : > { %v946_v59 = vmul.f32 %v2084_v20, %v911_v23  ;;  %v977_v61 = vadd.f32 %v2118_v46, %v942_v32  ;;  %v2361_v13 = vunpack.c.l.bf16 %v2014_v54  ;;  %v1097_v55 = vmax.f32 %v1065_v56, 0.0  ;;  %1125 = vst [vmem:[%s2212_s27] sm:$0xff] %v1093_v24 }
 0x3b2   : > { %v1068_v21 = vadd.f32 %v2360_v40, %v972_v4  ;;  %v947_v43 = vmul.f32 %v2084_v20, %v912_v47  ;;  %v978_v8 = vadd.f32 %v2118_v46, %v943_v0  ;;  %v2362_v27 = vunpack.c.h.bf16 %v2014_v54  ;;  %1126 = vst [vmem:[%s2212_s27 + $0x8] sm:$0xff] %v1094_v3 }
 0x3b3   : > { %v1069_v17 = vadd.f32 %v2361_v13, %v973_v58  ;;  %v1098_v6 = vmax.f32 %v1066_v41, 0.0  ;;  %v948_v23 = vmul.f32 %v2084_v20, %v2124_v52  ;;  %v979_v45 = vadd.f32 %v2118_v46, %v944_v53  ;;  %1127 = vst [vmem:[%s2212_s27 + $0x10] sm:$0xff] %v1095_v26 }
 0x3b4   : > { %v1070_v51 = vadd.f32 %v2362_v27, %v974_v16  ;;  %v2363_v63 = vunpack.c.l.bf16 %v2018_v60  ;;  %v1099_v38 = vmax.f32 %v1067_v31, 0.0  ;;  %v949_v47 = vmul.f32 %v2084_v20, %v2128_v57  ;;  %1128 = vst [vmem:[%s2212_s27 + $0x18] sm:$0xff] %v1096_v42 }
 0x3b5   : > { %v980_v54 = vadd.f32 %v2118_v46, %v945_v28  ;;  %v2364_v12 = vunpack.c.h.bf16 %v2018_v60  ;;  %v1100_v33 = vmax.f32 %v1068_v21, 0.0  ;;  %v950_v52 = vmul.f32 %v2084_v20, %v2133_v1  ;;  %1129 = vst [vmem:[%s2212_s27 + $0x20] sm:$0xff] %v1097_v55 }
 0x3b6   : > { %v1071_v34 = vadd.f32 %v2363_v63, %v975_v50  ;;  %v981_v4 = vadd.f32 %v2118_v46, %v946_v59  ;;  %v2365_v35 = vunpack.c.l.bf16 %v2021_v11  ;;  %v1101_v0 = vmax.f32 %v1069_v17, 0.0  ;;  %1130 = vst [vmem:[%s2212_s27 + $0x28] sm:$0xff] %v1098_v6 }
 0x3b7   : > { %v1072_v25 = vadd.f32 %v2364_v12, %v976_v37  ;;  %v951_v57 = vmul.f32 %v2084_v20, %v2137_v62  ;;  %v982_v60 = vadd.f32 %v2118_v46, %v947_v43  ;;  %v2366_v58 = vunpack.c.h.bf16 %v2021_v11  ;;  %1131 = vst [vmem:[%s2212_s27 + $0x30] sm:$0xff] %v1099_v38 }
 0x3b8   : > { %v1073_v32 = vadd.f32 %v2365_v35, %v977_v61  ;;  %v1102_v53 = vmax.f32 %v1070_v51, 0.0  ;;  %v952_v1 = vmul.f32 %v2084_v20, %v2141_v10  ;;  %v983_v16 = vadd.f32 %v2118_v46, %v948_v23  ;;  %1132 = vst [vmem:[%s2212_s27 + $0x38] sm:$0xff] %v1100_v33 }
 0x3b9   : > { %v1074_v56 = vadd.f32 %v2366_v58, %v978_v8  ;;  %v2367_v50 = vunpack.c.l.bf16 %v2028_v14  ;;  %v1103_v31 = vmax.f32 %v1071_v34, 0.0  ;;  %v953_v62 = vmul.f32 %v2084_v20, %v2146_v15  ;;  %1133 = vst [vmem:[%s2212_s27 + $0x40] sm:$0xff] %v1101_v0 }
 0x3ba   : > { %v984_v11 = vadd.f32 %v2118_v46, %v949_v47  ;;  %v2368_v24 = vunpack.c.h.bf16 %v2028_v14  ;;  %v1104_v26 = vmax.f32 %v1072_v25, 0.0  ;;  %v954_v10 = vmul.f32 %v2084_v20, %v2150_v18  ;;  %1134 = vst [vmem:[%s2212_s27 + $0x48] sm:$0xff] %v1102_v53 }
 0x3bb   : > { %v1075_v41 = vadd.f32 %v2367_v50, %v979_v45  ;;  %v985_v28 = vadd.f32 %v2118_v46, %v950_v52  ;;  %v2369_v37 = vunpack.c.l.bf16 %v2035_v36  ;;  %v1105_v21 = vmax.f32 %v1073_v32, 0.0  ;;  %1135 = vst [vmem:[%s2212_s27 + $0x50] sm:$0xff] %v1103_v31 }
 0x3bc   : > { %v1076_v3 = vadd.f32 %v2368_v24, %v980_v54  ;;  %v955_v15 = vmul.f32 %v2084_v20, %v2154_v30  ;;  %v986_v14 = vadd.f32 %v2118_v46, %v951_v57  ;;  %v2370_v42 = vunpack.c.h.bf16 %v2035_v36  ;;  %1136 = vst [vmem:[%s2212_s27 + $0x58] sm:$0xff] %v1104_v26 }
 0x3bd   : > { %v1077_v40 = vadd.f32 %v2369_v37, %v981_v4  ;;  %v1106_v61 = vmax.f32 %v1074_v56, 0.0  ;;  %v956_v18 = vmul.f32 %v2084_v20, %v2163_v39  ;;  %v987_v13 = vadd.f32 %v2118_v46, %v952_v1  ;;  %1137 = vst [vmem:[%s2212_s27 + $0x60] sm:$0xff] %v1105_v21 }
 0x3be   : > { %v1078_v59 = vadd.f32 %v2370_v42, %v982_v60  ;;  %v2371_v17 = vunpack.c.l.bf16 %v2038_v19  ;;  %v1107_v43 = vmax.f32 %v1075_v41, 0.0  ;;  %v957_v30 = vmul.f32 %v2084_v20, %v2167_v48  ;;  %v1441_v48 = vld [vmem:[%s1999_s19 + $0x70] sm:$0xff]  }
 0x3bf   : > { %v988_v36 = vadd.f32 %v2118_v46, %v953_v62  ;;  %v2372_v8 = vunpack.c.h.bf16 %v2038_v19  ;;  %v1108_v51 = vmax.f32 %v1076_v3, 0.0  ;;  %v958_v39 = vmul.f32 %v2084_v20, %v2173_v5  ;;  %1138 = vst [vmem:[%s2212_s27 + $0x68] sm:$0xff] %v1106_v61 }
 0x3c0   : > { %v1079_v55 = vadd.f32 %v2371_v17, %v983_v16  ;;  %v989_v6 = vadd.f32 %v2118_v46, %v954_v10  ;;  %v2373_v23 = vunpack.c.l.bf16 %v2045_v49  ;;  %v1109_v63 = vmax.f32 %v1077_v40, 0.0  ;;  %1139 = vst [vmem:[%s2212_s27 + $0x70] sm:$0xff] %v1107_v43 }
 0x3c1   : > { %v1080_v27 = vadd.f32 %v2372_v8, %v984_v11  ;;  %v959_v19 = vmul.f32 %v2084_v20, %v2177_v9  ;;  %v990_v34 = vadd.f32 %v2118_v46, %v955_v15  ;;  %v2374_v38 = vunpack.c.h.bf16 %v2045_v49  ;;  %v1442_v9 = vld [vmem:[%s1999_s19 + $0x78] sm:$0xff]   ;;  %1140 = vst [vmem:[%s2212_s27 + $0x78] sm:$0xff] %v1108_v51 }
 0x3c2   : > { %v1081_v45 = vadd.f32 %v2373_v23, %v985_v28  ;;  %v1110_v54 = vmax.f32 %v1078_v59, 0.0  ;;  %v960_v5 = vmul.f32 %v2084_v20, %v2183_v29  ;;  %v991_v12 = vadd.f32 %v2118_v46, %v956_v18  ;;  %1141 = vst [vmem:[%s2212_s27 + $0x80] sm:$0xff] %v1109_v63 }
 0x3c3   : > { %v1082_v47 = vadd.f32 %v2374_v38, %v986_v14  ;;  %v2375_v25 = vunpack.c.l.bf16 %v2048_v7  ;;  %v1111_v52 = vmax.f32 %v1079_v55, 0.0  ;;  %v961_v4 = vmul.f32 %v2084_v20, %v2198_v44 }
 0x3c4   : > { %v992_v49 = vadd.f32 %v2118_v46, %v957_v30  ;;  %v2376_v35 = vunpack.c.h.bf16 %v2048_v7  ;;  %v1112_v0 = vmax.f32 %v1080_v27, 0.0  ;;  %v1422_v29 = vunpack.c.l.bf16 %v1441_v48  ;;  %1142 = vst [vmem:[%s2212_s27 + $0x88] sm:$0xff] %v1110_v54 }
 0x3c5   : > { %v1083_v33 = vadd.f32 %v2375_v25, %v987_v13  ;;  %v993_v57 = vadd.f32 %v2118_v46, %v958_v39  ;;  %v2377_v60 = vunpack.c.l.bf16 %v2054_v2  ;;  %v1113_v56 = vmax.f32 %v1081_v45, 0.0  ;;  %1143 = vst [vmem:[%s2212_s27 + $0x90] sm:$0xff] %v1111_v52 }
 0x3c6   : > { %v1084_v32 = vadd.f32 %v2376_v35, %v988_v36  ;;  %v1423_v53 = vunpack.c.h.bf16 %v1441_v48  ;;  %v994_v20 = vadd.f32 %v2118_v46, %v959_v19  ;;  %v2378_v44 = vunpack.c.h.bf16 %v2054_v2  ;;  %1144 = vst [vmem:[%s2212_s27 + $0x98] sm:$0xff] %v1112_v0 }
 0x3c7   : > { %v1085_v58 = vadd.f32 %v2377_v60, %v989_v6  ;;  %v1114_v1 = vmax.f32 %v1082_v47, 0.0  ;;  %v1426_v16 = vunpack.c.l.bf16 %v1442_v9  ;;  %v995_v50 = vadd.f32 %v2118_v46, %v960_v5  ;;  %1145 = vst [vmem:[%s2212_s27 + $0xa0] sm:$0xff] %v1113_v56 }
 0x3c8   : > { %v1086_v7 = vadd.f32 %v2378_v44, %v990_v34  ;;  %v2379_v41 = vunpack.c.l.bf16 %v2057_v22  ;;  %v1115_v62 = vmax.f32 %v1083_v33, 0.0  ;;  %v1427_v11 = vunpack.c.h.bf16 %v1442_v9 }
 0x3c9   : > { %v996_v24 = vadd.f32 %v2118_v46, %v961_v4  ;;  %v2380_v2 = vunpack.c.h.bf16 %v2057_v22  ;;  %v1116_v26 = vmax.f32 %v1084_v32, 0.0  ;;  %v1089_v10 = vadd.f32 %v1422_v29, %v993_v57  ;;  %1146 = vst [vmem:[%s2212_s27 + $0xa8] sm:$0xff] %v1114_v1 }
 0x3ca   : > { %v1087_v31 = vadd.f32 %v2379_v41, %v991_v12  ;;  %v1117_v28 = vmax.f32 %v1085_v58, 0.0  ;;  %v1090_v37 = vadd.f32 %v1423_v53, %v994_v20  ;;  %v1118_v40 = vmax.f32 %v1086_v7, 0.0  ;;  %1147 = vst [vmem:[%s2212_s27 + $0xb0] sm:$0xff] %v1115_v62 }
 0x3cb   : > { %v1088_v3 = vadd.f32 %v2380_v2, %v992_v49  ;;  %v1091_v21 = vadd.f32 %v1426_v16, %v995_v50  ;;  %v1092_v22 = vadd.f32 %v1427_v11, %v996_v24  ;;  %1148 = vst [vmem:[%s2212_s27 + $0xb8] sm:$0xff] %v1116_v26  ;;  %v1121_v14 = vmax.f32 %v1089_v10, 0.0 }
 0x3cc   : > { %v1119_v46 = vmax.f32 %v1087_v31, 0.0  ;;  %1149 = vst [vmem:[%s2212_s27 + $0xc0] sm:$0xff] %v1117_v28  ;;  %v1122_v42 = vmax.f32 %v1090_v37, 0.0 }
 0x3cd   : > { %v1120_v15 = vmax.f32 %v1088_v3, 0.0  ;;  %1150 = vst [vmem:[%s2212_s27 + $0xc8] sm:$0xff] %v1118_v40  ;;  %v1123_v59 = vmax.f32 %v1091_v21, 0.0  ;;  %v1124_v61 = vmax.f32 %v1092_v22, 0.0 }
 0x3ce   : > { %1151 = vst [vmem:[%s2212_s27 + $0xd0] sm:$0xff] %v1119_v46 }
 0x3cf   : > { %1152 = vst [vmem:[%s2212_s27 + $0xd8] sm:$0xff] %v1120_v15 }
 0x3d0   : > { %1153 = vst [vmem:[%s2212_s27 + $0xe0] sm:$0xff] %v1121_v14 }
 0x3d1   : > { %1154 = vst [vmem:[%s2212_s27 + $0xe8] sm:$0xff] %v1122_v42 }
 0x3d2   : > { %1155 = vst [vmem:[%s2212_s27 + $0xf0] sm:$0xff] %v1123_v59 }
 0x3d3   : > { %1156 = vst [vmem:[%s2212_s27 + $0xf8] sm:$0xff] %v1124_v61 }
 0x3d4 PF: > { %s17_s24 = sadd.s32 1, %s1487_s24  }
 0x3d5   : > { %p14_p4 = scmp.ge.s32.totalorder %s17_s24, 4  }
 0x3d7   :  { %16 = sbr.rel (!%p14_p4) target bundleno = 1 (0x1), region = 81 }

// kernel: bottleneck_forward.4
= control target key start
LH: loop header
LB: loop body
LE: loop exit
PB: predicated region body
PF: predicated region fallthrough
CT: control target
= control target key end

     0   :  { %s6198_s21 = smov 0   ;;  %s8306_s0 = inlined_call_operand.vmem [shape: bf16[2,1,18,18,128], index: 0, kind: input, shape index: {}]   ;;  %s8307_s1 = inlined_call_operand.vmem [shape: bf16[9,128,128], index: 1, kind: input, shape index: {}]   ;;  %s8308_s2 = inlined_call_operand.vmem [shape: f32[1,128], index: 2, kind: input, shape index: {}]   ;;  %s8309_s3 = inlined_call_operand.vmem [shape: f32[1,128], index: 3, kind: input, shape index: {}]   ;;  %s8310_s4 = inlined_call_operand.vmem [shape: f32[128,2], index: 4, kind: input, shape index: {}]   ;;  %s8311_s5 = inlined_call_operand.vmem [shape: f32[2,128], index: 5, kind: input, shape index: {}]   ;;  %s8312_s6 = inlined_call_operand.vmem [shape: bf16[2,256,128], index: 6, kind: output, shape index: {}]  }
   0x1 LB: > { %s4981_s22 = sadd.s32 4294967295, %s6161_s21   ;;  %p4985_p0 = scmp.ge.s32.totalorder %s6161_s21, 1  ;;  %s6161_s21 = sphi %s6198_s21, %s16_s21  }
   0x2   : > { %p212_p1 = scmp.lt.s32.totalorder %s6161_s21, 3 }
   0x4   : > { %p213_p2 = pnand %p4985_p0, %p212_p1 }
   0x6   : > { %216 = sbr.rel (%p213_p2) target bundleno = 1435 (0x59b), region = 44 }
   0xb   : > { %v5875_v0 = vld [vmem:[%s8307_s1 + $0x78] sm:$0xff]  ;;  %p242_p3 = scmp.lt.s32.totalorder %s4981_s22, 1  ;;  %v5874_v1 = vld [vmem:[%s8307_s1 + $0x70] sm:$0xff]  ;;  %v5873_v2 = vld [vmem:[%s8307_s1 + $0x68] sm:$0xff]  ;;  %vm316_vm0 = vsmask.f32 3328 }
   0xc   : > { %832 = vmatpush.bf16.msra.mxu0 %v5875_v0  ;;  %6059 = vmatpush.bf16.msra.mxu1 %v5875_v0  ;;  %vm317_vm1 = vsmask.f32 7440  ;;  %v5872_v6 = vld [vmem:[%s8307_s1 + $0x60] sm:$0xff]  ;;  %v5871_v35 = vld [vmem:[%s8307_s1 + $0x58] sm:$0xff]  ;;  %v5870_v54 = vld [vmem:[%s8307_s1 + $0x50] sm:$0xff]  ;;  %vm1202_vm3 = vcmask 1042432  }
   0xd   : > { %s8399_s22 = smov (!%p242_p3, %s4981_s22), 1  ;;  %6060 = vmatpush.bf16.msra.mxu2 %v5875_v0  ;;  %6061 = vmatpush.bf16.msra.mxu3 %v5875_v0  ;;  %vm6243_vm2 = vmor %vm316_vm0, %vm317_vm1  ;;  %vm1203_vm4 = vcmask 1046532   ;;  %vm4546_vm6 = vcmask 1041408   ;;  %vm4432_vm7 = vcmask 15360  }
   0xe   : > { %s6083_s27 = smul.u32 216, %s8399_s22  ;;  %vm6537_vm5 = vmor %vm1202_vm3, %vm1203_vm4  ;;  %s5843_s23 = sshll.u32 %s8399_s22, 7 }
   0xf   : > { %s8278_s22 = scalar_lea.vmem %s8312_s6, %s5843_s23 }
  0x10   : > { %833 = vmatpush.bf16.msra.mxu0 %v5874_v1  ;;  %6062 = vmatpush.bf16.msra.mxu1 %v5874_v1  ;;  %s6221_s8 = scalar_lea.vmem %s8306_s0, %s6083_s27 }
  0x11   : > { %6063 = vmatpush.bf16.msra.mxu2 %v5874_v1  ;;  %6064 = vmatpush.bf16.msra.mxu3 %v5874_v1  ;;  %v252_v3 = vld [vmem:[%s6221_s8] sm:$0xf]  ;;  %v6225_v4 = vld [vmem:[%s6221_s8 + $0x4] sm:$0xf]  ;;  %v6228_v5 = vld [vmem:[%s6221_s8 + $0x8] sm:$0x1] }
  0x12   : > { %v320_v7 = vshrl.u32 %v252_v3, 16  ;;  %v323_v8 = vshll.u32 %v252_v3, 16  ;;  %v329_v9 = vshll.u32 %v6225_v4, 16  ;;  %v333_v10 = vshrl.u32 %v6225_v4, 16  ;;  %v262_v11 = vld [vmem:[%s6221_s8 + $0x3c] sm:$0xf] }
  0x13   : > { %v339_v12 = vshll.u32 %v6228_v5, 16  ;;  %v263_v13 = vld [vmem:[%s6221_s8 + $0x40] sm:$0xf]  ;;  %v305_v14 = vld [vmem:[%s6221_s8 + $0x44] sm:$0x1]  ;;  %v440_v15 = vshrl.u32 %v262_v11, 16 }
  0x14   : > { %834 = vmatpush.bf16.msra.mxu0 %v5873_v2  ;;  %6065 = vmatpush.bf16.msra.mxu1 %v5873_v2  ;;  %v322_v16 = vrot.slane %v320_v7, 4  ;;  %v325_v17 = vrot.slane %v323_v8, 5  ;;  %v331_v18 = vrot.slane %v329_v9, 5  ;;  %v335_v19 = vrot.slane %v333_v10, 4  ;;  %v268_v20 = vld [vmem:[%s6221_s8 + $0x60] sm:$0xf] }
  0x15   : > { %6066 = vmatpush.bf16.msra.mxu2 %v5873_v2  ;;  %6067 = vmatpush.bf16.msra.mxu3 %v5873_v2  ;;  %v341_v21 = vrot.slane %v339_v12, 5  ;;  %v442_v22 = vrot.slane %v440_v15, 4  ;;  %v443_v23 = vshll.u32 %v262_v11, 16  ;;  %v449_v24 = vshll.u32 %v263_v13, 16  ;;  %v269_v29 = vld [vmem:[%s6221_s8 + $0x64] sm:$0xf] }
  0x16   : > { %v326_v25 = vor.u32 %v325_v17, %v322_v16  ;;  %v336_v26 = vor.u32 %v335_v19, %v331_v18  ;;  %v453_v27 = vshrl.u32 %v263_v13, 16  ;;  %v459_v28 = vshll.u32 %v305_v14, 16  ;;  %v308_v41 = vld [vmem:[%s6221_s8 + $0x68] sm:$0x1]  ;;  %v276_v49 = vld [vmem:[%s6221_s8 + $0x90] sm:$0xf] }
  0x17   : > { %v445_v31 = vrot.slane %v443_v23, 5  ;;  %v451_v32 = vrot.slane %v449_v24, 5  ;;  %v512_v33 = vshrl.u32 %v268_v20, 16  ;;  %v515_v34 = vshll.u32 %v268_v20, 16  ;;  %v277_v62 = vld [vmem:[%s6221_s8 + $0x94] sm:$0xf] }
  0x18   : > { %835 = vmatpush.bf16.msra.mxu0 %v5872_v6  ;;  %6068 = vmatpush.bf16.msra.mxu1 %v5872_v6  ;;  %v327_v36 = vrot.slane %v326_v25, 4  ;;  %v337_v37 = vrot.slane %v336_v26, 4  ;;  %v455_v38 = vrot.slane %v453_v27, 4  ;;  %v461_v39 = vrot.slane %v459_v28, 5  ;;  %v254_v7 = vld [vmem:[%s6221_s8 + $0xc] sm:$0xf] }
  0x19   : > { %6069 = vmatpush.bf16.msra.mxu2 %v5872_v6  ;;  %6070 = vmatpush.bf16.msra.mxu3 %v5872_v6  ;;  %v446_v40 = vor.u32 %v445_v31, %v442_v22  ;;  %v514_v42 = vrot.slane %v512_v33, 4  ;;  %v517_v43 = vrot.slane %v515_v34, 5  ;;  %v521_v44 = vshll.u32 %v269_v29, 16  ;;  %v312_v6 = vld [vmem:[%s6221_s8 + $0x98] sm:$0x1]  ;;  %v5869_v12 = vld [vmem:[%s8307_s1 + $0x48] sm:$0xff] }
  0x1a   : > { %v332_v45 = vsel %vm6243_vm2, %v327_v36, %v331_v18  ;;  %v342_v46 = vsel %vm6243_vm2, %v337_v37, %v341_v21  ;;  %v456_v47 = vor.u32 %v455_v38, %v451_v32  ;;  %v525_v48 = vshrl.u32 %v269_v29, 16  ;;  %v6284_v17 = vld [vmem:[%s6221_s8 + $0x10] sm:$0xf]  ;;  %v6289_v21 = vld [vmem:[%s6221_s8 + $0x14] sm:$0x1]  ;;  %v5868_v33 = vld [vmem:[%s8307_s1 + $0x40] sm:$0xff] }
  0x1b   : > { %v6256_v50 = vunpack.c.l.b16 %v332_v45  ;;  %v6258_v51 = vunpack.c.l.b16 %v342_v46  ;;  %v447_v52 = vrot.slane %v446_v40, 4  ;;  %v518_v53 = vor.u32 %v517_v43, %v514_v42  ;;  %v264_v27 = vld [vmem:[%s6221_s8 + $0x48] sm:$0xf]  ;;  %v5915_v40 = vld [vmem:[%s8307_s1 + $0x138] sm:$0xff]  ;;  %v265_v42 = vld [vmem:[%s6221_s8 + $0x4c] sm:$0xf] }
  0x1c   : > { %836 = vmatpush.bf16.msra.mxu0 %v5871_v35  ;;  %6071 = vmatpush.bf16.msra.mxu1 %v5871_v35  ;;  %v457_v55 = vrot.slane %v456_v47, 4  ;;  %v523_v56 = vrot.slane %v521_v44, 5  ;;  %v527_v57 = vrot.slane %v525_v48, 4  ;;  %v531_v58 = vshll.u32 %v308_v41, 16  ;;  %v5883_v45 = vld [vmem:[%s8307_s1 + $0xb8] sm:$0xff] }
  0x1d   : > { %6072 = vmatpush.bf16.msra.mxu2 %v5871_v35  ;;  %6073 = vmatpush.bf16.msra.mxu3 %v5871_v35  ;;  %v752_v59 = vpack.c.b16 %v6258_v51, %v6256_v50  ;;  %v452_v60 = vsel %vm6243_vm2, %v447_v52, %v451_v32  ;;  %v519_v61 = vrot.slane %v518_v53, 4  ;;  %v608_v63 = vshrl.u32 %v276_v49, 16 }
  0x1e   : > { %v462_v0 = vsel %vm6243_vm2, %v457_v55, %v461_v39  ;;  %v6270_v1 = vunpack.c.l.b16 %v452_v60  ;;  %v528_v2 = vor.u32 %v527_v57, %v523_v56  ;;  %v533_v3 = vrot.slane %v531_v58, 5  ;;  %v5907_v60 = vld [vmem:[%s8307_s1 + $0xf8] sm:$0xff] }
  0x1f   : > { %v6274_v8 = vunpack.c.l.b16 %v462_v0  ;;  %v524_v9 = vsel %vm6243_vm2, %v519_v61, %v523_v56  ;;  %v610_v10 = vrot.slane %v608_v63, 4  ;;  %v611_v11 = vshll.u32 %v276_v49, 16  ;;  %v306_v49 = vld [vmem:[%s6221_s8 + $0x50] sm:$0x1]  ;;  %v270_v56 = vld [vmem:[%s6221_s8 + $0x6c] sm:$0xf] }
  0x20   : > { %837 = vmatpush.bf16.msra.mxu0 %v5870_v54  ;;  %6074 = vmatpush.bf16.msra.mxu1 %v5870_v54  ;;  %v529_v13 = vrot.slane %v528_v2, 4  ;;  %v6281_v14 = vunpack.c.l.b16 %v524_v9  ;;  %v617_v15 = vshll.u32 %v277_v62, 16  ;;  %v621_v16 = vshrl.u32 %v277_v62, 16  ;;  %v5914_v0 = vld [vmem:[%s8307_s1 + $0x130] sm:$0xff] }
  0x21   : > { %6075 = vmatpush.bf16.msra.mxu2 %v5870_v54  ;;  %6076 = vmatpush.bf16.msra.mxu3 %v5870_v54  ;;  %v757_v18 = vpack.c.b16 %v6274_v8, %v6270_v1  ;;  %v613_v19 = vrot.slane %v611_v11, 5  ;;  %v627_v20 = vshll.u32 %v312_v6, 16  ;;  %v344_v22 = vshrl.u32 %v254_v7, 16  ;;  %v5882_v9 = vld [vmem:[%s8307_s1 + $0xb0] sm:$0xff] }
  0x22   : > { %v534_v23 = vsel %vm6243_vm2, %v529_v13, %v533_v3  ;;  %v619_v24 = vrot.slane %v617_v15, 5  ;;  %v623_v25 = vrot.slane %v621_v16, 4  ;;  %v347_v26 = vshll.u32 %v254_v7, 16  ;;  %v5867_v7 = vld [vmem:[%s8307_s1 + $0x38] sm:$0xff]  ;;  %v271_v13 = vld [vmem:[%s6221_s8 + $0x70] sm:$0xf] }
  0x23   : > { %v737_v28 = vunpack.c.l.b16 %v534_v23  ;;  %v614_v29 = vor.u32 %v613_v19, %v610_v10  ;;  %v629_v31 = vrot.slane %v627_v20, 5  ;;  %v346_v32 = vrot.slane %v344_v22, 4  ;;  %v309_v22 = vld [vmem:[%s6221_s8 + $0x74] sm:$0x1]  ;;  %v278_v23 = vld [vmem:[%s6221_s8 + $0x9c] sm:$0xf] }
  0x24   : > { %838 = vmatpush.bf16.msra.mxu0 %v5869_v12  ;;  %6077 = vmatpush.bf16.msra.mxu1 %v5869_v12  ;;  %v624_v34 = vor.u32 %v623_v25, %v619_v24  ;;  %v349_v35 = vrot.slane %v347_v26, 5  ;;  %v353_v36 = vshll.u32 %v6284_v17, 16  ;;  %v357_v37 = vshrl.u32 %v6284_v17, 16 }
  0x25   : > { %6078 = vmatpush.bf16.msra.mxu2 %v5869_v12  ;;  %6079 = vmatpush.bf16.msra.mxu3 %v5869_v12  ;;  %v760_v38 = vpack.c.b16 %v737_v28, %v6281_v14  ;;  %v615_v39 = vrot.slane %v614_v29, 4  ;;  %v363_v41 = vshll.u32 %v6289_v21, 16  ;;  %v464_v43 = vshrl.u32 %v264_v27, 16  ;;  %v5866_v28 = vld [vmem:[%s8307_s1 + $0x30] sm:$0xff] }
  0x26   : > { %v625_v44 = vrot.slane %v624_v34, 4  ;;  %v350_v46 = vor.u32 %v349_v35, %v346_v32  ;;  %v355_v47 = vrot.slane %v353_v36, 5  ;;  %v359_v48 = vrot.slane %v357_v37, 4  ;;  %v5913_v34 = vld [vmem:[%s8307_s1 + $0x128] sm:$0xff] }
  0x27   : > { %v620_v52 = vsel %vm6243_vm2, %v615_v39, %v619_v24  ;;  %v365_v53 = vrot.slane %v363_v41, 5  ;;  %v466_v54 = vrot.slane %v464_v43, 4  ;;  %v467_v55 = vshll.u32 %v264_v27, 16  ;;  %v279_v27 = vld [vmem:[%s6221_s8 + $0xa0] sm:$0xf]  ;;  %v5881_v35 = vld [vmem:[%s8307_s1 + $0xa8] sm:$0xff] }
  0x28   : > { %839 = vmatpush.bf16.msra.mxu0 %v5868_v33  ;;  %6080 = vmatpush.bf16.msra.mxu1 %v5868_v33  ;;  %v630_v57 = vsel %vm6243_vm2, %v625_v44, %v629_v31  ;;  %v744_v58 = vunpack.c.l.b16 %v620_v52  ;;  %v351_v61 = vrot.slane %v350_v46, 4  ;;  %v360_v62 = vor.u32 %v359_v48, %v355_v47  ;;  %v5865_v52 = vld [vmem:[%s8307_s1 + $0x28] sm:$0xff] }
  0x29   : > { %6081 = vmatpush.bf16.msra.mxu2 %v5868_v33  ;;  %6082 = vmatpush.bf16.msra.mxu3 %v5868_v33  ;;  %v745_v63 = vunpack.c.l.b16 %v630_v57  ;;  %v469_v2 = vrot.slane %v467_v55, 5  ;;  %v473_v3 = vshll.u32 %v265_v42, 16  ;;  %v477_v6 = vshrl.u32 %v265_v42, 16 }
  0x2a   : > { %v356_v10 = vsel %vm6243_vm2, %v351_v61, %v355_v47  ;;  %v361_v11 = vrot.slane %v360_v62, 4  ;;  %v483_v12 = vshll.u32 %v306_v49, 16  ;;  %v536_v14 = vshrl.u32 %v270_v56, 16 }
  0x2b   : > { %840 = vmatmul.bf16.vlgmr.msra.gmra.mxu0 %v752_v59  ;;  %865 = vmatmul.bf16.vlgmr.msra.gmra.mxu1 %v757_v18  ;;  %v764_v15 = vpack.c.b16 %v745_v63, %v744_v58  ;;  %v6335_v16 = vunpack.c.l.b16 %v356_v10  ;;  %v470_v19 = vor.u32 %v469_v2, %v466_v54  ;;  %v475_v20 = vrot.slane %v473_v3, 5  ;;  %v5906_v59 = vld [vmem:[%s8307_s1 + $0xf0] sm:$0xff]  ;;  %v5880_v58 = vld [vmem:[%s8307_s1 + $0xa0] sm:$0xff]  ;;  %v6379_v2 = vld [vmem:[%s6221_s8 + $0x1c] sm:$0xf] }
  0x2c   : > { %2443 = vmatpush.bf16.msrb.mxu0 %v5915_v40  ;;  %880 = vmatmul.bf16.vlgmr.msra.gmra.mxu2 %v760_v38  ;;  %v366_v24 = vsel %vm6243_vm2, %v361_v11, %v365_v53  ;;  %v479_v25 = vrot.slane %v477_v6, 4  ;;  %v485_v50 = vrot.slane %v483_v12, 5  ;;  %v538_v51 = vrot.slane %v536_v14, 4  ;;  %v313_v40 = vld [vmem:[%s6221_s8 + $0xa4] sm:$0x1] }
  0x2d   : > { %1446 = vmatpush.bf16.msrb.mxu2 %v5883_v45  ;;  %1761 = vmatpush.bf16.msrb.mxu3 %v5907_v60  ;;  %v6344_v1 = vunpack.c.l.b16 %v366_v24  ;;  %v471_v8 = vrot.slane %v470_v19, 4  ;;  %v539_v18 = vshll.u32 %v270_v56, 16  ;;  %v545_v26 = vshll.u32 %v271_v13, 16  ;;  %v5905_v45 = vld [vmem:[%s8307_s1 + $0xe8] sm:$0xff]  ;;  %v256_v53 = vld [vmem:[%s6221_s8 + $0x18] sm:$0xf] }
  0x2e   : > { %900 = vmatmul.bf16.vlgmr.msra.gmra.mxu3 %v764_v15  ;;  %1065 = vmatpush.bf16.msrb.mxu1 %v5867_v7  ;;  %v480_v29 = vor.u32 %v479_v25, %v475_v20  ;;  %v549_v31 = vshrl.u32 %v271_v13, 16  ;;  %v555_v32 = vshll.u32 %v309_v22, 16  ;;  %v632_v33 = vshrl.u32 %v278_v23, 16  ;;  %v5912_v60 = vld [vmem:[%s8307_s1 + $0x120] sm:$0xff] }
  0x2f   : > { %v753_v36 = vpack.c.b16 %v6344_v1, %v6335_v16  ;;  %v476_v37 = vsel %vm6243_vm2, %v471_v8, %v475_v20  ;;  %v541_v38 = vrot.slane %v539_v18, 5  ;;  %v547_v39 = vrot.slane %v545_v26, 5  ;;  %v5904_v10 = vld [vmem:[%s8307_s1 + $0xe0] sm:$0xff]  ;;  %v266_v20 = vld [vmem:[%s6221_s8 + $0x54] sm:$0xf] }
  0x30   : > { %2444 = vmatpush.bf16.msrb.mxu0 %v5914_v0  ;;  %v481_v41 = vrot.slane %v480_v29, 4  ;;  %v6361_v42 = vunpack.c.l.b16 %v476_v37  ;;  %v551_v43 = vrot.slane %v549_v31, 4  ;;  %v557_v44 = vrot.slane %v555_v32, 5  ;;  %v5864_v14 = vld [vmem:[%s8307_s1 + $0x20] sm:$0xff]  ;;  %v5903_v32 = vld [vmem:[%s8307_s1 + $0xd8] sm:$0xff] }
  0x31   : > { %1447 = vmatpush.bf16.msrb.mxu2 %v5882_v9  ;;  %1762 = vmatpush.bf16.msrb.mxu3 %v5906_v59  ;;  %v542_v46 = vor.u32 %v541_v38, %v538_v51  ;;  %v634_v47 = vrot.slane %v632_v33, 4  ;;  %v635_v48 = vshll.u32 %v278_v23, 16  ;;  %v641_v49 = vshll.u32 %v279_v27, 16  ;;  %v6391_v15 = vld [vmem:[%s6221_s8 + $0x20] sm:$0x1]  ;;  %v5911_v51 = vld [vmem:[%s8307_s1 + $0x118] sm:$0xff] }
  0x32   : > { %1066 = vmatpush.bf16.msrb.mxu1 %v5866_v28  ;;  %v486_v54 = vsel %vm6243_vm2, %v481_v41, %v485_v50  ;;  %v552_v55 = vor.u32 %v551_v43, %v547_v39  ;;  %v645_v56 = vshrl.u32 %v279_v27, 16  ;;  %v651_v57 = vshll.u32 %v313_v40, 16  ;;  %v5879_v50 = vld [vmem:[%s8307_s1 + $0x98] sm:$0xff] }
  0x33   : > { %v733_v61 = vunpack.c.l.b16 %v486_v54  ;;  %v543_v62 = vrot.slane %v542_v46, 4  ;;  %v637_v63 = vrot.slane %v635_v48, 5  ;;  %v643_v0 = vrot.slane %v641_v49, 5  ;;  %v267_v38 = vld [vmem:[%s6221_s8 + $0x58] sm:$0xf]  ;;  %v5878_v46 = vld [vmem:[%s8307_s1 + $0x90] sm:$0xff] }
  0x34   : > { %2445 = vmatpush.bf16.msrb.mxu0 %v5913_v34  ;;  %v553_v3 = vrot.slane %v552_v55, 4  ;;  %v647_v6 = vrot.slane %v645_v56, 4  ;;  %v653_v7 = vrot.slane %v651_v57, 5  ;;  %v368_v9 = vshrl.u32 %v256_v53, 16  ;;  %v5863_v40 = vld [vmem:[%s8307_s1 + $0x18] sm:$0xff] }
  0x35   : > { %1448 = vmatpush.bf16.msrb.mxu2 %v5881_v35  ;;  %1763 = vmatpush.bf16.msrb.mxu3 %v5905_v45  ;;  %v758_v11 = vpack.c.b16 %v733_v61, %v6361_v42  ;;  %v548_v12 = vsel %vm6243_vm2, %v543_v62, %v547_v39  ;;  %v638_v13 = vor.u32 %v637_v63, %v634_v47  ;;  %v371_v19 = vshll.u32 %v256_v53, 16  ;;  %v307_v39 = vld [vmem:[%s6221_s8 + $0x5c] sm:$0x1]  ;;  %v272_v45 = vld [vmem:[%s6221_s8 + $0x78] sm:$0xf] }
  0x36   : > { %1067 = vmatpush.bf16.msrb.mxu1 %v5865_v52  ;;  %v558_v22 = vsel %vm6243_vm2, %v553_v3, %v557_v44  ;;  %v738_v23 = vunpack.c.l.b16 %v548_v12  ;;  %v648_v24 = vor.u32 %v647_v6, %v643_v0  ;;  %v370_v25 = vrot.slane %v368_v9, 4  ;;  %v273_v16 = vld [vmem:[%s6221_s8 + $0x7c] sm:$0xf]  ;;  %v310_v3 = vld [vmem:[%s6221_s8 + $0x80] sm:$0x1] }
  0x37   : > { %v739_v59 = vunpack.c.l.b16 %v558_v22  ;;  %v639_v8 = vrot.slane %v638_v13, 4  ;;  %v373_v18 = vrot.slane %v371_v19, 5  ;;  %v377_v26 = vshll.u32 %v6379_v2, 16 }
  0x38   : > { %2446 = vmatpush.bf16.msrb.mxu0 %v5912_v60  ;;  %v649_v27 = vrot.slane %v648_v24, 4  ;;  %v381_v28 = vshrl.u32 %v6379_v2, 16  ;;  %v387_v29 = vshll.u32 %v6391_v15, 16  ;;  %v488_v31 = vshrl.u32 %v266_v20, 16 }
  0x39   : > { %1449 = vmatpush.bf16.msrb.mxu2 %v5880_v58  ;;  %1764 = vmatpush.bf16.msrb.mxu3 %v5904_v10  ;;  %v761_v33 = vpack.c.b16 %v739_v59, %v738_v23  ;;  %v644_v34 = vsel %vm6243_vm2, %v639_v8, %v643_v0  ;;  %v374_v35 = vor.u32 %v373_v18, %v370_v25  ;;  %v379_v37 = vrot.slane %v377_v26, 5 }
  0x3a   : > { %1068 = vmatpush.bf16.msrb.mxu1 %v5864_v14  ;;  %v654_v41 = vsel %vm6243_vm2, %v649_v27, %v653_v7  ;;  %v746_v42 = vunpack.c.l.b16 %v644_v34  ;;  %v383_v43 = vrot.slane %v381_v28, 4  ;;  %v389_v44 = vrot.slane %v387_v29, 5  ;;  %v258_v27 = vld [vmem:[%s6221_s8 + $0x24] sm:$0xf]  ;;  %v5910_v34 = vld [vmem:[%s8307_s1 + $0x110] sm:$0xff] }
  0x3b   : > { %845 = vmatmul.bf16.gmra.mxu0 %v753_v36  ;;  %870 = vmatmul.bf16.gmra.mxu1 %v758_v11  ;;  %v747_v47 = vunpack.c.l.b16 %v654_v41  ;;  %v375_v48 = vrot.slane %v374_v35, 4  ;;  %v490_v49 = vrot.slane %v488_v31, 4  ;;  %v491_v52 = vshll.u32 %v266_v20, 16  ;;  %v5862_v36 = vld [vmem:[%s8307_s1 + $0x10] sm:$0xff]  ;;  %v280_v11 = vld [vmem:[%s6221_s8 + $0xa8] sm:$0xf] }
  0x3c   : > { %2447 = vmatpush.bf16.msrb.mxu0 %v5911_v51  ;;  %885 = vmatmul.bf16.gmra.mxu2 %v761_v33  ;;  %v384_v53 = vor.u32 %v383_v43, %v379_v37  ;;  %v497_v54 = vshll.u32 %v267_v38, 16  ;;  %v501_v55 = vshrl.u32 %v267_v38, 16  ;;  %v507_v56 = vshll.u32 %v307_v39, 16  ;;  %v281_v20 = vld [vmem:[%s6221_s8 + $0xac] sm:$0xf]  ;;  %v5902_v33 = vld [vmem:[%s8307_s1 + $0xd0] sm:$0xff] }
  0x3d   : > { %1450 = vmatpush.bf16.msrb.mxu2 %v5879_v50  ;;  %1765 = vmatpush.bf16.msrb.mxu3 %v5903_v32  ;;  %v765_v57 = vpack.c.b16 %v747_v47, %v746_v42  ;;  %v380_v58 = vsel %vm6243_vm2, %v375_v48, %v379_v37  ;;  %v493_v60 = vrot.slane %v491_v52, 5  ;;  %v560_v1 = vshrl.u32 %v272_v45, 16  ;;  %v314_v50 = vld [vmem:[%s6221_s8 + $0xb0] sm:$0x1]  ;;  %v5861_v51 = vld [vmem:[%s8307_s1 + $0x8] sm:$0xff] }
  0x3e   : > { %1069 = vmatpush.bf16.msrb.mxu1 %v5863_v40  ;;  %v385_v61 = vrot.slane %v384_v53, 4  ;;  %v6430_v62 = vunpack.c.l.b16 %v380_v58  ;;  %v499_v63 = vrot.slane %v497_v54, 5  ;;  %v503_v0 = vrot.slane %v501_v55, 4  ;;  %v5877_v35 = vld [vmem:[%s8307_s1 + $0x88] sm:$0xff]  ;;  %v5876_v54 = vld [vmem:[%s8307_s1 + $0x80] sm:$0xff] }
  0x3f   : > { %905 = vmatmul.bf16.gmra.mxu3 %v765_v57  ;;  %v494_v6 = vor.u32 %v493_v60, %v490_v49  ;;  %v509_v7 = vrot.slane %v507_v56, 5  ;;  %v562_v9 = vrot.slane %v560_v1, 4  ;;  %v563_v10 = vshll.u32 %v272_v45, 16  ;;  %v5860_v45 = vld [vmem:[%s8307_s1] sm:$0xff]  ;;  %v5909_v53 = vld [vmem:[%s8307_s1 + $0x108] sm:$0xff] }
  0x40   : > { %v390_v12 = vsel %vm6243_vm2, %v385_v61, %v389_v44  ;;  %v504_v13 = vor.u32 %v503_v0, %v499_v63  ;;  %v569_v14 = vshll.u32 %v273_v16, 16  ;;  %v573_v19 = vshrl.u32 %v273_v16, 16  ;;  %2448 = vmatpush.bf16.msrb.mxu0 %v5910_v34  ;;  %v6474_v60 = vld [vmem:[%s6221_s8 + $0x28] sm:$0xf]  ;;  %v6477_v16 = vld [vmem:[%s6221_s8 + $0x2c] sm:$0x1] }
  0x41   : > { %1451 = vmatpush.bf16.msrb.mxu2 %v5878_v46  ;;  %v6437_v22 = vunpack.c.l.b16 %v390_v12  ;;  %v495_v23 = vrot.slane %v494_v6, 4  ;;  %v565_v24 = vrot.slane %v563_v10, 5  ;;  %v579_v25 = vshll.u32 %v310_v3, 16  ;;  %1766 = vmatpush.bf16.msrb.mxu3 %v5902_v33  ;;  %v5901_v46 = vld [vmem:[%s8307_s1 + $0xc8] sm:$0xff] }
  0x42   : > { %1070 = vmatpush.bf16.msrb.mxu1 %v5862_v36  ;;  %v505_v59 = vrot.slane %v504_v13, 4  ;;  %v571_v8 = vrot.slane %v569_v14, 5  ;;  %v575_v18 = vrot.slane %v573_v19, 4  ;;  %v656_v26 = vshrl.u32 %v280_v11, 16 }
  0x43   : > { %v754_v28 = vpack.c.b16 %v6437_v22, %v6430_v62  ;;  %v500_v29 = vsel %vm6243_vm2, %v495_v23, %v499_v63  ;;  %v566_v31 = vor.u32 %v565_v24, %v562_v9  ;;  %v581_v32 = vrot.slane %v579_v25, 5  ;;  %v274_v63 = vld [vmem:[%s6221_s8 + $0x84] sm:$0xf]  ;;  %v275_v22 = vld [vmem:[%s6221_s8 + $0x88] sm:$0xf] }
  0x44   : > { %v510_v37 = vsel %vm6243_vm2, %v505_v59, %v509_v7  ;;  %v734_v38 = vunpack.c.l.b16 %v500_v29  ;;  %v576_v39 = vor.u32 %v575_v18, %v571_v8  ;;  %v658_v40 = vrot.slane %v656_v26, 4  ;;  %v5900_v9 = vld [vmem:[%s8307_s1 + $0xc0] sm:$0xff]  ;;  %2449 = vmatpush.bf16.msrb.mxu0 %v5909_v53  ;;  %v311_v18 = vld [vmem:[%s6221_s8 + $0x8c] sm:$0x1] }
  0x45   : > { %v735_v41 = vunpack.c.l.b16 %v510_v37  ;;  %v567_v42 = vrot.slane %v566_v31, 4  ;;  %v659_v43 = vshll.u32 %v280_v11, 16  ;;  %v665_v44 = vshll.u32 %v281_v20, 16  ;;  %1452 = vmatpush.bf16.msrb.mxu2 %v5877_v35  ;;  %1767 = vmatpush.bf16.msrb.mxu3 %v5901_v46 }
  0x46   : > { %1071 = vmatpush.bf16.msrb.mxu1 %v5861_v51  ;;  %v577_v47 = vrot.slane %v576_v39, 4  ;;  %v669_v48 = vshrl.u32 %v281_v20, 16  ;;  %v675_v49 = vshll.u32 %v314_v50, 16  ;;  %v392_v52 = vshrl.u32 %v258_v27, 16 }
  0x47   : > { %v759_v55 = vpack.c.b16 %v735_v41, %v734_v38  ;;  %v572_v56 = vsel %vm6243_vm2, %v567_v42, %v571_v8  ;;  %v661_v57 = vrot.slane %v659_v43, 5  ;;  %v667_v58 = vrot.slane %v665_v44, 5  ;;  %v283_v42 = vld [vmem:[%s6221_s8 + $0xb8] sm:$0xf] }
  0x48   : > { %v582_v1 = vsel %vm6243_vm2, %v577_v47, %v581_v32  ;;  %v740_v36 = vunpack.c.l.b16 %v572_v56  ;;  %v671_v61 = vrot.slane %v669_v48, 4  ;;  %v677_v62 = vrot.slane %v675_v49, 5  ;;  %v315_v48 = vld [vmem:[%s6221_s8 + $0xbc] sm:$0x1]  ;;  %v260_v49 = vld [vmem:[%s6221_s8 + $0x30] sm:$0xf] }
  0x49   : > { %v741_v0 = vunpack.c.l.b16 %v582_v1  ;;  %v662_v3 = vor.u32 %v661_v57, %v658_v40  ;;  %v394_v6 = vrot.slane %v392_v52, 4  ;;  %v395_v7 = vshll.u32 %v258_v27, 16  ;;  %1453 = vmatpush.bf16.msrb.mxu2 %v5876_v54  ;;  %1768 = vmatpush.bf16.msrb.mxu3 %v5900_v9 }
  0x4a   : > { %1072 = vmatpush.bf16.msrb.mxu1 %v5860_v45  ;;  %v672_v10 = vor.u32 %v671_v61, %v667_v58  ;;  %v401_v11 = vshll.u32 %v6474_v60, 16  ;;  %v405_v12 = vshrl.u32 %v6474_v60, 16  ;;  %v411_v13 = vshll.u32 %v6477_v16, 16  ;;  %v5947_v61 = vld [vmem:[%s8307_s1 + $0x1b8] sm:$0xff] }
  0x4b   : > { %850 = vmatmul.bf16.gmra.mxu0 %v754_v28  ;;  %875 = vmatmul.bf16.gmra.mxu1 %v759_v55  ;;  %v762_v14 = vpack.c.b16 %v741_v0, %v740_v36  ;;  %v663_v19 = vrot.slane %v662_v3, 4  ;;  %v397_v20 = vrot.slane %v395_v7, 5  ;;  %v584_v23 = vshrl.u32 %v274_v63, 16  ;;  %v282_v28 = vld [vmem:[%s6221_s8 + $0xb4] sm:$0xf]  ;;  %v5908_v36 = vld [vmem:[%s8307_s1 + $0x100] sm:$0xff] }
  0x4c   : > { %v673_v24 = vrot.slane %v672_v10, 4  ;;  %v403_v25 = vrot.slane %v401_v11, 5  ;;  %v407_v50 = vrot.slane %v405_v12, 4  ;;  %v413_v51 = vrot.slane %v411_v13, 5  ;;  %v5923_v7 = vld [vmem:[%s8307_s1 + $0x178] sm:$0xff]  ;;  %2450 = vmatpush.bf16.msrb.mxu0 %v5908_v36 }
  0x4d   : > { %890 = vmatmul.bf16.gmra.mxu2 %v762_v14  ;;  %v668_v59 = vsel %vm6243_vm2, %v663_v19, %v667_v58  ;;  %v398_v8 = vor.u32 %v397_v20, %v394_v6  ;;  %v586_v26 = vrot.slane %v584_v23, 4  ;;  %v587_v27 = vshll.u32 %v274_v63, 16  ;;  %v6517_v13 = vld [vmem:[%s6221_s8 + $0x34] sm:$0xf]  ;;  %v6520_v23 = vld [vmem:[%s6221_s8 + $0x38] sm:$0x1] }
  0x4e   : > { %v678_v29 = vsel %vm6243_vm2, %v673_v24, %v677_v62  ;;  %v748_v31 = vunpack.c.l.b16 %v668_v59  ;;  %v408_v32 = vor.u32 %v407_v50, %v403_v25  ;;  %v593_v33 = vshll.u32 %v275_v22, 16  ;;  %v5955_v62 = vld [vmem:[%s8307_s1 + $0x1f8] sm:$0xff]  ;;  %3184 = vmatpush.bf16.msra.mxu2 %v5947_v61  ;;  %2869 = vmatpush.bf16.msra.mxu1 %v5923_v7  ;;  %v5844_v50 = vld [vmem:[%s6221_s8] sm:$0xff]  ;;  %v5342_v36 = vld [vmem:[%s6221_s8 + $0x10] sm:$0xf] }
  0x4f   : > { %v749_v34 = vunpack.c.l.b16 %v678_v29  ;;  %v399_v35 = vrot.slane %v398_v8, 4  ;;  %v589_v37 = vrot.slane %v587_v27, 5  ;;  %v597_v38 = vshrl.u32 %v275_v22, 16  ;;  %3866 = vmatpush.bf16.msra.mxu3 %v5955_v62 }
  0x50   : > { %v409_v39 = vrot.slane %v408_v32, 4  ;;  %v595_v40 = vrot.slane %v593_v33, 5  ;;  %v603_v41 = vshll.u32 %v311_v18, 16  ;;  %v680_v43 = vshrl.u32 %v282_v28, 16  ;;  %v1154_v32 = vld [vmem:[%s6221_s8] sm:$0xe] }
  0x51   : > { %v766_v44 = vpack.c.b16 %v749_v34, %v748_v31  ;;  %v404_v45 = vsel %vm6243_vm2, %v399_v35, %v403_v25  ;;  %v590_v46 = vor.u32 %v589_v37, %v586_v26  ;;  %v599_v47 = vrot.slane %v597_v38, 4 }
  0x52   : > { %v414_v52 = vsel %vm6243_vm2, %v409_v39, %v413_v51  ;;  %v726_v53 = vunpack.c.l.b16 %v404_v45  ;;  %v605_v54 = vrot.slane %v603_v41, 5  ;;  %v682_v55 = vrot.slane %v680_v43, 4  ;;  %v1155_v41 = vld [vmem:[%s6221_s8 + $0xc] sm:$0xe] }
  0x53   : > { %910 = vmatmul.bf16.gmra.mxu3 %v766_v44  ;;  %v727_v56 = vunpack.c.l.b16 %v414_v52  ;;  %v591_v57 = vrot.slane %v590_v46, 4  ;;  %v600_v58 = vor.u32 %v599_v47, %v595_v40  ;;  %v683_v1 = vshll.u32 %v282_v28, 16 }
  0x54   : > { %v689_v63 = vshll.u32 %v283_v42, 16  ;;  %v693_v0 = vshrl.u32 %v283_v42, 16  ;;  %v699_v3 = vshll.u32 %v315_v48, 16  ;;  %v416_v6 = vshrl.u32 %v260_v49, 16 }
  0x55   : > { %v755_v9 = vpack.c.b16 %v727_v56, %v726_v53  ;;  %v596_v10 = vsel %vm6243_vm2, %v591_v57, %v595_v40  ;;  %v601_v11 = vrot.slane %v600_v58, 4  ;;  %v685_v12 = vrot.slane %v683_v1, 5  ;;  %v5341_v1 = vld [vmem:[%s6221_s8 + $0xc] sm:$0xf]  ;;  %v7803_v53 = vld [vmem:[%s8311_s5] sm:$0x3] }
  0x56   : > { %v742_v14 = vunpack.c.l.b16 %v596_v10  ;;  %v691_v19 = vrot.slane %v689_v63, 5  ;;  %v695_v20 = vrot.slane %v693_v0, 4  ;;  %v701_v22 = vrot.slane %v699_v3, 5 }
  0x57   : > { %v606_v24 = vsel %vm6243_vm2, %v601_v11, %v605_v54  ;;  %v686_v25 = vor.u32 %v685_v12, %v682_v55  ;;  %v418_v51 = vrot.slane %v416_v6, 4  ;;  %v419_v59 = vshll.u32 %v260_v49, 16  ;;  %v5963_v12 = vld [vmem:[%s8307_s1 + $0x238] sm:$0xff] }
  0x58   : > { %v743_v8 = vunpack.c.l.b16 %v606_v24  ;;  %v696_v18 = vor.u32 %v695_v20, %v691_v19  ;;  %v425_v26 = vshll.u32 %v6517_v13, 16  ;;  %v429_v27 = vshrl.u32 %v6517_v13, 16  ;;  %4292 = vmatpush.bf16.msra.mxu0 %v5963_v12 }
  0x59   : > { %v687_v28 = vrot.slane %v686_v25, 4  ;;  %v421_v29 = vrot.slane %v419_v59, 5  ;;  %v435_v31 = vshll.u32 %v6520_v23, 16  ;;  %v5133_v45 = vrot.slane %v1154_v32, 9 }
  0x5a   : > { %v763_v33 = vpack.c.b16 %v743_v8, %v742_v14  ;;  %v697_v34 = vrot.slane %v696_v18, 4  ;;  %v427_v35 = vrot.slane %v425_v26, 5  ;;  %v431_v37 = vrot.slane %v429_v27, 4  ;;  %v5845_v18 = vld [vmem:[%s6221_s8 + $0xc] sm:$0xff] }
  0x5b   : > { %855 = vmatmul.bf16.gmra.mxu0 %v755_v9  ;;  %v692_v38 = vsel %vm6243_vm2, %v687_v28, %v691_v19  ;;  %1073 = vmatmul.bf16.vlgmr.msrb.gmra.mxu1 %v5844_v50  ;;  %v422_v39 = vor.u32 %v421_v29, %v418_v51  ;;  %v437_v40 = vrot.slane %v435_v31, 5  ;;  %v1207_v48 = vrot.slane %v6225_v4, 5  ;;  %v5343_v19 = vld [vmem:[%s6221_s8 + $0x14] sm:$0x1]  ;;  %v5344_v29 = vld [vmem:[%s6221_s8 + $0x18] sm:$0xf] }
  0x5c   : > { %v702_v42 = vsel %vm6243_vm2, %v697_v34, %v701_v22  ;;  %v750_v43 = vunpack.c.l.b16 %v692_v38  ;;  %v432_v44 = vor.u32 %v431_v37, %v427_v35  ;;  %v1210_v49 = vrot.slane %v6228_v5, 5 }
  0x5d   : > { %895 = vmatmul.bf16.gmra.mxu2 %v763_v33  ;;  %v751_v46 = vunpack.c.l.b16 %v702_v42  ;;  %v423_v47 = vrot.slane %v422_v39, 4  ;;  %v5134_v54 = vrot.slane %v1155_v41, 9  ;;  %v1214_v55 = vrot.slane %v6284_v17, 5  ;;  %v5345_v33 = vld [vmem:[%s6221_s8 + $0x1c] sm:$0xf] }
  0x5e   : > { %v433_v52 = vrot.slane %v432_v44, 4  ;;  %v1209_v57 = vrot.slane %v1207_v48, 4  ;;  %v1217_v58 = vrot.slane %v6289_v21, 5  ;;  %v1208_v62 = vsel %vm6537_vm5, %v5133_v45, %v1207_v48 }
  0x5f   : > { %v767_v56 = vpack.c.b16 %v751_v46, %v750_v43  ;;  %v428_v4 = vsel %vm6243_vm2, %v423_v47, %v427_v35  ;;  %v1215_v61 = vsel %vm6537_vm5, %v5134_v54, %v1214_v55  ;;  %v1216_v63 = vrot.slane %v1214_v55, 4  ;;  %v1156_v35 = vld [vmem:[%s6221_s8 + $0x18] sm:$0xe]  ;;  %v5884_v47 = vld [vmem:[%s6221_s8 + $0xc] sm:$0xff] }
  0x60   : > { %v438_v5 = vsel %vm6243_vm2, %v433_v52, %v437_v40  ;;  %v1211_v17 = vsel %vm6537_vm5, %v1209_v57, %v1210_v49  ;;  %v1336_v21 = vunpack.c.l.b16 %v1215_v61  ;;  %v1931_v0 = vshrl.u32 %v5341_v1, 16  ;;  %v5954_v61 = vld [vmem:[%s8307_s1 + $0x1f0] sm:$0xff] }
  0x61   : > { %v1934_v3 = vshll.u32 %v5341_v1, 16  ;;  %v1940_v6 = vshll.u32 %v5342_v36, 16  ;;  %v728_v7 = vunpack.c.l.b16 %v428_v4  ;;  %v729_v9 = vunpack.c.l.b16 %v438_v5  ;;  %v5346_v1 = vld [vmem:[%s6221_s8 + $0x20] sm:$0x1]  ;;  %v5946_v5 = vld [vmem:[%s8307_s1 + $0x1b0] sm:$0xff]  ;;  %3867 = vmatpush.bf16.msra.mxu3 %v5954_v61 }
  0x62   : > { %v1218_v10 = vsel %vm6537_vm5, %v1216_v63, %v1217_v58  ;;  %v1944_v11 = vshrl.u32 %v5342_v36, 16  ;;  %v1933_v20 = vrot.slane %v1931_v0, 4  ;;  %v1334_v24 = vunpack.c.l.b16 %v1208_v62  ;;  %v5922_v62 = vld [vmem:[%s8307_s1 + $0x170] sm:$0xff]  ;;  %3185 = vmatpush.bf16.msra.mxu2 %v5946_v5  ;;  %v5846_v0 = vld [vmem:[%s6221_s8 + $0x18] sm:$0xff] }
  0x63   : > { %915 = vmatmul.bf16.gmra.mxu3 %v767_v56  ;;  %v1337_v14 = vunpack.c.l.b16 %v1218_v10  ;;  %v1936_v22 = vrot.slane %v1934_v3, 5  ;;  %v1335_v25 = vunpack.c.l.b16 %v1211_v17  ;;  %v1942_v50 = vrot.slane %v1940_v6, 5  ;;  %2870 = vmatpush.bf16.msra.mxu1 %v5922_v62 }
  0x64   : > { %v1946_v51 = vrot.slane %v1944_v11, 4  ;;  %v756_v8 = vpack.c.b16 %v729_v9, %v728_v7  ;;  %v1950_v26 = vshll.u32 %v5343_v19, 16  ;;  %v1221_v32 = vrot.slane %v6379_v2, 5  ;;  %v1157_v11 = vld [vmem:[%s6221_s8 + $0x24] sm:$0xe] }
  0x65   : > { %v1367_v59 = vpack.c.b16 %v1337_v14, %v1336_v21  ;;  %v1937_v27 = vor.u32 %v1936_v22, %v1933_v20  ;;  %v1366_v31 = vpack.c.b16 %v1335_v25, %v1334_v24  ;;  %v1224_v37 = vrot.slane %v6391_v15, 5  ;;  %v5347_v14 = vld [vmem:[%s6221_s8 + $0x24] sm:$0xf]  ;;  %v5348_v22 = vld [vmem:[%s6221_s8 + $0x28] sm:$0xf] }
  0x66   : > { %v1947_v28 = vor.u32 %v1946_v51, %v1942_v50  ;;  %v1952_v34 = vrot.slane %v1950_v26, 5  ;;  %v1955_v38 = vshrl.u32 %v5344_v29, 16  ;;  %v5135_v41 = vrot.slane %v1156_v35, 9 }
  0x67   : > { %v1938_v39 = vrot.slane %v1937_v27, 4  ;;  %v1223_v42 = vrot.slane %v1221_v32, 4  ;;  %v1958_v43 = vshll.u32 %v5344_v29, 16  ;;  %v1964_v44 = vshll.u32 %v5345_v33, 16 }
  0x68   : > { %v1948_v40 = vrot.slane %v1947_v28, 4  ;;  %v1968_v45 = vshrl.u32 %v5345_v33, 16  ;;  %v1222_v2 = vsel %vm6537_vm5, %v5135_v41, %v1221_v32  ;;  %v1957_v54 = vrot.slane %v1955_v38, 4  ;;  %v5349_v38 = vld [vmem:[%s6221_s8 + $0x2c] sm:$0x1] }
  0x69   : > { %v1225_v46 = vsel %vm6537_vm5, %v1223_v42, %v1224_v37  ;;  %v1338_v48 = vunpack.c.l.b16 %v1222_v2  ;;  %v1943_v15 = vsel %vm6243_vm2, %v1938_v39, %v1942_v50  ;;  %v1960_v56 = vrot.slane %v1958_v43, 5  ;;  %v5962_v37 = vld [vmem:[%s8307_s1 + $0x230] sm:$0xff]  ;;  %v5847_v39 = vld [vmem:[%s6221_s8 + $0x24] sm:$0xff] }
  0x6a   : > { %v1339_v49 = vunpack.c.l.b16 %v1225_v46  ;;  %v1953_v52 = vsel %vm6243_vm2, %v1948_v40, %v1952_v34  ;;  %v1966_v57 = vrot.slane %v1964_v44, 5  ;;  %v1970_v58 = vrot.slane %v1968_v45, 4  ;;  %4293 = vmatpush.bf16.msra.mxu0 %v5962_v37  ;;  %v5355_v37 = vld [vmem:[%s6221_s8 + $0x44] sm:$0x1] }
  0x6b   : > { %860 = vmatmul.bf16.gmra.mxu0 %v756_v8  ;;  %1078 = vmatmul.bf16.gmra.mxu1 %v5845_v18  ;;  %v2331_v36 = vunpack.c.l.b16 %v1943_v15  ;;  %v2332_v4 = vunpack.c.l.b16 %v1953_v52  ;;  %v1961_v17 = vor.u32 %v1960_v56, %v1957_v54  ;;  %v1974_v21 = vshll.u32 %v5346_v1, 16  ;;  %v5885_v8 = vld [vmem:[%s6221_s8 + $0x18] sm:$0xff]  ;;  %v5350_v52 = vld [vmem:[%s6221_s8 + $0x30] sm:$0xf]  ;;  %v5351_v54 = vld [vmem:[%s6221_s8 + $0x34] sm:$0xf] }
  0x6c   : > { %v6576_v55 = vpack.c.b16 %v1339_v49, %v1338_v48  ;;  %v1971_v63 = vor.u32 %v1970_v58, %v1966_v57  ;;  %v1228_v10 = vrot.slane %v6474_v60, 5  ;;  %v1231_v12 = vrot.slane %v6477_v16, 5 }
  0x6d   : > { %1454 = vmatmul.bf16.vlgmr.msrb.gmra.mxu2 %v1366_v31  ;;  %v2363_v3 = vpack.c.b16 %v2332_v4, %v2331_v36  ;;  %v1962_v6 = vrot.slane %v1961_v17, 4  ;;  %v1976_v9 = vrot.slane %v1974_v21, 5  ;;  %v5136_v19 = vrot.slane %v1157_v11, 9  ;;  %v5945_v21 = vld [vmem:[%s8307_s1 + $0x1a8] sm:$0xff]  ;;  %v5352_v11 = vld [vmem:[%s6221_s8 + $0x38] sm:$0x1] }
  0x6e   : > { %v1972_v7 = vrot.slane %v1971_v63, 4  ;;  %v1230_v20 = vrot.slane %v1228_v10, 4  ;;  %v1979_v51 = vshrl.u32 %v5347_v14, 16  ;;  %v1982_v16 = vshll.u32 %v5347_v14, 16  ;;  %3186 = vmatpush.bf16.msra.mxu2 %v5945_v21 }
  0x6f   : > { %v1967_v24 = vsel %vm6243_vm2, %v1962_v6, %v1966_v57  ;;  %v1229_v60 = vsel %vm6537_vm5, %v5136_v19, %v1228_v10  ;;  %v1992_v27 = vshrl.u32 %v5348_v22, 16  ;;  %v1998_v43 = vshll.u32 %v5349_v38, 16  ;;  %v5886_v57 = vld [vmem:[%s6221_s8 + $0x24] sm:$0xff] }
  0x70   : > { %v1977_v25 = vsel %vm6243_vm2, %v1972_v7, %v1976_v9  ;;  %v1232_v50 = vsel %vm6537_vm5, %v1230_v20, %v1231_v12  ;;  %v1340_v18 = vunpack.c.l.b16 %v1229_v60  ;;  %v2333_v29 = vunpack.c.l.b16 %v1967_v24  ;;  %v5848_v12 = vld [vmem:[%s6221_s8 + $0x30] sm:$0xff]  ;;  %v5353_v24 = vld [vmem:[%s6221_s8 + $0x3c] sm:$0xf]  ;;  %v5961_v38 = vld [vmem:[%s8307_s1 + $0x228] sm:$0xff] }
  0x71   : > { %v1341_v26 = vunpack.c.l.b16 %v1232_v50  ;;  %v2334_v31 = vunpack.c.l.b16 %v1977_v25  ;;  %v1981_v32 = vrot.slane %v1979_v51, 4  ;;  %v1984_v33 = vrot.slane %v1982_v16, 5  ;;  %v5354_v25 = vld [vmem:[%s6221_s8 + $0x40] sm:$0xf]  ;;  %4294 = vmatpush.bf16.msra.mxu0 %v5961_v38  ;;  %v5360_v38 = vld [vmem:[%s6221_s8 + $0x58] sm:$0xf] }
  0x72   : > { %v1994_v35 = vrot.slane %v1992_v27, 4  ;;  %v1235_v44 = vrot.slane %v6517_v13, 5  ;;  %v2000_v46 = vrot.slane %v1998_v43, 5  ;;  %v1238_v48 = vrot.slane %v6520_v23, 5 }
  0x73   : > { %1769 = vmatmul.bf16.vlgmr.msrb.gmra.mxu3 %v5884_v47  ;;  %v6603_v28 = vpack.c.b16 %v1341_v26, %v1340_v18  ;;  %v2364_v40 = vpack.c.b16 %v2334_v31, %v2333_v29  ;;  %v1985_v41 = vor.u32 %v1984_v33, %v1981_v32  ;;  %v1158_v47 = vld [vmem:[%s6221_s8 + $0x30] sm:$0xe]  ;;  %v2003_v4 = vshrl.u32 %v5350_v52, 16 }
  0x74   : > { %v5137_v49 = vrot.slane %v1158_v47, 9  ;;  %v1237_v15 = vrot.slane %v1235_v44, 4  ;;  %v2012_v5 = vshll.u32 %v5351_v54, 16  ;;  %v2016_v61 = vshrl.u32 %v5351_v54, 16  ;;  %v5357_v54 = vld [vmem:[%s6221_s8 + $0x4c] sm:$0xf] }
  0x75   : > { %v1986_v45 = vrot.slane %v1985_v41, 4  ;;  %v2005_v6 = vrot.slane %v2003_v4, 4  ;;  %v2027_v16 = vshrl.u32 %v5353_v24, 16  ;;  %v2036_v18 = vshll.u32 %v5354_v25, 16 }
  0x76   : > { %v1236_v56 = vsel %vm6537_vm5, %v5137_v49, %v1235_v44  ;;  %v1239_v13 = vsel %vm6537_vm5, %v1237_v15, %v1238_v48  ;;  %v2014_v9 = vrot.slane %v2012_v5, 5  ;;  %v2018_v10 = vrot.slane %v2016_v61, 4  ;;  %v1159_v15 = vld [vmem:[%s6221_s8 + $0x3c] sm:$0xe] }
  0x77   : > { %v1342_v23 = vunpack.c.l.b16 %v1236_v56  ;;  %v1343_v36 = vunpack.c.l.b16 %v1239_v13  ;;  %v2040_v26 = vshrl.u32 %v5354_v25, 16  ;;  %v2029_v31 = vrot.slane %v2027_v16, 4  ;;  %v6099_v56 = vld [vmem:[%s6221_s8 + $0x44] sm:$0x1] }
  0x78   : > { %v2019_v20 = vor.u32 %v2018_v10, %v2014_v9  ;;  %v2038_v33 = vrot.slane %v2036_v18, 5  ;;  %v2046_v41 = vshll.u32 %v5355_v37, 16  ;;  %v1245_v13 = vrot.slane %v6099_v56, 5  ;;  %v5920_v25 = vld [vmem:[%s8307_s1 + $0x160] sm:$0xff]  ;;  %v5359_v37 = vld [vmem:[%s6221_s8 + $0x54] sm:$0xf] }
  0x79   : > { %v1370_v62 = vpack.c.b16 %v1343_v36, %v1342_v23  ;;  %v5888_v36 = vld [vmem:[%s6221_s8 + $0x3c] sm:$0xff]  ;;  %v2060_v61 = vshll.u32 %v5357_v54, 16 }
  0x7a   : > { %v2020_v50 = vrot.slane %v2019_v20, 4  ;;  %v2048_v49 = vrot.slane %v2046_v41, 5  ;;  %v6101_v41 = vld [vmem:[%s6221_s8 + $0x50] sm:$0x1] }
  0x7b   : > { %1083 = vmatmul.bf16.gmra.mxu1 %v5846_v0  ;;  %2451 = vmatmul.bf16.vlgmr.msrb.gmra.mxu0 %v2363_v3  ;;  %v5953_v0 = vld [vmem:[%s8307_s1 + $0x1e8] sm:$0xff] }
  0x7c   : > { %v5921_v3 = vld [vmem:[%s8307_s1 + $0x168] sm:$0xff]  ;;  %3868 = vmatpush.bf16.msra.mxu3 %v5953_v0 }
  0x7d   : > { %1459 = vmatmul.bf16.gmra.mxu2 %v1367_v59  ;;  %v1988_v59 = vshll.u32 %v5348_v22, 16  ;;  %2871 = vmatpush.bf16.msra.mxu1 %v5921_v3  ;;  %v2022_v22 = vshll.u32 %v5352_v11, 16  ;;  %v2062_v11 = vrot.slane %v2060_v61, 5 }
  0x7f   : > { %v1990_v34 = vrot.slane %v1988_v59, 5  ;;  %v2024_v51 = vrot.slane %v2022_v22, 5  ;;  %v5887_v59 = vld [vmem:[%s6221_s8 + $0x30] sm:$0xff]  ;;  %v5944_v22 = vld [vmem:[%s8307_s1 + $0x1a0] sm:$0xff] }
  0x80   : > { %3187 = vmatpush.bf16.msra.mxu2 %v5944_v22 }
  0x81   : > { %v1995_v42 = vor.u32 %v1994_v35, %v1990_v34  ;;  %v1991_v58 = vsel %vm6243_vm2, %v1986_v45, %v1990_v34  ;;  %v2025_v29 = vsel %vm6243_vm2, %v2020_v50, %v2024_v51  ;;  %v2042_v34 = vrot.slane %v2040_v26, 4  ;;  %v5850_v50 = vld [vmem:[%s6221_s8 + $0x48] sm:$0xff]  ;;  %2872 = vmatpush.bf16.msra.mxu1 %v5920_v25 }
  0x82   : > { %v2335_v17 = vunpack.c.l.b16 %v1991_v58 }
  0x83   : > { %1774 = vmatmul.bf16.gmra.mxu3 %v5885_v8  ;;  %v1996_v2 = vrot.slane %v1995_v42, 4  ;;  %v2030_v8 = vshll.u32 %v5353_v24, 16  ;;  %v5849_v42 = vld [vmem:[%s6221_s8 + $0x3c] sm:$0xff] }
  0x84   : > { %v5952_v24 = vld [vmem:[%s8307_s1 + $0x1e0] sm:$0xff] }
  0x85   : > { %v2001_v1 = vsel %vm6243_vm2, %v1996_v2, %v2000_v46  ;;  %v2032_v32 = vrot.slane %v2030_v8, 5  ;;  %v6098_v2 = vld [vmem:[%s6221_s8 + $0x40] sm:$0xf]  ;;  %3869 = vmatpush.bf16.msra.mxu3 %v5952_v24  ;;  %v6102_v24 = vld [vmem:[%s6221_s8 + $0x58] sm:$0xf] }
  0x86   : > { %v2336_v63 = vunpack.c.l.b16 %v2001_v1  ;;  %v1242_v46 = vrot.slane %v6098_v2, 5  ;;  %v1256_v25 = vrot.slane %v6102_v24, 5 }
  0x88   : > { %v2365_v14 = vpack.c.b16 %v2336_v63, %v2335_v17  ;;  %v1244_v58 = vrot.slane %v1242_v46, 4  ;;  %v2064_v17 = vshrl.u32 %v5357_v54, 16  ;;  %v2088_v54 = vshrl.u32 %v5360_v38, 16 }
  0x8a   : > { %v1246_v3 = vsel %vm6537_vm5, %v1244_v58, %v1245_v13 }
  0x8b   : > { %1088 = vmatmul.bf16.gmra.mxu1 %v5847_v39  ;;  %2456 = vmatmul.bf16.gmra.mxu0 %v2364_v40  ;;  %v2033_v39 = vor.u32 %v2032_v32, %v2029_v31  ;;  %v2043_v40 = vor.u32 %v2042_v34, %v2038_v33  ;;  %v1345_v20 = vunpack.c.l.b16 %v1246_v3  ;;  %v6100_v31 = vld [vmem:[%s6221_s8 + $0x4c] sm:$0xf] }
  0x8c   : > { %v1249_v32 = vrot.slane %v6100_v31, 5 }
  0x8d   : > { %1464 = vmatmul.bf16.gmra.mxu2 %v6576_v55  ;;  %v2006_v55 = vshll.u32 %v5350_v52, 16  ;;  %v2034_v47 = vrot.slane %v2033_v39, 4  ;;  %v2044_v48 = vrot.slane %v2043_v40, 4  ;;  %v5356_v52 = vld [vmem:[%s6221_s8 + $0x48] sm:$0xf] }
  0x8e   : > { %v2054_v5 = vshll.u32 %v5356_v52, 16  ;;  %v1251_v40 = vrot.slane %v1249_v32, 4 }
  0x8f   : > { %v2008_v7 = vrot.slane %v2006_v55, 5  ;;  %v2039_v1 = vsel %vm6243_vm2, %v2034_v47, %v2038_v33  ;;  %v2049_v23 = vsel %vm6243_vm2, %v2044_v48, %v2048_v49  ;;  %v2051_v55 = vshrl.u32 %v5356_v52, 16  ;;  %v1160_v33 = vld [vmem:[%s6221_s8 + $0x48] sm:$0xe] }
  0x90   : > { %v2056_v10 = vrot.slane %v2054_v5, 5  ;;  %v5139_v39 = vrot.slane %v1160_v33, 9  ;;  %v2075_v49 = vshrl.u32 %v5359_v37, 16  ;;  %v2084_v52 = vshll.u32 %v5360_v38, 16 }
  0x91   : > { %v2009_v19 = vor.u32 %v2008_v7, %v2005_v6  ;;  %v2339_v6 = vunpack.c.l.b16 %v2039_v1  ;;  %v2340_v7 = vunpack.c.l.b16 %v2049_v23  ;;  %v1258_v33 = vrot.slane %v1256_v25, 4 }
  0x92   : > { %v2086_v61 = vrot.slane %v2084_v52, 5 }
  0x93   : > { %1779 = vmatmul.bf16.gmra.mxu3 %v5886_v57  ;;  %v2010_v60 = vrot.slane %v2009_v19, 4  ;;  %v5138_v57 = vrot.slane %v1159_v15, 9  ;;  %v2367_v51 = vpack.c.b16 %v2340_v7, %v2339_v6  ;;  %v2078_v15 = vshll.u32 %v5359_v37, 16  ;;  %v5361_v6 = vld [vmem:[%s6221_s8 + $0x5c] sm:$0x1] }
  0x95   : > { %v2015_v27 = vsel %vm6243_vm2, %v2010_v60, %v2014_v9  ;;  %v1243_v0 = vsel %vm6537_vm5, %v5138_v57, %v1242_v46  ;;  %v2053_v9 = vrot.slane %v2051_v55, 4  ;;  %v1250_v57 = vsel %vm6537_vm5, %v5139_v39, %v1249_v32 }
  0x96   : > { %v2337_v35 = vunpack.c.l.b16 %v2015_v27  ;;  %v1344_v19 = vunpack.c.l.b16 %v1243_v0  ;;  %v2077_v55 = vrot.slane %v2075_v49, 4  ;;  %v2080_v5 = vrot.slane %v2078_v15, 5 }
  0x97   : > { %v2057_v16 = vor.u32 %v2056_v10, %v2053_v9  ;;  %v1346_v0 = vunpack.c.l.b16 %v1250_v57  ;;  %v5851_v9 = vld [vmem:[%s6221_s8 + $0x54] sm:$0xff] }
  0x99   : > { %v2058_v34 = vrot.slane %v2057_v16, 4  ;;  %v5363_v16 = vld [vmem:[%s6221_s8 + $0x64] sm:$0xf] }
  0x9a   : > { %v2108_v38 = vshll.u32 %v5363_v16, 16  ;;  %v2112_v39 = vshrl.u32 %v5363_v16, 16 }
  0x9b   : > { %1093 = vmatmul.bf16.gmra.mxu1 %v5848_v12  ;;  %2461 = vmatmul.bf16.gmra.mxu0 %v2365_v14  ;;  %v2066_v12 = vrot.slane %v2064_v17, 4  ;;  %v5358_v14 = vld [vmem:[%s6221_s8 + $0x50] sm:$0x1]  ;;  %v2063_v46 = vsel %vm6243_vm2, %v2058_v34, %v2062_v11  ;;  %v2090_v17 = vrot.slane %v2088_v54, 4  ;;  %v6103_v34 = vld [vmem:[%s6221_s8 + $0x5c] sm:$0x1] }
  0x9c   : > { %v2070_v18 = vshll.u32 %v5358_v14, 16  ;;  %v2341_v1 = vunpack.c.l.b16 %v2063_v46  ;;  %v2110_v57 = vrot.slane %v2108_v38, 5  ;;  %v6105_v38 = vld [vmem:[%s6221_s8 + $0x68] sm:$0x1] }
  0x9d   : > { %1469 = vmatmul.bf16.gmra.mxu2 %v6603_v28  ;;  %v2338_v28 = vunpack.c.l.b16 %v2025_v29  ;;  %v2067_v8 = vor.u32 %v2066_v12, %v2062_v11  ;;  %v1371_v29 = vpack.c.b16 %v1345_v20, %v1344_v19  ;;  %v2081_v12 = vor.u32 %v2080_v5, %v2077_v55 }
  0x9e   : > { %v2091_v14 = vor.u32 %v2090_v17, %v2086_v61  ;;  %v2094_v19 = vshll.u32 %v5361_v6, 16  ;;  %v5852_v17 = vld [vmem:[%s6221_s8 + $0x60] sm:$0xff] }
  0x9f   : > { %v2366_v43 = vpack.c.b16 %v2338_v28, %v2337_v35  ;;  %v2068_v35 = vrot.slane %v2067_v8, 4  ;;  %v2072_v28 = vrot.slane %v2070_v18, 5  ;;  %v2082_v18 = vrot.slane %v2081_v12, 4  ;;  %v5951_v12 = vld [vmem:[%s8307_s1 + $0x1d8] sm:$0xff] }
  0xa0   : > { %v2096_v31 = vrot.slane %v2094_v19, 5  ;;  %3870 = vmatpush.bf16.msra.mxu3 %v5951_v12 }
  0xa1   : > { %v2073_v47 = vsel %vm6243_vm2, %v2068_v35, %v2072_v28  ;;  %v1259_v35 = vrot.slane %v6103_v34, 5  ;;  %v5366_v34 = vld [vmem:[%s6221_s8 + $0x70] sm:$0xf] }
  0xa2   : > { %v2342_v23 = vunpack.c.l.b16 %v2073_v47 }
  0xa3   : > { %1784 = vmatmul.bf16.gmra.mxu3 %v5887_v59  ;;  %v1260_v15 = vsel %vm6537_vm5, %v1258_v33, %v1259_v35  ;;  %v5365_v33 = vld [vmem:[%s6221_s8 + $0x6c] sm:$0xf] }
  0xa4   : > { %v2368_v10 = vpack.c.b16 %v2342_v23, %v2341_v1  ;;  %v1349_v5 = vunpack.c.l.b16 %v1260_v15  ;;  %v2132_v15 = vshll.u32 %v5366_v34, 16 }
  0xa8   : > { %v6649_v44 = vpop.f32.mrf.mxu0  ;;  %v6651_v45 = vpop.f32.mrf.mxu1 }
  0xab   : > { %1098 = vmatmul.bf16.gmra.mxu1 %v5849_v42  ;;  %2466 = vmatmul.bf16.gmra.mxu0 %v2366_v43  ;;  %v1252_v42 = vrot.slane %v6101_v41, 5  ;;  %v5889_v43 = vld [vmem:[%s6221_s8 + $0x48] sm:$0xff] }
  0xad   : > { %1474 = vmatmul.bf16.gmra.mxu2 %v1370_v62  ;;  %v1253_v58 = vsel %vm6537_vm5, %v1251_v40, %v1252_v42  ;;  %v5890_v40 = vld [vmem:[%s6221_s8 + $0x54] sm:$0xff] }
  0xae   : > { %v1347_v3 = vunpack.c.l.b16 %v1253_v58  ;;  %v2114_v58 = vrot.slane %v2112_v39, 4  ;;  %v1266_v39 = vrot.slane %v6105_v38, 5  ;;  %v1163_v38 = vld [vmem:[%s6221_s8 + $0x6c] sm:$0xe] }
  0xaf   : > { %v6663_v4 = vpop.f32.mrf.mxu2 }
  0xb0   : > { %v6667_v62 = vpop.f32.mrf.mxu0  ;;  %v6669_v21 = vpop.f32.mrf.mxu1  ;;  %v1372_v22 = vpack.c.b16 %v1347_v3, %v1346_v0  ;;  %v2115_v3 = vor.u32 %v2114_v58, %v2110_v57 }
  0xb1   : > { %v6665_v63 = vpop.f32.mrf.mxu3 }
  0xb3   : > { %1789 = vmatmul.bf16.gmra.mxu3 %v5888_v36  ;;  %v5960_v36 = vld [vmem:[%s8307_s1 + $0x220] sm:$0xff] }
  0xb4   : > { %4295 = vmatpush.bf16.msra.mxu0 %v5960_v36  ;;  %v5364_v36 = vld [vmem:[%s6221_s8 + $0x68] sm:$0x1] }
  0xb5   : > { %v2118_v6 = vshll.u32 %v5364_v36, 16 }
  0xb7   : > { %v6685_v60 = vpop.f32.mrf.mxu2 }
  0xb8   : > { %v6690_v59 = vpop.f32.mrf.mxu0  ;;  %v6692_v27 = vpop.f32.mrf.mxu1 }
  0xb9   : > { %v6688_v26 = vpop.f32.mrf.mxu3 }
  0xbb   : > { %1103 = vmatmul.bf16.gmra.mxu1 %v5850_v50  ;;  %2471 = vmatmul.bf16.gmra.mxu0 %v2367_v51  ;;  %v1161_v50 = vld [vmem:[%s6221_s8 + $0x54] sm:$0xe]  ;;  %v5362_v51 = vld [vmem:[%s6221_s8 + $0x60] sm:$0xf] }
  0xbc   : > { %v5140_v32 = vrot.slane %v1161_v50, 9  ;;  %v2099_v28 = vshrl.u32 %v5362_v51, 16  ;;  %v2102_v37 = vshll.u32 %v5362_v51, 16  ;;  %v6104_v50 = vld [vmem:[%s6221_s8 + $0x64] sm:$0xf] }
  0xbd   : > { %1479 = vmatmul.bf16.gmra.mxu2 %v1371_v29  ;;  %v2092_v29 = vrot.slane %v2091_v14, 4  ;;  %v5919_v14 = vld [vmem:[%s8307_s1 + $0x158] sm:$0xff]  ;;  %v1263_v51 = vrot.slane %v6104_v50, 5 }
  0xbe   : > { %v1257_v49 = vsel %vm6537_vm5, %v5140_v32, %v1256_v25  ;;  %v2101_v52 = vrot.slane %v2099_v28, 4  ;;  %v2104_v54 = vrot.slane %v2102_v37, 5  ;;  %v2120_v32 = vrot.slane %v2118_v6, 5  ;;  %2873 = vmatpush.bf16.msra.mxu1 %v5919_v14 }
  0xbf   : > { %v6700_v2 = vpop.f32.mrf.mxu2  ;;  %v2097_v46 = vsel %vm6243_vm2, %v2092_v29, %v2096_v31  ;;  %v1348_v55 = vunpack.c.l.b16 %v1257_v49  ;;  %v2116_v31 = vrot.slane %v2115_v3, 4  ;;  %v1265_v37 = vrot.slane %v1263_v51, 4 }
  0xc0   : > { %v6706_v48 = vpop.f32.mrf.mxu0  ;;  %v6708_v56 = vpop.f32.mrf.mxu1  ;;  %v2344_v23 = vunpack.c.l.b16 %v2097_v46  ;;  %v2105_v0 = vor.u32 %v2104_v54, %v2101_v52  ;;  %v2123_v46 = vshrl.u32 %v5365_v33, 16  ;;  %v2126_v49 = vshll.u32 %v5365_v33, 16 }
  0xc1   : > { %v1373_v25 = vpack.c.b16 %v1349_v5, %v1348_v55  ;;  %v2136_v52 = vshrl.u32 %v5366_v34, 16  ;;  %v1267_v36 = vsel %vm6537_vm5, %v1265_v37, %v1266_v39  ;;  %v2134_v3 = vrot.slane %v2132_v15, 5 }
  0xc2   : > { %v6710_v13 = vpop.f32.mrf.mxu3  ;;  %v2106_v29 = vrot.slane %v2105_v0, 4  ;;  %v2128_v0 = vrot.slane %v2126_v49, 5  ;;  %v1351_v14 = vunpack.c.l.b16 %v1267_v36  ;;  %v5142_v15 = vrot.slane %v1163_v38, 9 }
  0xc3   : > { %1794 = vmatmul.bf16.gmra.mxu3 %v5889_v43  ;;  %v2087_v43 = vsel %vm6243_vm2, %v2082_v18, %v2086_v61  ;;  %v1162_v18 = vld [vmem:[%s6221_s8 + $0x60] sm:$0xe]  ;;  %v2138_v6 = vrot.slane %v2136_v52, 4 }
  0xc4   : > { %v2343_v1 = vunpack.c.l.b16 %v2087_v43  ;;  %v5141_v35 = vrot.slane %v1162_v18, 9  ;;  %v5891_v43 = vld [vmem:[%s6221_s8 + $0x60] sm:$0xff] }
  0xc7   : > { %v6720_v7 = vpop.f32.mrf.mxu2 }
  0xc8   : > { %v6723_v11 = vpop.f32.mrf.mxu0  ;;  %v6725_v20 = vpop.f32.mrf.mxu1 }
  0xca   : > { %v6731_v8 = vpop.f32.mrf.mxu3 }
  0xcb   : > { %1108 = vmatmul.bf16.gmra.mxu1 %v5851_v9  ;;  %2476 = vmatmul.bf16.gmra.mxu0 %v2368_v10  ;;  %v2369_v9 = vpack.c.b16 %v2344_v23, %v2343_v1  ;;  %v5943_v10 = vld [vmem:[%s8307_s1 + $0x198] sm:$0xff]  ;;  %v1264_v23 = vsel %vm6537_vm5, %v5141_v35, %v1263_v51  ;;  %v2139_v51 = vor.u32 %v2138_v6, %v2134_v3  ;;  %v6106_v35 = vld [vmem:[%s6221_s8 + $0x70] sm:$0xf] }
  0xcc   : > { %3188 = vmatpush.bf16.msra.mxu2 %v5943_v10  ;;  %v5367_v10 = vld [vmem:[%s6221_s8 + $0x74] sm:$0x1]  ;;  %v1350_v12 = vunpack.c.l.b16 %v1264_v23  ;;  %v1270_v37 = vrot.slane %v6106_v35, 5 }
  0xcd   : > { %1484 = vmatmul.bf16.gmra.mxu2 %v1372_v22  ;;  %v2142_v18 = vshll.u32 %v5367_v10, 16 }
  0xce   : > { %v1374_v33 = vpack.c.b16 %v1351_v14, %v1350_v12  ;;  %v1272_v52 = vrot.slane %v1270_v37, 4 }
  0xd0   : > { %v6735_v41 = vpop.f32.mrf.mxu2  ;;  %v6737_v42 = vpop.f32.mrf.mxu0 }
  0xd1   : > { %v6743_v47 = vpop.f32.mrf.mxu1 }
  0xd3   : > { %1799 = vmatmul.bf16.gmra.mxu3 %v5890_v40  ;;  %v2121_v40 = vsel %vm6243_vm2, %v2116_v31, %v2120_v32 }
  0xd4   : > { %v2346_v5 = vunpack.c.l.b16 %v2121_v40  ;;  %v2144_v40 = vrot.slane %v2142_v18, 5 }
  0xd6   : > { %v6750_v61 = vpop.f32.mrf.mxu3 }
  0xd8   : > { %v6762_v19 = vpop.f32.mrf.mxu2  ;;  %v6764_v22 = vpop.f32.mrf.mxu0 }
  0xd9   : > { %v1074_v24 = vpop.f32.mrf.mxu1 }
  0xda   : > { %v6768_v16 = vadd.f32 %v1074_v24, %v6649_v44  ;;  %v2111_v44 = vsel %vm6243_vm2, %v2106_v29, %v2110_v57  ;;  %v5853_v24 = vld [vmem:[%s6221_s8 + $0x6c] sm:$0xff] }
  0xdb   : > { %1113 = vmatmul.bf16.gmra.mxu1 %v5852_v17  ;;  %2481 = vmatmul.bf16.gmra.mxu0 %v2369_v9  ;;  %v2345_v55 = vunpack.c.l.b16 %v2111_v44  ;;  %v2125_v17 = vrot.slane %v2123_v46, 4  ;;  %v5959_v9 = vld [vmem:[%s8307_s1 + $0x218] sm:$0xff]  ;;  %v2140_v44 = vrot.slane %v2139_v51, 4 }
  0xdc   : > { %4296 = vmatpush.bf16.msra.mxu0 %v5959_v9  ;;  %v5369_v46 = vld [vmem:[%s6221_s8 + $0x7c] sm:$0xf] }
  0xdd   : > { %1489 = vmatmul.bf16.gmra.mxu2 %v1373_v25  ;;  %v2370_v25 = vpack.c.b16 %v2346_v5, %v2345_v55  ;;  %v2129_v50 = vor.u32 %v2128_v0, %v2125_v17  ;;  %v2145_v55 = vsel %vm6243_vm2, %v2140_v44, %v2144_v40  ;;  %v2156_v9 = vshll.u32 %v5369_v46, 16 }
  0xde   : > { %v6773_v28 = vpop.f32.mrf.mxu3  ;;  %v2160_v10 = vshrl.u32 %v5369_v46, 16  ;;  %v2348_v51 = vunpack.c.l.b16 %v2145_v55  ;;  %v5950_v46 = vld [vmem:[%s8307_s1 + $0x1d0] sm:$0xff] }
  0xdf   : > { %v2130_v39 = vrot.slane %v2129_v50, 4  ;;  %3871 = vmatpush.bf16.msra.mxu3 %v5950_v46  ;;  %v5893_v46 = vld [vmem:[%s6221_s8 + $0x78] sm:$0xff] }
  0xe0   : > { %v6781_v54 = vpop.f32.mrf.mxu2  ;;  %v6783_v58 = vpop.f32.mrf.mxu0  ;;  %v2162_v35 = vrot.slane %v2160_v10, 4  ;;  %v6108_v10 = vld [vmem:[%s6221_s8 + $0x7c] sm:$0xf] }
  0xe1   : > { %v1076_v1 = vpop.f32.mrf.mxu1  ;;  %v2135_v36 = vsel %vm6243_vm2, %v2130_v39, %v2134_v3  ;;  %v1271_v3 = vsel %vm6537_vm5, %v5142_v15, %v1270_v37  ;;  %v5370_v39 = vld [vmem:[%s6221_s8 + $0x80] sm:$0x1]  ;;  %v5942_v37 = vld [vmem:[%s8307_s1 + $0x190] sm:$0xff] }
  0xe2   : > { %v6788_v57 = vadd.f32 %v1076_v1, %v6667_v62  ;;  %v6107_v1 = vld [vmem:[%s6221_s8 + $0x74] sm:$0x1]  ;;  %v2347_v50 = vunpack.c.l.b16 %v2135_v36  ;;  %v1352_v38 = vunpack.c.l.b16 %v1271_v3  ;;  %v2166_v36 = vshll.u32 %v5370_v39, 16  ;;  %3189 = vmatpush.bf16.msra.mxu2 %v5942_v37  ;;  %v5371_v3 = vld [vmem:[%s6221_s8 + $0x84] sm:$0xf] }
  0xe3   : > { %1804 = vmatmul.bf16.gmra.mxu3 %v5891_v43  ;;  %v5368_v43 = vld [vmem:[%s6221_s8 + $0x78] sm:$0xf]  ;;  %v1273_v23 = vrot.slane %v6107_v1, 5  ;;  %v5918_v15 = vld [vmem:[%s8307_s1 + $0x150] sm:$0xff] }
  0xe4   : > { %v2147_v0 = vshrl.u32 %v5368_v43, 16  ;;  %v2150_v6 = vshll.u32 %v5368_v43, 16  ;;  %v2371_v43 = vpack.c.b16 %v2348_v51, %v2347_v50  ;;  %2874 = vmatpush.bf16.msra.mxu1 %v5918_v15 }
  0xe6   : > { %v6796_v62 = vpop.f32.mrf.mxu3  ;;  %v2149_v18 = vrot.slane %v2147_v0, 4 }
  0xe8   : > { %v6799_v29 = vpop.f32.mrf.mxu2  ;;  %v6801_v31 = vpop.f32.mrf.mxu0 }
  0xe9   : > { %v1079_v32 = vpop.f32.mrf.mxu1 }
  0xea   : > { %v6804_v34 = vadd.f32 %v1079_v32, %v6690_v59  ;;  %v5892_v59 = vld [vmem:[%s6221_s8 + $0x6c] sm:$0xff]  ;;  %v2152_v32 = vrot.slane %v2150_v6, 5 }
  0xeb   : > { %1118 = vmatmul.bf16.gmra.mxu1 %v5853_v24  ;;  %2486 = vmatmul.bf16.gmra.mxu0 %v2370_v25  ;;  %v1274_v25 = vsel %vm6537_vm5, %v1272_v52, %v1273_v23 }
  0xec   : > { %v2153_v23 = vor.u32 %v2152_v32, %v2149_v18  ;;  %v2168_v18 = vrot.slane %v2166_v36, 5 }
  0xed   : > { %1494 = vmatmul.bf16.gmra.mxu2 %v1374_v33  ;;  %v2158_v33 = vrot.slane %v2156_v9, 5  ;;  %v1164_v9 = vld [vmem:[%s6221_s8 + $0x78] sm:$0xe] }
  0xee   : > { %v6810_v49 = vpop.f32.mrf.mxu3  ;;  %v2154_v50 = vrot.slane %v2153_v23, 4 }
  0xf0   : > { %v1455_v5 = vpop.f32.mrf.mxu2  ;;  %v6818_v17 = vpop.f32.mrf.mxu0 }
  0xf1   : > { %v1535_v12 = vadd.f32 %v1455_v5, %v6768_v16  ;;  %v1081_v14 = vpop.f32.mrf.mxu1  ;;  %v1353_v16 = vunpack.c.l.b16 %v1274_v25  ;;  %v5372_v25 = vld [vmem:[%s6221_s8 + $0x88] sm:$0xf] }
  0xf2   : > { %v6822_v24 = vadd.f32 %v1081_v14, %v6706_v48  ;;  %v5854_v48 = vld [vmem:[%s6221_s8 + $0x78] sm:$0xff] }
  0xf3   : > { %1809 = vmatmul.bf16.gmra.mxu3 %v5892_v59  ;;  %v2163_v59 = vor.u32 %v2162_v35, %v2158_v33  ;;  %v1375_v6 = vpack.c.b16 %v1353_v16, %v1352_v38  ;;  %v6109_v35 = vld [vmem:[%s6221_s8 + $0x80] sm:$0x1]  ;;  %v2171_v16 = vshrl.u32 %v5371_v3, 16 }
  0xf4   : > { %v1280_v38 = vrot.slane %v6109_v35, 5 }
  0xf5   : > { %v2164_v51 = vrot.slane %v2163_v59, 4 }
  0xf6   : > { %v1770_v44 = vpop.f32.mrf.mxu3 }
  0xf7   : > { %v1850_v40 = vadd.f32 %v1770_v44, %v1535_v12  ;;  %v1277_v12 = vrot.slane %v6108_v10, 5  ;;  %v2174_v44 = vshll.u32 %v5371_v3, 16 }
  0xf8   : > { %v1457_v52 = vpop.f32.mrf.mxu2  ;;  %v2452_v1 = vpop.f32.mrf.mxu0 }
  0xf9   : > { %v1536_v55 = vadd.f32 %v1457_v52, %v6788_v57  ;;  %v1084_v5 = vpop.f32.mrf.mxu1  ;;  %v6840_v0 = vadd.f32 %v2452_v1, %v1850_v40  ;;  %v5143_v57 = vrot.slane %v1164_v9, 9  ;;  %v1279_v32 = vrot.slane %v1277_v12, 4 }
  0xfa   : > { %v6845_v14 = vadd.f32 %v1084_v5, %v6723_v11  ;;  %v2180_v40 = vshll.u32 %v5372_v25, 16  ;;  %v2184_v11 = vshrl.u32 %v5372_v25, 16  ;;  %v2159_v52 = vsel %vm6243_vm2, %v2154_v50, %v2158_v33  ;;  %v5373_v25 = vld [vmem:[%s6221_s8 + $0x8c] sm:$0x1] }
  0xfb   : > { %1123 = vmatmul.bf16.gmra.mxu1 %v5854_v48  ;;  %2491 = vmatmul.bf16.gmra.mxu0 %v2371_v43  ;;  %v1278_v43 = vsel %vm6537_vm5, %v5143_v57, %v1277_v12  ;;  %v2169_v1 = vsel %vm6243_vm2, %v2164_v51, %v2168_v18  ;;  %v2173_v5 = vrot.slane %v2171_v16, 4  ;;  %v2176_v9 = vrot.slane %v2174_v44, 5 }
  0xfc   : > { %v2182_v10 = vrot.slane %v2180_v40, 5  ;;  %v2186_v12 = vrot.slane %v2184_v11, 4  ;;  %v2349_v33 = vunpack.c.l.b16 %v2159_v52  ;;  %v2350_v3 = vunpack.c.l.b16 %v2169_v1  ;;  %v1165_v52 = vld [vmem:[%s6221_s8 + $0x84] sm:$0xe] }
  0xfd   : > { %1499 = vmatmul.bf16.gmra.mxu2 %v1375_v6  ;;  %v1354_v57 = vunpack.c.l.b16 %v1278_v43 }
  0xfe   : > { %v1772_v39 = vpop.f32.mrf.mxu3  ;;  %v2187_v18 = vor.u32 %v2186_v12, %v2182_v10  ;;  %v2372_v16 = vpack.c.b16 %v2350_v3, %v2349_v33  ;;  %v6111_v33 = vld [vmem:[%s6221_s8 + $0x8c] sm:$0x1] }
  0xff   : > { %v1851_v37 = vadd.f32 %v1772_v39, %v1536_v55  ;;  %v1281_v55 = vsel %vm6537_vm5, %v1279_v32, %v1280_v38  ;;  %v2190_v32 = vshll.u32 %v5373_v25, 16  ;;  %v5855_v38 = vld [vmem:[%s6221_s8 + $0x84] sm:$0xff]  ;;  %v1287_v3 = vrot.slane %v6111_v33, 5 }
 0x100   : > { %v1460_v15 = vpop.f32.mrf.mxu2  ;;  %v2454_v48 = vpop.f32.mrf.mxu0  ;;  %v1355_v50 = vunpack.c.l.b16 %v1281_v55  ;;  %v5374_v55 = vld [vmem:[%s6221_s8 + $0x90] sm:$0xf] }
 0x101   : > { %v1537_v23 = vadd.f32 %v1460_v15, %v6804_v34  ;;  %v1086_v59 = vpop.f32.mrf.mxu1  ;;  %v6858_v36 = vadd.f32 %v2454_v48, %v1851_v37  ;;  %v5958_v34 = vld [vmem:[%s8307_s1 + $0x210] sm:$0xff]  ;;  %v6110_v15 = vld [vmem:[%s6221_s8 + $0x88] sm:$0xf] }
 0x102   : > { %v6863_v6 = vadd.f32 %v1086_v59, %v6737_v42  ;;  %4297 = vmatpush.bf16.msra.mxu0 %v5958_v34  ;;  %v2177_v42 = vor.u32 %v2176_v9, %v2173_v5  ;;  %v1284_v48 = vrot.slane %v6110_v15, 5  ;;  %v2192_v59 = vrot.slane %v2190_v32, 5  ;;  %v5375_v5 = vld [vmem:[%s6221_s8 + $0x94] sm:$0xf] }
 0x103   : > { %1814 = vmatmul.bf16.gmra.mxu3 %v5893_v46  ;;  %v1376_v46 = vpack.c.b16 %v1355_v50, %v1354_v57  ;;  %v2195_v34 = vshrl.u32 %v5374_v55, 16  ;;  %v5894_v50 = vld [vmem:[%s6221_s8 + $0x84] sm:$0xff] }
 0x104   : > { %v2178_v1 = vrot.slane %v2177_v42, 4  ;;  %v1286_v9 = vrot.slane %v1284_v48, 4  ;;  %v2204_v42 = vshll.u32 %v5375_v5, 16 }
 0x105   : > { %v2197_v15 = vrot.slane %v2195_v34, 4 }
 0x106   : > { %v1775_v51 = vpop.f32.mrf.mxu3  ;;  %v2183_v25 = vsel %vm6243_vm2, %v2178_v1, %v2182_v10  ;;  %v2206_v1 = vrot.slane %v2204_v42, 5 }
 0x107   : > { %v1852_v35 = vadd.f32 %v1775_v51, %v1537_v23  ;;  %v2188_v23 = vrot.slane %v2187_v18, 4  ;;  %v2198_v51 = vshll.u32 %v5374_v55, 16  ;;  %v2208_v18 = vshrl.u32 %v5375_v5, 16 }
 0x108   : > { %v1462_v39 = vpop.f32.mrf.mxu2  ;;  %v2457_v44 = vpop.f32.mrf.mxu0 }
 0x109   : > { %v1538_v40 = vadd.f32 %v1462_v39, %v6822_v24  ;;  %v1089_v11 = vpop.f32.mrf.mxu1  ;;  %v6871_v37 = vadd.f32 %v2457_v44, %v1852_v35  ;;  %v5144_v24 = vrot.slane %v1165_v52, 9  ;;  %v2200_v52 = vrot.slane %v2198_v51, 5 }
 0x10a   : > { %v6875_v43 = vadd.f32 %v1089_v11, %v6764_v22  ;;  %v2193_v22 = vsel %vm6243_vm2, %v2188_v23, %v2192_v59  ;;  %v2351_v11 = vunpack.c.l.b16 %v2183_v25  ;;  %v5376_v23 = vld [vmem:[%s6221_s8 + $0x98] sm:$0x1]  ;;  %v5917_v25 = vld [vmem:[%s8307_s1 + $0x148] sm:$0xff] }
 0x10b   : > { %1128 = vmatmul.bf16.gmra.mxu1 %v5855_v38  ;;  %2496 = vmatmul.bf16.gmra.mxu0 %v2372_v16  ;;  %v1285_v10 = vsel %vm6537_vm5, %v5144_v24, %v1284_v48 }
 0x10c   : > { %v1356_v59 = vunpack.c.l.b16 %v1285_v10  ;;  %2875 = vmatpush.bf16.msra.mxu1 %v5917_v25 }
 0x10d   : > { %1504 = vmatmul.bf16.gmra.mxu2 %v1376_v46  ;;  %v2352_v46 = vunpack.c.l.b16 %v2193_v22 }
 0x10e   : > { %v1777_v12 = vpop.f32.mrf.mxu3 }
 0x10f   : > { %v1853_v57 = vadd.f32 %v1777_v12, %v1538_v40  ;;  %v1288_v40 = vsel %vm6537_vm5, %v1286_v9, %v1287_v3  ;;  %v5856_v12 = vld [vmem:[%s6221_s8 + $0x90] sm:$0xff]  ;;  %v2373_v33 = vpack.c.b16 %v2352_v46, %v2351_v11  ;;  %v5941_v9 = vld [vmem:[%s8307_s1 + $0x188] sm:$0xff]  ;;  %v5377_v11 = vld [vmem:[%s6221_s8 + $0x9c] sm:$0xf] }
 0x110   : > { %v1465_v32 = vpop.f32.mrf.mxu2  ;;  %v2459_v35 = vpop.f32.mrf.mxu0  ;;  %v1357_v55 = vunpack.c.l.b16 %v1288_v40  ;;  %v5949_v3 = vld [vmem:[%s8307_s1 + $0x1c8] sm:$0xff]  ;;  %3190 = vmatpush.bf16.msra.mxu2 %v5941_v9  ;;  %v5378_v46 = vld [vmem:[%s6221_s8 + $0xa0] sm:$0xf] }
 0x111   : > { %v1539_v38 = vadd.f32 %v1465_v32, %v6845_v14  ;;  %v1091_v16 = vpop.f32.mrf.mxu1  ;;  %v6887_v39 = vadd.f32 %v2459_v35, %v1853_v57  ;;  %v2210_v14 = vrot.slane %v2208_v18, 4  ;;  %v2214_v57 = vshll.u32 %v5376_v23, 16  ;;  %3872 = vmatpush.bf16.msra.mxu3 %v5949_v3  ;;  %v6112_v35 = vld [vmem:[%s6221_s8 + $0x94] sm:$0xf]  ;;  %v6113_v23 = vld [vmem:[%s6221_s8 + $0x98] sm:$0x1] }
 0x112   : > { %v6892_v44 = vadd.f32 %v1091_v16, %v6783_v58  ;;  %v2201_v58 = vor.u32 %v2200_v52, %v2197_v15  ;;  %v1377_v18 = vpack.c.b16 %v1357_v55, %v1356_v59  ;;  %v1166_v16 = vld [vmem:[%s6221_s8 + $0x90] sm:$0xe]  ;;  %v2232_v9 = vshrl.u32 %v5378_v46, 16 }
 0x113   : > { %1819 = vmatmul.bf16.gmra.mxu3 %v5894_v50  ;;  %v2211_v24 = vor.u32 %v2210_v14, %v2206_v1  ;;  %v2216_v40 = vrot.slane %v2214_v57, 5  ;;  %v5145_v52 = vrot.slane %v1166_v16, 9  ;;  %v5895_v55 = vld [vmem:[%s6221_s8 + $0x90] sm:$0xff]  ;;  %v2228_v57 = vshll.u32 %v5378_v46, 16 }
 0x115   : > { %v2212_v10 = vrot.slane %v2211_v24, 4  ;;  %v2222_v24 = vshll.u32 %v5377_v11, 16 }
 0x116   : > { %v1780_v5 = vpop.f32.mrf.mxu3 }
 0x117   : > { %v1854_v48 = vadd.f32 %v1780_v5, %v1539_v38  ;;  %v1291_v38 = vrot.slane %v6112_v35, 5  ;;  %v2224_v16 = vrot.slane %v2222_v24, 5 }
 0x118   : > { %v1467_v22 = vpop.f32.mrf.mxu2  ;;  %v2462_v34 = vpop.f32.mrf.mxu0 }
 0x119   : > { %v1540_v50 = vadd.f32 %v1467_v22, %v6863_v6  ;;  %v1094_v51 = vpop.f32.mrf.mxu1  ;;  %v6908_v42 = vadd.f32 %v2462_v34, %v1854_v48  ;;  %v2202_v6 = vrot.slane %v2201_v58, 4  ;;  %v1293_v14 = vrot.slane %v1291_v38, 4 }
 0x11a   : > { %v6911_v32 = vadd.f32 %v1094_v51, %v6801_v31  ;;  %v1294_v31 = vrot.slane %v6113_v23, 5  ;;  %v2219_v58 = vshrl.u32 %v5377_v11, 16  ;;  %v5379_v11 = vld [vmem:[%s6221_s8 + $0xa4] sm:$0x1] }
 0x11b   : > { %1133 = vmatmul.bf16.gmra.mxu1 %v5856_v12  ;;  %2501 = vmatmul.bf16.gmra.mxu0 %v2373_v33  ;;  %v2207_v5 = vsel %vm6243_vm2, %v2202_v6, %v2206_v1  ;;  %v2217_v12 = vsel %vm6243_vm2, %v2212_v10, %v2216_v40  ;;  %v1292_v1 = vsel %vm6537_vm5, %v5145_v52, %v1291_v38  ;;  %v2230_v6 = vrot.slane %v2228_v57, 5  ;;  %v1167_v57 = vld [vmem:[%s6221_s8 + $0x9c] sm:$0xe] }
 0x11c   : > { %v2353_v51 = vunpack.c.l.b16 %v2207_v5  ;;  %v2221_v35 = vrot.slane %v2219_v58, 4  ;;  %v2234_v10 = vrot.slane %v2232_v9, 4  ;;  %v6114_v58 = vld [vmem:[%s6221_s8 + $0xa0] sm:$0xf] }
 0x11d   : > { %1509 = vmatmul.bf16.gmra.mxu2 %v1377_v18  ;;  %v2354_v18 = vunpack.c.l.b16 %v2217_v12  ;;  %v1298_v24 = vrot.slane %v6114_v58, 5 }
 0x11e   : > { %v1782_v15 = vpop.f32.mrf.mxu3 }
 0x11f   : > { %v1855_v59 = vadd.f32 %v1782_v15, %v1540_v50  ;;  %v1295_v50 = vsel %vm6537_vm5, %v1293_v14, %v1294_v31  ;;  %v5857_v15 = vld [vmem:[%s6221_s8 + $0x9c] sm:$0xff]  ;;  %v2374_v52 = vpack.c.b16 %v2354_v18, %v2353_v51  ;;  %v2225_v31 = vor.u32 %v2224_v16, %v2221_v35 }
 0x120   : > { %v1470_v33 = vpop.f32.mrf.mxu2  ;;  %v2464_v48 = vpop.f32.mrf.mxu0  ;;  %v1359_v40 = vunpack.c.l.b16 %v1295_v50  ;;  %v5381_v50 = vld [vmem:[%s6221_s8 + $0xac] sm:$0xf]  ;;  %v1300_v18 = vrot.slane %v1298_v24, 4 }
 0x121   : > { %v1541_v3 = vadd.f32 %v1470_v33, %v6875_v43  ;;  %v1096_v25 = vpop.f32.mrf.mxu1  ;;  %v6924_v22 = vadd.f32 %v2464_v48, %v1855_v59  ;;  %v5957_v43 = vld [vmem:[%s8307_s1 + $0x208] sm:$0xff]  ;;  %v2235_v59 = vor.u32 %v2234_v10, %v2230_v6  ;;  %v2226_v9 = vrot.slane %v2225_v31, 4  ;;  %v5896_v10 = vld [vmem:[%s6221_s8 + $0x9c] sm:$0xff] }
 0x122   : > { %v6927_v34 = vadd.f32 %v1096_v25, %v6818_v17  ;;  %v1358_v17 = vunpack.c.l.b16 %v1292_v1  ;;  %4298 = vmatpush.bf16.msra.mxu0 %v5957_v43  ;;  %v5380_v1 = vld [vmem:[%s6221_s8 + $0xa8] sm:$0xf]  ;;  %v6115_v43 = vld [vmem:[%s6221_s8 + $0xa4] sm:$0x1] }
 0x123   : > { %1824 = vmatmul.bf16.gmra.mxu3 %v5895_v55  ;;  %v2238_v55 = vshll.u32 %v5379_v11, 16  ;;  %v1301_v35 = vrot.slane %v6115_v43, 5 }
 0x124   : > { %v1378_v48 = vpack.c.b16 %v1359_v40, %v1358_v17  ;;  %v2243_v17 = vshrl.u32 %v5380_v1, 16  ;;  %v2246_v40 = vshll.u32 %v5380_v1, 16  ;;  %v5382_v1 = vld [vmem:[%s6221_s8 + $0xb0] sm:$0x1] }
 0x125   : > { %v2240_v25 = vrot.slane %v2238_v55, 5 }
 0x126   : > { %v1785_v38 = vpop.f32.mrf.mxu3  ;;  %v2245_v58 = vrot.slane %v2243_v17, 4 }
 0x127   : > { %v1856_v46 = vadd.f32 %v1785_v38, %v1541_v3  ;;  %v2236_v3 = vrot.slane %v2235_v59, 4 }
 0x128   : > { %v1472_v14 = vpop.f32.mrf.mxu2  ;;  %v2467_v23 = vpop.f32.mrf.mxu0 }
 0x129   : > { %v1542_v5 = vadd.f32 %v1472_v14, %v6892_v44  ;;  %v6939_v12 = vpop.f32.mrf.mxu1  ;;  %v6941_v33 = vadd.f32 %v2467_v23, %v1856_v46  ;;  %v5146_v44 = vrot.slane %v1167_v57, 9  ;;  %v2231_v46 = vsel %vm6243_vm2, %v2226_v9, %v2230_v6 }
 0x12a   : > { %v2256_v14 = vshrl.u32 %v5381_v50, 16  ;;  %v1302_v6 = vsel %vm6537_vm5, %v1300_v18, %v1301_v35  ;;  %v2248_v57 = vrot.slane %v2246_v40, 5  ;;  %v5940_v18 = vld [vmem:[%s8307_s1 + $0x180] sm:$0xff] }
 0x12b   : > { %1138 = vmatmul.bf16.gmra.mxu1 %v5857_v15  ;;  %2506 = vmatmul.bf16.gmra.mxu0 %v2374_v52  ;;  %v2241_v15 = vsel %vm6243_vm2, %v2236_v3, %v2240_v25  ;;  %v2252_v52 = vshll.u32 %v5381_v50, 16  ;;  %v1299_v55 = vsel %vm6537_vm5, %v5146_v44, %v1298_v24  ;;  %v1361_v25 = vunpack.c.l.b16 %v1302_v6  ;;  %v6116_v50 = vld [vmem:[%s6221_s8 + $0x10] sm:$0xf]  ;;  %v5948_v35 = vld [vmem:[%s8307_s1 + $0x1c0] sm:$0xff] }
 0x12c   : > { %v2258_v3 = vrot.slane %v2256_v14, 4  ;;  %3191 = vmatpush.bf16.msra.mxu2 %v5940_v18  ;;  %3873 = vmatpush.bf16.msra.mxu3 %v5948_v35 }
 0x12d   : > { %1514 = vmatmul.bf16.gmra.mxu2 %v1378_v48  ;;  %v2356_v48 = vunpack.c.l.b16 %v2241_v15  ;;  %v6962_v9 = vrot.slane %v2252_v52, 5 }
 0x12e   : > { %v1787_v51 = vpop.f32.mrf.mxu3 }
 0x12f   : > { %v1857_v16 = vadd.f32 %v1787_v51, %v1542_v5  ;;  %v2355_v5 = vunpack.c.l.b16 %v2231_v46  ;;  %v2630_v51 = vrot.slane %v6116_v50, 5  ;;  %v2262_v46 = vshll.u32 %v5382_v1, 16  ;;  %v5437_v1 = vld [vmem:[%s6221_s8 + $0xc] sm:$0xe] }
 0x130   : > { %v1475_v11 = vpop.f32.mrf.mxu2  ;;  %v2469_v38 = vpop.f32.mrf.mxu0  ;;  %v5453_v35 = vrot.slane %v5437_v1, 9  ;;  %5837 = vmatpush.msk.msrb.mxu2 %vm4546_vm6, %v7803_v53 }
 0x131   : > { %v1543_v23 = vadd.f32 %v1475_v11, %v6911_v32  ;;  %v6954_v31 = vpop.f32.mrf.mxu1  ;;  %v6956_v59 = vadd.f32 %v2469_v38, %v1857_v16  ;;  %v1360_v32 = vunpack.c.l.b16 %v1299_v55  ;;  %v5858_v16 = vld [vmem:[%s6221_s8 + $0xa8] sm:$0xff]  ;;  %v2375_v44 = vpack.c.b16 %v2356_v48, %v2355_v5  ;;  %v6118_v48 = vld [vmem:[%s6221_s8 + $0x14] sm:$0x1] }
 0x132   : > { %v2249_v11 = vor.u32 %v2248_v57, %v2245_v58  ;;  %v2259_v38 = vor.u32 %v2258_v3, %v6962_v9  ;;  %v6117_v55 = vld [vmem:[%s6221_s8 + $0xac] sm:$0xf]  ;;  %v2632_v5 = vrot.slane %v2630_v51, 4  ;;  %v2633_v58 = vrot.slane %v6118_v48, 5  ;;  %v1168_v57 = vld [vmem:[%s6221_s8 + $0xa8] sm:$0xe] }
 0x133   : > { %1829 = vmatmul.bf16.gmra.mxu3 %v5896_v10  ;;  %v5916_v10 = vld [vmem:[%s8307_s1 + $0x140] sm:$0xff]  ;;  %v1305_v6 = vrot.slane %v6117_v55, 5  ;;  %v5383_v3 = vld [vmem:[%s6221_s8 + $0xb4] sm:$0xf]  ;;  %v5897_v48 = vld [vmem:[%s6221_s8 + $0xa8] sm:$0xff]  ;;  %v2631_v1 = vsel %vm6537_vm5, %v5453_v35, %v2630_v51 }
 0x134   : > { %2876 = vmatpush.bf16.msra.mxu1 %v5916_v10  ;;  %v2260_v50 = vrot.slane %v2259_v38, 4  ;;  %v2267_v10 = vshrl.u32 %v5383_v3, 16 }
 0x135   : > { %v1307_v18 = vrot.slane %v1305_v6, 4 }
 0x136   : > { %v1790_v43 = vpop.f32.mrf.mxu3 }
 0x137   : > { %v1858_v24 = vadd.f32 %v1790_v43, %v1543_v23  ;;  %v1379_v23 = vpack.c.b16 %v1361_v25, %v1360_v32  ;;  %v2264_v43 = vrot.slane %v2262_v46, 5  ;;  %v5384_v32 = vld [vmem:[%s6221_s8 + $0xb8] sm:$0xf]  ;;  %v1100_v25 = vadd.f32 %v6939_v12, %v6651_v45 }
 0x138   : > { %v1477_v17 = vpop.f32.mrf.mxu2  ;;  %v2472_v40 = vpop.f32.mrf.mxu0  ;;  %v2276_v46 = vshll.u32 %v5384_v32, 16  ;;  %v2280_v45 = vshrl.u32 %v5384_v32, 16 }
 0x139   : > { %v1544_v15 = vadd.f32 %v1477_v17, %v6927_v34  ;;  %v6978_v52 = vpop.f32.mrf.mxu1  ;;  %v6980_v14 = vadd.f32 %v2472_v40, %v1858_v24  ;;  %v2250_v34 = vrot.slane %v2249_v11, 4  ;;  %v5147_v24 = vrot.slane %v1168_v57, 9  ;;  %v6119_v40 = vld [vmem:[%s6221_s8 + $0xb0] sm:$0x1] }
 0x13a   : > { %v1308_v55 = vrot.slane %v6119_v40, 5  ;;  %v2265_v57 = vsel %vm6243_vm2, %v2260_v50, %v2264_v43  ;;  %v2278_v43 = vrot.slane %v2276_v46, 5  ;;  %v2282_v35 = vrot.slane %v2280_v45, 4 }
 0x13b   : > { %1143 = vmatmul.bf16.gmra.mxu1 %v5858_v16  ;;  %2511 = vmatmul.bf16.gmra.mxu0 %v2375_v44  ;;  %v2270_v16 = vshll.u32 %v5383_v3, 16  ;;  %v2634_v44 = vsel %vm6537_vm5, %v2632_v5, %v2633_v58  ;;  %v2255_v38 = vsel %vm6243_vm2, %v2250_v34, %v6962_v9  ;;  %v1306_v9 = vsel %vm6537_vm5, %v5147_v24, %v1305_v6 }
 0x13c   : > { %v2758_v3 = vunpack.c.l.b16 %v2634_v44  ;;  %v2757_v58 = vunpack.c.l.b16 %v2631_v1  ;;  %v1309_v34 = vsel %vm6537_vm5, %v1307_v18, %v1308_v55  ;;  %v2357_v32 = vunpack.c.l.b16 %v2255_v38  ;;  %v5956_v44 = vld [vmem:[%s8307_s1 + $0x200] sm:$0xff] }
 0x13d   : > { %1519 = vmatmul.bf16.gmra.mxu2 %v1379_v23  ;;  %v2272_v50 = vrot.slane %v2270_v16, 5  ;;  %v2358_v51 = vunpack.c.l.b16 %v2265_v57  ;;  %v1362_v6 = vunpack.c.l.b16 %v1306_v9  ;;  %v1363_v24 = vunpack.c.l.b16 %v1309_v34  ;;  %4299 = vmatpush.bf16.msra.mxu0 %v5956_v44  ;;  %v6121_v44 = vld [vmem:[%s6221_s8 + $0xbc] sm:$0x1] }
 0x13e   : > { %v1792_v17 = vpop.f32.mrf.mxu3  ;;  %v1102_v18 = vadd.f32 %v6954_v31, %v6669_v21  ;;  %v2283_v46 = vor.u32 %v2282_v35, %v2278_v43  ;;  %v6120_v21 = vld [vmem:[%s6221_s8 + $0xb8] sm:$0xf] }
 0x13f   : > { %v1859_v11 = vadd.f32 %v1792_v17, %v1544_v15  ;;  %v2269_v17 = vrot.slane %v2267_v10, 4  ;;  %v2376_v38 = vpack.c.b16 %v2358_v51, %v2357_v32  ;;  %v1380_v9 = vpack.c.b16 %v1363_v24, %v1362_v6 }
 0x140   : > { %v1480_v12 = vpop.f32.mrf.mxu2  ;;  %v2474_v23 = vpop.f32.mrf.mxu0  ;;  %v1312_v31 = vrot.slane %v6120_v21, 5 }
 0x141   : > { %v1545_v40 = vadd.f32 %v1480_v12, %v1100_v25  ;;  %v7001_v5 = vpop.f32.mrf.mxu1  ;;  %v7003_v15 = vadd.f32 %v2474_v23, %v1859_v11  ;;  %v7009_v25 = vpack.c.b16 %v2758_v3, %v2757_v58  ;;  %v5385_v11 = vld [vmem:[%s6221_s8 + $0xbc] sm:$0x1]  ;;  %v2273_v10 = vor.u32 %v2272_v50, %v2269_v17  ;;  %v1169_v58 = vld [vmem:[%s6221_s8 + $0xb4] sm:$0xe]  ;;  %v5386_v17 = vld [vmem:[%s6221_s8 + $0xc0] sm:$0xf] }
 0x142   : > { %v2286_v45 = vshll.u32 %v5385_v11, 16  ;;  %v5387_v50 = vld [vmem:[%s6221_s8 + $0xc4] sm:$0xf]  ;;  %v5148_v51 = vrot.slane %v1169_v58, 9  ;;  %v1314_v35 = vrot.slane %v1312_v31, 4  ;;  %v1315_v11 = vrot.slane %v6121_v44, 5 }
 0x143   : > { %8342 = vst [vmem:[#allocation2_spill] sm:$0xff] %v7003_v15  ;;  %1834 = vmatmul.bf16.gmra.mxu3 %v5897_v48  ;;  %v5859_v48 = vld [vmem:[%s6221_s8 + $0xb4] sm:$0xff]  ;;  %v2274_v34 = vrot.slane %v2273_v10, 4  ;;  %v2294_v10 = vshll.u32 %v5386_v17, 16  ;;  %v7044_v44 = vld [vmem:[%s6221_s8 + $0x1c] sm:$0xf] }
 0x144   : > { %v2288_v32 = vrot.slane %v2286_v45, 5  ;;  %v2304_v45 = vshrl.u32 %v5387_v50, 16 }
 0x145   : > { %v2279_v24 = vsel %vm6243_vm2, %v2274_v34, %v2278_v43  ;;  %v1313_v43 = vsel %vm6537_vm5, %v5148_v51, %v1312_v31  ;;  %v1107_v31 = vadd.f32 %v7001_v5, %v6708_v56  ;;  %v5438_v5 = vld [vmem:[%s6221_s8 + $0x18] sm:$0xe] }
 0x146   : > { %v1795_v55 = vpop.f32.mrf.mxu3  ;;  %v2359_v21 = vunpack.c.l.b16 %v2279_v24  ;;  %v3363_v24 = vshll.u32 %v7044_v44, 16 }
 0x147   : > { %v1860_v16 = vadd.f32 %v1795_v55, %v1545_v40  ;;  %v2284_v40 = vrot.slane %v2283_v46, 4  ;;  %v2291_v55 = vshrl.u32 %v5386_v17, 16  ;;  %v2300_v46 = vshll.u32 %v5387_v50, 16 }
 0x148   : > { %v1482_v12 = vpop.f32.mrf.mxu2  ;;  %v2477_v23 = vpop.f32.mrf.mxu0  ;;  %v2306_v50 = vrot.slane %v2304_v45, 4 }
 0x149   : > { %v1546_v57 = vadd.f32 %v1482_v12, %v1102_v18  ;;  %v7018_v1 = vpop.f32.mrf.mxu1  ;;  %v7020_v3 = vadd.f32 %v2477_v23, %v1860_v16  ;;  %v1105_v18 = vadd.f32 %v6978_v52, %v6692_v27  ;;  %v2293_v34 = vrot.slane %v2291_v55, 4 }
 0x14a   : > { %v2302_v17 = vrot.slane %v2300_v46, 5 }
 0x14b   : > { %1148 = vmatmul.bf16.gmra.mxu1 %v5859_v48  ;;  %2516 = vmatmul.bf16.gmra.mxu0 %v2376_v38  ;;  %v5898_v48 = vld [vmem:[%s6221_s8 + $0xb4] sm:$0xff]  ;;  %v2289_v38 = vsel %vm6243_vm2, %v2284_v40, %v2288_v32  ;;  %v2296_v40 = vrot.slane %v2294_v10, 5 }
 0x14c   : > { %v2360_v58 = vunpack.c.l.b16 %v2289_v38  ;;  %v5661_v32 = vld [vmem:[%s6221_s8 + $0x18] sm:$0xf]  ;;  %v2307_v10 = vor.u32 %v2306_v50, %v2302_v17  ;;  %v3367_v38 = vshrl.u32 %v7044_v44, 16  ;;  %v3365_v50 = vrot.slane %v3363_v24, 5 }
 0x14d   : > { %1524 = vmatmul.bf16.gmra.mxu2 %v1380_v9 }
 0x14e   : > { %v1797_v6 = vpop.f32.mrf.mxu3 }
 0x14f   : > { %v1861_v16 = vadd.f32 %v1797_v6, %v1546_v57  ;;  %v1316_v57 = vsel %vm6537_vm5, %v1314_v35, %v1315_v11  ;;  %v2377_v35 = vpack.c.b16 %v2360_v58, %v2359_v21  ;;  %v2297_v11 = vor.u32 %v2296_v40, %v2293_v34 }
 0x150   : > { %v1485_v12 = vpop.f32.mrf.mxu2  ;;  %v2479_v23 = vpop.f32.mrf.mxu0  ;;  %v1365_v6 = vunpack.c.l.b16 %v1316_v57  ;;  %v6122_v57 = vld [vmem:[%s6221_s8 + $0x1c] sm:$0xf]  ;;  %v2308_v34 = vrot.slane %v2307_v10, 4 }
 0x151   : > { %v1547_v9 = vadd.f32 %v1485_v12, %v1105_v18  ;;  %v7034_v27 = vpop.f32.mrf.mxu1  ;;  %v7036_v52 = vadd.f32 %v2479_v23, %v1861_v16  ;;  %v1364_v18 = vunpack.c.l.b16 %v1313_v43  ;;  %v5388_v16 = vld [vmem:[%s6221_s8 + $0xc8] sm:$0x1]  ;;  %v3354_v12 = vshrl.u32 %v5661_v32, 16 }
 0x152   : > { %v3357_v23 = vshll.u32 %v5661_v32, 16  ;;  %v2637_v15 = vrot.slane %v6122_v57, 5 }
 0x153   : > { %8343 = vst [vmem:[#allocation3_spill] sm:$0xff] %v7036_v52  ;;  %1839 = vmatmul.bf16.gmra.mxu3 %v5898_v48  ;;  %v2310_v48 = vshll.u32 %v5388_v16, 16  ;;  %v1381_v43 = vpack.c.b16 %v1365_v6, %v1364_v18  ;;  %v3356_v21 = vrot.slane %v3354_v12, 4  ;;  %v3369_v18 = vrot.slane %v3367_v38, 4 }
 0x154   : > { %v3359_v58 = vrot.slane %v3357_v23, 5  ;;  %v5454_v6 = vrot.slane %v5438_v5, 9  ;;  %v2639_v16 = vrot.slane %v2637_v15, 4  ;;  %v1110_v12 = vadd.f32 %v7018_v1, %v6725_v20 }
 0x155   : > { %v2312_v40 = vrot.slane %v2310_v48, 5  ;;  %v3370_v10 = vor.u32 %v3369_v18, %v3365_v50 }
 0x156   : > { %v1800_v51 = vpop.f32.mrf.mxu3 }
 0x157   : > { %v1862_v55 = vadd.f32 %v1800_v51, %v1547_v9  ;;  %v2298_v9 = vrot.slane %v2297_v11, 4  ;;  %v5899_v11 = vld [vmem:[%s6221_s8 + $0xc0] sm:$0xff]  ;;  %v2313_v24 = vsel %vm6243_vm2, %v2308_v34, %v2312_v40  ;;  %v3371_v40 = vrot.slane %v3370_v10, 4  ;;  %v6124_v10 = vld [vmem:[%s6221_s8 + $0x28] sm:$0xf] }
 0x158   : > { %v1487_v46 = vpop.f32.mrf.mxu2  ;;  %v2482_v45 = vpop.f32.mrf.mxu0 }
 0x159   : > { %v1548_v32 = vadd.f32 %v1487_v46, %v1107_v31  ;;  %v7052_v52 = vpop.f32.mrf.mxu1  ;;  %v7054_v56 = vadd.f32 %v2482_v45, %v1862_v55  ;;  %v6123_v31 = vld [vmem:[%s6221_s8 + $0x20] sm:$0x1]  ;;  %v3360_v55 = vor.u32 %v3359_v58, %v3356_v21  ;;  %v2362_v21 = vunpack.c.l.b16 %v2313_v24  ;;  %v5664_v58 = vld [vmem:[%s6221_s8 + $0x24] sm:$0xf] }
 0x15a   : > { %v2640_v51 = vrot.slane %v6123_v31, 5  ;;  %v7060_v46 = vld [vmem:[%s6221_s8 + $0x20] sm:$0x1]  ;;  %v7080_v31 = vld [vmem:[%s6221_s8 + $0x28] sm:$0xf] }
 0x15b   : > { %2521 = vmatmul.bf16.gmra.mxu0 %v2377_v35  ;;  %2877 = vmatmul.bf16.vlgmr.msra.gmra.mxu1 %v7009_v25  ;;  %v2303_v25 = vsel %vm6243_vm2, %v2298_v9, %v2302_v17  ;;  %v3373_v48 = vshll.u32 %v7060_v46, 16 }
 0x15c   : > { %v2641_v20 = vsel %vm6537_vm5, %v2639_v16, %v2640_v51  ;;  %v2361_v5 = vunpack.c.l.b16 %v2303_v25  ;;  %v3381_v16 = vshll.u32 %v5664_v58, 16  ;;  %v1112_v51 = vadd.f32 %v7034_v27, %v6743_v47 }
 0x15d   : > { %1529 = vmatmul.bf16.gmra.mxu2 %v1381_v43  ;;  %v2638_v43 = vsel %vm6537_vm5, %v5454_v6, %v2637_v15  ;;  %v2760_v34 = vunpack.c.l.b16 %v2641_v20  ;;  %v3375_v18 = vrot.slane %v3373_v48, 5  ;;  %v3378_v6 = vshrl.u32 %v5664_v58, 16 }
 0x15e   : > { %v1802_v23 = vpop.f32.mrf.mxu3  ;;  %v2759_v9 = vunpack.c.l.b16 %v2638_v43  ;;  %v3391_v25 = vshrl.u32 %v7080_v31, 16  ;;  %v4053_v47 = vrot.slane %v7044_v44, 5 }
 0x15f   : > { %v1863_v35 = vadd.f32 %v1802_v23, %v1548_v32  ;;  %v3361_v32 = vrot.slane %v3360_v55, 4  ;;  %v3387_v23 = vshll.u32 %v7080_v31, 16  ;;  %v3376_v24 = vsel %vm6243_vm2, %v3371_v40, %v3375_v18 }
 0x160   : > { %v1490_v38 = vpop.f32.mrf.mxu2  ;;  %v2484_v45 = vpop.f32.mrf.mxu0  ;;  %v3393_v40 = vrot.slane %v3391_v25, 4 }
 0x161   : > { %v1549_v1 = vadd.f32 %v1490_v38, %v1110_v12  ;;  %v7074_v17 = vpop.f32.mrf.mxu1  ;;  %v7076_v57 = vadd.f32 %v2484_v45, %v1863_v35  ;;  %v3366_v15 = vsel %vm6243_vm2, %v3361_v32, %v3365_v50  ;;  %v2378_v12 = vpack.c.b16 %v2362_v21, %v2361_v5  ;;  %v5439_v45 = vld [vmem:[%s6221_s8 + $0x24] sm:$0xe]  ;;  %v5924_v32 = vld [vmem:[%s6221_s8 + $0x18] sm:$0xff] }
 0x162   : > { %v2644_v50 = vrot.slane %v6124_v10, 5  ;;  %v3383_v5 = vrot.slane %v3381_v16, 5  ;;  %v5757_v21 = vld [vmem:[%s6221_s8 + $0x18] sm:$0xe]  ;;  %v3754_v58 = vunpack.c.l.b16 %v3366_v15  ;;  %v5455_v18 = vrot.slane %v5439_v45, 9 }
 0x163   : > { %1844 = vmatmul.bf16.gmra.mxu3 %v5899_v11  ;;  %v2790_v11 = vpack.c.b16 %v2760_v34, %v2759_v9  ;;  %v3755_v9 = vunpack.c.l.b16 %v3376_v24  ;;  %v7099_v34 = vrot.slane %v3387_v23, 5  ;;  %v7103_v10 = vld [vmem:[%s6221_s8 + $0x2c] sm:$0x1] }
 0x164   : > { %v2646_v44 = vrot.slane %v2644_v50, 4  ;;  %v3397_v25 = vshll.u32 %v7103_v10, 16  ;;  %v2645_v24 = vsel %vm6537_vm5, %v5455_v18, %v2644_v50  ;;  %v5667_v18 = vld [vmem:[%s6221_s8 + $0x30] sm:$0xf] }
 0x165   : > { %v3786_v15 = vpack.c.b16 %v3755_v9, %v3754_v58  ;;  %v3394_v23 = vor.u32 %v3393_v40, %v7099_v34 }
 0x166   : > { %v1805_v55 = vpop.f32.mrf.mxu3  ;;  %v3399_v40 = vrot.slane %v3397_v25, 5  ;;  %v1117_v25 = vadd.f32 %v7074_v17, %v6685_v60  ;;  %v5758_v60 = vld [vmem:[%s6221_s8 + $0x24] sm:$0xe] }
 0x167   : > { %v1864_v35 = vadd.f32 %v1805_v55, %v1549_v1  ;;  %v3380_v1 = vrot.slane %v3378_v6, 4  ;;  %v6125_v55 = vld [vmem:[%s6221_s8 + $0x2c] sm:$0x1]  ;;  %v3395_v9 = vrot.slane %v3394_v23, 4 }
 0x168   : > { %v1492_v48 = vpop.f32.mrf.mxu2  ;;  %v2487_v38 = vpop.f32.mrf.mxu0 }
 0x169   : > { %v1550_v27 = vadd.f32 %v1492_v48, %v1112_v51  ;;  %v7093_v43 = vpop.f32.mrf.mxu1  ;;  %v7095_v20 = vadd.f32 %v2487_v38, %v1864_v35  ;;  %v2647_v51 = vrot.slane %v6125_v55, 5  ;;  %v5773_v48 = vrot.slane %v5757_v21, 9 }
 0x16a   : > { %v4055_v35 = vrot.slane %v4053_v47, 4  ;;  %v4056_v38 = vrot.slane %v7060_v46, 5  ;;  %v3384_v6 = vor.u32 %v3383_v5, %v3380_v1 }
 0x16b   : > { %2526 = vmatmul.bf16.gmra.mxu0 %v2378_v12  ;;  %2882 = vmatmul.bf16.gmra.mxu1 %v2790_v11  ;;  %v1115_v12 = vadd.f32 %v7052_v52, %v6663_v4  ;;  %v2648_v45 = vsel %vm6537_vm5, %v2646_v44, %v2647_v51  ;;  %v4054_v1 = vsel %vm6537_vm5, %v5773_v48, %v4053_v47  ;;  %v7124_v51 = vld [vmem:[%s6221_s8 + $0x34] sm:$0xf]  ;;  %v3402_v48 = vshrl.u32 %v5667_v18, 16 }
 0x16c   : > { %v4057_v5 = vsel %vm6537_vm5, %v4055_v35, %v4056_v38  ;;  %v3385_v52 = vrot.slane %v3384_v6, 4  ;;  %v2762_v50 = vunpack.c.l.b16 %v2648_v45  ;;  %v4180_v44 = vunpack.c.l.b16 %v4054_v1 }
 0x16d   : > { %3192 = vmatmul.bf16.vlgmr.msra.gmra.mxu2 %v5924_v32  ;;  %v4181_v55 = vunpack.c.l.b16 %v4057_v5  ;;  %v3405_v35 = vshll.u32 %v5667_v18, 16  ;;  %v3411_v23 = vshll.u32 %v7124_v51, 16  ;;  %v4060_v1 = vrot.slane %v7080_v31, 5 }
 0x16e   : > { %v1807_v16 = vpop.f32.mrf.mxu3  ;;  %v3390_v47 = vsel %vm6243_vm2, %v3385_v52, %v7099_v34 }
 0x16f   : > { %v1865_v11 = vadd.f32 %v1807_v16, %v1550_v27  ;;  %v2761_v27 = vunpack.c.l.b16 %v2645_v24  ;;  %v3400_v16 = vsel %vm6243_vm2, %v3395_v9, %v3399_v40  ;;  %v6126_v24 = vld [vmem:[%s6221_s8 + $0x34] sm:$0xf]  ;;  %v3404_v9 = vrot.slane %v3402_v48, 4 }
 0x170   : > { %v1495_v46 = vpop.f32.mrf.mxu2  ;;  %v2489_v32 = vpop.f32.mrf.mxu0  ;;  %v2651_v34 = vrot.slane %v6126_v24, 5  ;;  %v3407_v40 = vrot.slane %v3405_v35, 5  ;;  %v3756_v17 = vunpack.c.l.b16 %v3390_v47  ;;  %v7144_v18 = vrot.slane %v3411_v23, 5  ;;  %v7148_v24 = vld [vmem:[%s6221_s8 + $0x38] sm:$0x1] }
 0x171   : > { %v1551_v21 = vadd.f32 %v1495_v46, %v1115_v12  ;;  %v7118_v58 = vpop.f32.mrf.mxu1  ;;  %v7120_v4 = vadd.f32 %v2489_v32, %v1865_v11  ;;  %v2791_v6 = vpack.c.b16 %v2762_v50, %v2761_v27  ;;  %v4212_v11 = vpack.c.b16 %v4181_v55, %v4180_v44  ;;  %v5440_v32 = vld [vmem:[%s6221_s8 + $0x30] sm:$0xe]  ;;  %v5925_v50 = vld [vmem:[%s6221_s8 + $0x24] sm:$0xff] }
 0x172   : > { %v5456_v55 = vrot.slane %v5440_v32, 9  ;;  %v2653_v31 = vrot.slane %v2651_v34, 4  ;;  %v3408_v48 = vor.u32 %v3407_v40, %v3404_v9  ;;  %v3421_v23 = vshll.u32 %v7148_v24, 16 }
 0x173   : > { %3874 = vmatmul.bf16.vlgmr.msra.gmra.mxu3 %v3786_v15  ;;  %v3415_v15 = vshrl.u32 %v7124_v51, 16 }
 0x175   : > { %v3417_v44 = vrot.slane %v3415_v15, 4 }
 0x176   : > { %v1810_v38 = vpop.f32.mrf.mxu3 }
 0x177   : > { %v1866_v12 = vadd.f32 %v1810_v38, %v1551_v21  ;;  %v3757_v21 = vunpack.c.l.b16 %v3400_v16  ;;  %v6127_v38 = vld [vmem:[%s6221_s8 + $0x38] sm:$0x1]  ;;  %v3418_v16 = vor.u32 %v3417_v44, %v7144_v18  ;;  %v3423_v44 = vrot.slane %v3421_v23, 5 }
 0x178   : > { %v1497_v45 = vpop.f32.mrf.mxu2  ;;  %v2492_v46 = vpop.f32.mrf.mxu0  ;;  %v1122_v23 = vadd.f32 %v7118_v58, %v6720_v7  ;;  %v5759_v7 = vld [vmem:[%s6221_s8 + $0x30] sm:$0xe] }
 0x179   : > { %v1552_v5 = vadd.f32 %v1497_v45, %v1117_v25  ;;  %v7138_v52 = vpop.f32.mrf.mxu1  ;;  %v7140_v27 = vadd.f32 %v2492_v46, %v1866_v12  ;;  %v2654_v25 = vrot.slane %v6127_v38, 5  ;;  %v5774_v45 = vrot.slane %v5758_v60, 9 }
 0x17a   : > { %v4062_v12 = vrot.slane %v4060_v1, 4  ;;  %v4063_v46 = vrot.slane %v7103_v10, 5  ;;  %v3787_v47 = vpack.c.b16 %v3757_v21, %v3756_v17  ;;  %v3419_v21 = vrot.slane %v3418_v16, 4 }
 0x17b   : > { %2887 = vmatmul.bf16.gmra.mxu1 %v2791_v6  ;;  %4300 = vmatmul.bf16.vlgmr.msra.gmra.mxu0 %v4212_v11  ;;  %v1120_v6 = vadd.f32 %v7093_v43, %v6700_v2  ;;  %v2652_v11 = vsel %vm6537_vm5, %v5456_v55, %v2651_v34  ;;  %v2655_v32 = vsel %vm6537_vm5, %v2653_v31, %v2654_v25  ;;  %v3409_v43 = vrot.slane %v3408_v48, 4  ;;  %v5670_v55 = vld [vmem:[%s6221_s8 + $0x3c] sm:$0xf]  ;;  %v7169_v25 = vld [vmem:[%s6221_s8 + $0x40] sm:$0xf] }
 0x17c   : > { %v4061_v9 = vsel %vm6537_vm5, %v5774_v45, %v4060_v1  ;;  %v4064_v40 = vsel %vm6537_vm5, %v4062_v12, %v4063_v46  ;;  %v2764_v34 = vunpack.c.l.b16 %v2655_v32  ;;  %v3426_v45 = vshrl.u32 %v5670_v55, 16 }
 0x17d   : > { %3197 = vmatmul.bf16.gmra.mxu2 %v5925_v50  ;;  %v4182_v31 = vunpack.c.l.b16 %v4061_v9  ;;  %v4183_v38 = vunpack.c.l.b16 %v4064_v40  ;;  %v3414_v1 = vsel %vm6243_vm2, %v3409_v43, %v7144_v18  ;;  %v3429_v12 = vshll.u32 %v5670_v55, 16 }
 0x17e   : > { %v1812_v35 = vpop.f32.mrf.mxu3  ;;  %v3435_v16 = vshll.u32 %v7169_v25, 16  ;;  %v4067_v9 = vrot.slane %v7124_v51, 5  ;;  %v3758_v58 = vunpack.c.l.b16 %v3414_v1 }
 0x17f   : > { %v1867_v15 = vadd.f32 %v1812_v35, %v1552_v5  ;;  %v2763_v5 = vunpack.c.l.b16 %v2652_v11  ;;  %v3424_v35 = vsel %vm6243_vm2, %v3419_v21, %v3423_v44  ;;  %v6128_v11 = vld [vmem:[%s6221_s8 + $0x40] sm:$0xf]  ;;  %v3428_v21 = vrot.slane %v3426_v45, 4 }
 0x180   : > { %v1500_v10 = vpop.f32.mrf.mxu2  ;;  %v2494_v50 = vpop.f32.mrf.mxu0  ;;  %v2658_v18 = vrot.slane %v6128_v11, 5  ;;  %v3431_v44 = vrot.slane %v3429_v12, 5  ;;  %v7189_v55 = vrot.slane %v3435_v16, 5  ;;  %v7193_v11 = vld [vmem:[%s6221_s8 + $0x44] sm:$0x1] }
 0x181   : > { %v1553_v60 = vadd.f32 %v1500_v10, %v1120_v6  ;;  %v7163_v17 = vpop.f32.mrf.mxu1  ;;  %v7165_v2 = vadd.f32 %v2494_v50, %v1867_v15  ;;  %v2792_v48 = vpack.c.b16 %v2764_v34, %v2763_v5  ;;  %v4213_v15 = vpack.c.b16 %v4183_v38, %v4182_v31  ;;  %v5441_v50 = vld [vmem:[%s6221_s8 + $0x3c] sm:$0xe]  ;;  %v5926_v34 = vld [vmem:[%s6221_s8 + $0x30] sm:$0xff] }
 0x182   : > { %v5457_v38 = vrot.slane %v5441_v50, 9  ;;  %v2660_v51 = vrot.slane %v2658_v18, 4  ;;  %v3432_v45 = vor.u32 %v3431_v44, %v3428_v21  ;;  %v3445_v16 = vshll.u32 %v7193_v11, 16 }
 0x183   : > { %3879 = vmatmul.bf16.gmra.mxu3 %v3787_v47  ;;  %v3439_v47 = vshrl.u32 %v7169_v25, 16 }
 0x185   : > { %v3441_v31 = vrot.slane %v3439_v47, 4 }
 0x186   : > { %v1815_v46 = vpop.f32.mrf.mxu3 }
 0x187   : > { %v1868_v6 = vadd.f32 %v1815_v46, %v1553_v60  ;;  %v3759_v60 = vunpack.c.l.b16 %v3424_v35  ;;  %v6129_v46 = vld [vmem:[%s6221_s8 + $0x44] sm:$0x1]  ;;  %v3442_v35 = vor.u32 %v3441_v31, %v7189_v55  ;;  %v3447_v31 = vrot.slane %v3445_v16, 5 }
 0x188   : > { %v1502_v32 = vpop.f32.mrf.mxu2  ;;  %v2497_v10 = vpop.f32.mrf.mxu0  ;;  %v1127_v16 = vadd.f32 %v7163_v17, %v6762_v19  ;;  %v5760_v19 = vld [vmem:[%s6221_s8 + $0x3c] sm:$0xe] }
 0x189   : > { %v1554_v40 = vadd.f32 %v1502_v32, %v1122_v23  ;;  %v7183_v43 = vpop.f32.mrf.mxu1  ;;  %v7185_v5 = vadd.f32 %v2497_v10, %v1868_v6  ;;  %v2661_v23 = vrot.slane %v6129_v46, 5  ;;  %v5775_v32 = vrot.slane %v5759_v7, 9 }
 0x18a   : > { %v4069_v6 = vrot.slane %v4067_v9, 4  ;;  %v4070_v10 = vrot.slane %v7148_v24, 5  ;;  %v3788_v1 = vpack.c.b16 %v3759_v60, %v3758_v58  ;;  %v3443_v60 = vrot.slane %v3442_v35, 4 }
 0x18b   : > { %2892 = vmatmul.bf16.gmra.mxu1 %v2792_v48  ;;  %4305 = vmatmul.bf16.gmra.mxu0 %v4213_v15  ;;  %v1125_v48 = vadd.f32 %v7138_v52, %v6735_v41  ;;  %v2659_v15 = vsel %vm6537_vm5, %v5457_v38, %v2658_v18  ;;  %v2662_v50 = vsel %vm6537_vm5, %v2660_v51, %v2661_v23  ;;  %v3433_v52 = vrot.slane %v3432_v45, 4  ;;  %v5673_v38 = vld [vmem:[%s6221_s8 + $0x48] sm:$0xf]  ;;  %v7214_v23 = vld [vmem:[%s6221_s8 + $0x4c] sm:$0xf] }
 0x18c   : > { %v4068_v21 = vsel %vm6537_vm5, %v5775_v32, %v4067_v9  ;;  %v4071_v44 = vsel %vm6537_vm5, %v4069_v6, %v4070_v10  ;;  %v2766_v18 = vunpack.c.l.b16 %v2662_v50  ;;  %v3450_v32 = vshrl.u32 %v5673_v38, 16 }
 0x18d   : > { %3202 = vmatmul.bf16.gmra.mxu2 %v5926_v34  ;;  %v4184_v51 = vunpack.c.l.b16 %v4068_v21  ;;  %v4185_v46 = vunpack.c.l.b16 %v4071_v44  ;;  %v3438_v9 = vsel %vm6243_vm2, %v3433_v52, %v7189_v55  ;;  %v3453_v6 = vshll.u32 %v5673_v38, 16 }
 0x18e   : > { %v1817_v12 = vpop.f32.mrf.mxu3  ;;  %v3459_v35 = vshll.u32 %v7214_v23, 16  ;;  %v4074_v21 = vrot.slane %v7169_v25, 5  ;;  %v3760_v17 = vunpack.c.l.b16 %v3438_v9 }
 0x18f   : > { %v1869_v47 = vadd.f32 %v1817_v12, %v1554_v40  ;;  %v2765_v40 = vunpack.c.l.b16 %v2659_v15  ;;  %v3448_v12 = vsel %vm6243_vm2, %v3443_v60, %v3447_v31  ;;  %v6130_v15 = vld [vmem:[%s6221_s8 + $0x4c] sm:$0xf]  ;;  %v3452_v60 = vrot.slane %v3450_v32, 4 }
 0x190   : > { %v1505_v24 = vpop.f32.mrf.mxu2  ;;  %v2499_v34 = vpop.f32.mrf.mxu0  ;;  %v2665_v55 = vrot.slane %v6130_v15, 5  ;;  %v3455_v31 = vrot.slane %v3453_v6, 5  ;;  %v7234_v38 = vrot.slane %v3459_v35, 5  ;;  %v7238_v15 = vld [vmem:[%s6221_s8 + $0x50] sm:$0x1] }
 0x191   : > { %v1555_v7 = vadd.f32 %v1505_v24, %v1125_v48  ;;  %v7208_v58 = vpop.f32.mrf.mxu1  ;;  %v7210_v41 = vadd.f32 %v2499_v34, %v1869_v47  ;;  %v2793_v45 = vpack.c.b16 %v2766_v18, %v2765_v40  ;;  %v4214_v47 = vpack.c.b16 %v4185_v46, %v4184_v51  ;;  %v5442_v34 = vld [vmem:[%s6221_s8 + $0x48] sm:$0xe]  ;;  %v5927_v18 = vld [vmem:[%s6221_s8 + $0x3c] sm:$0xff] }
 0x192   : > { %v5458_v46 = vrot.slane %v5442_v34, 9  ;;  %v2667_v25 = vrot.slane %v2665_v55, 4  ;;  %v3456_v32 = vor.u32 %v3455_v31, %v3452_v60  ;;  %v3469_v35 = vshll.u32 %v7238_v15, 16 }
 0x193   : > { %3884 = vmatmul.bf16.gmra.mxu3 %v3788_v1  ;;  %v3463_v1 = vshrl.u32 %v7214_v23, 16 }
 0x195   : > { %v3465_v51 = vrot.slane %v3463_v1, 4 }
 0x196   : > { %v1820_v10 = vpop.f32.mrf.mxu3 }
 0x197   : > { %v1870_v48 = vadd.f32 %v1820_v10, %v1555_v7  ;;  %v3761_v7 = vunpack.c.l.b16 %v3448_v12  ;;  %v6131_v10 = vld [vmem:[%s6221_s8 + $0x50] sm:$0x1]  ;;  %v3466_v12 = vor.u32 %v3465_v51, %v7234_v38  ;;  %v3471_v51 = vrot.slane %v3469_v35, 5 }
 0x198   : > { %v1507_v50 = vpop.f32.mrf.mxu2  ;;  %v2502_v24 = vpop.f32.mrf.mxu0  ;;  %v1132_v35 = vadd.f32 %v7208_v58, %v6799_v29  ;;  %v5761_v29 = vld [vmem:[%s6221_s8 + $0x48] sm:$0xe] }
 0x199   : > { %v1556_v44 = vadd.f32 %v1507_v50, %v1127_v16  ;;  %v7228_v52 = vpop.f32.mrf.mxu1  ;;  %v7230_v40 = vadd.f32 %v2502_v24, %v1870_v48  ;;  %v2668_v16 = vrot.slane %v6131_v10, 5  ;;  %v5776_v50 = vrot.slane %v5760_v19, 9 }
 0x19a   : > { %v4076_v48 = vrot.slane %v4074_v21, 4  ;;  %v4077_v24 = vrot.slane %v7193_v11, 5  ;;  %v3789_v9 = vpack.c.b16 %v3761_v7, %v3760_v17  ;;  %v3467_v7 = vrot.slane %v3466_v12, 4 }
 0x19b   : > { %2897 = vmatmul.bf16.gmra.mxu1 %v2793_v45  ;;  %4310 = vmatmul.bf16.gmra.mxu0 %v4214_v47  ;;  %v1130_v45 = vadd.f32 %v7183_v43, %v6781_v54  ;;  %v2666_v47 = vsel %vm6537_vm5, %v5458_v46, %v2665_v55  ;;  %v2669_v34 = vsel %vm6537_vm5, %v2667_v25, %v2668_v16  ;;  %v3457_v43 = vrot.slane %v3456_v32, 4  ;;  %v5676_v46 = vld [vmem:[%s6221_s8 + $0x54] sm:$0xf]  ;;  %v7259_v16 = vld [vmem:[%s6221_s8 + $0x58] sm:$0xf] }
 0x19c   : > { %v4075_v60 = vsel %vm6537_vm5, %v5776_v50, %v4074_v21  ;;  %v4078_v31 = vsel %vm6537_vm5, %v4076_v48, %v4077_v24  ;;  %v2768_v55 = vunpack.c.l.b16 %v2669_v34  ;;  %v3474_v50 = vshrl.u32 %v5676_v46, 16 }
 0x19d   : > { %3207 = vmatmul.bf16.gmra.mxu2 %v5927_v18  ;;  %v4186_v25 = vunpack.c.l.b16 %v4075_v60  ;;  %v4187_v10 = vunpack.c.l.b16 %v4078_v31  ;;  %v3462_v21 = vsel %vm6243_vm2, %v3457_v43, %v7234_v38  ;;  %v3477_v48 = vshll.u32 %v5676_v46, 16 }
 0x19e   : > { %v1822_v6 = vpop.f32.mrf.mxu3  ;;  %v3483_v12 = vshll.u32 %v7259_v16, 16  ;;  %v4081_v60 = vrot.slane %v7214_v23, 5  ;;  %v3762_v58 = vunpack.c.l.b16 %v3462_v21 }
 0x19f   : > { %v1871_v1 = vadd.f32 %v1822_v6, %v1556_v44  ;;  %v2767_v44 = vunpack.c.l.b16 %v2666_v47  ;;  %v3472_v6 = vsel %vm6243_vm2, %v3467_v7, %v3471_v51  ;;  %v6132_v47 = vld [vmem:[%s6221_s8 + $0x58] sm:$0xf]  ;;  %v3476_v7 = vrot.slane %v3474_v50, 4 }
 0x1a0   : > { %v1510_v11 = vpop.f32.mrf.mxu2  ;;  %v2504_v18 = vpop.f32.mrf.mxu0  ;;  %v2672_v38 = vrot.slane %v6132_v47, 5  ;;  %v3479_v51 = vrot.slane %v3477_v48, 5  ;;  %v7279_v46 = vrot.slane %v3483_v12, 5  ;;  %v7283_v47 = vld [vmem:[%s6221_s8 + $0x5c] sm:$0x1] }
 0x1a1   : > { %v1557_v19 = vadd.f32 %v1510_v11, %v1130_v45  ;;  %v7253_v17 = vpop.f32.mrf.mxu1  ;;  %v7255_v54 = vadd.f32 %v2504_v18, %v1871_v1  ;;  %v2794_v32 = vpack.c.b16 %v2768_v55, %v2767_v44  ;;  %v4215_v1 = vpack.c.b16 %v4187_v10, %v4186_v25  ;;  %v5443_v18 = vld [vmem:[%s6221_s8 + $0x54] sm:$0xe]  ;;  %v5928_v55 = vld [vmem:[%s6221_s8 + $0x48] sm:$0xff] }
 0x1a2   : > { %v5459_v10 = vrot.slane %v5443_v18, 9  ;;  %v2674_v23 = vrot.slane %v2672_v38, 4  ;;  %v3480_v50 = vor.u32 %v3479_v51, %v3476_v7  ;;  %v3493_v12 = vshll.u32 %v7283_v47, 16 }
 0x1a3   : > { %3889 = vmatmul.bf16.gmra.mxu3 %v3789_v9  ;;  %v3487_v9 = vshrl.u32 %v7259_v16, 16 }
 0x1a5   : > { %v3489_v25 = vrot.slane %v3487_v9, 4 }
 0x1a6   : > { %v1825_v24 = vpop.f32.mrf.mxu3 }
 0x1a7   : > { %v1872_v45 = vadd.f32 %v1825_v24, %v1557_v19  ;;  %v3763_v19 = vunpack.c.l.b16 %v3472_v6  ;;  %v6133_v24 = vld [vmem:[%s6221_s8 + $0x5c] sm:$0x1]  ;;  %v3490_v6 = vor.u32 %v3489_v25, %v7279_v46  ;;  %v3495_v25 = vrot.slane %v3493_v12, 5 }
 0x1a8   : > { %v1512_v34 = vpop.f32.mrf.mxu2  ;;  %v2507_v11 = vpop.f32.mrf.mxu0  ;;  %v1137_v12 = vadd.f32 %v7253_v17, %v6688_v26  ;;  %v5762_v26 = vld [vmem:[%s6221_s8 + $0x54] sm:$0xe] }
 0x1a9   : > { %v1558_v31 = vadd.f32 %v1512_v34, %v1132_v35  ;;  %v7273_v43 = vpop.f32.mrf.mxu1  ;;  %v7275_v44 = vadd.f32 %v2507_v11, %v1872_v45  ;;  %v2675_v35 = vrot.slane %v6133_v24, 5  ;;  %v5777_v34 = vrot.slane %v5761_v29, 9 }
 0x1aa   : > { %v4083_v45 = vrot.slane %v4081_v60, 4  ;;  %v4084_v11 = vrot.slane %v7238_v15, 5  ;;  %v3790_v21 = vpack.c.b16 %v3763_v19, %v3762_v58  ;;  %v3491_v19 = vrot.slane %v3490_v6, 4 }
 0x1ab   : > { %2902 = vmatmul.bf16.gmra.mxu1 %v2794_v32  ;;  %4315 = vmatmul.bf16.gmra.mxu0 %v4215_v1  ;;  %v1135_v32 = vadd.f32 %v7228_v52, %v6665_v63  ;;  %v2673_v1 = vsel %vm6537_vm5, %v5459_v10, %v2672_v38  ;;  %v2676_v18 = vsel %vm6537_vm5, %v2674_v23, %v2675_v35  ;;  %v3481_v52 = vrot.slane %v3480_v50, 4  ;;  %v5679_v10 = vld [vmem:[%s6221_s8 + $0x60] sm:$0xf]  ;;  %v7304_v35 = vld [vmem:[%s6221_s8 + $0x64] sm:$0xf] }
 0x1ac   : > { %v4082_v7 = vsel %vm6537_vm5, %v5777_v34, %v4081_v60  ;;  %v4085_v51 = vsel %vm6537_vm5, %v4083_v45, %v4084_v11  ;;  %v2770_v38 = vunpack.c.l.b16 %v2676_v18  ;;  %v3498_v34 = vshrl.u32 %v5679_v10, 16 }
 0x1ad   : > { %3212 = vmatmul.bf16.gmra.mxu2 %v5928_v55  ;;  %v4188_v23 = vunpack.c.l.b16 %v4082_v7  ;;  %v4189_v24 = vunpack.c.l.b16 %v4085_v51  ;;  %v3486_v60 = vsel %vm6243_vm2, %v3481_v52, %v7279_v46  ;;  %v3501_v45 = vshll.u32 %v5679_v10, 16 }
 0x1ae   : > { %v1827_v48 = vpop.f32.mrf.mxu3  ;;  %v3507_v6 = vshll.u32 %v7304_v35, 16  ;;  %v4088_v7 = vrot.slane %v7259_v16, 5  ;;  %v3764_v17 = vunpack.c.l.b16 %v3486_v60 }
 0x1af   : > { %v1873_v9 = vadd.f32 %v1827_v48, %v1558_v31  ;;  %v2769_v31 = vunpack.c.l.b16 %v2673_v1  ;;  %v3496_v48 = vsel %vm6243_vm2, %v3491_v19, %v3495_v25  ;;  %v6134_v1 = vld [vmem:[%s6221_s8 + $0x64] sm:$0xf]  ;;  %v3500_v19 = vrot.slane %v3498_v34, 4 }
 0x1b0   : > { %v1515_v15 = vpop.f32.mrf.mxu2  ;;  %v2509_v55 = vpop.f32.mrf.mxu0  ;;  %v2679_v46 = vrot.slane %v6134_v1, 5  ;;  %v3503_v25 = vrot.slane %v3501_v45, 5  ;;  %v7324_v10 = vrot.slane %v3507_v6, 5  ;;  %v7328_v1 = vld [vmem:[%s6221_s8 + $0x68] sm:$0x1] }
 0x1b1   : > { %v1559_v29 = vadd.f32 %v1515_v15, %v1135_v32  ;;  %v7298_v58 = vpop.f32.mrf.mxu1  ;;  %v7300_v63 = vadd.f32 %v2509_v55, %v1873_v9  ;;  %v2795_v50 = vpack.c.b16 %v2770_v38, %v2769_v31  ;;  %v4216_v9 = vpack.c.b16 %v4189_v24, %v4188_v23  ;;  %v5444_v55 = vld [vmem:[%s6221_s8 + $0x60] sm:$0xe]  ;;  %v5929_v38 = vld [vmem:[%s6221_s8 + $0x54] sm:$0xff] }
 0x1b2   : > { %v5460_v24 = vrot.slane %v5444_v55, 9  ;;  %v2681_v16 = vrot.slane %v2679_v46, 4  ;;  %v3504_v34 = vor.u32 %v3503_v25, %v3500_v19  ;;  %v3517_v6 = vshll.u32 %v7328_v1, 16 }
 0x1b3   : > { %3894 = vmatmul.bf16.gmra.mxu3 %v3790_v21  ;;  %v3511_v21 = vshrl.u32 %v7304_v35, 16 }
 0x1b5   : > { %v3513_v23 = vrot.slane %v3511_v21, 4 }
 0x1b6   : > { %v1830_v11 = vpop.f32.mrf.mxu3 }
 0x1b7   : > { %v1874_v32 = vadd.f32 %v1830_v11, %v1559_v29  ;;  %v3765_v29 = vunpack.c.l.b16 %v3496_v48  ;;  %v6135_v11 = vld [vmem:[%s6221_s8 + $0x68] sm:$0x1]  ;;  %v3514_v48 = vor.u32 %v3513_v23, %v7324_v10  ;;  %v3519_v23 = vrot.slane %v3517_v6, 5 }
 0x1b8   : > { %v1517_v18 = vpop.f32.mrf.mxu2  ;;  %v2512_v15 = vpop.f32.mrf.mxu0  ;;  %v1142_v6 = vadd.f32 %v7298_v58, %v6731_v8  ;;  %v5763_v8 = vld [vmem:[%s6221_s8 + $0x60] sm:$0xe] }
 0x1b9   : > { %v1560_v51 = vadd.f32 %v1517_v18, %v1137_v12  ;;  %v7318_v52 = vpop.f32.mrf.mxu1  ;;  %v7320_v31 = vadd.f32 %v2512_v15, %v1874_v32  ;;  %v2682_v12 = vrot.slane %v6135_v11, 5  ;;  %v5778_v18 = vrot.slane %v5762_v26, 9 }
 0x1ba   : > { %v4090_v32 = vrot.slane %v4088_v7, 4  ;;  %v4091_v15 = vrot.slane %v7283_v47, 5  ;;  %v3791_v60 = vpack.c.b16 %v3765_v29, %v3764_v17  ;;  %v3515_v29 = vrot.slane %v3514_v48, 4 }
 0x1bb   : > { %2907 = vmatmul.bf16.gmra.mxu1 %v2795_v50  ;;  %4320 = vmatmul.bf16.gmra.mxu0 %v4216_v9  ;;  %v1140_v50 = vadd.f32 %v7273_v43, %v6710_v13  ;;  %v2680_v9 = vsel %vm6537_vm5, %v5460_v24, %v2679_v46  ;;  %v2683_v55 = vsel %vm6537_vm5, %v2681_v16, %v2682_v12  ;;  %v3505_v43 = vrot.slane %v3504_v34, 4  ;;  %v5682_v24 = vld [vmem:[%s6221_s8 + $0x6c] sm:$0xf]  ;;  %v7349_v12 = vld [vmem:[%s6221_s8 + $0x70] sm:$0xf] }
 0x1bc   : > { %v4089_v19 = vsel %vm6537_vm5, %v5778_v18, %v4088_v7  ;;  %v4092_v25 = vsel %vm6537_vm5, %v4090_v32, %v4091_v15  ;;  %v2772_v46 = vunpack.c.l.b16 %v2683_v55  ;;  %v3522_v18 = vshrl.u32 %v5682_v24, 16 }
 0x1bd   : > { %3217 = vmatmul.bf16.gmra.mxu2 %v5929_v38  ;;  %v4190_v16 = vunpack.c.l.b16 %v4089_v19  ;;  %v4191_v11 = vunpack.c.l.b16 %v4092_v25  ;;  %v3510_v7 = vsel %vm6243_vm2, %v3505_v43, %v7324_v10  ;;  %v3525_v32 = vshll.u32 %v5682_v24, 16 }
 0x1be   : > { %v1832_v45 = vpop.f32.mrf.mxu3  ;;  %v3531_v48 = vshll.u32 %v7349_v12, 16  ;;  %v4095_v19 = vrot.slane %v7304_v35, 5  ;;  %v3766_v58 = vunpack.c.l.b16 %v3510_v7 }
 0x1bf   : > { %v1875_v21 = vadd.f32 %v1832_v45, %v1560_v51  ;;  %v2771_v51 = vunpack.c.l.b16 %v2680_v9  ;;  %v3520_v45 = vsel %vm6243_vm2, %v3515_v29, %v3519_v23  ;;  %v6136_v9 = vld [vmem:[%s6221_s8 + $0x70] sm:$0xf]  ;;  %v3524_v29 = vrot.slane %v3522_v18, 4 }
 0x1c0   : > { %v1520_v47 = vpop.f32.mrf.mxu2  ;;  %v2514_v38 = vpop.f32.mrf.mxu0  ;;  %v2686_v10 = vrot.slane %v6136_v9, 5  ;;  %v3527_v23 = vrot.slane %v3525_v32, 5  ;;  %v7369_v24 = vrot.slane %v3531_v48, 5  ;;  %v7373_v9 = vld [vmem:[%s6221_s8 + $0x74] sm:$0x1]  ;;  %v1145_v48 = vadd.f32 %v7318_v52, %v6750_v61 }
 0x1c1   : > { %v1561_v26 = vadd.f32 %v1520_v47, %v1140_v50  ;;  %v7343_v17 = vpop.f32.mrf.mxu1  ;;  %v7345_v13 = vadd.f32 %v2514_v38, %v1875_v21  ;;  %v2796_v34 = vpack.c.b16 %v2772_v46, %v2771_v51  ;;  %v4217_v21 = vpack.c.b16 %v4191_v11, %v4190_v16  ;;  %v5445_v38 = vld [vmem:[%s6221_s8 + $0x6c] sm:$0xe]  ;;  %v5930_v46 = vld [vmem:[%s6221_s8 + $0x60] sm:$0xff]  ;;  %v5685_v52 = vld [vmem:[%s6221_s8 + $0x78] sm:$0xf] }
 0x1c2   : > { %v5461_v11 = vrot.slane %v5445_v38, 9  ;;  %v2688_v35 = vrot.slane %v2686_v10, 4  ;;  %v3528_v18 = vor.u32 %v3527_v23, %v3524_v29 }
 0x1c3   : > { %3899 = vmatmul.bf16.gmra.mxu3 %v3791_v60  ;;  %v3535_v60 = vshrl.u32 %v7349_v12, 16 }
 0x1c4   : > { %v3529_v61 = vrot.slane %v3528_v18, 4 }
 0x1c5   : > { %v3537_v16 = vrot.slane %v3535_v60, 4 }
 0x1c6   : > { %v1835_v15 = vpop.f32.mrf.mxu3 }
 0x1c7   : > { %v1876_v50 = vadd.f32 %v1835_v15, %v1561_v26  ;;  %v3767_v26 = vunpack.c.l.b16 %v3520_v45  ;;  %v6137_v15 = vld [vmem:[%s6221_s8 + $0x74] sm:$0x1]  ;;  %v3538_v45 = vor.u32 %v3537_v16, %v7369_v24 }
 0x1c8   : > { %v1522_v55 = vpop.f32.mrf.mxu2  ;;  %v2517_v47 = vpop.f32.mrf.mxu0 }
 0x1c9   : > { %v1562_v25 = vadd.f32 %v1522_v55, %v1142_v6  ;;  %v7363_v43 = vpop.f32.mrf.mxu1  ;;  %v7365_v51 = vadd.f32 %v2517_v47, %v1876_v50  ;;  %v2689_v6 = vrot.slane %v6137_v15, 5  ;;  %v5779_v55 = vrot.slane %v5763_v8, 9 }
 0x1ca   : > { %v4097_v50 = vrot.slane %v4095_v19, 4  ;;  %v4098_v47 = vrot.slane %v7328_v1, 5  ;;  %v3792_v7 = vpack.c.b16 %v3767_v26, %v3766_v58 }
 0x1cb   : > { %2912 = vmatmul.bf16.gmra.mxu1 %v2796_v34  ;;  %4325 = vmatmul.bf16.gmra.mxu0 %v4217_v21  ;;  %v3541_v34 = vshll.u32 %v7373_v9, 16  ;;  %v2687_v21 = vsel %vm6537_vm5, %v5461_v11, %v2686_v10  ;;  %v2690_v1 = vsel %vm6537_vm5, %v2688_v35, %v2689_v6  ;;  %v4096_v29 = vsel %vm6537_vm5, %v5779_v55, %v4095_v19 }
 0x1cc   : > { %v4099_v23 = vsel %vm6537_vm5, %v4097_v50, %v4098_v47  ;;  %v2773_v10 = vunpack.c.l.b16 %v2687_v21  ;;  %v2774_v16 = vunpack.c.l.b16 %v2690_v1  ;;  %v3539_v11 = vrot.slane %v3538_v45, 4 }
 0x1cd   : > { %3222 = vmatmul.bf16.gmra.mxu2 %v5930_v46  ;;  %v3543_v35 = vrot.slane %v3541_v34, 5  ;;  %v4192_v19 = vunpack.c.l.b16 %v4096_v29  ;;  %v4193_v15 = vunpack.c.l.b16 %v4099_v23  ;;  %v3546_v6 = vshrl.u32 %v5685_v52, 16 }
 0x1ce   : > { %v1837_v32 = vpop.f32.mrf.mxu3  ;;  %v3549_v55 = vshll.u32 %v5685_v52, 16  ;;  %v2797_v18 = vpack.c.b16 %v2774_v16, %v2773_v10  ;;  %v5764_v16 = vld [vmem:[%s6221_s8 + $0x6c] sm:$0xe] }
 0x1cf   : > { %v1877_v60 = vadd.f32 %v1837_v32, %v1562_v25  ;;  %v7394_v25 = vld [vmem:[%s6221_s8 + $0x7c] sm:$0xf]  ;;  %v3544_v45 = vsel %vm6243_vm2, %v3539_v11, %v3543_v35  ;;  %v4218_v1 = vpack.c.b16 %v4193_v15, %v4192_v19  ;;  %v3548_v52 = vrot.slane %v3546_v6, 4  ;;  %v7415_v19 = vld [vmem:[%s6221_s8 + $0x80] sm:$0x1] }
 0x1d0   : > { %v1525_v38 = vpop.f32.mrf.mxu2  ;;  %v2519_v46 = vpop.f32.mrf.mxu0  ;;  %v3555_v50 = vshll.u32 %v7394_v25, 16  ;;  %v3559_v47 = vshrl.u32 %v7394_v25, 16  ;;  %v6139_v6 = vld [vmem:[%s6221_s8 + $0x80] sm:$0x1] }
 0x1d1   : > { %v1563_v8 = vadd.f32 %v1525_v38, %v1145_v48  ;;  %v7388_v58 = vpop.f32.mrf.mxu1  ;;  %v7390_v26 = vadd.f32 %v2519_v46, %v1877_v60  ;;  %v3534_v48 = vsel %vm6243_vm2, %v3529_v61, %v7369_v24  ;;  %v1147_v60 = vadd.f32 %v7343_v17, %v6773_v28  ;;  %v5446_v38 = vld [vmem:[%s6221_s8 + $0x78] sm:$0xe]  ;;  %v5931_v28 = vld [vmem:[%s6221_s8 + $0x6c] sm:$0xff] }
 0x1d2   : > { %v4102_v46 = vrot.slane %v7349_v12, 5  ;;  %v3551_v24 = vrot.slane %v3549_v55, 5  ;;  %v7408_v61 = vrot.slane %v3555_v50, 5  ;;  %v3561_v10 = vrot.slane %v3559_v47, 4 }
 0x1d3   : > { %3904 = vmatmul.bf16.gmra.mxu3 %v3792_v7  ;;  %v6138_v7 = vld [vmem:[%s6221_s8 + $0x7c] sm:$0xf]  ;;  %v3768_v17 = vunpack.c.l.b16 %v3534_v48  ;;  %v5462_v15 = vrot.slane %v5446_v38, 9  ;;  %v2696_v55 = vrot.slane %v6139_v6, 5  ;;  %v5780_v50 = vrot.slane %v5764_v16, 9 }
 0x1d4   : > { %v2693_v34 = vrot.slane %v6138_v7, 5  ;;  %v4104_v47 = vrot.slane %v4102_v46, 4  ;;  %v3565_v48 = vshll.u32 %v7415_v19, 16  ;;  %v7441_v6 = vld [vmem:[%s6221_s8 + $0x88] sm:$0xf] }
 0x1d6   : > { %v1840_v32 = vpop.f32.mrf.mxu3 }
 0x1d7   : > { %v1878_v21 = vadd.f32 %v1840_v32, %v1563_v8  ;;  %v3769_v8 = vunpack.c.l.b16 %v3544_v45  ;;  %v2695_v32 = vrot.slane %v2693_v34, 4 }
 0x1d8   : > { %v1527_v29 = vpop.f32.mrf.mxu2  ;;  %v2522_v23 = vpop.f32.mrf.mxu0 }
 0x1d9   : > { %v1564_v11 = vadd.f32 %v1527_v29, %v1147_v60  ;;  %v7411_v35 = vadd.f32 %v2522_v23, %v1878_v21  ;;  %v2878_v7 = vpop.f32.mrf.mxu1  ;;  %v4105_v60 = vrot.slane %v7373_v9, 5  ;;  %v3552_v21 = vor.u32 %v3551_v24, %v3548_v52 }
 0x1da   : > { %v7418_v12 = vadd.f32 %v2878_v7, %v6840_v0  ;;  %v3562_v29 = vor.u32 %v3561_v10, %v7408_v61  ;;  %v3793_v23 = vpack.c.b16 %v3769_v8, %v3768_v17  ;;  %v2694_v0 = vsel %vm6537_vm5, %v5462_v15, %v2693_v34 }
 0x1db   : > { %2917 = vmatmul.bf16.gmra.mxu1 %v2797_v18  ;;  %4330 = vmatmul.bf16.gmra.mxu0 %v4218_v1  ;;  %v2697_v38 = vsel %vm6537_vm5, %v2695_v32, %v2696_v55  ;;  %v1150_v18 = vadd.f32 %v7363_v43, %v6796_v62  ;;  %v4103_v9 = vsel %vm6537_vm5, %v5780_v50, %v4102_v46  ;;  %v3553_v16 = vrot.slane %v3552_v21, 4  ;;  %v5688_v32 = vld [vmem:[%s6221_s8 + $0x84] sm:$0xf] }
 0x1dc   : > { %v4106_v52 = vsel %vm6537_vm5, %v4104_v47, %v4105_v60  ;;  %v3563_v7 = vrot.slane %v3562_v29, 4  ;;  %v3567_v34 = vrot.slane %v3565_v48, 5  ;;  %v2775_v15 = vunpack.c.l.b16 %v2694_v0 }
 0x1dd   : > { %3227 = vmatmul.bf16.gmra.mxu2 %v5931_v28  ;;  %v2776_v62 = vunpack.c.l.b16 %v2697_v38  ;;  %v4194_v46 = vunpack.c.l.b16 %v4103_v9  ;;  %v3558_v50 = vsel %vm6243_vm2, %v3553_v16, %v7408_v61  ;;  %v1152_v60 = vadd.f32 %v7388_v58, %v6810_v49  ;;  %v4428_v61 = vld [vmem:[%s8310_s4 + $0x78] sm:$0xff]  ;;  %v5447_v49 = vld [vmem:[%s6221_s8 + $0x84] sm:$0xe] }
 0x1de   : > { %v1842_v45 = vpop.f32.mrf.mxu3  ;;  %v3568_v47 = vsel %vm6243_vm2, %v3563_v7, %v3567_v34  ;;  %v3570_v29 = vshrl.u32 %v5688_v32, 16  ;;  %v3573_v48 = vshll.u32 %v5688_v32, 16  ;;  %v3579_v38 = vshll.u32 %v7441_v6, 16  ;;  %4508 = vmatpush.msrb.mxu1 %v4428_v61  ;;  %4672 = vmatpush.msrb.mxu3 %v4428_v61  ;;  %v5932_v16 = vld [vmem:[%s6221_s8 + $0x78] sm:$0xff] }
 0x1df   : > { %v1879_v1 = vadd.f32 %v1842_v45, %v1564_v11  ;;  %v4195_v11 = vunpack.c.l.b16 %v4106_v52  ;;  %v2798_v55 = vpack.c.b16 %v2776_v62, %v2775_v15  ;;  %v4109_v58 = vrot.slane %v7394_v25, 5  ;;  %v5765_v34 = vld [vmem:[%s6221_s8 + $0x78] sm:$0xe] }
 0x1e0   : > { %v1530_v24 = vpop.f32.mrf.mxu2  ;;  %v2524_v10 = vpop.f32.mrf.mxu0  ;;  %v3770_v7 = vunpack.c.l.b16 %v3558_v50  ;;  %v3572_v15 = vrot.slane %v3570_v29, 4  ;;  %v3575_v62 = vrot.slane %v3573_v48, 5  ;;  %v5463_v25 = vrot.slane %v5447_v49, 9 }
 0x1e1   : > { %v1565_v28 = vadd.f32 %v1530_v24, %v1150_v18  ;;  %v7434_v17 = vadd.f32 %v2524_v10, %v1879_v1  ;;  %v2880_v8 = vpop.f32.mrf.mxu1  ;;  %v4219_v21 = vpack.c.b16 %v4195_v11, %v4194_v46  ;;  %v3583_v18 = vshrl.u32 %v7441_v6, 16 }
 0x1e2   : > { %v7437_v43 = vadd.f32 %v2880_v8, %v6858_v36  ;;  %v3771_v8 = vunpack.c.l.b16 %v3568_v47  ;;  %v7465_v11 = vrot.slane %v3579_v38, 5  ;;  %v4111_v50 = vrot.slane %v4109_v58, 4 }
 0x1e3   : > { %3909 = vmatmul.bf16.gmra.mxu3 %v3793_v23  ;;  %v6140_v23 = vld [vmem:[%s6221_s8 + $0x88] sm:$0xf]  ;;  %v3585_v32 = vrot.slane %v3583_v18, 4  ;;  %v4112_v61 = vrot.slane %v7415_v19, 5 }
 0x1e4   : > { %v2700_v0 = vrot.slane %v6140_v23, 5  ;;  %v5781_v23 = vrot.slane %v5765_v34, 9  ;;  %v3794_v47 = vpack.c.b16 %v3771_v8, %v3770_v7  ;;  %v5691_v34 = vld [vmem:[%s6221_s8 + $0x90] sm:$0xf] }
 0x1e5   : > { %v4113_v49 = vsel %vm6537_vm5, %v4111_v50, %v4112_v61 }
 0x1e6   : > { %v1845_v36 = vpop.f32.mrf.mxu3  ;;  %v2702_v46 = vrot.slane %v2700_v0, 4  ;;  %v4110_v19 = vsel %vm6537_vm5, %v5781_v23, %v4109_v58 }
 0x1e7   : > { %v1880_v45 = vadd.f32 %v1845_v36, %v1565_v28 }
 0x1e8   : > { %v1532_v1 = vpop.f32.mrf.mxu2  ;;  %v2527_v9 = vpop.f32.mrf.mxu0 }
 0x1e9   : > { %v1566_v52 = vadd.f32 %v1532_v1, %v1152_v60  ;;  %v7458_v24 = vadd.f32 %v2527_v9, %v1880_v45  ;;  %v2883_v10 = vpop.f32.mrf.mxu1  ;;  %v6141_v60 = vld [vmem:[%s6221_s8 + $0x8c] sm:$0x1]  ;;  %v2701_v1 = vsel %vm6537_vm5, %v5463_v25, %v2700_v0  ;;  %v7490_v25 = vld [vmem:[%s6221_s8 + $0x94] sm:$0xf] }
 0x1ea   : > { %v7463_v28 = vadd.f32 %v2883_v10, %v6871_v37  ;;  %v2703_v36 = vrot.slane %v6141_v60, 5  ;;  %v7469_v45 = vld [vmem:[%s6221_s8 + $0x8c] sm:$0x1]  ;;  %v2777_v0 = vunpack.c.l.b16 %v2701_v1  ;;  %v3603_v23 = vshll.u32 %v7490_v25, 16  ;;  %v5448_v1 = vld [vmem:[%s6221_s8 + $0x90] sm:$0xe] }
 0x1eb   : > { %2922 = vmatmul.bf16.gmra.mxu1 %v2798_v55  ;;  %4335 = vmatmul.bf16.gmra.mxu0 %v4219_v21  ;;  %v3576_v55 = vor.u32 %v3575_v62, %v3572_v15  ;;  %v3586_v21 = vor.u32 %v3585_v32, %v7465_v11  ;;  %v3589_v48 = vshll.u32 %v7469_v45, 16  ;;  %v4196_v15 = vunpack.c.l.b16 %v4110_v19 }
 0x1ec   : > { %v2704_v9 = vsel %vm6537_vm5, %v2702_v46, %v2703_v36  ;;  %v4197_v62 = vunpack.c.l.b16 %v4113_v49  ;;  %v3597_v36 = vshll.u32 %v5691_v34, 16 }
 0x1ed   : > { %3232 = vmatmul.bf16.gmra.mxu2 %v5932_v16  ;;  %v2778_v8 = vunpack.c.l.b16 %v2704_v9  ;;  %v3577_v58 = vrot.slane %v3576_v55, 4  ;;  %v3587_v46 = vrot.slane %v3586_v21, 4  ;;  %v3591_v32 = vrot.slane %v3589_v48, 5  ;;  %v4427_v55 = vld [vmem:[%s8310_s4 + $0x70] sm:$0xff] }
 0x1ee   : > { %v1847_v37 = vpop.f32.mrf.mxu3  ;;  %v4116_v9 = vrot.slane %v7441_v6, 5  ;;  %4509 = vmatpush.msrb.mxu1 %v4427_v55  ;;  %4673 = vmatpush.msrb.mxu3 %v4427_v55  ;;  %v4119_v55 = vrot.slane %v7469_v45, 5 }
 0x1ef   : > { %v1881_v29 = vadd.f32 %v1847_v37, %v1566_v52  ;;  %v2799_v61 = vpack.c.b16 %v2778_v8, %v2777_v0  ;;  %v4220_v37 = vpack.c.b16 %v4197_v62, %v4196_v15  ;;  %v5766_v0 = vld [vmem:[%s6221_s8 + $0x84] sm:$0xe]  ;;  %v3599_v8 = vrot.slane %v3597_v36, 5 }
 0x1f0   : > { %v3193_v38 = vpop.f32.mrf.mxu2  ;;  %v2529_v18 = vpop.f32.mrf.mxu0  ;;  %v7513_v15 = vrot.slane %v3603_v23, 5 }
 0x1f1   : > { %v3273_v52 = vadd.f32 %v3193_v38, %v7418_v12  ;;  %v7483_v10 = vadd.f32 %v2529_v18, %v1881_v29  ;;  %v2885_v16 = vpop.f32.mrf.mxu1  ;;  %v3594_v12 = vshrl.u32 %v5691_v34, 16  ;;  %v3582_v38 = vsel %vm6243_vm2, %v3577_v58, %v7465_v11 }
 0x1f2   : > { %v7486_v7 = vadd.f32 %v2885_v16, %v6887_v39  ;;  %v3607_v39 = vshrl.u32 %v7490_v25, 16  ;;  %v3592_v18 = vsel %vm6243_vm2, %v3587_v46, %v3591_v32  ;;  %v5933_v16 = vld [vmem:[%s6221_s8 + $0x84] sm:$0xff]  ;;  %v3772_v6 = vunpack.c.l.b16 %v3582_v38  ;;  %v7516_v32 = vld [vmem:[%s6221_s8 + $0x98] sm:$0x1] }
 0x1f3   : > { %8344 = vst [vmem:[#allocation4_spill] sm:$0xff] %v7483_v10  ;;  %3914 = vmatmul.bf16.gmra.mxu3 %v3794_v47  ;;  %v6142_v47 = vld [vmem:[%s6221_s8 + $0x94] sm:$0xf]  ;;  %v3596_v34 = vrot.slane %v3594_v12, 4  ;;  %v3773_v58 = vunpack.c.l.b16 %v3592_v18  ;;  %v4118_v12 = vrot.slane %v4116_v9, 4 }
 0x1f4   : > { %v2707_v29 = vrot.slane %v6142_v47, 5  ;;  %v3609_v62 = vrot.slane %v3607_v39, 4  ;;  %v5782_v47 = vrot.slane %v5766_v0, 9  ;;  %v3613_v39 = vshll.u32 %v7516_v32, 16  ;;  %v7535_v0 = vld [vmem:[%s6221_s8 + $0xa0] sm:$0xf] }
 0x1f5   : > { %v3600_v36 = vor.u32 %v3599_v8, %v3596_v34 }
 0x1f6   : > { %v3875_v60 = vpop.f32.mrf.mxu3  ;;  %v2709_v46 = vrot.slane %v2707_v29, 4  ;;  %v3610_v23 = vor.u32 %v3609_v62, %v7513_v15  ;;  %v4117_v45 = vsel %vm6537_vm5, %v5782_v47, %v4116_v9  ;;  %v3631_v47 = vshrl.u32 %v7535_v0, 16 }
 0x1f7   : > { %v3955_v50 = vadd.f32 %v3875_v60, %v3273_v52  ;;  %v6143_v60 = vld [vmem:[%s6221_s8 + $0x98] sm:$0x1] }
 0x1f8   : > { %v3195_v21 = vpop.f32.mrf.mxu2  ;;  %v4301_v48 = vpop.f32.mrf.mxu0  ;;  %v3611_v62 = vrot.slane %v3610_v23, 4 }
 0x1f9   : > { %v3274_v19 = vadd.f32 %v3195_v21, %v7437_v43  ;;  %v2888_v49 = vpop.f32.mrf.mxu1  ;;  %v7506_v52 = vadd.f32 %v4301_v48, %v3955_v50  ;;  %v5464_v43 = vrot.slane %v5448_v1, 9  ;;  %v2710_v50 = vrot.slane %v6143_v60, 5 }
 0x1fa   : > { %v7511_v11 = vadd.f32 %v2888_v49, %v6908_v42  ;;  %v4120_v1 = vsel %vm6537_vm5, %v4118_v12, %v4119_v55 }
 0x1fb   : > { %8345 = vst [vmem:[#allocation5_spill] sm:$0xff] %v7506_v52  ;;  %2927 = vmatmul.bf16.gmra.mxu1 %v2799_v61  ;;  %4340 = vmatmul.bf16.gmra.mxu0 %v4220_v37  ;;  %v3795_v37 = vpack.c.b16 %v3773_v58, %v3772_v6  ;;  %v2708_v38 = vsel %vm6537_vm5, %v5464_v43, %v2707_v29  ;;  %v3601_v29 = vrot.slane %v3600_v36, 4  ;;  %v3615_v6 = vrot.slane %v3613_v39, 5 }
 0x1fc   : > { %v2711_v18 = vsel %vm6537_vm5, %v2709_v46, %v2710_v50  ;;  %v2779_v9 = vunpack.c.l.b16 %v2708_v38  ;;  %v4198_v43 = vunpack.c.l.b16 %v4117_v45  ;;  %v4199_v46 = vunpack.c.l.b16 %v4120_v1 }
 0x1fd   : > { %3237 = vmatmul.bf16.gmra.mxu2 %v5933_v16  ;;  %v2780_v58 = vunpack.c.l.b16 %v2711_v18  ;;  %v3627_v50 = vshll.u32 %v7535_v0, 16  ;;  %v3616_v55 = vsel %vm6243_vm2, %v3611_v62, %v3615_v6  ;;  %v5934_v62 = vld [vmem:[%s6221_s8 + $0x90] sm:$0xff] }
 0x1fe   : > { %v3877_v42 = vpop.f32.mrf.mxu3 }
 0x1ff   : > { %v3956_v61 = vadd.f32 %v3877_v42, %v3274_v19  ;;  %v5694_v19 = vld [vmem:[%s6221_s8 + $0x9c] sm:$0xf]  ;;  %v6144_v42 = vld [vmem:[%s6221_s8 + $0xa0] sm:$0xf]  ;;  %v2800_v39 = vpack.c.b16 %v2780_v58, %v2779_v9  ;;  %v7553_v1 = vrot.slane %v3627_v50, 5  ;;  %v3775_v58 = vunpack.c.l.b16 %v3616_v55 }
 0x200   : > { %v3198_v21 = vpop.f32.mrf.mxu2  ;;  %v4303_v48 = vpop.f32.mrf.mxu0  ;;  %v3621_v60 = vshll.u32 %v5694_v19, 16  ;;  %v2714_v36 = vrot.slane %v6144_v42, 5 }
 0x201   : > { %v3275_v49 = vadd.f32 %v3198_v21, %v7463_v28  ;;  %v2890_v16 = vpop.f32.mrf.mxu1  ;;  %v7531_v34 = vadd.f32 %v4303_v48, %v3956_v61  ;;  %v3618_v28 = vshrl.u32 %v5694_v19, 16  ;;  %v4221_v61 = vpack.c.b16 %v4199_v46, %v4198_v43  ;;  %v4426_v48 = vld [vmem:[%s8310_s4 + $0x68] sm:$0xff] }
 0x202   : > { %v7538_v8 = vadd.f32 %v2890_v16, %v6924_v22  ;;  %v3606_v22 = vsel %vm6243_vm2, %v3601_v29, %v7513_v15  ;;  %v4123_v21 = vrot.slane %v7490_v25, 5  ;;  %v3623_v45 = vrot.slane %v3621_v60, 5  ;;  %4510 = vmatpush.msrb.mxu1 %v4426_v48  ;;  %4674 = vmatpush.msrb.mxu3 %v4426_v48  ;;  %v6145_v60 = vld [vmem:[%s6221_s8 + $0xa4] sm:$0x1] }
 0x203   : > { %8346 = vst [vmem:[#allocation6_spill] sm:$0xff] %v7531_v34  ;;  %3919 = vmatmul.bf16.gmra.mxu3 %v3795_v37  ;;  %v5449_v37 = vld [vmem:[%s6221_s8 + $0x9c] sm:$0xe]  ;;  %v3620_v15 = vrot.slane %v3618_v28, 4  ;;  %v3633_v16 = vrot.slane %v3631_v47, 4  ;;  %v3774_v6 = vunpack.c.l.b16 %v3606_v22  ;;  %v2716_v46 = vrot.slane %v2714_v36, 4 }
 0x204   : > { %v5465_v43 = vrot.slane %v5449_v37, 9  ;;  %v7564_v28 = vld [vmem:[%s6221_s8 + $0xa4] sm:$0x1]  ;;  %v2717_v50 = vrot.slane %v6145_v60, 5 }
 0x205   : > { %v3624_v42 = vor.u32 %v3623_v45, %v3620_v15  ;;  %v3796_v55 = vpack.c.b16 %v3775_v58, %v3774_v6 }
 0x206   : > { %v3880_v12 = vpop.f32.mrf.mxu3  ;;  %v2715_v37 = vsel %vm6537_vm5, %v5465_v43, %v2714_v36  ;;  %v5697_v43 = vld [vmem:[%s6221_s8 + $0xa8] sm:$0xf] }
 0x207   : > { %v3957_v23 = vadd.f32 %v3880_v12, %v3275_v49  ;;  %v5767_v49 = vld [vmem:[%s6221_s8 + $0x90] sm:$0xe]  ;;  %v4125_v12 = vrot.slane %v4123_v21, 4  ;;  %v3625_v15 = vrot.slane %v3624_v42, 4 }
 0x208   : > { %v3200_v38 = vpop.f32.mrf.mxu2  ;;  %v4306_v18 = vpop.f32.mrf.mxu0  ;;  %v5783_v47 = vrot.slane %v5767_v49, 9 }
 0x209   : > { %v3276_v19 = vadd.f32 %v3200_v38, %v7486_v7  ;;  %v2893_v29 = vpop.f32.mrf.mxu1  ;;  %v7557_v25 = vadd.f32 %v4306_v18, %v3957_v23  ;;  %v4126_v7 = vrot.slane %v7516_v32, 5  ;;  %v3634_v23 = vor.u32 %v3633_v16, %v7553_v1 }
 0x20a   : > { %v7561_v9 = vadd.f32 %v2893_v29, %v6941_v33  ;;  %v3637_v33 = vshll.u32 %v7564_v28, 16 }
 0x20b   : > { %8347 = vst [vmem:[#allocation7_spill] sm:$0xff] %v7557_v25  ;;  %2932 = vmatmul.bf16.gmra.mxu1 %v2800_v39  ;;  %4345 = vmatmul.bf16.gmra.mxu0 %v4221_v61  ;;  %v2718_v39 = vsel %vm6537_vm5, %v2716_v46, %v2717_v50  ;;  %v4124_v61 = vsel %vm6537_vm5, %v5783_v47, %v4123_v21  ;;  %v3635_v45 = vrot.slane %v3634_v23, 4  ;;  %v7586_v46 = vld [vmem:[%s6221_s8 + $0xac] sm:$0xf] }
 0x20c   : > { %v4127_v32 = vsel %vm6537_vm5, %v4125_v12, %v4126_v7  ;;  %v3639_v29 = vrot.slane %v3637_v33, 5  ;;  %v2782_v21 = vunpack.c.l.b16 %v2718_v39  ;;  %v4200_v6 = vunpack.c.l.b16 %v4124_v61  ;;  %v6146_v23 = vld [vmem:[%s6221_s8 + $0xac] sm:$0xf]  ;;  %v5450_v39 = vld [vmem:[%s6221_s8 + $0xa8] sm:$0xe] }
 0x20d   : > { %3242 = vmatmul.bf16.gmra.mxu2 %v5934_v62  ;;  %v4201_v58 = vunpack.c.l.b16 %v4127_v32  ;;  %v3645_v7 = vshll.u32 %v5697_v43, 16  ;;  %v2721_v33 = vrot.slane %v6146_v23, 5  ;;  %v4130_v61 = vrot.slane %v7535_v0, 5 }
 0x20e   : > { %v3882_v22 = vpop.f32.mrf.mxu3  ;;  %v3640_v60 = vsel %vm6243_vm2, %v3635_v45, %v3639_v29  ;;  %v5768_v45 = vld [vmem:[%s6221_s8 + $0x9c] sm:$0xe]  ;;  %v5466_v0 = vrot.slane %v5450_v39, 9 }
 0x20f   : > { %v3958_v48 = vadd.f32 %v3882_v22, %v3276_v19  ;;  %v2781_v19 = vunpack.c.l.b16 %v2715_v37  ;;  %v4222_v12 = vpack.c.b16 %v4201_v58, %v4200_v6  ;;  %v3651_v22 = vshll.u32 %v7586_v46, 16 }
 0x210   : > { %v3203_v38 = vpop.f32.mrf.mxu2  ;;  %v4308_v18 = vpop.f32.mrf.mxu0  ;;  %v3647_v29 = vrot.slane %v3645_v7, 5  ;;  %v5784_v23 = vrot.slane %v5768_v45, 9 }
 0x211   : > { %v3277_v16 = vadd.f32 %v3203_v38, %v7511_v11  ;;  %v2895_v49 = vpop.f32.mrf.mxu1  ;;  %v7579_v36 = vadd.f32 %v4308_v18, %v3958_v48  ;;  %v3630_v11 = vsel %vm6243_vm2, %v3625_v15, %v7553_v1  ;;  %v2801_v47 = vpack.c.b16 %v2782_v21, %v2781_v19  ;;  %v7599_v1 = vld [vmem:[%s8310_s4 + $0x60] sm:$0xff] }
 0x212   : > { %v7582_v62 = vadd.f32 %v2895_v49, %v6956_v59  ;;  %v3642_v59 = vshrl.u32 %v5697_v43, 16  ;;  %8349 = vst [vmem:[#allocation9_spill] sm:$0xff] %v7599_v1  ;;  %4511 = vmatpush.msrb.mxu1 %v7599_v1  ;;  %4675 = vmatpush.msrb.mxu3 %v7599_v1  ;;  %v5935_v15 = vld [vmem:[%s6221_s8 + $0x9c] sm:$0xff]  ;;  %v3777_v49 = vunpack.c.l.b16 %v3640_v60  ;;  %v2723_v21 = vrot.slane %v2721_v33, 4  ;;  %v6147_v43 = vld [vmem:[%s6221_s8 + $0xb0] sm:$0x1] }
 0x213   : > { %8348 = vst [vmem:[#allocation8_spill] sm:$0xff] %v7579_v36  ;;  %3924 = vmatmul.bf16.gmra.mxu3 %v3796_v55  ;;  %v3655_v55 = vshrl.u32 %v7586_v46, 16  ;;  %v7612_v6 = vrot.slane %v3651_v22, 5 }
 0x214   : > { %v3644_v19 = vrot.slane %v3642_v59, 4 }
 0x215   : > { %v3657_v58 = vrot.slane %v3655_v55, 4 }
 0x216   : > { %v3885_v50 = vpop.f32.mrf.mxu3  ;;  %v3648_v60 = vor.u32 %v3647_v29, %v3644_v19  ;;  %v7636_v29 = vld [vmem:[%s6221_s8 + $0xb8] sm:$0xf] }
 0x217   : > { %v3959_v42 = vadd.f32 %v3885_v50, %v3277_v16  ;;  %v3776_v16 = vunpack.c.l.b16 %v3630_v11  ;;  %v7616_v50 = vld [vmem:[%s6221_s8 + $0xb0] sm:$0x1]  ;;  %v3658_v59 = vor.u32 %v3657_v58, %v7612_v6 }
 0x218   : > { %v3205_v37 = vpop.f32.mrf.mxu2  ;;  %v4311_v48 = vpop.f32.mrf.mxu0  ;;  %v3661_v7 = vshll.u32 %v7616_v50, 16  ;;  %v3649_v19 = vrot.slane %v3648_v60, 4 }
 0x219   : > { %v3278_v32 = vadd.f32 %v3205_v37, %v7538_v8  ;;  %v7606_v38 = vpop.f32.mrf.mxu1  ;;  %v7608_v18 = vadd.f32 %v4311_v48, %v3959_v42  ;;  %v2724_v8 = vrot.slane %v6147_v43, 5  ;;  %v4132_v42 = vrot.slane %v4130_v61, 4 }
 0x21a   : > { %v4133_v37 = vrot.slane %v7564_v28, 5  ;;  %v2722_v48 = vsel %vm6537_vm5, %v5466_v0, %v2721_v33  ;;  %v4131_v28 = vsel %vm6537_vm5, %v5784_v23, %v4130_v61  ;;  %v3659_v61 = vrot.slane %v3658_v59, 4  ;;  %v7647_v59 = vld [vmem:[%s8310_s4 + $0x58] sm:$0xff] }
 0x21b   : > { %8350 = vst [vmem:[#allocation10_spill] sm:$0xff] %v7608_v18  ;;  %2937 = vmatmul.bf16.gmra.mxu1 %v2801_v47  ;;  %4350 = vmatmul.bf16.gmra.mxu0 %v4222_v12  ;;  %v3797_v12 = vpack.c.b16 %v3777_v49, %v3776_v16  ;;  %v2725_v39 = vsel %vm6537_vm5, %v2723_v21, %v2724_v8  ;;  %v5700_v49 = vld [vmem:[%s6221_s8 + $0xb4] sm:$0xf]  ;;  %v2783_v33 = vunpack.c.l.b16 %v2722_v48  ;;  %v4202_v21 = vunpack.c.l.b16 %v4131_v28 }
 0x21c   : > { %v2784_v0 = vunpack.c.l.b16 %v2725_v39  ;;  %v3663_v43 = vrot.slane %v3661_v7, 5  ;;  %v3666_v8 = vshrl.u32 %v5700_v49, 16  ;;  %v3669_v23 = vshll.u32 %v5700_v49, 16  ;;  %8352 = vst [vmem:[#allocation12_spill] sm:$0xff] %v7647_v59  ;;  %v5451_v28 = vld [vmem:[%s6221_s8 + $0xb4] sm:$0xe]  ;;  %4512 = vmatpush.msrb.mxu1 %v7647_v59  ;;  %4676 = vmatpush.msrb.mxu3 %v7647_v59 }
 0x21d   : > { %3247 = vmatmul.bf16.gmra.mxu2 %v5935_v15  ;;  %v4134_v15 = vsel %vm6537_vm5, %v4132_v42, %v4133_v37  ;;  %v3679_v42 = vshrl.u32 %v7636_v29, 16 }
 0x21e   : > { %v3887_v11 = vpop.f32.mrf.mxu3  ;;  %v4203_v58 = vunpack.c.l.b16 %v4134_v15  ;;  %v3664_v39 = vsel %vm6243_vm2, %v3659_v61, %v3663_v43  ;;  %v3668_v15 = vrot.slane %v3666_v8, 4  ;;  %v5769_v61 = vld [vmem:[%s6221_s8 + $0xa8] sm:$0xe] }
 0x21f   : > { %v3960_v47 = vadd.f32 %v3887_v11, %v3278_v32  ;;  %v3654_v11 = vsel %vm6243_vm2, %v3649_v19, %v7612_v6  ;;  %v3671_v6 = vrot.slane %v3669_v23, 5  ;;  %v5467_v23 = vrot.slane %v5451_v28, 9 }
 0x220   : > { %v3208_v22 = vpop.f32.mrf.mxu2  ;;  %v4313_v55 = vpop.f32.mrf.mxu0  ;;  %v3778_v8 = vunpack.c.l.b16 %v3654_v11 }
 0x221   : > { %v3279_v32 = vadd.f32 %v3208_v22, %v7561_v9  ;;  %v7630_v45 = vpop.f32.mrf.mxu1  ;;  %v7632_v16 = vadd.f32 %v4313_v55, %v3960_v47  ;;  %v3675_v9 = vshll.u32 %v7636_v29, 16  ;;  %v2802_v47 = vpack.c.b16 %v2784_v0, %v2783_v33  ;;  %v6148_v22 = vld [vmem:[%s6221_s8 + $0xb8] sm:$0xf]  ;;  %v5936_v0 = vld [vmem:[%s6221_s8 + $0xa8] sm:$0xff] }
 0x222   : > { %v2728_v55 = vrot.slane %v6148_v22, 5  ;;  %v6149_v22 = vld [vmem:[%s6221_s8 + $0xbc] sm:$0x1] }
 0x223   : > { %8351 = vst [vmem:[#allocation11_spill] sm:$0xff] %v7632_v16  ;;  %3929 = vmatmul.bf16.gmra.mxu3 %v3797_v12  ;;  %v4223_v12 = vpack.c.b16 %v4203_v58, %v4202_v21  ;;  %v3677_v21 = vrot.slane %v3675_v9, 5  ;;  %v3681_v58 = vrot.slane %v3679_v42, 4  ;;  %v2731_v1 = vrot.slane %v6149_v22, 5 }
 0x224   : > { %v3672_v9 = vor.u32 %v3671_v6, %v3668_v15 }
 0x225   : > { %v3682_v42 = vor.u32 %v3681_v58, %v3677_v21  ;;  %v8355_v58 = vld [vmem:[#allocation3_spill] sm:$0xff] }
 0x226   : > { %v3890_v37 = vpop.f32.mrf.mxu3 }
 0x227   : > { %v3961_v60 = vadd.f32 %v3890_v37, %v3279_v32  ;;  %v4137_v32 = vrot.slane %v7586_v46, 5  ;;  %v3779_v46 = vunpack.c.l.b16 %v3664_v39  ;;  %v2730_v37 = vrot.slane %v2728_v55, 4 }
 0x228   : > { %v3210_v7 = vpop.f32.mrf.mxu2  ;;  %v4316_v48 = vpop.f32.mrf.mxu0 }
 0x229   : > { %v3280_v49 = vadd.f32 %v3210_v7, %v7582_v62  ;;  %v2903_v19 = vpop.f32.mrf.mxu1  ;;  %v7656_v33 = vadd.f32 %v4316_v48, %v3961_v60  ;;  %v7665_v62 = vld [vmem:[%s6221_s8 + $0xbc] sm:$0x1]  ;;  %v5785_v7 = vrot.slane %v5769_v61, 9  ;;  %v4139_v60 = vrot.slane %v4137_v32, 4 }
 0x22a   : > { %v7661_v43 = vadd.f32 %v2903_v19, %v7020_v3  ;;  %v4140_v48 = vrot.slane %v7616_v50, 5  ;;  %v3685_v3 = vshll.u32 %v7665_v62, 16  ;;  %v2732_v39 = vsel %vm6537_vm5, %v2730_v37, %v2731_v1 }
 0x22b   : > { %8353 = vst [vmem:[#allocation13_spill] sm:$0xff] %v7656_v33  ;;  %2942 = vmatmul.bf16.gmra.mxu1 %v2802_v47  ;;  %4355 = vmatmul.bf16.gmra.mxu0 %v4223_v12  ;;  %v3798_v47 = vpack.c.b16 %v3779_v46, %v3778_v8  ;;  %v2729_v12 = vsel %vm6537_vm5, %v5467_v23, %v2728_v55  ;;  %v3683_v55 = vrot.slane %v3682_v42, 4  ;;  %v2786_v8 = vunpack.c.l.b16 %v2732_v39 }
 0x22c   : > { %v4138_v50 = vsel %vm6537_vm5, %v5785_v7, %v4137_v32  ;;  %v4141_v15 = vsel %vm6537_vm5, %v4139_v60, %v4140_v48  ;;  %v2785_v1 = vunpack.c.l.b16 %v2729_v12  ;;  %v3687_v46 = vrot.slane %v3685_v3, 5  ;;  %v5703_v32 = vld [vmem:[%s6221_s8 + $0xc0] sm:$0xf]  ;;  %v6150_v3 = vld [vmem:[%s6221_s8 + $0xc4] sm:$0xf] }
 0x22d   : > { %3252 = vmatmul.bf16.gmra.mxu2 %v5936_v0  ;;  %v3673_v0 = vrot.slane %v3672_v9, 4  ;;  %v4204_v37 = vunpack.c.l.b16 %v4138_v50  ;;  %v4205_v22 = vunpack.c.l.b16 %v4141_v15  ;;  %v3690_v7 = vshrl.u32 %v5703_v32, 16  ;;  %v7700_v50 = vld [vmem:[%s8310_s4 + $0x50] sm:$0xff] }
 0x22e   : > { %v3892_v59 = vpop.f32.mrf.mxu3  ;;  %v3693_v60 = vshll.u32 %v5703_v32, 16  ;;  %v2803_v9 = vpack.c.b16 %v2786_v8, %v2785_v1  ;;  %v3688_v42 = vsel %vm6243_vm2, %v3683_v55, %v3687_v46  ;;  %8357 = vst [vmem:[#allocation3_spill] sm:$0xff] %v7700_v50  ;;  %4513 = vmatpush.msrb.mxu1 %v7700_v50  ;;  %4677 = vmatpush.msrb.mxu3 %v7700_v50  ;;  %v5937_v8 = vld [vmem:[%s6221_s8 + $0xb4] sm:$0xff] }
 0x22f   : > { %v3962_v11 = vadd.f32 %v3892_v59, %v3280_v49  ;;  %v2966_v59 = vadd.f32 %v7606_v38, %v6980_v14  ;;  %v3678_v14 = vsel %vm6243_vm2, %v3673_v0, %v3677_v21  ;;  %v7688_v38 = vld [vmem:[%s6221_s8 + $0xc4] sm:$0xf]  ;;  %v4144_v21 = vrot.slane %v7636_v29, 5 }
 0x230   : > { %v3213_v28 = vpop.f32.mrf.mxu2  ;;  %v4318_v19 = vpop.f32.mrf.mxu0  ;;  %v3699_v0 = vshll.u32 %v7688_v38, 16  ;;  %v3703_v55 = vshrl.u32 %v7688_v38, 16  ;;  %v3692_v46 = vrot.slane %v3690_v7, 4  ;;  %v3695_v32 = vrot.slane %v3693_v60, 5  ;;  %v7716_v7 = vld [vmem:[%s6221_s8 + $0xc8] sm:$0x1] }
 0x231   : > { %v2905_v6 = vpop.f32.mrf.mxu1  ;;  %v7679_v49 = vadd.f32 %v4318_v19, %v3962_v11  ;;  %v3281_v23 = vadd.f32 %v3213_v28, %v2966_v59  ;;  %v2735_v11 = vrot.slane %v6150_v3, 5  ;;  %v4224_v28 = vpack.c.b16 %v4205_v22, %v4204_v37  ;;  %v5452_v19 = vld [vmem:[%s6221_s8 + $0xc0] sm:$0xe] }
 0x232   : > { %v7682_v61 = vadd.f32 %v2905_v6, %v8355_v58  ;;  %v3780_v6 = vunpack.c.l.b16 %v3678_v14  ;;  %v3781_v37 = vunpack.c.l.b16 %v3688_v42  ;;  %v5468_v22 = vrot.slane %v5452_v19, 9 }
 0x233   : > { %8354 = vst [vmem:[#allocation14_spill] sm:$0xff] %v7679_v49  ;;  %3934 = vmatmul.bf16.gmra.mxu3 %v3798_v47  ;;  %v8356_v47 = vld [vmem:[#allocation2_spill] sm:$0xff]  ;;  %v2737_v14 = vrot.slane %v2735_v11, 4  ;;  %v4146_v50 = vrot.slane %v4144_v21, 4  ;;  %v3696_v60 = vor.u32 %v3695_v32, %v3692_v46 }
 0x234   : > { %v2967_v12 = vadd.f32 %v7630_v45, %v8356_v47  ;;  %v5770_v45 = vld [vmem:[%s6221_s8 + $0xb4] sm:$0xe]  ;;  %v2736_v42 = vsel %vm6537_vm5, %v5468_v22, %v2735_v11 }
 0x235   : > { %v5786_v47 = vrot.slane %v5770_v45, 9  ;;  %v3697_v46 = vrot.slane %v3696_v60, 4 }
 0x236   : > { %v3895_v48 = vpop.f32.mrf.mxu3 }
 0x237   : > { %v3963_v39 = vadd.f32 %v3895_v48, %v3281_v23  ;;  %v6151_v48 = vld [vmem:[%s6221_s8 + $0xc8] sm:$0x1] }
 0x238   : > { %v3215_v15 = vpop.f32.mrf.mxu2  ;;  %v4321_v59 = vpop.f32.mrf.mxu0  ;;  %v2738_v3 = vrot.slane %v6151_v48, 5  ;;  %v5706_v48 = vld [vmem:[%s6221_s8 + $0xcc] sm:$0xf] }
 0x239   : > { %v3282_v58 = vadd.f32 %v3215_v15, %v2967_v12  ;;  %v2908_v29 = vpop.f32.mrf.mxu1  ;;  %v7707_v1 = vadd.f32 %v4321_v59, %v3963_v39  ;;  %v4147_v12 = vrot.slane %v7665_v62, 5  ;;  %v3701_v39 = vrot.slane %v3699_v0, 5 }
 0x23a   : > { %v7711_v23 = vadd.f32 %v2908_v29, %v7054_v56  ;;  %v3705_v15 = vrot.slane %v3703_v55, 4  ;;  %v3799_v56 = vpack.c.b16 %v3781_v37, %v3780_v6  ;;  %v3709_v6 = vshll.u32 %v7716_v7, 16 }
 0x23b   : > { %8358 = vst [vmem:[#allocation2_spill] sm:$0xff] %v7707_v1  ;;  %2947 = vmatmul.bf16.gmra.mxu1 %v2803_v9  ;;  %4360 = vmatmul.bf16.gmra.mxu0 %v4224_v28  ;;  %v2739_v9 = vsel %vm6537_vm5, %v2737_v14, %v2738_v3  ;;  %v4145_v28 = vsel %vm6537_vm5, %v5786_v47, %v4144_v21  ;;  %v7735_v3 = vld [vmem:[%s6221_s8 + $0xd0] sm:$0xf] }
 0x23c   : > { %v4148_v62 = vsel %vm6537_vm5, %v4146_v50, %v4147_v12  ;;  %v3706_v45 = vor.u32 %v3705_v15, %v3701_v39  ;;  %v2788_v21 = vunpack.c.l.b16 %v2739_v9  ;;  %v4206_v37 = vunpack.c.l.b16 %v4145_v28 }
 0x23d   : > { %3257 = vmatmul.bf16.gmra.mxu2 %v5937_v8  ;;  %v2787_v8 = vunpack.c.l.b16 %v2736_v42  ;;  %v4207_v50 = vunpack.c.l.b16 %v4148_v62  ;;  %v3711_v14 = vrot.slane %v3709_v6, 5  ;;  %v3723_v42 = vshll.u32 %v7735_v3, 16  ;;  %v5938_v6 = vld [vmem:[%s6221_s8 + $0xc0] sm:$0xff] }
 0x23e   : > { %v3897_v59 = vpop.f32.mrf.mxu3  ;;  %v3707_v22 = vrot.slane %v3706_v45, 4  ;;  %v4151_v62 = vrot.slane %v7688_v38, 5 }
 0x23f   : > { %v3964_v19 = vadd.f32 %v3897_v59, %v3282_v58  ;;  %v2804_v12 = vpack.c.b16 %v2788_v21, %v2787_v8  ;;  %v4225_v15 = vpack.c.b16 %v4207_v50, %v4206_v37  ;;  %v3717_v59 = vshll.u32 %v5706_v48, 16 }
 0x240   : > { %v3218_v0 = vpop.f32.mrf.mxu2  ;;  %v4323_v55 = vpop.f32.mrf.mxu0  ;;  %v3712_v28 = vsel %vm6243_vm2, %v3707_v22, %v3711_v14  ;;  %v3725_v37 = vrot.slane %v3723_v42, 5  ;;  %v4153_v14 = vrot.slane %v4151_v62, 4 }
 0x241   : > { %v3283_v29 = vadd.f32 %v3218_v0, %v7661_v43  ;;  %v2910_v11 = vpop.f32.mrf.mxu1  ;;  %v7728_v58 = vadd.f32 %v4323_v55, %v3964_v19  ;;  %v3702_v43 = vsel %vm6243_vm2, %v3697_v46, %v3701_v39  ;;  %v3727_v39 = vshrl.u32 %v7735_v3, 16 }
 0x242   : > { %v7731_v32 = vadd.f32 %v2910_v11, %v7076_v57  ;;  %v3714_v57 = vshrl.u32 %v5706_v48, 16  ;;  %v3782_v8 = vunpack.c.l.b16 %v3702_v43  ;;  %v3783_v46 = vunpack.c.l.b16 %v3712_v28  ;;  %v5708_v48 = vld [vmem:[%s6221_s8 + $0xd4] sm:$0x1] }
 0x243   : > { %8359 = vst [vmem:[#allocation15_spill] sm:$0xff] %v7728_v58  ;;  %3939 = vmatmul.bf16.gmra.mxu3 %v3799_v56  ;;  %v7743_v56 = vld [vmem:[%s8310_s4 + $0x48] sm:$0xff]  ;;  %v3719_v21 = vrot.slane %v3717_v59, 5  ;;  %v3729_v50 = vrot.slane %v3727_v39, 4 }
 0x244   : > { %8360 = vst [vmem:[#allocation16_spill] sm:$0xff] %v7743_v56  ;;  %4514 = vmatpush.msrb.mxu1 %v7743_v56  ;;  %4678 = vmatpush.msrb.mxu3 %v7743_v56  ;;  %v3716_v38 = vrot.slane %v3714_v57, 4 }
 0x245   : > { %v3730_v43 = vor.u32 %v3729_v50, %v3725_v37 }
 0x246   : > { %v3900_v47 = vpop.f32.mrf.mxu3 }
 0x247   : > { %v3965_v60 = vadd.f32 %v3900_v47, %v3283_v29  ;;  %v5771_v29 = vld [vmem:[%s6221_s8 + $0xc0] sm:$0xe] }
 0x248   : > { %v3220_v19 = vpop.f32.mrf.mxu2  ;;  %v4326_v9 = vpop.f32.mrf.mxu0  ;;  %v5787_v22 = vrot.slane %v5771_v29, 9  ;;  %v3731_v29 = vrot.slane %v3730_v43, 4 }
 0x249   : > { %v3284_v0 = vadd.f32 %v3220_v19, %v7682_v61  ;;  %v2913_v55 = vpop.f32.mrf.mxu1  ;;  %v7752_v45 = vadd.f32 %v4326_v9, %v3965_v60  ;;  %v4154_v61 = vrot.slane %v7716_v7, 5  ;;  %v3800_v19 = vpack.c.b16 %v3783_v46, %v3782_v8 }
 0x24a   : > { %v7757_v11 = vadd.f32 %v2913_v55, %v7095_v20  ;;  %v3720_v9 = vor.u32 %v3719_v21, %v3716_v38 }
 0x24b   : > { %8361 = vst [vmem:[#allocation17_spill] sm:$0xff] %v7752_v45  ;;  %2952 = vmatmul.bf16.gmra.mxu1 %v2804_v12  ;;  %4365 = vmatmul.bf16.gmra.mxu0 %v4225_v15  ;;  %v3733_v12 = vshll.u32 %v5708_v48, 16  ;;  %v4152_v15 = vsel %vm6537_vm5, %v5787_v22, %v4151_v62  ;;  %v4155_v57 = vsel %vm6537_vm5, %v4153_v14, %v4154_v61  ;;  %v4158_v14 = vrot.slane %v7735_v3, 5 }
 0x24c   : > { %v4208_v39 = vunpack.c.l.b16 %v4152_v15 }
 0x24d   : > { %3262 = vmatmul.bf16.gmra.mxu2 %v5938_v6  ;;  %v3721_v6 = vrot.slane %v3720_v9, 4  ;;  %v3735_v8 = vrot.slane %v3733_v12, 5  ;;  %v5772_v9 = vld [vmem:[%s6221_s8 + $0xcc] sm:$0xe]  ;;  %v4160_v43 = vrot.slane %v4158_v14, 4  ;;  %v4161_v12 = vrot.slane %v5708_v48, 5 }
 0x24e   : > { %v3902_v47 = vpop.f32.mrf.mxu3  ;;  %v5788_v30 = vrot.slane %v5772_v9, 9 }
 0x24f   : > { %v3966_v60 = vadd.f32 %v3902_v47, %v3284_v0  ;;  %v4209_v0 = vunpack.c.l.b16 %v4155_v57  ;;  %v3736_v22 = vsel %vm6243_vm2, %v3731_v29, %v3735_v8 }
 0x250   : > { %v3223_v20 = vpop.f32.mrf.mxu2  ;;  %v4328_v55 = vpop.f32.mrf.mxu0 }
 0x251   : > { %v3285_v59 = vadd.f32 %v3223_v20, %v7711_v23  ;;  %v2915_v42 = vpop.f32.mrf.mxu1  ;;  %v7766_v7 = vadd.f32 %v4328_v55, %v3966_v60  ;;  %v4226_v38 = vpack.c.b16 %v4209_v0, %v4208_v39  ;;  %v7772_v23 = vld [vmem:[%s8310_s4 + $0x40] sm:$0xff]  ;;  %v4162_v39 = vsel %vm6537_vm5, %v4160_v43, %v4161_v12 }
 0x252   : > { %v2973_v28 = vadd.f32 %v2915_v42, %v7120_v4  ;;  %8363 = vst [vmem:[#allocation19_spill] sm:$0xff] %v7772_v23  ;;  %v3726_v4 = vsel %vm6243_vm2, %v3721_v6, %v3725_v37  ;;  %4515 = vmatpush.msrb.mxu1 %v7772_v23  ;;  %4679 = vmatpush.msrb.mxu3 %v7772_v23  ;;  %v3785_v37 = vunpack.c.l.b16 %v3736_v22  ;;  %v4211_v8 = vunpack.c.l.b16 %v4162_v39 }
 0x253   : > { %8362 = vst [vmem:[#allocation18_spill] sm:$0xff] %v7766_v7  ;;  %3944 = vmatmul.bf16.gmra.mxu3 %v3800_v19  ;;  %v5939_v19 = vld [vmem:[%s6221_s8 + $0xcc] sm:$0xff]  ;;  %v3784_v55 = vunpack.c.l.b16 %v3726_v4 }
 0x255   : > { %v3801_v57 = vpack.c.b16 %v3785_v37, %v3784_v55 }
 0x256   : > { %v3905_v46 = vpop.f32.mrf.mxu3 }
 0x257   : > { %v3967_v62 = vadd.f32 %v3905_v46, %v3285_v59 }
 0x258   : > { %v3225_v21 = vpop.f32.mrf.mxu2  ;;  %v4331_v50 = vpop.f32.mrf.mxu0 }
 0x259   : > { %v3286_v61 = vadd.f32 %v3225_v21, %v7731_v32  ;;  %v2918_v47 = vpop.f32.mrf.mxu1  ;;  %v7782_v60 = vadd.f32 %v4331_v50, %v3967_v62  ;;  %v4159_v32 = vsel %vm6537_vm5, %v5788_v30, %v4158_v14  ;;  %v7798_v21 = vld [vmem:[%s8310_s4 + $0x38] sm:$0xff] }
 0x25a   : > { %v2974_v20 = vadd.f32 %v2918_v47, %v7140_v27  ;;  %v4210_v48 = vunpack.c.l.b16 %v4159_v32  ;;  %8366 = vst [vmem:[#allocation22_spill] sm:$0xff] %v7798_v21  ;;  %4516 = vmatpush.msrb.mxu1 %v7798_v21  ;;  %4680 = vmatpush.msrb.mxu3 %v7798_v21 }
 0x25b   : > { %8364 = vst [vmem:[#allocation20_spill] sm:$0xff] %v7782_v60  ;;  %4370 = vmatmul.bf16.gmra.mxu0 %v4226_v38 }
 0x25c   : > { %v4227_v38 = vpack.c.b16 %v4211_v8, %v4210_v48 }
 0x25d   : > { %3267 = vmatmul.bf16.gmra.mxu2 %v5939_v19 }
 0x25e   : > { %v3907_v3 = vpop.f32.mrf.mxu3 }
 0x25f   : > { %v3968_v15 = vadd.f32 %v3907_v3, %v3286_v61  ;;  %v7818_v3 = vld [vmem:[%s8310_s4 + $0x30] sm:$0xff] }
 0x260   : > { %v3228_v59 = vpop.f32.mrf.mxu2  ;;  %v4333_v42 = vpop.f32.mrf.mxu0  ;;  %8369 = vst [vmem:[#allocation25_spill] sm:$0xff] %v7818_v3  ;;  %4517 = vmatpush.msrb.mxu1 %v7818_v3  ;;  %4681 = vmatpush.msrb.mxu3 %v7818_v3 }
 0x261   : > { %v3287_v27 = vadd.f32 %v3228_v59, %v7757_v11  ;;  %v2920_v0 = vpop.f32.mrf.mxu1  ;;  %v7792_v6 = vadd.f32 %v4333_v42, %v3968_v15 }
 0x262   : > { %v2975_v29 = vadd.f32 %v2920_v0, %v7165_v2 }
 0x263   : > { %8365 = vst [vmem:[#allocation21_spill] sm:$0xff] %v7792_v6  ;;  %3949 = vmatmul.bf16.gmra.mxu3 %v3801_v57 }
 0x266   : > { %v3910_v46 = vpop.f32.mrf.mxu3 }
 0x267   : > { %v3969_v62 = vadd.f32 %v3910_v46, %v3287_v27 }
 0x268   : > { %v3230_v11 = vpop.f32.mrf.mxu2  ;;  %v4336_v50 = vpop.f32.mrf.mxu0 }
 0x269   : > { %v3288_v2 = vadd.f32 %v3230_v11, %v2973_v28  ;;  %v2923_v4 = vpop.f32.mrf.mxu1  ;;  %v7808_v22 = vadd.f32 %v4336_v50, %v3969_v62 }
 0x26a   : > { %v2976_v14 = vadd.f32 %v2923_v4, %v7185_v5 }
 0x26b   : > { %8367 = vst [vmem:[#allocation23_spill] sm:$0xff] %v7808_v22  ;;  %4375 = vmatmul.bf16.gmra.mxu0 %v4227_v38 }
 0x26e   : > { %v3912_v61 = vpop.f32.mrf.mxu3 }
 0x26f   : > { %v3970_v47 = vadd.f32 %v3912_v61, %v3288_v2 }
 0x270   : > { %v3233_v19 = vpop.f32.mrf.mxu2  ;;  %v4338_v9 = vpop.f32.mrf.mxu0 }
 0x271   : > { %v3289_v55 = vadd.f32 %v3233_v19, %v2974_v20  ;;  %v2925_v37 = vpop.f32.mrf.mxu1  ;;  %v7812_v30 = vadd.f32 %v4338_v9, %v3970_v47 }
 0x272   : > { %v2977_v43 = vadd.f32 %v2925_v37, %v7210_v41 }
 0x273   : > { %8368 = vst [vmem:[#allocation24_spill] sm:$0xff] %v7812_v30 }
 0x276   : > { %v3915_v12 = vpop.f32.mrf.mxu3 }
 0x277   : > { %v3971_v28 = vadd.f32 %v3915_v12, %v3289_v55 }
 0x278   : > { %v3235_v15 = vpop.f32.mrf.mxu2  ;;  %v4341_v5 = vpop.f32.mrf.mxu0 }
 0x279   : > { %v3290_v57 = vadd.f32 %v3235_v15, %v2975_v29  ;;  %v2928_v20 = vpop.f32.mrf.mxu1  ;;  %v7822_v59 = vadd.f32 %v4341_v5, %v3971_v28  ;;  %v7832_v29 = vld [vmem:[%s8310_s4 + $0x28] sm:$0xff]  ;;  %v7847_v28 = vld [vmem:[%s8310_s4 + $0x20] sm:$0xff] }
 0x27a   : > { %v2978_v42 = vadd.f32 %v2928_v20, %v7230_v40  ;;  %8371 = vst [vmem:[#allocation27_spill] sm:$0xff] %v7832_v29  ;;  %4518 = vmatpush.msrb.mxu1 %v7832_v29  ;;  %4682 = vmatpush.msrb.mxu3 %v7832_v29 }
 0x27b   : > { %8370 = vst [vmem:[#allocation26_spill] sm:$0xff] %v7822_v59 }
 0x27c   : > { %4519 = vmatpush.msrb.mxu1 %v7847_v28  ;;  %4683 = vmatpush.msrb.mxu3 %v7847_v28 }
 0x27e   : > { %v3917_v41 = vpop.f32.mrf.mxu3 }
 0x27f   : > { %v3972_v32 = vadd.f32 %v3917_v41, %v3290_v57 }
 0x280   : > { %v3238_v39 = vpop.f32.mrf.mxu2  ;;  %v4343_v27 = vpop.f32.mrf.mxu0 }
 0x281   : > { %v3291_v0 = vadd.f32 %v3238_v39, %v2976_v14  ;;  %v7825_v48 = vpop.f32.mrf.mxu1  ;;  %v7827_v8 = vadd.f32 %v4343_v27, %v3972_v32  ;;  %v7858_v39 = vld [vmem:[%s8310_s4 + $0x18] sm:$0xff] }
 0x282   : > { %4520 = vmatpush.msrb.mxu1 %v7858_v39  ;;  %4684 = vmatpush.msrb.mxu3 %v7858_v39 }
 0x286   : > { %v3920_v46 = vpop.f32.mrf.mxu3 }
 0x287   : > { %v3973_v62 = vadd.f32 %v3920_v46, %v3291_v0 }
 0x288   : > { %v3240_v38 = vpop.f32.mrf.mxu2  ;;  %v4346_v11 = vpop.f32.mrf.mxu0 }
 0x289   : > { %v3292_v40 = vadd.f32 %v3240_v38, %v2977_v43  ;;  %v7836_v50 = vadd.f32 %v4346_v11, %v3973_v62  ;;  %v7838_v2 = vpop.f32.mrf.mxu1 }
 0x28e   : > { %v3922_v4 = vpop.f32.mrf.mxu3 }
 0x28f   : > { %v3974_v14 = vadd.f32 %v3922_v4, %v3292_v40  ;;  %v4471_v4 = vadd.f32 %v7531_v34, %v7506_v52 }
 0x290   : > { %v3243_v61 = vpop.f32.mrf.mxu2  ;;  %v4348_v47 = vpop.f32.mrf.mxu0 }
 0x291   : > { %v3293_v19 = vadd.f32 %v3243_v61, %v2978_v42  ;;  %v7840_v9 = vadd.f32 %v4348_v47, %v3974_v14  ;;  %v7842_v55 = vpop.f32.mrf.mxu1  ;;  %v4472_v61 = vadd.f32 %v4471_v4, %v7557_v25  ;;  %v7874_v47 = vld [vmem:[%s8310_s4 + $0x10] sm:$0xff] }
 0x292   : > { %4521 = vmatpush.msrb.mxu1 %v7874_v47  ;;  %4685 = vmatpush.msrb.mxu3 %v7874_v47 }
 0x296   : > { %v3925_v37 = vpop.f32.mrf.mxu3 }
 0x297   : > { %v3975_v12 = vadd.f32 %v3925_v37, %v3293_v19 }
 0x298   : > { %v3245_v43 = vpop.f32.mrf.mxu2  ;;  %v4351_v15 = vpop.f32.mrf.mxu0 }
 0x299   : > { %v7851_v5 = vadd.f32 %v4351_v15, %v3975_v12  ;;  %v2938_v20 = vpop.f32.mrf.mxu1  ;;  %v4473_v12 = vadd.f32 %v4472_v61, %v7579_v36 }
 0x29b   : > { %v4474_v15 = vadd.f32 %v4473_v12, %v7608_v18 }
 0x29d   : > { %v4475_v34 = vadd.f32 %v4474_v15, %v7632_v16  ;;  %v4414_v15 = vld [vmem:[%s8310_s4 + $0x8] sm:$0xff] }
 0x29e   : > { %v3927_v57 = vpop.f32.mrf.mxu3  ;;  %4522 = vmatpush.msrb.mxu1 %v4414_v15  ;;  %4686 = vmatpush.msrb.mxu3 %v4414_v15 }
 0x29f   : > { %v4476_v25 = vadd.f32 %v4475_v34, %v7656_v33  ;;  %v2979_v33 = vadd.f32 %v7825_v48, %v7255_v54  ;;  %v2982_v54 = vadd.f32 %v2938_v20, %v7320_v31 }
 0x2a0   : > { %v3248_v42 = vpop.f32.mrf.mxu2  ;;  %v7853_v41 = vpop.f32.mrf.mxu0 }
 0x2a1   : > { %v2940_v46 = vpop.f32.mrf.mxu1  ;;  %v4477_v21 = vadd.f32 %v4476_v25, %v7679_v49 }
 0x2a3   : > { %v4478_v10 = vadd.f32 %v4477_v21, %v7707_v1 }
 0x2a5   : > { %v4479_v3 = vadd.f32 %v4478_v10, %v7728_v58 }
 0x2a6   : > { %v3930_v32 = vpop.f32.mrf.mxu3 }
 0x2a7   : > { %v4480_v61 = vadd.f32 %v4479_v3, %v7752_v45 }
 0x2a8   : > { %v3250_v27 = vpop.f32.mrf.mxu2  ;;  %v7860_v0 = vpop.f32.mrf.mxu0 }
 0x2a9   : > { %v2943_v40 = vpop.f32.mrf.mxu1  ;;  %v4481_v25 = vadd.f32 %v4480_v61, %v7766_v7  ;;  %v2980_v61 = vadd.f32 %v7838_v2, %v7275_v44 }
 0x2aa   : > { %v2984_v31 = vadd.f32 %v2943_v40, %v7365_v51  ;;  %v4436_v51 = vsel %vm4432_vm7, %v7874_v47, 0.0 }
 0x2ab   : > { %v4482_v21 = vadd.f32 %v4481_v25, %v7782_v60  ;;  %v3294_v25 = vadd.f32 %v3245_v43, %v2979_v33 }
 0x2ad   : > { %v4483_v10 = vadd.f32 %v4482_v21, %v7792_v6 }
 0x2ae   : > { %v3932_v62 = vpop.f32.mrf.mxu3 }
 0x2af   : > { %v4484_v1 = vadd.f32 %v4483_v10, %v7808_v22  ;;  %v2981_v10 = vadd.f32 %v7842_v55, %v7300_v63  ;;  %v3295_v22 = vadd.f32 %v3248_v42, %v2980_v61  ;;  %v8372_v61 = vld [vmem:[#allocation27_spill] sm:$0xff] }
 0x2b0   : > { %v3253_v38 = vpop.f32.mrf.mxu2  ;;  %v7864_v11 = vpop.f32.mrf.mxu0 }
 0x2b1   : > { %v2945_v52 = vpop.f32.mrf.mxu1  ;;  %v4485_v49 = vadd.f32 %v4484_v1, %v7812_v30  ;;  %v3976_v1 = vadd.f32 %v3927_v57, %v3294_v25  ;;  %v3296_v30 = vadd.f32 %v3250_v27, %v2981_v10  ;;  %v3297_v33 = vadd.f32 %v3253_v38, %v2982_v54  ;;  %v8373_v10 = vld [vmem:[#allocation25_spill] sm:$0xff] }
 0x2b3   : > { %v4486_v36 = vadd.f32 %v4485_v49, %v7822_v59  ;;  %v3977_v59 = vadd.f32 %v3930_v32, %v3295_v22  ;;  %v7916_v44 = vadd.f32 %v7853_v41, %v3976_v1  ;;  %v3978_v2 = vadd.f32 %v3932_v62, %v3296_v30  ;;  %v4413_v32 = vld [vmem:[%s8310_s4] sm:$0xff] }
 0x2b4   : > { %v4434_v30 = vsel %vm4432_vm7, %v4414_v15, 0.0  ;;  %4523 = vmatpush.msrb.mxu1 %v4413_v32  ;;  %4687 = vmatpush.msrb.mxu3 %v4413_v32 }
 0x2b5   : > { %v4487_v21 = vadd.f32 %v4486_v36, %v7827_v8  ;;  %v2983_v36 = vadd.f32 %v2940_v46, %v7345_v13  ;;  %v7921_v55 = vadd.f32 %v7860_v0, %v3977_v59  ;;  %v7926_v22 = vadd.f32 %v7864_v11, %v3978_v2  ;;  %v8375_v2 = vld [vmem:[#allocation22_spill] sm:$0xff] }
 0x2b6   : > { %v7868_v14 = vpop.f32.mrf.mxu3  ;;  %v2985_v13 = vadd.f32 %v2945_v52, %v7390_v26  ;;  %v4433_v52 = vsel %vm4432_vm7, %v4413_v32, 0.0  ;;  %5839 = vmatpush.msk.msra.mxu1 %vm4546_vm6, %v7803_v53 }
 0x2b7   : > { %v4488_v60 = vadd.f32 %v4487_v21, %v7836_v50  ;;  %v3979_v20 = vadd.f32 %v7868_v14, %v3297_v33  ;;  %v4435_v38 = vadd.f32 %v4434_v30, %v4433_v52 }
 0x2b8   : > { %v3255_v19 = vpop.f32.mrf.mxu2  ;;  %v7876_v37 = vpop.f32.mrf.mxu0 }
 0x2b9   : > { %v2948_v12 = vpop.f32.mrf.mxu1  ;;  %v4489_v49 = vadd.f32 %v4488_v60, %v7840_v9  ;;  %v3298_v43 = vadd.f32 %v3255_v19, %v2983_v36  ;;  %v7938_v0 = vadd.f32 %v7876_v37, %v3979_v20  ;;  %v4437_v37 = vadd.f32 %v4436_v51, %v4435_v38  ;;  %v8376_v20 = vld [vmem:[#allocation19_spill] sm:$0xff] }
 0x2bb   : > { %v4490_v63 = vadd.f32 %v4489_v49, %v7851_v5 }
 0x2bd   : > { %v4491_v60 = vadd.f32 %v4490_v63, %v7916_v44 }
 0x2be   : > { %v3937_v4 = vpop.f32.mrf.mxu3 }
 0x2bf   : > { %v4492_v59 = vadd.f32 %v4491_v60, %v7921_v55  ;;  %v3980_v27 = vadd.f32 %v3937_v4, %v3298_v43 }
 0x2c0   : > { %v3258_v56 = vpop.f32.mrf.mxu2  ;;  %v7884_v23 = vpop.f32.mrf.mxu0 }
 0x2c1   : > { %v2950_v18 = vpop.f32.mrf.mxu1  ;;  %v3299_v42 = vadd.f32 %v3258_v56, %v2984_v31  ;;  %v2986_v56 = vadd.f32 %v2948_v12, %v7411_v35  ;;  %v4493_v11 = vadd.f32 %v4492_v59, %v7926_v22  ;;  %v7947_v14 = vadd.f32 %v7884_v23, %v3980_v27 }
 0x2c2   : > { %v2987_v47 = vadd.f32 %v2950_v18, %v7434_v17  ;;  %v4440_v35 = vsel %vm4432_vm7, %v7847_v28, 0.0 }
 0x2c3   : > { %v4494_v4 = vadd.f32 %v4493_v11, %v7938_v0 }
 0x2c5   : > { %v4495_v17 = vadd.f32 %v4494_v4, %v7947_v14 }
 0x2c6   : > { %v7889_v29 = vpop.f32.mrf.mxu3 }
 0x2c7   : > { %v3981_v40 = vadd.f32 %v7889_v29, %v3299_v42 }
 0x2c8   : > { %v3260_v16 = vpop.f32.mrf.mxu2  ;;  %v7895_v34 = vpop.f32.mrf.mxu0 }
 0x2c9   : > { %v2953_v57 = vpop.f32.mrf.mxu1  ;;  %v3300_v46 = vadd.f32 %v3260_v16, %v2985_v13  ;;  %v4438_v16 = vsel %vm4432_vm7, %v7858_v39, 0.0  ;;  %v7956_v12 = vadd.f32 %v7895_v34, %v3981_v40  ;;  %v4442_v39 = vsel %vm4432_vm7, %v8372_v61, 0.0  ;;  %v8379_v40 = vld [vmem:[#allocation12_spill] sm:$0xff] }
 0x2ca   : > { %v2988_v29 = vadd.f32 %v2953_v57, %v7458_v24  ;;  %v4439_v15 = vadd.f32 %v4438_v16, %v4437_v37  ;;  %v4444_v34 = vsel %vm4432_vm7, %v8373_v10, 0.0  ;;  %v4448_v13 = vsel %vm4432_vm7, %v8376_v20, 0.0  ;;  %v8380_v37 = vld [vmem:[#allocation9_spill] sm:$0xff] }
 0x2cb   : > { %v4496_v24 = vadd.f32 %v4495_v17, %v7956_v12  ;;  %v4454_v16 = vsel %vm4432_vm7, %v8379_v40, 0.0 }
 0x2ce   : > { %v3942_v58 = vpop.f32.mrf.mxu3 }
 0x2cf   : > { %v3982_v53 = vadd.f32 %v3942_v58, %v3300_v46  ;;  %v4441_v58 = vadd.f32 %v4440_v35, %v4439_v15  ;;  %v4456_v35 = vsel %vm4432_vm7, %v8380_v37, 0.0 }
 0x2d0   : > { %v3263_v3 = vpop.f32.mrf.mxu2  ;;  %v7901_v45 = vpop.f32.mrf.mxu0 }
 0x2d1   : > { %v3301_v19 = vadd.f32 %v3263_v3, %v2986_v56  ;;  %v2955_v18 = vpop.f32.mrf.mxu1  ;;  %v7963_v3 = vadd.f32 %v7901_v45, %v3982_v53  ;;  %v4443_v63 = vadd.f32 %v4442_v39, %v4441_v58  ;;  %v4446_v45 = vsel %vm4432_vm7, %v8375_v2, 0.0  ;;  %v6153_v39 = vld [vmem:[%s8310_s4 + $0x70] sm:$0xff] }
 0x2d2   : > { %v4460_v17 = vsel %vm4432_vm7, %v6153_v39, 0.0 }
 0x2d3   : > { %v4445_v60 = vadd.f32 %v4444_v34, %v4443_v63 }
 0x2d6   : > { %v3945_v6 = vpop.f32.mrf.mxu3 }
 0x2d7   : > { %v3983_v25 = vadd.f32 %v3945_v6, %v3301_v19  ;;  %v4497_v6 = vadd.f32 %v4496_v24, %v7963_v3 }
 0x2d8   : > { %v3265_v48 = vpop.f32.mrf.mxu2  ;;  %v4371_v7 = vpop.f32.mrf.mxu0 }
 0x2d9   : > { %v3302_v23 = vadd.f32 %v3265_v48, %v2987_v47  ;;  %v8374_v48 = vld [vmem:[#allocation4_spill] sm:$0xff]  ;;  %v7969_v33 = vadd.f32 %v4371_v7, %v3983_v25  ;;  %v4447_v7 = vadd.f32 %v4446_v45, %v4445_v60  ;;  %v6154_v25 = vld [vmem:[%s8310_s4 + $0x78] sm:$0xff] }
 0x2da   : > { %v2989_v49 = vadd.f32 %v2955_v18, %v8374_v48 }
 0x2db   : > { %v4498_v42 = vadd.f32 %v4497_v6, %v7969_v33  ;;  %v4449_v46 = vadd.f32 %v4448_v13, %v4447_v7 }
 0x2de   : > { %v3947_v41 = vpop.f32.mrf.mxu3 }
 0x2df   : > { %v3984_v36 = vadd.f32 %v3947_v41, %v3302_v23  ;;  %v8377_v41 = vld [vmem:[#allocation16_spill] sm:$0xff] }
 0x2e0   : > { %v3268_v62 = vpop.f32.mrf.mxu2  ;;  %v4373_v26 = vpop.f32.mrf.mxu0  ;;  %v4450_v59 = vsel %vm4432_vm7, %v8377_v41, 0.0 }
 0x2e1   : > { %v3303_v21 = vadd.f32 %v3268_v62, %v2988_v29  ;;  %v7974_v43 = vadd.f32 %v4373_v26, %v3984_v36  ;;  %v8378_v62 = vld [vmem:[#allocation3_spill] sm:$0xff]  ;;  %v4451_v11 = vadd.f32 %v4450_v59, %v4449_v46 }
 0x2e2   : > { %v4452_v26 = vsel %vm4432_vm7, %v8378_v62, 0.0  ;;  %v6152_v29 = vld [vmem:[%s8310_s4 + $0x68] sm:$0xff]  ;;  %v8381_v62 = vld [vmem:[#allocation5_spill] sm:$0xff] }
 0x2e3   : > { %v4499_v32 = vadd.f32 %v4498_v42, %v7974_v43  ;;  %v4453_v19 = vadd.f32 %v4452_v26, %v4451_v11  ;;  %v4458_v23 = vsel %vm4432_vm7, %v6152_v29, 0.0  ;;  %v8383_v11 = vld [vmem:[#allocation7_spill] sm:$0xff] }
 0x2e5   : > { %v4455_v53 = vadd.f32 %v4454_v16, %v4453_v19  ;;  %v8384_v19 = vld [vmem:[#allocation8_spill] sm:$0xff] }
 0x2e6   : > { %v3950_v28 = vpop.f32.mrf.mxu3 }
 0x2e7   : > { %v3985_v31 = vadd.f32 %v3950_v28, %v3303_v21  ;;  %v4457_v61 = vadd.f32 %v4456_v35, %v4455_v53  ;;  %v4462_v21 = vsel %vm4432_vm7, %v6154_v25, 0.0  ;;  %v8385_v35 = vld [vmem:[#allocation10_spill] sm:$0xff] }
 0x2e8   : > { %v3270_v1 = vpop.f32.mrf.mxu2  ;;  %v4376_v54 = vpop.f32.mrf.mxu0 }
 0x2e9   : > { %v3304_v57 = vadd.f32 %v3270_v1, %v2989_v49  ;;  %v7979_v30 = vadd.f32 %v4376_v54, %v3985_v31  ;;  %v4459_v28 = vadd.f32 %v4458_v23, %v4457_v61  ;;  %v8386_v23 = vld [vmem:[#allocation11_spill] sm:$0xff] }
 0x2eb   : > { %v4500_v56 = vadd.f32 %v4499_v32, %v7979_v30  ;;  %v4461_v10 = vadd.f32 %v4460_v17, %v4459_v28  ;;  %v8387_v17 = vld [vmem:[#allocation13_spill] sm:$0xff] }
 0x2ed   : > { %v4463_v24 = vadd.f32 %v4462_v21, %v4461_v10  ;;  %v8388_v21 = vld [vmem:[#allocation14_spill] sm:$0xff] }
 0x2ee   : > { %v3952_v51 = vpop.f32.mrf.mxu3 }
 0x2ef   : > { %v3986_v27 = vadd.f32 %v3952_v51, %v3304_v57  ;;  %v4464_v54 = vrot.slane %v4463_v24, 4 }
 0x2f0   : > { %v4378_v52 = vpop.f32.mrf.mxu0 }
 0x2f1   : > { %v7987_v38 = vadd.f32 %v4378_v52, %v3986_v27  ;;  %v4465_v48 = vadd.f32 %v4464_v54, %v4463_v24  ;;  %v8382_v52 = vld [vmem:[#allocation6_spill] sm:$0xff] }
 0x2f2   : > { %v8389_v24 = vld [vmem:[#allocation2_spill] sm:$0xff] }
 0x2f3   : > { %v4501_v47 = vadd.f32 %v4500_v56, %v7987_v38  ;;  %v4466_v49 = vrot.slane %v4465_v48, 2 }
 0x2f5   : > { %v4502_v4 = vrot.slane %v4501_v47, 4  ;;  %v4467_v36 = vadd.f32 %v4466_v49, %v4465_v48  ;;  %v8390_v49 = vld [vmem:[#allocation15_spill] sm:$0xff] }
 0x2f7   : > { %v4503_v15 = vadd.f32 %v4502_v4, %v4501_v47  ;;  %v4468_v63 = vrot.slane %v4467_v36, 1 }
 0x2f9   : > { %v4504_v18 = vrot.slane %v4503_v15, 2  ;;  %v4469_v2 = vadd.f32 %v4468_v63, %v4467_v36 }
 0x2fb   : > { %v4505_v58 = vadd.f32 %v4504_v18, %v4503_v15  ;;  %v4470_v45 = vmul.f32 256.0, %v4469_v2 }
 0x2fd   : > { %v4506_v34 = vrot.slane %v4505_v58, 1  ;;  %6094 = vrcp.f32 %v4470_v45  ;;  %vm4533_vm8 = vweird.f32 %v4470_v45  ;;  %v4539_v20 = vand.u32 2147483648, %v4470_v45 }
 0x2fe   : > { %v4537_v42 = vand.u32 2147483647, %v4470_v45 }
 0x2ff   : > { %v4507_v1 = vadd.f32 %v4506_v34, %v4505_v58  ;;  %v4540_v7 = vor.u32 1.1754944e-38, %v4539_v20 }
 0x300   : > { %vm4538_vm11 = vcmp.eq.f32.partialorder %v4537_v42, 8.507059e+37 }
 0x301   : > { %4524 = vmatmul.f32.vlgmr.msrb.gmra.mxu1 %v4507_v1 }
 0x303   : > { %v6095_v6 = vpop.eup %6094 }
 0x304   : > { %v4529_v31 = vmul.f32 %v6095_v6, %v4470_v45  ;;  %vm4534_vm9 = vweird.f32 %v6095_v6  ;;  %v8391_v45 = vld [vmem:[#allocation17_spill] sm:$0xff] }
 0x305   : > { %vm4535_vm10 = vmor %vm4533_vm8, %vm4534_vm9 }
 0x306   : > { %v4530_v57 = vsub.f32 1.0, %v4529_v31 }
 0x308   : > { %v4531_v60 = vmul.f32 %v6095_v6, %v4530_v57 }
 0x30a   : > { %v4532_v13 = vadd.f32 %v6095_v6, %v4531_v60  ;;  %v8392_v60 = vld [vmem:[#allocation18_spill] sm:$0xff] }
 0x30c   : > { %v4536_v41 = vsel %vm4535_vm10, %v6095_v6, %v4532_v13 }
 0x30d   : > { %v8006_v59 = vsel %vm4538_vm11, %v4540_v7, %v4536_v41  ;;  %v8393_v7 = vld [vmem:[#allocation20_spill] sm:$0xff] }
 0x37e   : > { %v4525_v51 = vpop.f32.mrf.mxu1 }
 0x37f   : > { %v4542_v32 = vmul.f32 %v8006_v59, %v4525_v51 }
 0x381   : > { %5838 = vmatmul.msk.f32.vlgmr.msrb.gmra.mxu2 %vm4432_vm7, %v4542_v32 }
 0x404   : > { %v4567_v27 = vpop.f32.mrf.mxu2 }
 0x405   : > { %v8010_v46 = vperm.slane %v4567_v27, 0  ;;  %v8394_v27 = vld [vmem:[#allocation21_spill] sm:$0xff] }
 0x407   : > { %v8014_v26 = vsub.f32 %v8381_v62, %v8010_v46  ;;  %v8018_v56 = vsub.f32 %v8382_v52, %v8010_v46  ;;  %v8022_v40 = vsub.f32 %v8383_v11, %v8010_v46  ;;  %v8030_v37 = vsub.f32 %v8384_v19, %v8010_v46 }
 0x408   : > { %v8034_v4 = vsub.f32 %v8385_v35, %v8010_v46  ;;  %v8040_v15 = vsub.f32 %v8386_v23, %v8010_v46  ;;  %v8046_v18 = vsub.f32 %v8387_v17, %v8010_v46  ;;  %v8052_v58 = vsub.f32 %v8388_v21, %v8010_v46 }
 0x409   : > { %v4603_v16 = vmul.f32 %v8014_v26, %v8014_v26  ;;  %v4604_v47 = vmul.f32 %v8018_v56, %v8018_v56  ;;  %v4605_v53 = vmul.f32 %v8022_v40, %v8022_v40  ;;  %v4606_v61 = vmul.f32 %v8030_v37, %v8030_v37 }
 0x40a   : > { %v4607_v28 = vmul.f32 %v8034_v4, %v8034_v4  ;;  %v4608_v10 = vmul.f32 %v8040_v15, %v8040_v15  ;;  %v8058_v1 = vsub.f32 %v8389_v24, %v8010_v46  ;;  %v4609_v54 = vmul.f32 %v8046_v18, %v8046_v18 }
 0x40b   : > { %v4635_v29 = vadd.f32 %v4604_v47, %v4603_v16  ;;  %v8064_v36 = vsub.f32 %v8390_v49, %v8010_v46  ;;  %v4610_v63 = vmul.f32 %v8052_v58, %v8052_v58  ;;  %v8070_v6 = vsub.f32 %v8391_v45, %v8010_v46  ;;  %v8395_v16 = vld [vmem:[#allocation23_spill] sm:$0xff] }
 0x40c   : > { %v4611_v31 = vmul.f32 %v8058_v1, %v8058_v1  ;;  %v8076_v20 = vsub.f32 %v8392_v60, %v8010_v46  ;;  %v8082_v41 = vsub.f32 %v8393_v7, %v8010_v46  ;;  %v8088_v62 = vsub.f32 %v8394_v27, %v8010_v46 }
 0x40d   : > { %v4636_v39 = vadd.f32 %v4635_v29, %v4605_v53  ;;  %v4612_v13 = vmul.f32 %v8064_v36, %v8064_v36  ;;  %v4613_v51 = vmul.f32 %v8070_v6, %v8070_v6  ;;  %v8094_v47 = vsub.f32 %v8395_v16, %v8010_v46  ;;  %v8396_v53 = vld [vmem:[#allocation24_spill] sm:$0xff] }
 0x40e   : > { %v4614_v52 = vmul.f32 %v8076_v20, %v8076_v20  ;;  %v4615_v19 = vmul.f32 %v8082_v41, %v8082_v41  ;;  %v8100_v29 = vsub.f32 %v8396_v53, %v8010_v46  ;;  %v4616_v23 = vmul.f32 %v8088_v62, %v8088_v62 }
 0x40f   : > { %v4637_v25 = vadd.f32 %v4636_v39, %v4606_v61  ;;  %v8397_v39 = vld [vmem:[#allocation26_spill] sm:$0xff]  ;;  %v8112_v21 = vsub.f32 %v7827_v8, %v8010_v46  ;;  %v8118_v24 = vsub.f32 %v7836_v50, %v8010_v46  ;;  %v8124_v49 = vsub.f32 %v7840_v9, %v8010_v46 }
 0x410   : > { %v8106_v17 = vsub.f32 %v8397_v39, %v8010_v46  ;;  %v8142_v60 = vsub.f32 %v7921_v55, %v8010_v46  ;;  %v8160_v27 = vsub.f32 %v7947_v14, %v8010_v46  ;;  %v8178_v53 = vsub.f32 %v7969_v33, %v8010_v46 }
 0x411   : > { %v4638_v34 = vadd.f32 %v4637_v25, %v4607_v28  ;;  %v4617_v28 = vmul.f32 %v8094_v47, %v8094_v47  ;;  %v4620_v8 = vmul.f32 %v8112_v21, %v8112_v21  ;;  %v4621_v50 = vmul.f32 %v8118_v24, %v8118_v24 }
 0x412   : > { %v4622_v9 = vmul.f32 %v8124_v49, %v8124_v49  ;;  %v4625_v55 = vmul.f32 %v8142_v60, %v8142_v60  ;;  %v4628_v14 = vmul.f32 %v8160_v27, %v8160_v27  ;;  %v4631_v33 = vmul.f32 %v8178_v53, %v8178_v53 }
 0x413   : > { %v4639_v48 = vadd.f32 %v4638_v34, %v4608_v10  ;;  %v4618_v10 = vmul.f32 %v8100_v29, %v8100_v29 }
 0x415   : > { %v4640_v2 = vadd.f32 %v4639_v48, %v4609_v54  ;;  %v4619_v54 = vmul.f32 %v8106_v17, %v8106_v17 }
 0x417   : > { %v4641_v57 = vadd.f32 %v4640_v2, %v4610_v63  ;;  %v8130_v2 = vsub.f32 %v7851_v5, %v8010_v46 }
 0x419   : > { %v4642_v42 = vadd.f32 %v4641_v57, %v4611_v31  ;;  %v8136_v31 = vsub.f32 %v7916_v44, %v8010_v46  ;;  %v4623_v5 = vmul.f32 %v8130_v2, %v8130_v2 }
 0x41b   : > { %v4643_v32 = vadd.f32 %v4642_v42, %v4612_v13  ;;  %v8148_v42 = vsub.f32 %v7926_v22, %v8010_v46  ;;  %v4624_v44 = vmul.f32 %v8136_v31, %v8136_v31 }
 0x41d   : > { %v4644_v11 = vadd.f32 %v4643_v32, %v4613_v51  ;;  %v8154_v51 = vsub.f32 %v7938_v0, %v8010_v46  ;;  %v4626_v22 = vmul.f32 %v8148_v42, %v8148_v42 }
 0x41f   : > { %v4645_v35 = vadd.f32 %v4644_v11, %v4614_v52  ;;  %v8166_v11 = vsub.f32 %v7956_v12, %v8010_v46  ;;  %v4627_v0 = vmul.f32 %v8154_v51, %v8154_v51 }
 0x421   : > { %v4646_v61 = vadd.f32 %v4645_v35, %v4615_v19  ;;  %v8172_v19 = vsub.f32 %v7963_v3, %v8010_v46  ;;  %v4629_v12 = vmul.f32 %v8166_v11, %v8166_v11 }
 0x423   : > { %v4647_v25 = vadd.f32 %v4646_v61, %v4616_v23  ;;  %v8184_v61 = vsub.f32 %v7974_v43, %v8010_v46  ;;  %v4630_v3 = vmul.f32 %v8172_v19, %v8172_v19 }
 0x425   : > { %v4648_v34 = vadd.f32 %v4647_v25, %v4617_v28  ;;  %v8190_v28 = vsub.f32 %v7979_v30, %v8010_v46  ;;  %v4632_v43 = vmul.f32 %v8184_v61, %v8184_v61 }
 0x427   : > { %v4649_v48 = vadd.f32 %v4648_v34, %v4618_v10  ;;  %v8196_v10 = vsub.f32 %v7987_v38, %v8010_v46 }
 0x429   : > { %v4650_v63 = vadd.f32 %v4649_v48, %v4619_v54  ;;  %v4633_v54 = vmul.f32 %v8190_v28, %v8190_v28  ;;  %v4634_v30 = vmul.f32 %v8196_v10, %v8196_v10 }
 0x42b   : > { %v4651_v45 = vadd.f32 %v4650_v63, %v4620_v8 }
 0x42d   : > { %v4652_v57 = vadd.f32 %v4651_v45, %v4621_v50 }
 0x42f   : > { %v4653_v13 = vadd.f32 %v4652_v57, %v4622_v9 }
 0x431   : > { %v4654_v7 = vadd.f32 %v4653_v13, %v4623_v5 }
 0x433   : > { %v4655_v32 = vadd.f32 %v4654_v7, %v4624_v44 }
 0x435   : > { %v4656_v52 = vadd.f32 %v4655_v32, %v4625_v55 }
 0x437   : > { %v4657_v16 = vadd.f32 %v4656_v52, %v4626_v22 }
 0x439   : > { %v4658_v35 = vadd.f32 %v4657_v16, %v4627_v0 }
 0x43b   : > { %v4659_v23 = vadd.f32 %v4658_v35, %v4628_v14 }
 0x43d   : > { %v4660_v39 = vadd.f32 %v4659_v23, %v4629_v12 }
 0x43f   : > { %v4661_v25 = vadd.f32 %v4660_v39, %v4630_v3 }
 0x441   : > { %v4662_v34 = vadd.f32 %v4661_v25, %v4631_v33 }
 0x443   : > { %v4663_v48 = vadd.f32 %v4662_v34, %v4632_v43 }
 0x445   : > { %v4664_v8 = vadd.f32 %v4663_v48, %v4633_v54 }
 0x447   : > { %v4665_v63 = vadd.f32 %v4664_v8, %v4634_v30 }
 0x449   : > { %v4666_v50 = vrot.slane %v4665_v63, 4 }
 0x44b   : > { %v4667_v45 = vadd.f32 %v4666_v50, %v4665_v63 }
 0x44d   : > { %v4668_v9 = vrot.slane %v4667_v45, 2 }
 0x44f   : > { %v4669_v57 = vadd.f32 %v4668_v9, %v4667_v45 }
 0x451   : > { %v4670_v5 = vrot.slane %v4669_v57, 1 }
 0x453   : > { %v4671_v38 = vadd.f32 %v4670_v5, %v4669_v57 }
 0x455   : > { %4688 = vmatmul.f32.vlgmr.msrb.gmra.mxu3 %v4671_v38 }
 0x4d8   : > { %v4689_v46 = vpop.f32.mrf.mxu3 }
 0x4d9   : > { %v4692_v13 = vmul.f32 %v4689_v46, %v8006_v59 }
 0x4db   : > { %v4693_v44 = vadd.f32 1e-05, %v4692_v13  ;;  %v8244_v13 = vld [vmem:[%s8309_s3] ss:$0 sm:$0xff] }
 0x4dd   : > { %6096 = vrsqrt.f32 %v4693_v44  ;;  %vm4700_vm13 = vweird.f32 %v4693_v44 }
 0x4e3   : > { %v6097_v7 = vpop.eup %6096 }
 0x4e4   : > { %v4695_v55 = vmul.f32 %v6097_v7, %v4693_v44  ;;  %vm4701_vm12 = vweird.f32 %v6097_v7 }
 0x4e5   : > { %vm4702_vm14 = vmor %vm4700_vm13, %vm4701_vm12 }
 0x4e6   : > { %v4696_v32 = vmul.f32 %v6097_v7, %v4695_v55 }
 0x4e8   : > { %v4697_v22 = vmul.f32 0.5, %v4696_v32 }
 0x4ea   : > { %v4698_v52 = vsub.f32 1.5, %v4697_v22 }
 0x4ec   : > { %v4699_v0 = vmul.f32 %v6097_v7, %v4698_v52 }
 0x4ee   : > { %v4703_v16 = vsel %vm4702_vm14, %v6097_v7, %v4699_v0 }
 0x4ef   : > { %5840 = vmatmul.msk.f32.vlgmr.msra.gmra.mxu1 %vm4432_vm7, %v4703_v16 }
 0x56c   : > { %v4724_v14 = vpop.f32.mrf.mxu1 }
 0x56d   : > { %v4727_v35 = vperm.slane %v4724_v14, 0 }
 0x56f   : > { %v4728_v12 = vmul.f32 %v4727_v35, %v8014_v26  ;;  %v4729_v59 = vmul.f32 %v4727_v35, %v8018_v56  ;;  %v4730_v23 = vmul.f32 %v4727_v35, %v8022_v40  ;;  %v4731_v3 = vmul.f32 %v4727_v35, %v8030_v37 }
 0x570   : > { %v4732_v39 = vmul.f32 %v4727_v35, %v8034_v4  ;;  %v4733_v33 = vmul.f32 %v4727_v35, %v8040_v15  ;;  %v4734_v25 = vmul.f32 %v4727_v35, %v8046_v18  ;;  %v4735_v43 = vmul.f32 %v4727_v35, %v8052_v58 }
 0x571   : > { %v4736_v34 = vmul.f32 %v4727_v35, %v8058_v1  ;;  %v4737_v54 = vmul.f32 %v4727_v35, %v8064_v36  ;;  %v4738_v26 = vmul.f32 %v4727_v35, %v8070_v6  ;;  %v4739_v56 = vmul.f32 %v4727_v35, %v8076_v20  ;;  %v6092_v6 = vld [vmem:[%s8308_s2] ss:$0 sm:$0xff] }
 0x572   : > { %v4740_v40 = vmul.f32 %v4727_v35, %v8082_v41  ;;  %v4741_v37 = vmul.f32 %v4727_v35, %v8088_v62  ;;  %v4742_v4 = vmul.f32 %v4727_v35, %v8094_v47  ;;  %v4743_v15 = vmul.f32 %v4727_v35, %v8100_v29 }
 0x573   : > { %v4744_v18 = vmul.f32 %v4727_v35, %v8106_v17  ;;  %v4745_v58 = vmul.f32 %v4727_v35, %v8112_v21  ;;  %v4746_v1 = vmul.f32 %v4727_v35, %v8118_v24  ;;  %v4747_v36 = vmul.f32 %v4727_v35, %v8124_v49 }
 0x574   : > { %v4748_v20 = vmul.f32 %v4727_v35, %v8130_v2  ;;  %v4749_v41 = vmul.f32 %v4727_v35, %v8136_v31  ;;  %v4750_v62 = vmul.f32 %v4727_v35, %v8142_v60  ;;  %v4751_v47 = vmul.f32 %v4727_v35, %v8148_v42 }
 0x575   : > { %v4752_v29 = vmul.f32 %v4727_v35, %v8154_v51  ;;  %v4753_v17 = vmul.f32 %v4727_v35, %v8160_v27  ;;  %v4754_v21 = vmul.f32 %v4727_v35, %v8166_v11  ;;  %v4755_v24 = vmul.f32 %v4727_v35, %v8172_v19 }
 0x576   : > { %v4756_v49 = vmul.f32 %v4727_v35, %v8178_v53  ;;  %v4757_v48 = vmul.f32 %v4727_v35, %v8184_v61  ;;  %v4758_v2 = vmul.f32 %v4727_v35, %v8190_v28  ;;  %v4759_v31 = vmul.f32 %v4727_v35, %v8196_v10 }
 0x577   : > { %v4763_v30 = vmul.f32 %v6092_v6, %v4728_v12  ;;  %v4764_v60 = vmul.f32 %v6092_v6, %v4729_v59  ;;  %v4765_v8 = vmul.f32 %v6092_v6, %v4730_v23  ;;  %v4766_v42 = vmul.f32 %v6092_v6, %v4731_v3 }
 0x578   : > { %v4767_v63 = vmul.f32 %v6092_v6, %v4732_v39  ;;  %v4768_v51 = vmul.f32 %v6092_v6, %v4733_v33  ;;  %v4769_v50 = vmul.f32 %v6092_v6, %v4734_v25  ;;  %v4770_v27 = vmul.f32 %v6092_v6, %v4735_v43 }
 0x579   : > { %v4771_v45 = vmul.f32 %v6092_v6, %v4736_v34  ;;  %v4772_v11 = vmul.f32 %v6092_v6, %v4737_v54  ;;  %v4773_v9 = vmul.f32 %v6092_v6, %v4738_v26  ;;  %v4774_v19 = vmul.f32 %v6092_v6, %v4739_v56 }
 0x57a   : > { %v4775_v57 = vmul.f32 %v6092_v6, %v4740_v40  ;;  %v4776_v53 = vmul.f32 %v6092_v6, %v4741_v37  ;;  %v4777_v5 = vmul.f32 %v6092_v6, %v4742_v4  ;;  %v4778_v61 = vmul.f32 %v6092_v6, %v4743_v15 }
 0x57b   : > { %v4779_v38 = vmul.f32 %v6092_v6, %v4744_v18  ;;  %v4780_v28 = vmul.f32 %v6092_v6, %v4745_v58  ;;  %v4781_v46 = vmul.f32 %v6092_v6, %v4746_v1  ;;  %v4782_v10 = vmul.f32 %v6092_v6, %v4747_v36 }
 0x57c   : > { %v4783_v44 = vmul.f32 %v6092_v6, %v4748_v20  ;;  %v4784_v7 = vmul.f32 %v6092_v6, %v4749_v41  ;;  %v4785_v55 = vmul.f32 %v6092_v6, %v4750_v62  ;;  %v4786_v32 = vmul.f32 %v6092_v6, %v4751_v47 }
 0x57d   : > { %v4787_v22 = vmul.f32 %v6092_v6, %v4752_v29  ;;  %v4788_v52 = vmul.f32 %v6092_v6, %v4753_v17  ;;  %v4789_v0 = vmul.f32 %v6092_v6, %v4754_v21  ;;  %v4790_v16 = vmul.f32 %v6092_v6, %v4755_v24 }
 0x57e   : > { %v4791_v14 = vmul.f32 %v6092_v6, %v4756_v49  ;;  %v4792_v35 = vmul.f32 %v6092_v6, %v4757_v48  ;;  %v4793_v12 = vmul.f32 %v6092_v6, %v4758_v2  ;;  %v8246_v59 = vmul.f32 %v6092_v6, %v4759_v31 }
 0x57f   : > { %v4798_v23 = vadd.f32 %v8244_v13, %v4763_v30  ;;  %v4799_v3 = vadd.f32 %v8244_v13, %v4764_v60  ;;  %v4800_v39 = vadd.f32 %v8244_v13, %v4765_v8  ;;  %v4801_v33 = vadd.f32 %v8244_v13, %v4766_v42 }
 0x580   : > { %v4802_v25 = vadd.f32 %v8244_v13, %v4767_v63  ;;  %v4803_v43 = vadd.f32 %v8244_v13, %v4768_v51  ;;  %v4804_v34 = vadd.f32 %v8244_v13, %v4769_v50  ;;  %v4805_v54 = vadd.f32 %v8244_v13, %v4770_v27 }
 0x581   : > { %v4806_v26 = vadd.f32 %v8244_v13, %v4771_v45  ;;  %v4807_v56 = vadd.f32 %v8244_v13, %v4772_v11  ;;  %v4808_v40 = vadd.f32 %v8244_v13, %v4773_v9  ;;  %v4809_v37 = vadd.f32 %v8244_v13, %v4774_v19 }
 0x582   : > { %v4810_v4 = vadd.f32 %v8244_v13, %v4775_v57  ;;  %v4811_v15 = vadd.f32 %v8244_v13, %v4776_v53  ;;  %v4812_v18 = vadd.f32 %v8244_v13, %v4777_v5  ;;  %v4813_v58 = vadd.f32 %v8244_v13, %v4778_v61 }
 0x583   : > { %v4814_v1 = vadd.f32 %v8244_v13, %v4779_v38  ;;  %v4815_v36 = vadd.f32 %v8244_v13, %v4780_v28  ;;  %v4816_v6 = vadd.f32 %v8244_v13, %v4781_v46  ;;  %v4817_v20 = vadd.f32 %v8244_v13, %v4782_v10 }
 0x584   : > { %v4818_v41 = vadd.f32 %v8244_v13, %v4783_v44  ;;  %v4819_v62 = vadd.f32 %v8244_v13, %v4784_v7  ;;  %v4830_v47 = vmax.f32 %v4798_v23, 0.0  ;;  %v4831_v29 = vmax.f32 %v4799_v3, 0.0 }
 0x585   : > { %v4832_v17 = vmax.f32 %v4800_v39, 0.0  ;;  %v4833_v21 = vmax.f32 %v4801_v33, 0.0  ;;  %v4834_v24 = vmax.f32 %v4802_v25, 0.0  ;;  %v4835_v49 = vmax.f32 %v4803_v43, 0.0 }
 0x586   : > { %v4820_v48 = vadd.f32 %v8244_v13, %v4785_v55  ;;  %v4821_v2 = vadd.f32 %v8244_v13, %v4786_v32  ;;  %v4836_v31 = vmax.f32 %v4804_v34, 0.0  ;;  %v4837_v30 = vmax.f32 %v4805_v54, 0.0 }
 0x587   : > { %v4822_v60 = vadd.f32 %v8244_v13, %v4787_v22  ;;  %v4823_v8 = vadd.f32 %v8244_v13, %v4788_v52  ;;  %v4838_v42 = vmax.f32 %v4806_v26, 0.0  ;;  %v4839_v63 = vmax.f32 %v4807_v56, 0.0 }
 0x588   : > { %v4824_v51 = vadd.f32 %v8244_v13, %v4789_v0  ;;  %v4840_v50 = vmax.f32 %v4808_v40, 0.0  ;;  %v4841_v27 = vmax.f32 %v4809_v37, 0.0  ;;  %v4842_v45 = vmax.f32 %v4810_v4, 0.0 }
 0x589   : > { %v4843_v11 = vmax.f32 %v4811_v15, 0.0  ;;  %v5967_v9 = vpack.c.bf16 %v4831_v29, %v4830_v47  ;;  %v5972_v19 = vpack.c.bf16 %v4833_v21, %v4832_v17  ;;  %v5977_v57 = vpack.c.bf16 %v4835_v49, %v4834_v24 }
 0x58a   : > { %v4825_v53 = vadd.f32 %v8244_v13, %v4790_v16  ;;  %v4844_v5 = vmax.f32 %v4812_v18, 0.0  ;;  %v4845_v61 = vmax.f32 %v4813_v58, 0.0  ;;  %v5982_v38 = vpack.c.bf16 %v4837_v30, %v4836_v31 }
 0x58b   : > { %v4826_v28 = vadd.f32 %v8244_v13, %v4791_v14  ;;  %v4846_v46 = vmax.f32 %v4814_v1, 0.0  ;;  %v4847_v10 = vmax.f32 %v4815_v36, 0.0  ;;  %5968 = vst [vmem:[%s8278_s22] sm:$0xff] %v5967_v9   ;;  %v5987_v44 = vpack.c.bf16 %v4839_v63, %v4838_v42 }
 0x58c   : > { %v4827_v7 = vadd.f32 %v8244_v13, %v4792_v35  ;;  %v4848_v55 = vmax.f32 %v4816_v6, 0.0  ;;  %v4849_v32 = vmax.f32 %v4817_v20, 0.0  ;;  %6044 = vst [vmem:[%s8278_s22 + $0x8] sm:$0xff] %v5972_v19   ;;  %v5992_v22 = vpack.c.bf16 %v4841_v27, %v4840_v50 }
 0x58d   : > { %v4828_v52 = vadd.f32 %v8244_v13, %v4793_v12  ;;  %v4850_v0 = vmax.f32 %v4818_v41, 0.0  ;;  %v4851_v16 = vmax.f32 %v4819_v62, 0.0  ;;  %6045 = vst [vmem:[%s8278_s22 + $0x10] sm:$0xff] %v5977_v57   ;;  %v5997_v23 = vpack.c.bf16 %v4843_v11, %v4842_v45 }
 0x58e   : > { %v4829_v14 = vadd.f32 %v8244_v13, %v8246_v59  ;;  %v4852_v3 = vmax.f32 %v4820_v48, 0.0  ;;  %v4853_v39 = vmax.f32 %v4821_v2, 0.0  ;;  %6046 = vst [vmem:[%s8278_s22 + $0x18] sm:$0xff] %v5982_v38   ;;  %v6002_v35 = vpack.c.bf16 %v4845_v61, %v4844_v5 }
 0x58f   : > { %v4854_v33 = vmax.f32 %v4822_v60, 0.0  ;;  %v4855_v25 = vmax.f32 %v4823_v8, 0.0  ;;  %6047 = vst [vmem:[%s8278_s22 + $0x20] sm:$0xff] %v5987_v44   ;;  %v6007_v12 = vpack.c.bf16 %v4847_v10, %v4846_v46  ;;  %v4856_v43 = vmax.f32 %v4824_v51, 0.0 }
 0x590   : > { %v4857_v34 = vmax.f32 %v4825_v53, 0.0  ;;  %6048 = vst [vmem:[%s8278_s22 + $0x28] sm:$0xff] %v5992_v22   ;;  %v6012_v54 = vpack.c.bf16 %v4849_v32, %v4848_v55  ;;  %v4858_v26 = vmax.f32 %v4826_v28, 0.0  ;;  %v4859_v13 = vmax.f32 %v4827_v7, 0.0 }
 0x591   : > { %6049 = vst [vmem:[%s8278_s22 + $0x30] sm:$0xff] %v5997_v23   ;;  %v6017_v59 = vpack.c.bf16 %v4851_v16, %v4850_v0  ;;  %v4860_v56 = vmax.f32 %v4828_v52, 0.0  ;;  %v4861_v40 = vmax.f32 %v4829_v14, 0.0  ;;  %v6022_v37 = vpack.c.bf16 %v4853_v39, %v4852_v3 }
 0x592   : > { %6050 = vst [vmem:[%s8278_s22 + $0x38] sm:$0xff] %v6002_v35   ;;  %v6027_v4 = vpack.c.bf16 %v4855_v25, %v4854_v33  ;;  %v6032_v15 = vpack.c.bf16 %v4857_v34, %v4856_v43  ;;  %v6037_v18 = vpack.c.bf16 %v4859_v13, %v4858_v26 }
 0x593   : > { %6051 = vst [vmem:[%s8278_s22 + $0x40] sm:$0xff] %v6007_v12   ;;  %v6042_v58 = vpack.c.bf16 %v4861_v40, %v4860_v56 }
 0x594   : > { %6052 = vst [vmem:[%s8278_s22 + $0x48] sm:$0xff] %v6012_v54  }
 0x595   : > { %6053 = vst [vmem:[%s8278_s22 + $0x50] sm:$0xff] %v6017_v59  }
 0x596   : > { %6054 = vst [vmem:[%s8278_s22 + $0x58] sm:$0xff] %v6022_v37  }
 0x597   : > { %6055 = vst [vmem:[%s8278_s22 + $0x60] sm:$0xff] %v6027_v4  }
 0x598   : > { %6056 = vst [vmem:[%s8278_s22 + $0x68] sm:$0xff] %v6032_v15  }
 0x599   : > { %6057 = vst [vmem:[%s8278_s22 + $0x70] sm:$0xff] %v6037_v18  }
 0x59a   : > { %6058 = vst [vmem:[%s8278_s22 + $0x78] sm:$0xff] %v6042_v58  }
 0x59b PF: > { %s16_s21 = sadd.s32 1, %s6161_s21  }
 0x59c   : > { %p13_p4 = scmp.ge.s32.totalorder %s16_s21, 4  }
 0x59e   :  { %15 = sbr.rel (!%p13_p4) target bundleno = 1 (0x1), region = 84 }

</bundles_post_ra>
